<compile_context>
chip_gen: v7x
topology: tpu7x:2x2x1
jax: 0.10.0
libtpu: 0.0.40
codegen_flags: <defaults>
</compile_context>

<pallas_src>
import math
import numpy as np

import jax
import jax.numpy as jnp
from jax.experimental import pallas as pl
from jax.experimental.pallas import tpu as pltpu


LN_EPS = 1e-6
_HIGHEST = jax.lax.Precision.HIGHEST


# ----------------------------------------------------------------------------
# Fused stem kernel factory
# ----------------------------------------------------------------------------
def _make_stem_kernel(*, BB, K, pad, H, Wc, Cin, C, C2, OH1, OW1, OH2, OW2):
    """Build the fused Stem1D kernel.

    Scratch layout (both stages): scr[a, b, r, s, :] == xpad[2*r + a, 2*s + b, :]
    where xpad is the zero-padded activation.  Because the padding is even, the
    input row/col parity equals the padded row/col parity, so interior writes
    and all 49 conv taps are static unit-stride slices.
    """
    off = pad // 2                      # interior offset inside each parity plane

    def _layer_norm(v, g, b):
        mu = jnp.mean(v, axis=-1, keepdims=True)
        var = jnp.mean(jnp.square(v - mu), axis=-1, keepdims=True)
        return (v - mu) * jax.lax.rsqrt(var + LN_EPS) * g + b

    def _dwconv(scr, wdw, oh, ow):
        # 49 static unit-stride taps from the parity-split padded scratch;
        # 2 interleaved accumulators break the serial VALU dependency chain.
        acc0 = jnp.zeros((oh, ow, C), jnp.float32)
        acc1 = jnp.zeros((oh, ow, C), jnp.float32)
        t = 0
        for kh in range(K):
            for kw in range(K):
                patch = scr[kh % 2, kw % 2,
                            kh // 2:kh // 2 + oh,
                            kw // 2:kw // 2 + ow, :]
                tap = wdw[kh * K + kw:kh * K + kw + 1, :]       # (1, C)
                if t % 2 == 0:
                    acc0 = acc0 + patch * tap
                else:
                    acc1 = acc1 + patch * tap
                t += 1
        return acc0 + acc1

    def kernel(x_ref, w1_ref, b1_ref, wdw1_ref, bdw1_ref, g1_ref, be1_ref,
               wdw2_ref, bdw2_ref, g2_ref, be2_ref,
               w2_ref, b2_ref, g3_ref, be3_ref,
               o_ref, scrA, scrB):
        # Zero both padded scratches at the top of every grid step: the zero
        # halo is what the convs read outside the image, the interior is fully
        # overwritten per image below, and per-step zeroing keeps the
        # "parallel" batch axis safe on multi-TensorCore parts (no reliance on
        # scratch carry across grid steps).  The fill is ~17K words of VMEM
        # stores -- negligible next to the conv work.
        scrA[...] = jnp.zeros_like(scrA)
        scrB[...] = jnp.zeros_like(scrB)

        w1 = w1_ref[...]                                        # (Cin, C)
        b1 = b1_ref[...]                                        # (1, C)
        wdw1 = wdw1_ref[...]                                    # (K*K, C)
        wdw2 = wdw2_ref[...]                                    # (K*K, C)
        w2 = w2_ref[...]                                        # (C, C2)
        b2 = b2_ref[...]                                        # (1, C2)

        ev_cols = list(range(0, OW1, 2))
        od_cols = list(range(1, OW1, 2))

        for bi in range(BB):
            # ---- stage A prologue: pw1 as one small MXU dot per column
            #      parity, rows scattered (unit-stride) into the padded scratch.
            for p in range(2):
                xf = x_ref[bi, p].reshape(H * Wc, Cin)          # (H*Wc, Cin)
                yf = jnp.dot(xf, w1, precision=_HIGHEST,
                             preferred_element_type=jnp.float32) + b1
                for h in range(H):
                    scrA[h % 2, p, h // 2 + off, off:off + Wc, :] = \
                        yf[h * Wc:(h + 1) * Wc, :]

            # ---- stage A: oriented depthwise stride-2 conv + LN + GELU
            y1 = _dwconv(scrA, wdw1, OH1, OW1) + bdw1_ref[...]
            h1 = _layer_norm(y1, g1_ref[...], be1_ref[...])
            # TODO(synk): PyTorch F.gelu defaults to the exact erf form; the
            # tanh approximation is used here for robust Mosaic lowering.
            h1 = jax.nn.gelu(h1, approximate=True)              # (OH1, OW1, C)

            # ---- stage B scatter: split h1's columns by parity (OW1 is tiny)
            #      and scatter row by row into the second padded scratch.
            h1_ev = jnp.concatenate([h1[:, j:j + 1, :] for j in ev_cols], axis=1)
            h1_od = (jnp.concatenate([h1[:, j:j + 1, :] for j in od_cols], axis=1)
                     if od_cols else None)
            for h in range(OH1):
                scrB[h % 2, 0, h // 2 + off, off:off + len(ev_cols), :] = h1_ev[h]
                if od_cols:
                    scrB[h % 2, 1, h // 2 + off, off:off + len(od_cols), :] = h1_od[h]

            # ---- stage B: oriented depthwise stride-2 conv + LN + GELU
            y2 = _dwconv(scrB, wdw2, OH2, OW2) + bdw2_ref[...]
            h2 = _layer_norm(y2, g2_ref[...], be2_ref[...])
            h2 = jax.nn.gelu(h2, approximate=True)              # (OH2, OW2, C)

            # ---- epilogue: single flattened MXU dot (pw2) + LayerNorm,
            #      stored as one lane-dense (OH2*OW2, C2) block.
            z = jnp.dot(h2.reshape(OH2 * OW2, C), w2, precision=_HIGHEST,
                        preferred_element_type=jnp.float32) + b2
            o_ref[bi] = _layer_norm(z, g3_ref[...], be3_ref[...]).astype(o_ref.dtype)

    return kernel


# ----------------------------------------------------------------------------
# Pallas wrapper: whole Stem1D in one pallas_call
# ----------------------------------------------------------------------------
def stem1d_forward(x, params, K, stride=2):
    assert stride == 2, "kernel is specialized for the stride-2 stem"
    pad = (K - stride) // 2
    assert pad % 2 == 0, "kernel assumes even padding (parity-preserving)"
    B, Cin, H, W = x.shape
    assert W % 2 == 0
    Wc = W // 2
    C = params["w_pw1"].shape[1]
    C2 = params["w_pw2"].shape[1]

    OH1 = (H + 2 * pad - K) // stride + 1
    OW1 = (W + 2 * pad - K) // stride + 1
    OH2 = (OH1 + 2 * pad - K) // stride + 1
    OW2 = (OW1 + 2 * pad - K) // stride + 1
    PHa = (H + 2 * pad + 1) // 2
    PWa = (W + 2 * pad + 1) // 2
    PHb = (OH1 + 2 * pad + 1) // 2
    PWb = (OW1 + 2 * pad + 1) // 2

    # One grid step per TensorCore-sized batch slice: 2 steps when B is even
    # (maps onto v7x's two cores via the "parallel" axis; costs only one extra
    # ~0.35us step on single-core v5e/v6e), otherwise one image per step.
    if B % 2 == 0:
        G, BB = 2, B // 2
    else:
        G, BB = B, 1

    # NCHW -> column-parity-split channels-last (layout plumbing only):
    #   x_ps[b, p, h, s, c] = x[b, c, h, 2*s + p]
    # pw1 is pointwise, so applying it to the pre-split input yields the
    # stage-A activation already split by (padded) column parity.
    x_ps = jnp.transpose(x.reshape(B, Cin, H, Wc, 2), (0, 4, 2, 3, 1)).astype(jnp.float32)

    def _row(v):                          # 1-D param -> (1, C) row for lane broadcast
        return v.reshape(1, v.shape[-1]).astype(jnp.float32)

    inputs = [
        x_ps,
        params["w_pw1"].astype(jnp.float32), _row(params["b_pw1"]),
        params["w2d_dw1"].astype(jnp.float32), _row(params["b_dw1"]),
        _row(params["ln1_w"]), _row(params["ln1_b"]),
        params["w2d_dw2"].astype(jnp.float32), _row(params["b_dw2"]),
        _row(params["ln2_w"]), _row(params["ln2_b"]),
        params["w_pw2"].astype(jnp.float32), _row(params["b_pw2"]),
        _row(params["ln3_w"]), _row(params["ln3_b"]),
    ]

    def _const_spec(a):                   # whole-array block, same block every step
        zeros = (0,) * a.ndim
        return pl.BlockSpec(a.shape, lambda g, _z=zeros: _z)

    in_specs = [pl.BlockSpec((BB, 2, H, Wc, Cin), lambda g: (g, 0, 0, 0, 0))]
    in_specs += [_const_spec(a) for a in inputs[1:]]
    out_specs = pl.BlockSpec((BB, OH2 * OW2, C2), lambda g: (g, 0, 0))
    out_shape = jax.ShapeDtypeStruct((B, OH2 * OW2, C2), jnp.float32)

    kernel = _make_stem_kernel(BB=BB, K=K, pad=pad, H=H, Wc=Wc, Cin=Cin, C=C,
                               C2=C2, OH1=OH1, OW1=OW1, OH2=OH2, OW2=OW2)

    # Advisory cost estimate so XLA schedules sensibly around the custom call.
    flops = (2 * B * H * W * Cin * C
             + 2 * B * OH1 * OW1 * C * K * K
             + 2 * B * OH2 * OW2 * C * K * K
             + 2 * B * OH2 * OW2 * C * C2
             + 24 * B * (OH1 * OW1 * C + OH2 * OW2 * (C + C2)))
    param_elems = sum(int(np.prod(a.shape)) for a in inputs[1:])
    bytes_accessed = 4 * (int(np.prod(x_ps.shape)) + B * OH2 * OW2 * C2 + param_elems)
    cost = pl.CostEstimate(flops=int(flops),
                           transcendentals=int(B * (OH1 * OW1 + OH2 * OW2) * C),
                           bytes_accessed=int(bytes_accessed))

    grid_spec = pltpu.PrefetchScalarGridSpec(
        num_scalar_prefetch=0,
        grid=(G,),
        in_specs=in_specs,
        out_specs=out_specs,
        scratch_shapes=[pltpu.VMEM((2, 2, PHa, PWa, C), jnp.float32),   # stage-A pad
                        pltpu.VMEM((2, 2, PHb, PWb, C), jnp.float32)],  # stage-B pad
    )

    out_flat = pl.pallas_call(
        kernel,
        out_shape=out_shape,
        grid_spec=grid_spec,
        compiler_params=pltpu.CompilerParams(
            dimension_semantics=("parallel",)),
        cost_estimate=cost,
    )(*inputs)

    out = out_flat.reshape(B, OH2, OW2, C2)
    return jnp.transpose(out, (0, 3, 1, 2))                    # NHWC -> NCHW


# ----------------------------------------------------------------------------
# Pure-JAX reference (same math, XLA ops) for a numerical cross-check
# ----------------------------------------------------------------------------
def _ln_ref(x, g, b):
    mu = jnp.mean(x, axis=-1, keepdims=True)
    var = jnp.mean((x - mu) ** 2, axis=-1, keepdims=True)
    return (x - mu) / jnp.sqrt(var + LN_EPS) * g + b


def _dw_ref(x, w_flat, bias, K, stride, pad):
    B, H, W, C = x.shape
    w3 = w_flat.reshape(K, K, C)
    xp = jnp.pad(x, ((0, 0), (pad, pad), (pad, pad), (0, 0)))
    OH = (H + 2 * pad - K) // stride + 1
    OW = (W + 2 * pad - K) // stride + 1
    out = jnp.zeros((B, OH, OW, C), jnp.float32)
    for kh in range(K):
        for kw in range(K):
            out = out + w3[kh, kw] * xp[:, kh:kh + stride * OH:stride,
                                        kw:kw + stride * OW:stride, :]
    return out + bias


def stem1d_reference(x, params, K, stride=2):
    pad = (K - stride) // 2
    h = jnp.transpose(x, (0, 2, 3, 1)).astype(jnp.float32)
    h = jnp.einsum("bhwc,cd->bhwd", h, params["w_pw1"], precision=_HIGHEST) + params["b_pw1"]
    h = _dw_ref(h, params["w2d_dw1"], params["b_dw1"], K, stride, pad)
    h = jax.nn.gelu(_ln_ref(h, params["ln1_w"], params["ln1_b"]), approximate=True)
    h = _dw_ref(h, params["w2d_dw2"], params["b_dw2"], K, stride, pad)
    h = jax.nn.gelu(_ln_ref(h, params["ln2_w"], params["ln2_b"]), approximate=True)
    h = jnp.einsum("bhwc,cd->bhwd", h, params["w_pw2"], precision=_HIGHEST) + params["b_pw2"]
    h = _ln_ref(h, params["ln3_w"], params["ln3_b"])
    return jnp.transpose(h, (0, 3, 1, 2))


# ----------------------------------------------------------------------------
# Oriented-kernel construction (replicates the PyTorch-side helpers)
# ----------------------------------------------------------------------------
def channel_cycle_offset(c, C, N):
    n = (N * (c + 1) - 1) // C
    return n / N


def theta_offset(x):
    return math.pi * (x % 1)


def layer_wise_rotation_offset(k, K, enable_layer_cycle=0):
    if enable_layer_cycle:
        return k % 2 / 2
    return 0


def rasterize_oriented_1d(w1d_np, thetas, K):
    """Embed per-channel 1D kernels (length K) along their orientation theta into
    a dense (K*K, C) depthwise 2D kernel via nearest-integer rasterization."""
    # TODO(synk): the exact tap placement / interpolation of the original CUDA
    # DepthwiseOrientedConv1d is not available; nearest-integer rasterization is
    # used as a faithful stand-in.
    C = w1d_np.shape[0]
    ctr = (K - 1) // 2
    w2d = np.zeros((K, K, C), np.float32)
    for c in range(C):
        th = thetas[c]
        for t in range(K):
            d = t - ctr
            kh = ctr + int(round(d * math.sin(th)))
            kw = ctr + int(round(d * math.cos(th)))
            w2d[kh, kw, c] += w1d_np[c, t]
    return jnp.asarray(w2d.reshape(K * K, C))


# ----------------------------------------------------------------------------
# Main
# ----------------------------------------------------------------------------
if __name__ == "__main__":
    B, dim0, dim1, dim2 = 2, 4, 32, 48
    H = W = 16
    K = 7                       # kernel_size of the depthwise oriented convs
    N_DIR = 8
    stride = 2

    key = jax.random.PRNGKey(0)
    ks = jax.random.split(key, 16)
    x = jax.random.normal(ks[0], (B, dim0, H, W), jnp.float32)

    # Per-channel orientations (enable_layer_cycle=0 -> same offsets both layers).
    thetas1 = [theta_offset(channel_cycle_offset(c, dim1, N_DIR)
                            + layer_wise_rotation_offset(0, 2, 0)) for c in range(dim1)]
    thetas2 = [theta_offset(channel_cycle_offset(c, dim1, N_DIR)
                            + layer_wise_rotation_offset(1, 2, 0)) for c in range(dim1)]

    w_dw1_1d = np.asarray(jax.random.normal(ks[1], (dim1, K), jnp.float32)) * 0.2
    w_dw2_1d = np.asarray(jax.random.normal(ks[2], (dim1, K), jnp.float32)) * 0.2

    params = dict(
        w_pw1=jax.random.normal(ks[3], (dim0, dim1), jnp.float32) * 0.2,
        b_pw1=jax.random.normal(ks[4], (dim1,), jnp.float32) * 0.05,
        w_pw2=jax.random.normal(ks[5], (dim1, dim2), jnp.float32) * 0.1,
        b_pw2=jax.random.normal(ks[6], (dim2,), jnp.float32) * 0.05,
        w2d_dw1=rasterize_oriented_1d(w_dw1_1d, thetas1, K),
        b_dw1=jax.random.normal(ks[7], (dim1,), jnp.float32) * 0.05,
        w2d_dw2=rasterize_oriented_1d(w_dw2_1d, thetas2, K),
        b_dw2=jax.random.normal(ks[8], (dim1,), jnp.float32) * 0.05,
        ln1_w=1.0 + 0.1 * jax.random.normal(ks[9], (dim1,), jnp.float32),
        ln1_b=0.1 * jax.random.normal(ks[10], (dim1,), jnp.float32),
        ln2_w=1.0 + 0.1 * jax.random.normal(ks[11], (dim1,), jnp.float32),
        ln2_b=0.1 * jax.random.normal(ks[12], (dim1,), jnp.float32),
        ln3_w=1.0 + 0.1 * jax.random.normal(ks[13], (dim2,), jnp.float32),
        ln3_b=0.1 * jax.random.normal(ks[14], (dim2,), jnp.float32),
    )

    fwd = jax.jit(lambda xx: stem1d_forward(xx, params, K, stride))
    out = fwd(x)
    jax.block_until_ready(out)

    # Expected spatial: H=16 -(pad2,K7,s2)-> 7 -(pad2,K7,s2)-> 3
    assert out.shape == (B, dim2, 3, 3), out.shape
    assert bool(jnp.all(jnp.isfinite(out)))

    # Numerical cross-check against the pure-JAX reference of the same math.
    ref = stem1d_reference(x, params, K, stride)
    err = float(jnp.max(jnp.abs(out - ref)))
    assert err < 2e-2, f"max |pallas - reference| = {err}"

    print("KERNEL_OK")
</pallas_src>

<mosaic_0001>
module attributes {stable_mosaic.version = 11 : i64} {
  func.func @kernel(%arg0: i32, %arg1: memref<1x2x16x8x4xf32, #tpu.memory_space<vmem>>, %arg2: memref<4x32xf32, #tpu.memory_space<vmem>>, %arg3: memref<1x32xf32, #tpu.memory_space<vmem>>, %arg4: memref<49x32xf32, #tpu.memory_space<vmem>>, %arg5: memref<1x32xf32, #tpu.memory_space<vmem>>, %arg6: memref<1x32xf32, #tpu.memory_space<vmem>>, %arg7: memref<1x32xf32, #tpu.memory_space<vmem>>, %arg8: memref<49x32xf32, #tpu.memory_space<vmem>>, %arg9: memref<1x32xf32, #tpu.memory_space<vmem>>, %arg10: memref<1x32xf32, #tpu.memory_space<vmem>>, %arg11: memref<1x32xf32, #tpu.memory_space<vmem>>, %arg12: memref<32x48xf32, #tpu.memory_space<vmem>>, %arg13: memref<1x48xf32, #tpu.memory_space<vmem>>, %arg14: memref<1x48xf32, #tpu.memory_space<vmem>>, %arg15: memref<1x48xf32, #tpu.memory_space<vmem>>, %arg16: memref<1x9x48xf32, #tpu.memory_space<vmem>>, %arg17: memref<2x2x10x10x32xf32, #tpu.memory_space<vmem>>, %arg18: memref<2x2x6x6x32xf32, #tpu.memory_space<vmem>>) attributes {dimension_semantics = [#tpu.dimension_semantics<parallel>], iteration_bounds = array<i64: 2>, scalar_prefetch = 0 : i64, scratch_operands = 2 : i64, tpu.core_type = #tpu.core_type<tc>, window_params = [{transform_indices = @transform_0, window_bounds = array<i64: 1, 2, 16, 8, 4>}, {pipeline_mode = #tpu.pipeline_mode<synchronous>, transform_indices = @transform_1, window_bounds = array<i64: 4, 32>}, {pipeline_mode = #tpu.pipeline_mode<synchronous>, transform_indices = @transform_2, window_bounds = array<i64: 1, 32>}, {pipeline_mode = #tpu.pipeline_mode<synchronous>, transform_indices = @transform_3, window_bounds = array<i64: 49, 32>}, {pipeline_mode = #tpu.pipeline_mode<synchronous>, transform_indices = @transform_4, window_bounds = array<i64: 1, 32>}, {pipeline_mode = #tpu.pipeline_mode<synchronous>, transform_indices = @transform_5, window_bounds = array<i64: 1, 32>}, {pipeline_mode = #tpu.pipeline_mode<synchronous>, transform_indices = @transform_6, window_bounds = array<i64: 1, 32>}, {pipeline_mode = #tpu.pipeline_mode<synchronous>, transform_indices = @transform_7, window_bounds = array<i64: 49, 32>}, {pipeline_mode = #tpu.pipeline_mode<synchronous>, transform_indices = @transform_8, window_bounds = array<i64: 1, 32>}, {pipeline_mode = #tpu.pipeline_mode<synchronous>, transform_indices = @transform_9, window_bounds = array<i64: 1, 32>}, {pipeline_mode = #tpu.pipeline_mode<synchronous>, transform_indices = @transform_10, window_bounds = array<i64: 1, 32>}, {pipeline_mode = #tpu.pipeline_mode<synchronous>, transform_indices = @transform_11, window_bounds = array<i64: 32, 48>}, {pipeline_mode = #tpu.pipeline_mode<synchronous>, transform_indices = @transform_12, window_bounds = array<i64: 1, 48>}, {pipeline_mode = #tpu.pipeline_mode<synchronous>, transform_indices = @transform_13, window_bounds = array<i64: 1, 48>}, {pipeline_mode = #tpu.pipeline_mode<synchronous>, transform_indices = @transform_14, window_bounds = array<i64: 1, 48>}, {transform_indices = @transform_15, window_bounds = array<i64: 1, 9, 48>}]} {
    %cst = arith.constant 0.000000e+00 : f32
    %0 = vector.broadcast %cst : f32 to vector<2x2x10x10x32xf32>
    %c0 = arith.constant 0 : index
    %c0_0 = arith.constant 0 : index
    %c0_1 = arith.constant 0 : index
    %c0_2 = arith.constant 0 : index
    %c0_3 = arith.constant 0 : index
    %1 = vector.load %arg17[%c0, %c0_0, %c0_1, %c0_2, %c0_3] : memref<2x2x10x10x32xf32, #tpu.memory_space<vmem>>, vector<2x2x10x10x32xf32>
    tpu.vector_store %arg17[%c0, %c0_0, %c0_1, %c0_2, %c0_3], %0 {strides = array<i32>} : memref<2x2x10x10x32xf32, #tpu.memory_space<vmem>>, vector<2x2x10x10x32xf32>,
    %cst_4 = arith.constant 0.000000e+00 : f32
    %2 = vector.broadcast %cst_4 : f32 to vector<2x2x6x6x32xf32>
    %c0_5 = arith.constant 0 : index
    %c0_6 = arith.constant 0 : index
    %c0_7 = arith.constant 0 : index
    %c0_8 = arith.constant 0 : index
    %c0_9 = arith.constant 0 : index
    %3 = vector.load %arg18[%c0_5, %c0_6, %c0_7, %c0_8, %c0_9] : memref<2x2x6x6x32xf32, #tpu.memory_space<vmem>>, vector<2x2x6x6x32xf32>
    tpu.vector_store %arg18[%c0_5, %c0_6, %c0_7, %c0_8, %c0_9], %2 {strides = array<i32>} : memref<2x2x6x6x32xf32, #tpu.memory_space<vmem>>, vector<2x2x6x6x32xf32>,
    %c0_10 = arith.constant 0 : index
    %c0_11 = arith.constant 0 : index
    %4 = vector.load %arg2[%c0_10, %c0_11] : memref<4x32xf32, #tpu.memory_space<vmem>>, vector<4x32xf32>
    %c0_12 = arith.constant 0 : index
    %c0_13 = arith.constant 0 : index
    %5 = vector.load %arg3[%c0_12, %c0_13] : memref<1x32xf32, #tpu.memory_space<vmem>>, vector<1x32xf32>
    %c0_14 = arith.constant 0 : index
    %c0_15 = arith.constant 0 : index
    %6 = vector.load %arg4[%c0_14, %c0_15] : memref<49x32xf32, #tpu.memory_space<vmem>>, vector<49x32xf32>
    %c0_16 = arith.constant 0 : index
    %c0_17 = arith.constant 0 : index
    %7 = vector.load %arg8[%c0_16, %c0_17] : memref<49x32xf32, #tpu.memory_space<vmem>>, vector<49x32xf32>
    %c0_18 = arith.constant 0 : index
    %c0_19 = arith.constant 0 : index
    %8 = vector.load %arg12[%c0_18, %c0_19] : memref<32x48xf32, #tpu.memory_space<vmem>>, vector<32x48xf32>
    %c0_20 = arith.constant 0 : index
    %c0_21 = arith.constant 0 : index
    %9 = vector.load %arg13[%c0_20, %c0_21] : memref<1x48xf32, #tpu.memory_space<vmem>>, vector<1x48xf32>
    %c0_22 = arith.constant 0 : index
    %c0_23 = arith.constant 0 : index
    %c0_24 = arith.constant 0 : index
    %c0_25 = arith.constant 0 : index
    %c0_26 = arith.constant 0 : index
    %10 = vector.load %arg1[%c0_22, %c0_23, %c0_24, %c0_25, %c0_26] : memref<1x2x16x8x4xf32, #tpu.memory_space<vmem>>, vector<1x1x16x8x4xf32>
    %11 = vector.shape_cast %10 : vector<1x1x16x8x4xf32> to vector<16x8x4xf32>
    %12 = vector.shape_cast %11 : vector<16x8x4xf32> to vector<128x4xf32>
    %cst_27 = arith.constant dense<0.000000e+00> : vector<128x32xf32>
    %13 = tpu.matmul %12, %4, %cst_27 {dimension_numbers = #tpu.dot_dimension_numbers<[1], [0], [0], [1], [0, 0, 1, 1], [], []>, precision = #tpu.contract_precision<fp32>} : vector<128x4xf32>, vector<4x32xf32>, vector<128x32xf32> -> vector<128x32xf32>
    %14 = vector.broadcast %5 : vector<1x32xf32> to vector<128x32xf32>
    %15 = arith.addf %13, %14 : vector<128x32xf32>
    %16 = vector.extract_strided_slice %15 {offsets = [0, 0], sizes = [8, 32], strides = [1, 1]} : vector<128x32xf32> to vector<8x32xf32>
    %c0_28 = arith.constant 0 : index
    %c0_29 = arith.constant 0 : index
    %c1 = arith.constant 1 : index
    %c1_30 = arith.constant 1 : index
    %c0_31 = arith.constant 0 : index
    %17 = vector.load %arg17[%c0_28, %c0_29, %c1, %c1_30, %c0_31] : memref<2x2x10x10x32xf32, #tpu.memory_space<vmem>>, vector<1x1x1x8x32xf32>
    %18 = vector.shape_cast %17 : vector<1x1x1x8x32xf32> to vector<8x32xf32>
    %19 = vector.shape_cast %16 : vector<8x32xf32> to vector<1x1x1x8x32xf32>
    tpu.vector_store %arg17[%c0_28, %c0_29, %c1, %c1_30, %c0_31], %19 {strides = array<i32>} : memref<2x2x10x10x32xf32, #tpu.memory_space<vmem>>, vector<1x1x1x8x32xf32>,
    %20 = vector.extract_strided_slice %15 {offsets = [8, 0], sizes = [8, 32], strides = [1, 1]} : vector<128x32xf32> to vector<8x32xf32>
    %c1_32 = arith.constant 1 : index
    %c0_33 = arith.constant 0 : index
    %c1_34 = arith.constant 1 : index
    %c1_35 = arith.constant 1 : index
    %c0_36 = arith.constant 0 : index
    %21 = vector.load %arg17[%c1_32, %c0_33, %c1_34, %c1_35, %c0_36] : memref<2x2x10x10x32xf32, #tpu.memory_space<vmem>>, vector<1x1x1x8x32xf32>
    %22 = vector.shape_cast %21 : vector<1x1x1x8x32xf32> to vector<8x32xf32>
    %23 = vector.shape_cast %20 : vector<8x32xf32> to vector<1x1x1x8x32xf32>
    tpu.vector_store %arg17[%c1_32, %c0_33, %c1_34, %c1_35, %c0_36], %23 {strides = array<i32>} : memref<2x2x10x10x32xf32, #tpu.memory_space<vmem>>, vector<1x1x1x8x32xf32>,
    %24 = vector.extract_strided_slice %15 {offsets = [16, 0], sizes = [8, 32], strides = [1, 1]} : vector<128x32xf32> to vector<8x32xf32>
    %c0_37 = arith.constant 0 : index
    %c0_38 = arith.constant 0 : index
    %c2 = arith.constant 2 : index
    %c1_39 = arith.constant 1 : index
    %c0_40 = arith.constant 0 : index
    %25 = vector.load %arg17[%c0_37, %c0_38, %c2, %c1_39, %c0_40] : memref<2x2x10x10x32xf32, #tpu.memory_space<vmem>>, vector<1x1x1x8x32xf32>
    %26 = vector.shape_cast %25 : vector<1x1x1x8x32xf32> to vector<8x32xf32>
    %27 = vector.shape_cast %24 : vector<8x32xf32> to vector<1x1x1x8x32xf32>
    tpu.vector_store %arg17[%c0_37, %c0_38, %c2, %c1_39, %c0_40], %27 {strides = array<i32>} : memref<2x2x10x10x32xf32, #tpu.memory_space<vmem>>, vector<1x1x1x8x32xf32>,
    %28 = vector.extract_strided_slice %15 {offsets = [24, 0], sizes = [8, 32], strides = [1, 1]} : vector<128x32xf32> to vector<8x32xf32>
    %c1_41 = arith.constant 1 : index
    %c0_42 = arith.constant 0 : index
    %c2_43 = arith.constant 2 : index
    %c1_44 = arith.constant 1 : index
    %c0_45 = arith.constant 0 : index
    %29 = vector.load %arg17[%c1_41, %c0_42, %c2_43, %c1_44, %c0_45] : memref<2x2x10x10x32xf32, #tpu.memory_space<vmem>>, vector<1x1x1x8x32xf32>
    %30 = vector.shape_cast %29 : vector<1x1x1x8x32xf32> to vector<8x32xf32>
    %31 = vector.shape_cast %28 : vector<8x32xf32> to vector<1x1x1x8x32xf32>
    tpu.vector_store %arg17[%c1_41, %c0_42, %c2_43, %c1_44, %c0_45], %31 {strides = array<i32>} : memref<2x2x10x10x32xf32, #tpu.memory_space<vmem>>, vector<1x1x1x8x32xf32>,
    %32 = vector.extract_strided_slice %15 {offsets = [32, 0], sizes = [8, 32], strides = [1, 1]} : vector<128x32xf32> to vector<8x32xf32>
    %c0_46 = arith.constant 0 : index
    %c0_47 = arith.constant 0 : index
    %c3 = arith.constant 3 : index
    %c1_48 = arith.constant 1 : index
    %c0_49 = arith.constant 0 : index
    %33 = vector.load %arg17[%c0_46, %c0_47, %c3, %c1_48, %c0_49] : memref<2x2x10x10x32xf32, #tpu.memory_space<vmem>>, vector<1x1x1x8x32xf32>
    %34 = vector.shape_cast %33 : vector<1x1x1x8x32xf32> to vector<8x32xf32>
    %35 = vector.shape_cast %32 : vector<8x32xf32> to vector<1x1x1x8x32xf32>
    tpu.vector_store %arg17[%c0_46, %c0_47, %c3, %c1_48, %c0_49], %35 {strides = array<i32>} : memref<2x2x10x10x32xf32, #tpu.memory_space<vmem>>, vector<1x1x1x8x32xf32>,
    %36 = vector.extract_strided_slice %15 {offsets = [40, 0], sizes = [8, 32], strides = [1, 1]} : vector<128x32xf32> to vector<8x32xf32>
    %c1_50 = arith.constant 1 : index
    %c0_51 = arith.constant 0 : index
    %c3_52 = arith.constant 3 : index
    %c1_53 = arith.constant 1 : index
    %c0_54 = arith.constant 0 : index
    %37 = vector.load %arg17[%c1_50, %c0_51, %c3_52, %c1_53, %c0_54] : memref<2x2x10x10x32xf32, #tpu.memory_space<vmem>>, vector<1x1x1x8x32xf32>
    %38 = vector.shape_cast %37 : vector<1x1x1x8x32xf32> to vector<8x32xf32>
    %39 = vector.shape_cast %36 : vector<8x32xf32> to vector<1x1x1x8x32xf32>
    tpu.vector_store %arg17[%c1_50, %c0_51, %c3_52, %c1_53, %c0_54], %39 {strides = array<i32>} : memref<2x2x10x10x32xf32, #tpu.memory_space<vmem>>, vector<1x1x1x8x32xf32>,
    %40 = vector.extract_strided_slice %15 {offsets = [48, 0], sizes = [8, 32], strides = [1, 1]} : vector<128x32xf32> to vector<8x32xf32>
    %c0_55 = arith.constant 0 : index
    %c0_56 = arith.constant 0 : index
    %c4 = arith.constant 4 : index
    %c1_57 = arith.constant 1 : index
    %c0_58 = arith.constant 0 : index
    %41 = vector.load %arg17[%c0_55, %c0_56, %c4, %c1_57, %c0_58] : memref<2x2x10x10x32xf32, #tpu.memory_space<vmem>>, vector<1x1x1x8x32xf32>
    %42 = vector.shape_cast %41 : vector<1x1x1x8x32xf32> to vector<8x32xf32>
    %43 = vector.shape_cast %40 : vector<8x32xf32> to vector<1x1x1x8x32xf32>
    tpu.vector_store %arg17[%c0_55, %c0_56, %c4, %c1_57, %c0_58], %43 {strides = array<i32>} : memref<2x2x10x10x32xf32, #tpu.memory_space<vmem>>, vector<1x1x1x8x32xf32>,
    %44 = vector.extract_strided_slice %15 {offsets = [56, 0], sizes = [8, 32], strides = [1, 1]} : vector<128x32xf32> to vector<8x32xf32>
    %c1_59 = arith.constant 1 : index
    %c0_60 = arith.constant 0 : index
    %c4_61 = arith.constant 4 : index
    %c1_62 = arith.constant 1 : index
    %c0_63 = arith.constant 0 : index
    %45 = vector.load %arg17[%c1_59, %c0_60, %c4_61, %c1_62, %c0_63] : memref<2x2x10x10x32xf32, #tpu.memory_space<vmem>>, vector<1x1x1x8x32xf32>
    %46 = vector.shape_cast %45 : vector<1x1x1x8x32xf32> to vector<8x32xf32>
    %47 = vector.shape_cast %44 : vector<8x32xf32> to vector<1x1x1x8x32xf32>
    tpu.vector_store %arg17[%c1_59, %c0_60, %c4_61, %c1_62, %c0_63], %47 {strides = array<i32>} : memref<2x2x10x10x32xf32, #tpu.memory_space<vmem>>, vector<1x1x1x8x32xf32>,
    %48 = vector.extract_strided_slice %15 {offsets = [64, 0], sizes = [8, 32], strides = [1, 1]} : vector<128x32xf32> to vector<8x32xf32>
    %c0_64 = arith.constant 0 : index
    %c0_65 = arith.constant 0 : index
    %c5 = arith.constant 5 : index
    %c1_66 = arith.constant 1 : index
    %c0_67 = arith.constant 0 : index
    %49 = vector.load %arg17[%c0_64, %c0_65, %c5, %c1_66, %c0_67] : memref<2x2x10x10x32xf32, #tpu.memory_space<vmem>>, vector<1x1x1x8x32xf32>
    %50 = vector.shape_cast %49 : vector<1x1x1x8x32xf32> to vector<8x32xf32>
    %51 = vector.shape_cast %48 : vector<8x32xf32> to vector<1x1x1x8x32xf32>
    tpu.vector_store %arg17[%c0_64, %c0_65, %c5, %c1_66, %c0_67], %51 {strides = array<i32>} : memref<2x2x10x10x32xf32, #tpu.memory_space<vmem>>, vector<1x1x1x8x32xf32>,
    %52 = vector.extract_strided_slice %15 {offsets = [72, 0], sizes = [8, 32], strides = [1, 1]} : vector<128x32xf32> to vector<8x32xf32>
    %c1_68 = arith.constant 1 : index
    %c0_69 = arith.constant 0 : index
    %c5_70 = arith.constant 5 : index
    %c1_71 = arith.constant 1 : index
    %c0_72 = arith.constant 0 : index
    %53 = vector.load %arg17[%c1_68, %c0_69, %c5_70, %c1_71, %c0_72] : memref<2x2x10x10x32xf32, #tpu.memory_space<vmem>>, vector<1x1x1x8x32xf32>
    %54 = vector.shape_cast %53 : vector<1x1x1x8x32xf32> to vector<8x32xf32>
    %55 = vector.shape_cast %52 : vector<8x32xf32> to vector<1x1x1x8x32xf32>
    tpu.vector_store %arg17[%c1_68, %c0_69, %c5_70, %c1_71, %c0_72], %55 {strides = array<i32>} : memref<2x2x10x10x32xf32, #tpu.memory_space<vmem>>, vector<1x1x1x8x32xf32>,
    %56 = vector.extract_strided_slice %15 {offsets = [80, 0], sizes = [8, 32], strides = [1, 1]} : vector<128x32xf32> to vector<8x32xf32>
    %c0_73 = arith.constant 0 : index
    %c0_74 = arith.constant 0 : index
    %c6 = arith.constant 6 : index
    %c1_75 = arith.constant 1 : index
    %c0_76 = arith.constant 0 : index
    %57 = vector.load %arg17[%c0_73, %c0_74, %c6, %c1_75, %c0_76] : memref<2x2x10x10x32xf32, #tpu.memory_space<vmem>>, vector<1x1x1x8x32xf32>
    %58 = vector.shape_cast %57 : vector<1x1x1x8x32xf32> to vector<8x32xf32>
    %59 = vector.shape_cast %56 : vector<8x32xf32> to vector<1x1x1x8x32xf32>
    tpu.vector_store %arg17[%c0_73, %c0_74, %c6, %c1_75, %c0_76], %59 {strides = array<i32>} : memref<2x2x10x10x32xf32, #tpu.memory_space<vmem>>, vector<1x1x1x8x32xf32>,
    %60 = vector.extract_strided_slice %15 {offsets = [88, 0], sizes = [8, 32], strides = [1, 1]} : vector<128x32xf32> to vector<8x32xf32>
    %c1_77 = arith.constant 1 : index
    %c0_78 = arith.constant 0 : index
    %c6_79 = arith.constant 6 : index
    %c1_80 = arith.constant 1 : index
    %c0_81 = arith.constant 0 : index
    %61 = vector.load %arg17[%c1_77, %c0_78, %c6_79, %c1_80, %c0_81] : memref<2x2x10x10x32xf32, #tpu.memory_space<vmem>>, vector<1x1x1x8x32xf32>
    %62 = vector.shape_cast %61 : vector<1x1x1x8x32xf32> to vector<8x32xf32>
    %63 = vector.shape_cast %60 : vector<8x32xf32> to vector<1x1x1x8x32xf32>
    tpu.vector_store %arg17[%c1_77, %c0_78, %c6_79, %c1_80, %c0_81], %63 {strides = array<i32>} : memref<2x2x10x10x32xf32, #tpu.memory_space<vmem>>, vector<1x1x1x8x32xf32>,
    %64 = vector.extract_strided_slice %15 {offsets = [96, 0], sizes = [8, 32], strides = [1, 1]} : vector<128x32xf32> to vector<8x32xf32>
    %c0_82 = arith.constant 0 : index
    %c0_83 = arith.constant 0 : index
    %c7 = arith.constant 7 : index
    %c1_84 = arith.constant 1 : index
    %c0_85 = arith.constant 0 : index
    %65 = vector.load %arg17[%c0_82, %c0_83, %c7, %c1_84, %c0_85] : memref<2x2x10x10x32xf32, #tpu.memory_space<vmem>>, vector<1x1x1x8x32xf32>
    %66 = vector.shape_cast %65 : vector<1x1x1x8x32xf32> to vector<8x32xf32>
    %67 = vector.shape_cast %64 : vector<8x32xf32> to vector<1x1x1x8x32xf32>
    tpu.vector_store %arg17[%c0_82, %c0_83, %c7, %c1_84, %c0_85], %67 {strides = array<i32>} : memref<2x2x10x10x32xf32, #tpu.memory_space<vmem>>, vector<1x1x1x8x32xf32>,
    %68 = vector.extract_strided_slice %15 {offsets = [104, 0], sizes = [8, 32], strides = [1, 1]} : vector<128x32xf32> to vector<8x32xf32>
    %c1_86 = arith.constant 1 : index
    %c0_87 = arith.constant 0 : index
    %c7_88 = arith.constant 7 : index
    %c1_89 = arith.constant 1 : index
    %c0_90 = arith.constant 0 : index
    %69 = vector.load %arg17[%c1_86, %c0_87, %c7_88, %c1_89, %c0_90] : memref<2x2x10x10x32xf32, #tpu.memory_space<vmem>>, vector<1x1x1x8x32xf32>
    %70 = vector.shape_cast %69 : vector<1x1x1x8x32xf32> to vector<8x32xf32>
    %71 = vector.shape_cast %68 : vector<8x32xf32> to vector<1x1x1x8x32xf32>
    tpu.vector_store %arg17[%c1_86, %c0_87, %c7_88, %c1_89, %c0_90], %71 {strides = array<i32>} : memref<2x2x10x10x32xf32, #tpu.memory_space<vmem>>, vector<1x1x1x8x32xf32>,
    %72 = vector.extract_strided_slice %15 {offsets = [112, 0], sizes = [8, 32], strides = [1, 1]} : vector<128x32xf32> to vector<8x32xf32>
    %c0_91 = arith.constant 0 : index
    %c0_92 = arith.constant 0 : index
    %c8 = arith.constant 8 : index
    %c1_93 = arith.constant 1 : index
    %c0_94 = arith.constant 0 : index
    %73 = vector.load %arg17[%c0_91, %c0_92, %c8, %c1_93, %c0_94] : memref<2x2x10x10x32xf32, #tpu.memory_space<vmem>>, vector<1x1x1x8x32xf32>
    %74 = vector.shape_cast %73 : vector<1x1x1x8x32xf32> to vector<8x32xf32>
    %75 = vector.shape_cast %72 : vector<8x32xf32> to vector<1x1x1x8x32xf32>
    tpu.vector_store %arg17[%c0_91, %c0_92, %c8, %c1_93, %c0_94], %75 {strides = array<i32>} : memref<2x2x10x10x32xf32, #tpu.memory_space<vmem>>, vector<1x1x1x8x32xf32>,
    %76 = vector.extract_strided_slice %15 {offsets = [120, 0], sizes = [8, 32], strides = [1, 1]} : vector<128x32xf32> to vector<8x32xf32>
    %c1_95 = arith.constant 1 : index
    %c0_96 = arith.constant 0 : index
    %c8_97 = arith.constant 8 : index
    %c1_98 = arith.constant 1 : index
    %c0_99 = arith.constant 0 : index
    %77 = vector.load %arg17[%c1_95, %c0_96, %c8_97, %c1_98, %c0_99] : memref<2x2x10x10x32xf32, #tpu.memory_space<vmem>>, vector<1x1x1x8x32xf32>
    %78 = vector.shape_cast %77 : vector<1x1x1x8x32xf32> to vector<8x32xf32>
    %79 = vector.shape_cast %76 : vector<8x32xf32> to vector<1x1x1x8x32xf32>
    tpu.vector_store %arg17[%c1_95, %c0_96, %c8_97, %c1_98, %c0_99], %79 {strides = array<i32>} : memref<2x2x10x10x32xf32, #tpu.memory_space<vmem>>, vector<1x1x1x8x32xf32>,
    %c0_100 = arith.constant 0 : index
    %c1_101 = arith.constant 1 : index
    %c0_102 = arith.constant 0 : index
    %c0_103 = arith.constant 0 : index
    %c0_104 = arith.constant 0 : index
    %80 = vector.load %arg1[%c0_100, %c1_101, %c0_102, %c0_103, %c0_104] : memref<1x2x16x8x4xf32, #tpu.memory_space<vmem>>, vector<1x1x16x8x4xf32>
    %81 = vector.shape_cast %80 : vector<1x1x16x8x4xf32> to vector<16x8x4xf32>
    %82 = vector.shape_cast %81 : vector<16x8x4xf32> to vector<128x4xf32>
    %cst_105 = arith.constant dense<0.000000e+00> : vector<128x32xf32>
    %83 = tpu.matmul %82, %4, %cst_105 {dimension_numbers = #tpu.dot_dimension_numbers<[1], [0], [0], [1], [0, 0, 1, 1], [], []>, precision = #tpu.contract_precision<fp32>} : vector<128x4xf32>, vector<4x32xf32>, vector<128x32xf32> -> vector<128x32xf32>
    %84 = vector.broadcast %5 : vector<1x32xf32> to vector<128x32xf32>
    %85 = arith.addf %83, %84 : vector<128x32xf32>
    %86 = vector.extract_strided_slice %85 {offsets = [0, 0], sizes = [8, 32], strides = [1, 1]} : vector<128x32xf32> to vector<8x32xf32>
    %c0_106 = arith.constant 0 : index
    %c1_107 = arith.constant 1 : index
    %c1_108 = arith.constant 1 : index
    %c1_109 = arith.constant 1 : index
    %c0_110 = arith.constant 0 : index
    %87 = vector.load %arg17[%c0_106, %c1_107, %c1_108, %c1_109, %c0_110] : memref<2x2x10x10x32xf32, #tpu.memory_space<vmem>>, vector<1x1x1x8x32xf32>
    %88 = vector.shape_cast %87 : vector<1x1x1x8x32xf32> to vector<8x32xf32>
    %89 = vector.shape_cast %86 : vector<8x32xf32> to vector<1x1x1x8x32xf32>
    tpu.vector_store %arg17[%c0_106, %c1_107, %c1_108, %c1_109, %c0_110], %89 {strides = array<i32>} : memref<2x2x10x10x32xf32, #tpu.memory_space<vmem>>, vector<1x1x1x8x32xf32>,
    %90 = vector.extract_strided_slice %85 {offsets = [8, 0], sizes = [8, 32], strides = [1, 1]} : vector<128x32xf32> to vector<8x32xf32>
    %c1_111 = arith.constant 1 : index
    %c1_112 = arith.constant 1 : index
    %c1_113 = arith.constant 1 : index
    %c1_114 = arith.constant 1 : index
    %c0_115 = arith.constant 0 : index
    %91 = vector.load %arg17[%c1_111, %c1_112, %c1_113, %c1_114, %c0_115] : memref<2x2x10x10x32xf32, #tpu.memory_space<vmem>>, vector<1x1x1x8x32xf32>
    %92 = vector.shape_cast %91 : vector<1x1x1x8x32xf32> to vector<8x32xf32>
    %93 = vector.shape_cast %90 : vector<8x32xf32> to vector<1x1x1x8x32xf32>
    tpu.vector_store %arg17[%c1_111, %c1_112, %c1_113, %c1_114, %c0_115], %93 {strides = array<i32>} : memref<2x2x10x10x32xf32, #tpu.memory_space<vmem>>, vector<1x1x1x8x32xf32>,
    %94 = vector.extract_strided_slice %85 {offsets = [16, 0], sizes = [8, 32], strides = [1, 1]} : vector<128x32xf32> to vector<8x32xf32>
    %c0_116 = arith.constant 0 : index
    %c1_117 = arith.constant 1 : index
    %c2_118 = arith.constant 2 : index
    %c1_119 = arith.constant 1 : index
    %c0_120 = arith.constant 0 : index
    %95 = vector.load %arg17[%c0_116, %c1_117, %c2_118, %c1_119, %c0_120] : memref<2x2x10x10x32xf32, #tpu.memory_space<vmem>>, vector<1x1x1x8x32xf32>
    %96 = vector.shape_cast %95 : vector<1x1x1x8x32xf32> to vector<8x32xf32>
    %97 = vector.shape_cast %94 : vector<8x32xf32> to vector<1x1x1x8x32xf32>
    tpu.vector_store %arg17[%c0_116, %c1_117, %c2_118, %c1_119, %c0_120], %97 {strides = array<i32>} : memref<2x2x10x10x32xf32, #tpu.memory_space<vmem>>, vector<1x1x1x8x32xf32>,
    %98 = vector.extract_strided_slice %85 {offsets = [24, 0], sizes = [8, 32], strides = [1, 1]} : vector<128x32xf32> to vector<8x32xf32>
    %c1_121 = arith.constant 1 : index
    %c1_122 = arith.constant 1 : index
    %c2_123 = arith.constant 2 : index
    %c1_124 = arith.constant 1 : index
    %c0_125 = arith.constant 0 : index
    %99 = vector.load %arg17[%c1_121, %c1_122, %c2_123, %c1_124, %c0_125] : memref<2x2x10x10x32xf32, #tpu.memory_space<vmem>>, vector<1x1x1x8x32xf32>
    %100 = vector.shape_cast %99 : vector<1x1x1x8x32xf32> to vector<8x32xf32>
    %101 = vector.shape_cast %98 : vector<8x32xf32> to vector<1x1x1x8x32xf32>
    tpu.vector_store %arg17[%c1_121, %c1_122, %c2_123, %c1_124, %c0_125], %101 {strides = array<i32>} : memref<2x2x10x10x32xf32, #tpu.memory_space<vmem>>, vector<1x1x1x8x32xf32>,
    %102 = vector.extract_strided_slice %85 {offsets = [32, 0], sizes = [8, 32], strides = [1, 1]} : vector<128x32xf32> to vector<8x32xf32>
    %c0_126 = arith.constant 0 : index
    %c1_127 = arith.constant 1 : index
    %c3_128 = arith.constant 3 : index
    %c1_129 = arith.constant 1 : index
    %c0_130 = arith.constant 0 : index
    %103 = vector.load %arg17[%c0_126, %c1_127, %c3_128, %c1_129, %c0_130] : memref<2x2x10x10x32xf32, #tpu.memory_space<vmem>>, vector<1x1x1x8x32xf32>
    %104 = vector.shape_cast %103 : vector<1x1x1x8x32xf32> to vector<8x32xf32>
    %105 = vector.shape_cast %102 : vector<8x32xf32> to vector<1x1x1x8x32xf32>
    tpu.vector_store %arg17[%c0_126, %c1_127, %c3_128, %c1_129, %c0_130], %105 {strides = array<i32>} : memref<2x2x10x10x32xf32, #tpu.memory_space<vmem>>, vector<1x1x1x8x32xf32>,
    %106 = vector.extract_strided_slice %85 {offsets = [40, 0], sizes = [8, 32], strides = [1, 1]} : vector<128x32xf32> to vector<8x32xf32>
    %c1_131 = arith.constant 1 : index
    %c1_132 = arith.constant 1 : index
    %c3_133 = arith.constant 3 : index
    %c1_134 = arith.constant 1 : index
    %c0_135 = arith.constant 0 : index
    %107 = vector.load %arg17[%c1_131, %c1_132, %c3_133, %c1_134, %c0_135] : memref<2x2x10x10x32xf32, #tpu.memory_space<vmem>>, vector<1x1x1x8x32xf32>
    %108 = vector.shape_cast %107 : vector<1x1x1x8x32xf32> to vector<8x32xf32>
    %109 = vector.shape_cast %106 : vector<8x32xf32> to vector<1x1x1x8x32xf32>
    tpu.vector_store %arg17[%c1_131, %c1_132, %c3_133, %c1_134, %c0_135], %109 {strides = array<i32>} : memref<2x2x10x10x32xf32, #tpu.memory_space<vmem>>, vector<1x1x1x8x32xf32>,
    %110 = vector.extract_strided_slice %85 {offsets = [48, 0], sizes = [8, 32], strides = [1, 1]} : vector<128x32xf32> to vector<8x32xf32>
    %c0_136 = arith.constant 0 : index
    %c1_137 = arith.constant 1 : index
    %c4_138 = arith.constant 4 : index
    %c1_139 = arith.constant 1 : index
    %c0_140 = arith.constant 0 : index
    %111 = vector.load %arg17[%c0_136, %c1_137, %c4_138, %c1_139, %c0_140] : memref<2x2x10x10x32xf32, #tpu.memory_space<vmem>>, vector<1x1x1x8x32xf32>
    %112 = vector.shape_cast %111 : vector<1x1x1x8x32xf32> to vector<8x32xf32>
    %113 = vector.shape_cast %110 : vector<8x32xf32> to vector<1x1x1x8x32xf32>
    tpu.vector_store %arg17[%c0_136, %c1_137, %c4_138, %c1_139, %c0_140], %113 {strides = array<i32>} : memref<2x2x10x10x32xf32, #tpu.memory_space<vmem>>, vector<1x1x1x8x32xf32>,
    %114 = vector.extract_strided_slice %85 {offsets = [56, 0], sizes = [8, 32], strides = [1, 1]} : vector<128x32xf32> to vector<8x32xf32>
    %c1_141 = arith.constant 1 : index
    %c1_142 = arith.constant 1 : index
    %c4_143 = arith.constant 4 : index
    %c1_144 = arith.constant 1 : index
    %c0_145 = arith.constant 0 : index
    %115 = vector.load %arg17[%c1_141, %c1_142, %c4_143, %c1_144, %c0_145] : memref<2x2x10x10x32xf32, #tpu.memory_space<vmem>>, vector<1x1x1x8x32xf32>
    %116 = vector.shape_cast %115 : vector<1x1x1x8x32xf32> to vector<8x32xf32>
    %117 = vector.shape_cast %114 : vector<8x32xf32> to vector<1x1x1x8x32xf32>
    tpu.vector_store %arg17[%c1_141, %c1_142, %c4_143, %c1_144, %c0_145], %117 {strides = array<i32>} : memref<2x2x10x10x32xf32, #tpu.memory_space<vmem>>, vector<1x1x1x8x32xf32>,
    %118 = vector.extract_strided_slice %85 {offsets = [64, 0], sizes = [8, 32], strides = [1, 1]} : vector<128x32xf32> to vector<8x32xf32>
    %c0_146 = arith.constant 0 : index
    %c1_147 = arith.constant 1 : index
    %c5_148 = arith.constant 5 : index
    %c1_149 = arith.constant 1 : index
    %c0_150 = arith.constant 0 : index
    %119 = vector.load %arg17[%c0_146, %c1_147, %c5_148, %c1_149, %c0_150] : memref<2x2x10x10x32xf32, #tpu.memory_space<vmem>>, vector<1x1x1x8x32xf32>
    %120 = vector.shape_cast %119 : vector<1x1x1x8x32xf32> to vector<8x32xf32>
    %121 = vector.shape_cast %118 : vector<8x32xf32> to vector<1x1x1x8x32xf32>
    tpu.vector_store %arg17[%c0_146, %c1_147, %c5_148, %c1_149, %c0_150], %121 {strides = array<i32>} : memref<2x2x10x10x32xf32, #tpu.memory_space<vmem>>, vector<1x1x1x8x32xf32>,
    %122 = vector.extract_strided_slice %85 {offsets = [72, 0], sizes = [8, 32], strides = [1, 1]} : vector<128x32xf32> to vector<8x32xf32>
    %c1_151 = arith.constant 1 : index
    %c1_152 = arith.constant 1 : index
    %c5_153 = arith.constant 5 : index
    %c1_154 = arith.constant 1 : index
    %c0_155 = arith.constant 0 : index
    %123 = vector.load %arg17[%c1_151, %c1_152, %c5_153, %c1_154, %c0_155] : memref<2x2x10x10x32xf32, #tpu.memory_space<vmem>>, vector<1x1x1x8x32xf32>
    %124 = vector.shape_cast %123 : vector<1x1x1x8x32xf32> to vector<8x32xf32>
    %125 = vector.shape_cast %122 : vector<8x32xf32> to vector<1x1x1x8x32xf32>
    tpu.vector_store %arg17[%c1_151, %c1_152, %c5_153, %c1_154, %c0_155], %125 {strides = array<i32>} : memref<2x2x10x10x32xf32, #tpu.memory_space<vmem>>, vector<1x1x1x8x32xf32>,
    %126 = vector.extract_strided_slice %85 {offsets = [80, 0], sizes = [8, 32], strides = [1, 1]} : vector<128x32xf32> to vector<8x32xf32>
    %c0_156 = arith.constant 0 : index
    %c1_157 = arith.constant 1 : index
    %c6_158 = arith.constant 6 : index
    %c1_159 = arith.constant 1 : index
    %c0_160 = arith.constant 0 : index
    %127 = vector.load %arg17[%c0_156, %c1_157, %c6_158, %c1_159, %c0_160] : memref<2x2x10x10x32xf32, #tpu.memory_space<vmem>>, vector<1x1x1x8x32xf32>
    %128 = vector.shape_cast %127 : vector<1x1x1x8x32xf32> to vector<8x32xf32>
    %129 = vector.shape_cast %126 : vector<8x32xf32> to vector<1x1x1x8x32xf32>
    tpu.vector_store %arg17[%c0_156, %c1_157, %c6_158, %c1_159, %c0_160], %129 {strides = array<i32>} : memref<2x2x10x10x32xf32, #tpu.memory_space<vmem>>, vector<1x1x1x8x32xf32>,
    %130 = vector.extract_strided_slice %85 {offsets = [88, 0], sizes = [8, 32], strides = [1, 1]} : vector<128x32xf32> to vector<8x32xf32>
    %c1_161 = arith.constant 1 : index
    %c1_162 = arith.constant 1 : index
    %c6_163 = arith.constant 6 : index
    %c1_164 = arith.constant 1 : index
    %c0_165 = arith.constant 0 : index
    %131 = vector.load %arg17[%c1_161, %c1_162, %c6_163, %c1_164, %c0_165] : memref<2x2x10x10x32xf32, #tpu.memory_space<vmem>>, vector<1x1x1x8x32xf32>
    %132 = vector.shape_cast %131 : vector<1x1x1x8x32xf32> to vector<8x32xf32>
    %133 = vector.shape_cast %130 : vector<8x32xf32> to vector<1x1x1x8x32xf32>
    tpu.vector_store %arg17[%c1_161, %c1_162, %c6_163, %c1_164, %c0_165], %133 {strides = array<i32>} : memref<2x2x10x10x32xf32, #tpu.memory_space<vmem>>, vector<1x1x1x8x32xf32>,
    %134 = vector.extract_strided_slice %85 {offsets = [96, 0], sizes = [8, 32], strides = [1, 1]} : vector<128x32xf32> to vector<8x32xf32>
    %c0_166 = arith.constant 0 : index
    %c1_167 = arith.constant 1 : index
    %c7_168 = arith.constant 7 : index
    %c1_169 = arith.constant 1 : index
    %c0_170 = arith.constant 0 : index
    %135 = vector.load %arg17[%c0_166, %c1_167, %c7_168, %c1_169, %c0_170] : memref<2x2x10x10x32xf32, #tpu.memory_space<vmem>>, vector<1x1x1x8x32xf32>
    %136 = vector.shape_cast %135 : vector<1x1x1x8x32xf32> to vector<8x32xf32>
    %137 = vector.shape_cast %134 : vector<8x32xf32> to vector<1x1x1x8x32xf32>
    tpu.vector_store %arg17[%c0_166, %c1_167, %c7_168, %c1_169, %c0_170], %137 {strides = array<i32>} : memref<2x2x10x10x32xf32, #tpu.memory_space<vmem>>, vector<1x1x1x8x32xf32>,
    %138 = vector.extract_strided_slice %85 {offsets = [104, 0], sizes = [8, 32], strides = [1, 1]} : vector<128x32xf32> to vector<8x32xf32>
    %c1_171 = arith.constant 1 : index
    %c1_172 = arith.constant 1 : index
    %c7_173 = arith.constant 7 : index
    %c1_174 = arith.constant 1 : index
    %c0_175 = arith.constant 0 : index
    %139 = vector.load %arg17[%c1_171, %c1_172, %c7_173, %c1_174, %c0_175] : memref<2x2x10x10x32xf32, #tpu.memory_space<vmem>>, vector<1x1x1x8x32xf32>
    %140 = vector.shape_cast %139 : vector<1x1x1x8x32xf32> to vector<8x32xf32>
    %141 = vector.shape_cast %138 : vector<8x32xf32> to vector<1x1x1x8x32xf32>
    tpu.vector_store %arg17[%c1_171, %c1_172, %c7_173, %c1_174, %c0_175], %141 {strides = array<i32>} : memref<2x2x10x10x32xf32, #tpu.memory_space<vmem>>, vector<1x1x1x8x32xf32>,
    %142 = vector.extract_strided_slice %85 {offsets = [112, 0], sizes = [8, 32], strides = [1, 1]} : vector<128x32xf32> to vector<8x32xf32>
    %c0_176 = arith.constant 0 : index
    %c1_177 = arith.constant 1 : index
    %c8_178 = arith.constant 8 : index
    %c1_179 = arith.constant 1 : index
    %c0_180 = arith.constant 0 : index
    %143 = vector.load %arg17[%c0_176, %c1_177, %c8_178, %c1_179, %c0_180] : memref<2x2x10x10x32xf32, #tpu.memory_space<vmem>>, vector<1x1x1x8x32xf32>
    %144 = vector.shape_cast %143 : vector<1x1x1x8x32xf32> to vector<8x32xf32>
    %145 = vector.shape_cast %142 : vector<8x32xf32> to vector<1x1x1x8x32xf32>
    tpu.vector_store %arg17[%c0_176, %c1_177, %c8_178, %c1_179, %c0_180], %145 {strides = array<i32>} : memref<2x2x10x10x32xf32, #tpu.memory_space<vmem>>, vector<1x1x1x8x32xf32>,
    %146 = vector.extract_strided_slice %85 {offsets = [120, 0], sizes = [8, 32], strides = [1, 1]} : vector<128x32xf32> to vector<8x32xf32>
    %c1_181 = arith.constant 1 : index
    %c1_182 = arith.constant 1 : index
    %c8_183 = arith.constant 8 : index
    %c1_184 = arith.constant 1 : index
    %c0_185 = arith.constant 0 : index
    %147 = vector.load %arg17[%c1_181, %c1_182, %c8_183, %c1_184, %c0_185] : memref<2x2x10x10x32xf32, #tpu.memory_space<vmem>>, vector<1x1x1x8x32xf32>
    %148 = vector.shape_cast %147 : vector<1x1x1x8x32xf32> to vector<8x32xf32>
    %149 = vector.shape_cast %146 : vector<8x32xf32> to vector<1x1x1x8x32xf32>
    tpu.vector_store %arg17[%c1_181, %c1_182, %c8_183, %c1_184, %c0_185], %149 {strides = array<i32>} : memref<2x2x10x10x32xf32, #tpu.memory_space<vmem>>, vector<1x1x1x8x32xf32>,
    %cst_186 = arith.constant 0.000000e+00 : f32
    %150 = vector.broadcast %cst_186 : f32 to vector<7x7x32xf32>
    %cst_187 = arith.constant 0.000000e+00 : f32
    %151 = vector.broadcast %cst_187 : f32 to vector<7x7x32xf32>
    %c0_188 = arith.constant 0 : index
    %c0_189 = arith.constant 0 : index
    %c0_190 = arith.constant 0 : index
    %c0_191 = arith.constant 0 : index
    %c0_192 = arith.constant 0 : index
    %152 = vector.load %arg17[%c0_188, %c0_189, %c0_190, %c0_191, %c0_192] : memref<2x2x10x10x32xf32, #tpu.memory_space<vmem>>, vector<1x1x7x7x32xf32>
    %153 = vector.shape_cast %152 : vector<1x1x7x7x32xf32> to vector<7x7x32xf32>
    %154 = vector.extract_strided_slice %6 {offsets = [0, 0], sizes = [1, 32], strides = [1, 1]} : vector<49x32xf32> to vector<1x32xf32>
    %155 = vector.shape_cast %154 : vector<1x32xf32> to vector<1x1x32xf32>
    %156 = vector.broadcast %155 : vector<1x1x32xf32> to vector<7x7x32xf32>
    %157 = arith.mulf %153, %156 : vector<7x7x32xf32>
    %158 = arith.addf %150, %157 : vector<7x7x32xf32>
    %c0_193 = arith.constant 0 : index
    %c1_194 = arith.constant 1 : index
    %c0_195 = arith.constant 0 : index
    %c0_196 = arith.constant 0 : index
    %c0_197 = arith.constant 0 : index
    %159 = vector.load %arg17[%c0_193, %c1_194, %c0_195, %c0_196, %c0_197] : memref<2x2x10x10x32xf32, #tpu.memory_space<vmem>>, vector<1x1x7x7x32xf32>
    %160 = vector.shape_cast %159 : vector<1x1x7x7x32xf32> to vector<7x7x32xf32>
    %161 = vector.extract_strided_slice %6 {offsets = [1, 0], sizes = [1, 32], strides = [1, 1]} : vector<49x32xf32> to vector<1x32xf32>
    %162 = vector.shape_cast %161 : vector<1x32xf32> to vector<1x1x32xf32>
    %163 = vector.broadcast %162 : vector<1x1x32xf32> to vector<7x7x32xf32>
    %164 = arith.mulf %160, %163 : vector<7x7x32xf32>
    %165 = arith.addf %151, %164 : vector<7x7x32xf32>
    %c0_198 = arith.constant 0 : index
    %c0_199 = arith.constant 0 : index
    %c0_200 = arith.constant 0 : index
    %c1_201 = arith.constant 1 : index
    %c0_202 = arith.constant 0 : index
    %166 = vector.load %arg17[%c0_198, %c0_199, %c0_200, %c1_201, %c0_202] : memref<2x2x10x10x32xf32, #tpu.memory_space<vmem>>, vector<1x1x7x7x32xf32>
    %167 = vector.shape_cast %166 : vector<1x1x7x7x32xf32> to vector<7x7x32xf32>
    %168 = vector.extract_strided_slice %6 {offsets = [2, 0], sizes = [1, 32], strides = [1, 1]} : vector<49x32xf32> to vector<1x32xf32>
    %169 = vector.shape_cast %168 : vector<1x32xf32> to vector<1x1x32xf32>
    %170 = vector.broadcast %169 : vector<1x1x32xf32> to vector<7x7x32xf32>
    %171 = arith.mulf %167, %170 : vector<7x7x32xf32>
    %172 = arith.addf %158, %171 : vector<7x7x32xf32>
    %c0_203 = arith.constant 0 : index
    %c1_204 = arith.constant 1 : index
    %c0_205 = arith.constant 0 : index
    %c1_206 = arith.constant 1 : index
    %c0_207 = arith.constant 0 : index
    %173 = vector.load %arg17[%c0_203, %c1_204, %c0_205, %c1_206, %c0_207] : memref<2x2x10x10x32xf32, #tpu.memory_space<vmem>>, vector<1x1x7x7x32xf32>
    %174 = vector.shape_cast %173 : vector<1x1x7x7x32xf32> to vector<7x7x32xf32>
    %175 = vector.extract_strided_slice %6 {offsets = [3, 0], sizes = [1, 32], strides = [1, 1]} : vector<49x32xf32> to vector<1x32xf32>
    %176 = vector.shape_cast %175 : vector<1x32xf32> to vector<1x1x32xf32>
    %177 = vector.broadcast %176 : vector<1x1x32xf32> to vector<7x7x32xf32>
    %178 = arith.mulf %174, %177 : vector<7x7x32xf32>
    %179 = arith.addf %165, %178 : vector<7x7x32xf32>
    %c0_208 = arith.constant 0 : index
    %c0_209 = arith.constant 0 : index
    %c0_210 = arith.constant 0 : index
    %c2_211 = arith.constant 2 : index
    %c0_212 = arith.constant 0 : index
    %180 = vector.load %arg17[%c0_208, %c0_209, %c0_210, %c2_211, %c0_212] : memref<2x2x10x10x32xf32, #tpu.memory_space<vmem>>, vector<1x1x7x7x32xf32>
    %181 = vector.shape_cast %180 : vector<1x1x7x7x32xf32> to vector<7x7x32xf32>
    %182 = vector.extract_strided_slice %6 {offsets = [4, 0], sizes = [1, 32], strides = [1, 1]} : vector<49x32xf32> to vector<1x32xf32>
    %183 = vector.shape_cast %182 : vector<1x32xf32> to vector<1x1x32xf32>
    %184 = vector.broadcast %183 : vector<1x1x32xf32> to vector<7x7x32xf32>
    %185 = arith.mulf %181, %184 : vector<7x7x32xf32>
    %186 = arith.addf %172, %185 : vector<7x7x32xf32>
    %c0_213 = arith.constant 0 : index
    %c1_214 = arith.constant 1 : index
    %c0_215 = arith.constant 0 : index
    %c2_216 = arith.constant 2 : index
    %c0_217 = arith.constant 0 : index
    %187 = vector.load %arg17[%c0_213, %c1_214, %c0_215, %c2_216, %c0_217] : memref<2x2x10x10x32xf32, #tpu.memory_space<vmem>>, vector<1x1x7x7x32xf32>
    %188 = vector.shape_cast %187 : vector<1x1x7x7x32xf32> to vector<7x7x32xf32>
    %189 = vector.extract_strided_slice %6 {offsets = [5, 0], sizes = [1, 32], strides = [1, 1]} : vector<49x32xf32> to vector<1x32xf32>
    %190 = vector.shape_cast %189 : vector<1x32xf32> to vector<1x1x32xf32>
    %191 = vector.broadcast %190 : vector<1x1x32xf32> to vector<7x7x32xf32>
    %192 = arith.mulf %188, %191 : vector<7x7x32xf32>
    %193 = arith.addf %179, %192 : vector<7x7x32xf32>
    %c0_218 = arith.constant 0 : index
    %c0_219 = arith.constant 0 : index
    %c0_220 = arith.constant 0 : index
    %c3_221 = arith.constant 3 : index
    %c0_222 = arith.constant 0 : index
    %194 = vector.load %arg17[%c0_218, %c0_219, %c0_220, %c3_221, %c0_222] : memref<2x2x10x10x32xf32, #tpu.memory_space<vmem>>, vector<1x1x7x7x32xf32>
    %195 = vector.shape_cast %194 : vector<1x1x7x7x32xf32> to vector<7x7x32xf32>
    %196 = vector.extract_strided_slice %6 {offsets = [6, 0], sizes = [1, 32], strides = [1, 1]} : vector<49x32xf32> to vector<1x32xf32>
    %197 = vector.shape_cast %196 : vector<1x32xf32> to vector<1x1x32xf32>
    %198 = vector.broadcast %197 : vector<1x1x32xf32> to vector<7x7x32xf32>
    %199 = arith.mulf %195, %198 : vector<7x7x32xf32>
    %200 = arith.addf %186, %199 : vector<7x7x32xf32>
    %c1_223 = arith.constant 1 : index
    %c0_224 = arith.constant 0 : index
    %c0_225 = arith.constant 0 : index
    %c0_226 = arith.constant 0 : index
    %c0_227 = arith.constant 0 : index
    %201 = vector.load %arg17[%c1_223, %c0_224, %c0_225, %c0_226, %c0_227] : memref<2x2x10x10x32xf32, #tpu.memory_space<vmem>>, vector<1x1x7x7x32xf32>
    %202 = vector.shape_cast %201 : vector<1x1x7x7x32xf32> to vector<7x7x32xf32>
    %203 = vector.extract_strided_slice %6 {offsets = [7, 0], sizes = [1, 32], strides = [1, 1]} : vector<49x32xf32> to vector<1x32xf32>
    %204 = vector.shape_cast %203 : vector<1x32xf32> to vector<1x1x32xf32>
    %205 = vector.broadcast %204 : vector<1x1x32xf32> to vector<7x7x32xf32>
    %206 = arith.mulf %202, %205 : vector<7x7x32xf32>
    %207 = arith.addf %193, %206 : vector<7x7x32xf32>
    %c1_228 = arith.constant 1 : index
    %c1_229 = arith.constant 1 : index
    %c0_230 = arith.constant 0 : index
    %c0_231 = arith.constant 0 : index
    %c0_232 = arith.constant 0 : index
    %208 = vector.load %arg17[%c1_228, %c1_229, %c0_230, %c0_231, %c0_232] : memref<2x2x10x10x32xf32, #tpu.memory_space<vmem>>, vector<1x1x7x7x32xf32>
    %209 = vector.shape_cast %208 : vector<1x1x7x7x32xf32> to vector<7x7x32xf32>
    %210 = vector.extract_strided_slice %6 {offsets = [8, 0], sizes = [1, 32], strides = [1, 1]} : vector<49x32xf32> to vector<1x32xf32>
    %211 = vector.shape_cast %210 : vector<1x32xf32> to vector<1x1x32xf32>
    %212 = vector.broadcast %211 : vector<1x1x32xf32> to vector<7x7x32xf32>
    %213 = arith.mulf %209, %212 : vector<7x7x32xf32>
    %214 = arith.addf %200, %213 : vector<7x7x32xf32>
    %c1_233 = arith.constant 1 : index
    %c0_234 = arith.constant 0 : index
    %c0_235 = arith.constant 0 : index
    %c1_236 = arith.constant 1 : index
    %c0_237 = arith.constant 0 : index
    %215 = vector.load %arg17[%c1_233, %c0_234, %c0_235, %c1_236, %c0_237] : memref<2x2x10x10x32xf32, #tpu.memory_space<vmem>>, vector<1x1x7x7x32xf32>
    %216 = vector.shape_cast %215 : vector<1x1x7x7x32xf32> to vector<7x7x32xf32>
    %217 = vector.extract_strided_slice %6 {offsets = [9, 0], sizes = [1, 32], strides = [1, 1]} : vector<49x32xf32> to vector<1x32xf32>
    %218 = vector.shape_cast %217 : vector<1x32xf32> to vector<1x1x32xf32>
    %219 = vector.broadcast %218 : vector<1x1x32xf32> to vector<7x7x32xf32>
    %220 = arith.mulf %216, %219 : vector<7x7x32xf32>
    %221 = arith.addf %207, %220 : vector<7x7x32xf32>
    %c1_238 = arith.constant 1 : index
    %c1_239 = arith.constant 1 : index
    %c0_240 = arith.constant 0 : index
    %c1_241 = arith.constant 1 : index
    %c0_242 = arith.constant 0 : index
    %222 = vector.load %arg17[%c1_238, %c1_239, %c0_240, %c1_241, %c0_242] : memref<2x2x10x10x32xf32, #tpu.memory_space<vmem>>, vector<1x1x7x7x32xf32>
    %223 = vector.shape_cast %222 : vector<1x1x7x7x32xf32> to vector<7x7x32xf32>
    %224 = vector.extract_strided_slice %6 {offsets = [10, 0], sizes = [1, 32], strides = [1, 1]} : vector<49x32xf32> to vector<1x32xf32>
    %225 = vector.shape_cast %224 : vector<1x32xf32> to vector<1x1x32xf32>
    %226 = vector.broadcast %225 : vector<1x1x32xf32> to vector<7x7x32xf32>
    %227 = arith.mulf %223, %226 : vector<7x7x32xf32>
    %228 = arith.addf %214, %227 : vector<7x7x32xf32>
    %c1_243 = arith.constant 1 : index
    %c0_244 = arith.constant 0 : index
    %c0_245 = arith.constant 0 : index
    %c2_246 = arith.constant 2 : index
    %c0_247 = arith.constant 0 : index
    %229 = vector.load %arg17[%c1_243, %c0_244, %c0_245, %c2_246, %c0_247] : memref<2x2x10x10x32xf32, #tpu.memory_space<vmem>>, vector<1x1x7x7x32xf32>
    %230 = vector.shape_cast %229 : vector<1x1x7x7x32xf32> to vector<7x7x32xf32>
    %231 = vector.extract_strided_slice %6 {offsets = [11, 0], sizes = [1, 32], strides = [1, 1]} : vector<49x32xf32> to vector<1x32xf32>
    %232 = vector.shape_cast %231 : vector<1x32xf32> to vector<1x1x32xf32>
    %233 = vector.broadcast %232 : vector<1x1x32xf32> to vector<7x7x32xf32>
    %234 = arith.mulf %230, %233 : vector<7x7x32xf32>
    %235 = arith.addf %221, %234 : vector<7x7x32xf32>
    %c1_248 = arith.constant 1 : index
    %c1_249 = arith.constant 1 : index
    %c0_250 = arith.constant 0 : index
    %c2_251 = arith.constant 2 : index
    %c0_252 = arith.constant 0 : index
    %236 = vector.load %arg17[%c1_248, %c1_249, %c0_250, %c2_251, %c0_252] : memref<2x2x10x10x32xf32, #tpu.memory_space<vmem>>, vector<1x1x7x7x32xf32>
    %237 = vector.shape_cast %236 : vector<1x1x7x7x32xf32> to vector<7x7x32xf32>
    %238 = vector.extract_strided_slice %6 {offsets = [12, 0], sizes = [1, 32], strides = [1, 1]} : vector<49x32xf32> to vector<1x32xf32>
    %239 = vector.shape_cast %238 : vector<1x32xf32> to vector<1x1x32xf32>
    %240 = vector.broadcast %239 : vector<1x1x32xf32> to vector<7x7x32xf32>
    %241 = arith.mulf %237, %240 : vector<7x7x32xf32>
    %242 = arith.addf %228, %241 : vector<7x7x32xf32>
    %c1_253 = arith.constant 1 : index
    %c0_254 = arith.constant 0 : index
    %c0_255 = arith.constant 0 : index
    %c3_256 = arith.constant 3 : index
    %c0_257 = arith.constant 0 : index
    %243 = vector.load %arg17[%c1_253, %c0_254, %c0_255, %c3_256, %c0_257] : memref<2x2x10x10x32xf32, #tpu.memory_space<vmem>>, vector<1x1x7x7x32xf32>
    %244 = vector.shape_cast %243 : vector<1x1x7x7x32xf32> to vector<7x7x32xf32>
    %245 = vector.extract_strided_slice %6 {offsets = [13, 0], sizes = [1, 32], strides = [1, 1]} : vector<49x32xf32> to vector<1x32xf32>
    %246 = vector.shape_cast %245 : vector<1x32xf32> to vector<1x1x32xf32>
    %247 = vector.broadcast %246 : vector<1x1x32xf32> to vector<7x7x32xf32>
    %248 = arith.mulf %244, %247 : vector<7x7x32xf32>
    %249 = arith.addf %235, %248 : vector<7x7x32xf32>
    %c0_258 = arith.constant 0 : index
    %c0_259 = arith.constant 0 : index
    %c1_260 = arith.constant 1 : index
    %c0_261 = arith.constant 0 : index
    %c0_262 = arith.constant 0 : index
    %250 = vector.load %arg17[%c0_258, %c0_259, %c1_260, %c0_261, %c0_262] : memref<2x2x10x10x32xf32, #tpu.memory_space<vmem>>, vector<1x1x7x7x32xf32>
    %251 = vector.shape_cast %250 : vector<1x1x7x7x32xf32> to vector<7x7x32xf32>
    %252 = vector.extract_strided_slice %6 {offsets = [14, 0], sizes = [1, 32], strides = [1, 1]} : vector<49x32xf32> to vector<1x32xf32>
    %253 = vector.shape_cast %252 : vector<1x32xf32> to vector<1x1x32xf32>
    %254 = vector.broadcast %253 : vector<1x1x32xf32> to vector<7x7x32xf32>
    %255 = arith.mulf %251, %254 : vector<7x7x32xf32>
    %256 = arith.addf %242, %255 : vector<7x7x32xf32>
    %c0_263 = arith.constant 0 : index
    %c1_264 = arith.constant 1 : index
    %c1_265 = arith.constant 1 : index
    %c0_266 = arith.constant 0 : index
    %c0_267 = arith.constant 0 : index
    %257 = vector.load %arg17[%c0_263, %c1_264, %c1_265, %c0_266, %c0_267] : memref<2x2x10x10x32xf32, #tpu.memory_space<vmem>>, vector<1x1x7x7x32xf32>
    %258 = vector.shape_cast %257 : vector<1x1x7x7x32xf32> to vector<7x7x32xf32>
    %259 = vector.extract_strided_slice %6 {offsets = [15, 0], sizes = [1, 32], strides = [1, 1]} : vector<49x32xf32> to vector<1x32xf32>
    %260 = vector.shape_cast %259 : vector<1x32xf32> to vector<1x1x32xf32>
    %261 = vector.broadcast %260 : vector<1x1x32xf32> to vector<7x7x32xf32>
    %262 = arith.mulf %258, %261 : vector<7x7x32xf32>
    %263 = arith.addf %249, %262 : vector<7x7x32xf32>
    %c0_268 = arith.constant 0 : index
    %c0_269 = arith.constant 0 : index
    %c1_270 = arith.constant 1 : index
    %c1_271 = arith.constant 1 : index
    %c0_272 = arith.constant 0 : index
    %264 = vector.load %arg17[%c0_268, %c0_269, %c1_270, %c1_271, %c0_272] : memref<2x2x10x10x32xf32, #tpu.memory_space<vmem>>, vector<1x1x7x7x32xf32>
    %265 = vector.shape_cast %264 : vector<1x1x7x7x32xf32> to vector<7x7x32xf32>
    %266 = vector.extract_strided_slice %6 {offsets = [16, 0], sizes = [1, 32], strides = [1, 1]} : vector<49x32xf32> to vector<1x32xf32>
    %267 = vector.shape_cast %266 : vector<1x32xf32> to vector<1x1x32xf32>
    %268 = vector.broadcast %267 : vector<1x1x32xf32> to vector<7x7x32xf32>
    %269 = arith.mulf %265, %268 : vector<7x7x32xf32>
    %270 = arith.addf %256, %269 : vector<7x7x32xf32>
    %c0_273 = arith.constant 0 : index
    %c1_274 = arith.constant 1 : index
    %c1_275 = arith.constant 1 : index
    %c1_276 = arith.constant 1 : index
    %c0_277 = arith.constant 0 : index
    %271 = vector.load %arg17[%c0_273, %c1_274, %c1_275, %c1_276, %c0_277] : memref<2x2x10x10x32xf32, #tpu.memory_space<vmem>>, vector<1x1x7x7x32xf32>
    %272 = vector.shape_cast %271 : vector<1x1x7x7x32xf32> to vector<7x7x32xf32>
    %273 = vector.extract_strided_slice %6 {offsets = [17, 0], sizes = [1, 32], strides = [1, 1]} : vector<49x32xf32> to vector<1x32xf32>
    %274 = vector.shape_cast %273 : vector<1x32xf32> to vector<1x1x32xf32>
    %275 = vector.broadcast %274 : vector<1x1x32xf32> to vector<7x7x32xf32>
    %276 = arith.mulf %272, %275 : vector<7x7x32xf32>
    %277 = arith.addf %263, %276 : vector<7x7x32xf32>
    %c0_278 = arith.constant 0 : index
    %c0_279 = arith.constant 0 : index
    %c1_280 = arith.constant 1 : index
    %c2_281 = arith.constant 2 : index
    %c0_282 = arith.constant 0 : index
    %278 = vector.load %arg17[%c0_278, %c0_279, %c1_280, %c2_281, %c0_282] : memref<2x2x10x10x32xf32, #tpu.memory_space<vmem>>, vector<1x1x7x7x32xf32>
    %279 = vector.shape_cast %278 : vector<1x1x7x7x32xf32> to vector<7x7x32xf32>
    %280 = vector.extract_strided_slice %6 {offsets = [18, 0], sizes = [1, 32], strides = [1, 1]} : vector<49x32xf32> to vector<1x32xf32>
    %281 = vector.shape_cast %280 : vector<1x32xf32> to vector<1x1x32xf32>
    %282 = vector.broadcast %281 : vector<1x1x32xf32> to vector<7x7x32xf32>
    %283 = arith.mulf %279, %282 : vector<7x7x32xf32>
    %284 = arith.addf %270, %283 : vector<7x7x32xf32>
    %c0_283 = arith.constant 0 : index
    %c1_284 = arith.constant 1 : index
    %c1_285 = arith.constant 1 : index
    %c2_286 = arith.constant 2 : index
    %c0_287 = arith.constant 0 : index
    %285 = vector.load %arg17[%c0_283, %c1_284, %c1_285, %c2_286, %c0_287] : memref<2x2x10x10x32xf32, #tpu.memory_space<vmem>>, vector<1x1x7x7x32xf32>
    %286 = vector.shape_cast %285 : vector<1x1x7x7x32xf32> to vector<7x7x32xf32>
    %287 = vector.extract_strided_slice %6 {offsets = [19, 0], sizes = [1, 32], strides = [1, 1]} : vector<49x32xf32> to vector<1x32xf32>
    %288 = vector.shape_cast %287 : vector<1x32xf32> to vector<1x1x32xf32>
    %289 = vector.broadcast %288 : vector<1x1x32xf32> to vector<7x7x32xf32>
    %290 = arith.mulf %286, %289 : vector<7x7x32xf32>
    %291 = arith.addf %277, %290 : vector<7x7x32xf32>
    %c0_288 = arith.constant 0 : index
    %c0_289 = arith.constant 0 : index
    %c1_290 = arith.constant 1 : index
    %c3_291 = arith.constant 3 : index
    %c0_292 = arith.constant 0 : index
    %292 = vector.load %arg17[%c0_288, %c0_289, %c1_290, %c3_291, %c0_292] : memref<2x2x10x10x32xf32, #tpu.memory_space<vmem>>, vector<1x1x7x7x32xf32>
    %293 = vector.shape_cast %292 : vector<1x1x7x7x32xf32> to vector<7x7x32xf32>
    %294 = vector.extract_strided_slice %6 {offsets = [20, 0], sizes = [1, 32], strides = [1, 1]} : vector<49x32xf32> to vector<1x32xf32>
    %295 = vector.shape_cast %294 : vector<1x32xf32> to vector<1x1x32xf32>
    %296 = vector.broadcast %295 : vector<1x1x32xf32> to vector<7x7x32xf32>
    %297 = arith.mulf %293, %296 : vector<7x7x32xf32>
    %298 = arith.addf %284, %297 : vector<7x7x32xf32>
    %c1_293 = arith.constant 1 : index
    %c0_294 = arith.constant 0 : index
    %c1_295 = arith.constant 1 : index
    %c0_296 = arith.constant 0 : index
    %c0_297 = arith.constant 0 : index
    %299 = vector.load %arg17[%c1_293, %c0_294, %c1_295, %c0_296, %c0_297] : memref<2x2x10x10x32xf32, #tpu.memory_space<vmem>>, vector<1x1x7x7x32xf32>
    %300 = vector.shape_cast %299 : vector<1x1x7x7x32xf32> to vector<7x7x32xf32>
    %301 = vector.extract_strided_slice %6 {offsets = [21, 0], sizes = [1, 32], strides = [1, 1]} : vector<49x32xf32> to vector<1x32xf32>
    %302 = vector.shape_cast %301 : vector<1x32xf32> to vector<1x1x32xf32>
    %303 = vector.broadcast %302 : vector<1x1x32xf32> to vector<7x7x32xf32>
    %304 = arith.mulf %300, %303 : vector<7x7x32xf32>
    %305 = arith.addf %291, %304 : vector<7x7x32xf32>
    %c1_298 = arith.constant 1 : index
    %c1_299 = arith.constant 1 : index
    %c1_300 = arith.constant 1 : index
    %c0_301 = arith.constant 0 : index
    %c0_302 = arith.constant 0 : index
    %306 = vector.load %arg17[%c1_298, %c1_299, %c1_300, %c0_301, %c0_302] : memref<2x2x10x10x32xf32, #tpu.memory_space<vmem>>, vector<1x1x7x7x32xf32>
    %307 = vector.shape_cast %306 : vector<1x1x7x7x32xf32> to vector<7x7x32xf32>
    %308 = vector.extract_strided_slice %6 {offsets = [22, 0], sizes = [1, 32], strides = [1, 1]} : vector<49x32xf32> to vector<1x32xf32>
    %309 = vector.shape_cast %308 : vector<1x32xf32> to vector<1x1x32xf32>
    %310 = vector.broadcast %309 : vector<1x1x32xf32> to vector<7x7x32xf32>
    %311 = arith.mulf %307, %310 : vector<7x7x32xf32>
    %312 = arith.addf %298, %311 : vector<7x7x32xf32>
    %c1_303 = arith.constant 1 : index
    %c0_304 = arith.constant 0 : index
    %c1_305 = arith.constant 1 : index
    %c1_306 = arith.constant 1 : index
    %c0_307 = arith.constant 0 : index
    %313 = vector.load %arg17[%c1_303, %c0_304, %c1_305, %c1_306, %c0_307] : memref<2x2x10x10x32xf32, #tpu.memory_space<vmem>>, vector<1x1x7x7x32xf32>
    %314 = vector.shape_cast %313 : vector<1x1x7x7x32xf32> to vector<7x7x32xf32>
    %315 = vector.extract_strided_slice %6 {offsets = [23, 0], sizes = [1, 32], strides = [1, 1]} : vector<49x32xf32> to vector<1x32xf32>
    %316 = vector.shape_cast %315 : vector<1x32xf32> to vector<1x1x32xf32>
    %317 = vector.broadcast %316 : vector<1x1x32xf32> to vector<7x7x32xf32>
    %318 = arith.mulf %314, %317 : vector<7x7x32xf32>
    %319 = arith.addf %305, %318 : vector<7x7x32xf32>
    %c1_308 = arith.constant 1 : index
    %c1_309 = arith.constant 1 : index
    %c1_310 = arith.constant 1 : index
    %c1_311 = arith.constant 1 : index
    %c0_312 = arith.constant 0 : index
    %320 = vector.load %arg17[%c1_308, %c1_309, %c1_310, %c1_311, %c0_312] : memref<2x2x10x10x32xf32, #tpu.memory_space<vmem>>, vector<1x1x7x7x32xf32>
    %321 = vector.shape_cast %320 : vector<1x1x7x7x32xf32> to vector<7x7x32xf32>
    %322 = vector.extract_strided_slice %6 {offsets = [24, 0], sizes = [1, 32], strides = [1, 1]} : vector<49x32xf32> to vector<1x32xf32>
    %323 = vector.shape_cast %322 : vector<1x32xf32> to vector<1x1x32xf32>
    %324 = vector.broadcast %323 : vector<1x1x32xf32> to vector<7x7x32xf32>
    %325 = arith.mulf %321, %324 : vector<7x7x32xf32>
    %326 = arith.addf %312, %325 : vector<7x7x32xf32>
    %c1_313 = arith.constant 1 : index
    %c0_314 = arith.constant 0 : index
    %c1_315 = arith.constant 1 : index
    %c2_316 = arith.constant 2 : index
    %c0_317 = arith.constant 0 : index
    %327 = vector.load %arg17[%c1_313, %c0_314, %c1_315, %c2_316, %c0_317] : memref<2x2x10x10x32xf32, #tpu.memory_space<vmem>>, vector<1x1x7x7x32xf32>
    %328 = vector.shape_cast %327 : vector<1x1x7x7x32xf32> to vector<7x7x32xf32>
    %329 = vector.extract_strided_slice %6 {offsets = [25, 0], sizes = [1, 32], strides = [1, 1]} : vector<49x32xf32> to vector<1x32xf32>
    %330 = vector.shape_cast %329 : vector<1x32xf32> to vector<1x1x32xf32>
    %331 = vector.broadcast %330 : vector<1x1x32xf32> to vector<7x7x32xf32>
    %332 = arith.mulf %328, %331 : vector<7x7x32xf32>
    %333 = arith.addf %319, %332 : vector<7x7x32xf32>
    %c1_318 = arith.constant 1 : index
    %c1_319 = arith.constant 1 : index
    %c1_320 = arith.constant 1 : index
    %c2_321 = arith.constant 2 : index
    %c0_322 = arith.constant 0 : index
    %334 = vector.load %arg17[%c1_318, %c1_319, %c1_320, %c2_321, %c0_322] : memref<2x2x10x10x32xf32, #tpu.memory_space<vmem>>, vector<1x1x7x7x32xf32>
    %335 = vector.shape_cast %334 : vector<1x1x7x7x32xf32> to vector<7x7x32xf32>
    %336 = vector.extract_strided_slice %6 {offsets = [26, 0], sizes = [1, 32], strides = [1, 1]} : vector<49x32xf32> to vector<1x32xf32>
    %337 = vector.shape_cast %336 : vector<1x32xf32> to vector<1x1x32xf32>
    %338 = vector.broadcast %337 : vector<1x1x32xf32> to vector<7x7x32xf32>
    %339 = arith.mulf %335, %338 : vector<7x7x32xf32>
    %340 = arith.addf %326, %339 : vector<7x7x32xf32>
    %c1_323 = arith.constant 1 : index
    %c0_324 = arith.constant 0 : index
    %c1_325 = arith.constant 1 : index
    %c3_326 = arith.constant 3 : index
    %c0_327 = arith.constant 0 : index
    %341 = vector.load %arg17[%c1_323, %c0_324, %c1_325, %c3_326, %c0_327] : memref<2x2x10x10x32xf32, #tpu.memory_space<vmem>>, vector<1x1x7x7x32xf32>
    %342 = vector.shape_cast %341 : vector<1x1x7x7x32xf32> to vector<7x7x32xf32>
    %343 = vector.extract_strided_slice %6 {offsets = [27, 0], sizes = [1, 32], strides = [1, 1]} : vector<49x32xf32> to vector<1x32xf32>
    %344 = vector.shape_cast %343 : vector<1x32xf32> to vector<1x1x32xf32>
    %345 = vector.broadcast %344 : vector<1x1x32xf32> to vector<7x7x32xf32>
    %346 = arith.mulf %342, %345 : vector<7x7x32xf32>
    %347 = arith.addf %333, %346 : vector<7x7x32xf32>
    %c0_328 = arith.constant 0 : index
    %c0_329 = arith.constant 0 : index
    %c2_330 = arith.constant 2 : index
    %c0_331 = arith.constant 0 : index
    %c0_332 = arith.constant 0 : index
    %348 = vector.load %arg17[%c0_328, %c0_329, %c2_330, %c0_331, %c0_332] : memref<2x2x10x10x32xf32, #tpu.memory_space<vmem>>, vector<1x1x7x7x32xf32>
    %349 = vector.shape_cast %348 : vector<1x1x7x7x32xf32> to vector<7x7x32xf32>
    %350 = vector.extract_strided_slice %6 {offsets = [28, 0], sizes = [1, 32], strides = [1, 1]} : vector<49x32xf32> to vector<1x32xf32>
    %351 = vector.shape_cast %350 : vector<1x32xf32> to vector<1x1x32xf32>
    %352 = vector.broadcast %351 : vector<1x1x32xf32> to vector<7x7x32xf32>
    %353 = arith.mulf %349, %352 : vector<7x7x32xf32>
    %354 = arith.addf %340, %353 : vector<7x7x32xf32>
    %c0_333 = arith.constant 0 : index
    %c1_334 = arith.constant 1 : index
    %c2_335 = arith.constant 2 : index
    %c0_336 = arith.constant 0 : index
    %c0_337 = arith.constant 0 : index
    %355 = vector.load %arg17[%c0_333, %c1_334, %c2_335, %c0_336, %c0_337] : memref<2x2x10x10x32xf32, #tpu.memory_space<vmem>>, vector<1x1x7x7x32xf32>
    %356 = vector.shape_cast %355 : vector<1x1x7x7x32xf32> to vector<7x7x32xf32>
    %357 = vector.extract_strided_slice %6 {offsets = [29, 0], sizes = [1, 32], strides = [1, 1]} : vector<49x32xf32> to vector<1x32xf32>
    %358 = vector.shape_cast %357 : vector<1x32xf32> to vector<1x1x32xf32>
    %359 = vector.broadcast %358 : vector<1x1x32xf32> to vector<7x7x32xf32>
    %360 = arith.mulf %356, %359 : vector<7x7x32xf32>
    %361 = arith.addf %347, %360 : vector<7x7x32xf32>
    %c0_338 = arith.constant 0 : index
    %c0_339 = arith.constant 0 : index
    %c2_340 = arith.constant 2 : index
    %c1_341 = arith.constant 1 : index
    %c0_342 = arith.constant 0 : index
    %362 = vector.load %arg17[%c0_338, %c0_339, %c2_340, %c1_341, %c0_342] : memref<2x2x10x10x32xf32, #tpu.memory_space<vmem>>, vector<1x1x7x7x32xf32>
    %363 = vector.shape_cast %362 : vector<1x1x7x7x32xf32> to vector<7x7x32xf32>
    %364 = vector.extract_strided_slice %6 {offsets = [30, 0], sizes = [1, 32], strides = [1, 1]} : vector<49x32xf32> to vector<1x32xf32>
    %365 = vector.shape_cast %364 : vector<1x32xf32> to vector<1x1x32xf32>
    %366 = vector.broadcast %365 : vector<1x1x32xf32> to vector<7x7x32xf32>
    %367 = arith.mulf %363, %366 : vector<7x7x32xf32>
    %368 = arith.addf %354, %367 : vector<7x7x32xf32>
    %c0_343 = arith.constant 0 : index
    %c1_344 = arith.constant 1 : index
    %c2_345 = arith.constant 2 : index
    %c1_346 = arith.constant 1 : index
    %c0_347 = arith.constant 0 : index
    %369 = vector.load %arg17[%c0_343, %c1_344, %c2_345, %c1_346, %c0_347] : memref<2x2x10x10x32xf32, #tpu.memory_space<vmem>>, vector<1x1x7x7x32xf32>
    %370 = vector.shape_cast %369 : vector<1x1x7x7x32xf32> to vector<7x7x32xf32>
    %371 = vector.extract_strided_slice %6 {offsets = [31, 0], sizes = [1, 32], strides = [1, 1]} : vector<49x32xf32> to vector<1x32xf32>
    %372 = vector.shape_cast %371 : vector<1x32xf32> to vector<1x1x32xf32>
    %373 = vector.broadcast %372 : vector<1x1x32xf32> to vector<7x7x32xf32>
    %374 = arith.mulf %370, %373 : vector<7x7x32xf32>
    %375 = arith.addf %361, %374 : vector<7x7x32xf32>
    %c0_348 = arith.constant 0 : index
    %c0_349 = arith.constant 0 : index
    %c2_350 = arith.constant 2 : index
    %c2_351 = arith.constant 2 : index
    %c0_352 = arith.constant 0 : index
    %376 = vector.load %arg17[%c0_348, %c0_349, %c2_350, %c2_351, %c0_352] : memref<2x2x10x10x32xf32, #tpu.memory_space<vmem>>, vector<1x1x7x7x32xf32>
    %377 = vector.shape_cast %376 : vector<1x1x7x7x32xf32> to vector<7x7x32xf32>
    %378 = vector.extract_strided_slice %6 {offsets = [32, 0], sizes = [1, 32], strides = [1, 1]} : vector<49x32xf32> to vector<1x32xf32>
    %379 = vector.shape_cast %378 : vector<1x32xf32> to vector<1x1x32xf32>
    %380 = vector.broadcast %379 : vector<1x1x32xf32> to vector<7x7x32xf32>
    %381 = arith.mulf %377, %380 : vector<7x7x32xf32>
    %382 = arith.addf %368, %381 : vector<7x7x32xf32>
    %c0_353 = arith.constant 0 : index
    %c1_354 = arith.constant 1 : index
    %c2_355 = arith.constant 2 : index
    %c2_356 = arith.constant 2 : index
    %c0_357 = arith.constant 0 : index
    %383 = vector.load %arg17[%c0_353, %c1_354, %c2_355, %c2_356, %c0_357] : memref<2x2x10x10x32xf32, #tpu.memory_space<vmem>>, vector<1x1x7x7x32xf32>
    %384 = vector.shape_cast %383 : vector<1x1x7x7x32xf32> to vector<7x7x32xf32>
    %385 = vector.extract_strided_slice %6 {offsets = [33, 0], sizes = [1, 32], strides = [1, 1]} : vector<49x32xf32> to vector<1x32xf32>
    %386 = vector.shape_cast %385 : vector<1x32xf32> to vector<1x1x32xf32>
    %387 = vector.broadcast %386 : vector<1x1x32xf32> to vector<7x7x32xf32>
    %388 = arith.mulf %384, %387 : vector<7x7x32xf32>
    %389 = arith.addf %375, %388 : vector<7x7x32xf32>
    %c0_358 = arith.constant 0 : index
    %c0_359 = arith.constant 0 : index
    %c2_360 = arith.constant 2 : index
    %c3_361 = arith.constant 3 : index
    %c0_362 = arith.constant 0 : index
    %390 = vector.load %arg17[%c0_358, %c0_359, %c2_360, %c3_361, %c0_362] : memref<2x2x10x10x32xf32, #tpu.memory_space<vmem>>, vector<1x1x7x7x32xf32>
    %391 = vector.shape_cast %390 : vector<1x1x7x7x32xf32> to vector<7x7x32xf32>
    %392 = vector.extract_strided_slice %6 {offsets = [34, 0], sizes = [1, 32], strides = [1, 1]} : vector<49x32xf32> to vector<1x32xf32>
    %393 = vector.shape_cast %392 : vector<1x32xf32> to vector<1x1x32xf32>
    %394 = vector.broadcast %393 : vector<1x1x32xf32> to vector<7x7x32xf32>
    %395 = arith.mulf %391, %394 : vector<7x7x32xf32>
    %396 = arith.addf %382, %395 : vector<7x7x32xf32>
    %c1_363 = arith.constant 1 : index
    %c0_364 = arith.constant 0 : index
    %c2_365 = arith.constant 2 : index
    %c0_366 = arith.constant 0 : index
    %c0_367 = arith.constant 0 : index
    %397 = vector.load %arg17[%c1_363, %c0_364, %c2_365, %c0_366, %c0_367] : memref<2x2x10x10x32xf32, #tpu.memory_space<vmem>>, vector<1x1x7x7x32xf32>
    %398 = vector.shape_cast %397 : vector<1x1x7x7x32xf32> to vector<7x7x32xf32>
    %399 = vector.extract_strided_slice %6 {offsets = [35, 0], sizes = [1, 32], strides = [1, 1]} : vector<49x32xf32> to vector<1x32xf32>
    %400 = vector.shape_cast %399 : vector<1x32xf32> to vector<1x1x32xf32>
    %401 = vector.broadcast %400 : vector<1x1x32xf32> to vector<7x7x32xf32>
    %402 = arith.mulf %398, %401 : vector<7x7x32xf32>
    %403 = arith.addf %389, %402 : vector<7x7x32xf32>
    %c1_368 = arith.constant 1 : index
    %c1_369 = arith.constant 1 : index
    %c2_370 = arith.constant 2 : index
    %c0_371 = arith.constant 0 : index
    %c0_372 = arith.constant 0 : index
    %404 = vector.load %arg17[%c1_368, %c1_369, %c2_370, %c0_371, %c0_372] : memref<2x2x10x10x32xf32, #tpu.memory_space<vmem>>, vector<1x1x7x7x32xf32>
    %405 = vector.shape_cast %404 : vector<1x1x7x7x32xf32> to vector<7x7x32xf32>
    %406 = vector.extract_strided_slice %6 {offsets = [36, 0], sizes = [1, 32], strides = [1, 1]} : vector<49x32xf32> to vector<1x32xf32>
    %407 = vector.shape_cast %406 : vector<1x32xf32> to vector<1x1x32xf32>
    %408 = vector.broadcast %407 : vector<1x1x32xf32> to vector<7x7x32xf32>
    %409 = arith.mulf %405, %408 : vector<7x7x32xf32>
    %410 = arith.addf %396, %409 : vector<7x7x32xf32>
    %c1_373 = arith.constant 1 : index
    %c0_374 = arith.constant 0 : index
    %c2_375 = arith.constant 2 : index
    %c1_376 = arith.constant 1 : index
    %c0_377 = arith.constant 0 : index
    %411 = vector.load %arg17[%c1_373, %c0_374, %c2_375, %c1_376, %c0_377] : memref<2x2x10x10x32xf32, #tpu.memory_space<vmem>>, vector<1x1x7x7x32xf32>
    %412 = vector.shape_cast %411 : vector<1x1x7x7x32xf32> to vector<7x7x32xf32>
    %413 = vector.extract_strided_slice %6 {offsets = [37, 0], sizes = [1, 32], strides = [1, 1]} : vector<49x32xf32> to vector<1x32xf32>
    %414 = vector.shape_cast %413 : vector<1x32xf32> to vector<1x1x32xf32>
    %415 = vector.broadcast %414 : vector<1x1x32xf32> to vector<7x7x32xf32>
    %416 = arith.mulf %412, %415 : vector<7x7x32xf32>
    %417 = arith.addf %403, %416 : vector<7x7x32xf32>
    %c1_378 = arith.constant 1 : index
    %c1_379 = arith.constant 1 : index
    %c2_380 = arith.constant 2 : index
    %c1_381 = arith.constant 1 : index
    %c0_382 = arith.constant 0 : index
    %418 = vector.load %arg17[%c1_378, %c1_379, %c2_380, %c1_381, %c0_382] : memref<2x2x10x10x32xf32, #tpu.memory_space<vmem>>, vector<1x1x7x7x32xf32>
    %419 = vector.shape_cast %418 : vector<1x1x7x7x32xf32> to vector<7x7x32xf32>
    %420 = vector.extract_strided_slice %6 {offsets = [38, 0], sizes = [1, 32], strides = [1, 1]} : vector<49x32xf32> to vector<1x32xf32>
    %421 = vector.shape_cast %420 : vector<1x32xf32> to vector<1x1x32xf32>
    %422 = vector.broadcast %421 : vector<1x1x32xf32> to vector<7x7x32xf32>
    %423 = arith.mulf %419, %422 : vector<7x7x32xf32>
    %424 = arith.addf %410, %423 : vector<7x7x32xf32>
    %c1_383 = arith.constant 1 : index
    %c0_384 = arith.constant 0 : index
    %c2_385 = arith.constant 2 : index
    %c2_386 = arith.constant 2 : index
    %c0_387 = arith.constant 0 : index
    %425 = vector.load %arg17[%c1_383, %c0_384, %c2_385, %c2_386, %c0_387] : memref<2x2x10x10x32xf32, #tpu.memory_space<vmem>>, vector<1x1x7x7x32xf32>
    %426 = vector.shape_cast %425 : vector<1x1x7x7x32xf32> to vector<7x7x32xf32>
    %427 = vector.extract_strided_slice %6 {offsets = [39, 0], sizes = [1, 32], strides = [1, 1]} : vector<49x32xf32> to vector<1x32xf32>
    %428 = vector.shape_cast %427 : vector<1x32xf32> to vector<1x1x32xf32>
    %429 = vector.broadcast %428 : vector<1x1x32xf32> to vector<7x7x32xf32>
    %430 = arith.mulf %426, %429 : vector<7x7x32xf32>
    %431 = arith.addf %417, %430 : vector<7x7x32xf32>
    %c1_388 = arith.constant 1 : index
    %c1_389 = arith.constant 1 : index
    %c2_390 = arith.constant 2 : index
    %c2_391 = arith.constant 2 : index
    %c0_392 = arith.constant 0 : index
    %432 = vector.load %arg17[%c1_388, %c1_389, %c2_390, %c2_391, %c0_392] : memref<2x2x10x10x32xf32, #tpu.memory_space<vmem>>, vector<1x1x7x7x32xf32>
    %433 = vector.shape_cast %432 : vector<1x1x7x7x32xf32> to vector<7x7x32xf32>
    %434 = vector.extract_strided_slice %6 {offsets = [40, 0], sizes = [1, 32], strides = [1, 1]} : vector<49x32xf32> to vector<1x32xf32>
    %435 = vector.shape_cast %434 : vector<1x32xf32> to vector<1x1x32xf32>
    %436 = vector.broadcast %435 : vector<1x1x32xf32> to vector<7x7x32xf32>
    %437 = arith.mulf %433, %436 : vector<7x7x32xf32>
    %438 = arith.addf %424, %437 : vector<7x7x32xf32>
    %c1_393 = arith.constant 1 : index
    %c0_394 = arith.constant 0 : index
    %c2_395 = arith.constant 2 : index
    %c3_396 = arith.constant 3 : index
    %c0_397 = arith.constant 0 : index
    %439 = vector.load %arg17[%c1_393, %c0_394, %c2_395, %c3_396, %c0_397] : memref<2x2x10x10x32xf32, #tpu.memory_space<vmem>>, vector<1x1x7x7x32xf32>
    %440 = vector.shape_cast %439 : vector<1x1x7x7x32xf32> to vector<7x7x32xf32>
    %441 = vector.extract_strided_slice %6 {offsets = [41, 0], sizes = [1, 32], strides = [1, 1]} : vector<49x32xf32> to vector<1x32xf32>
    %442 = vector.shape_cast %441 : vector<1x32xf32> to vector<1x1x32xf32>
    %443 = vector.broadcast %442 : vector<1x1x32xf32> to vector<7x7x32xf32>
    %444 = arith.mulf %440, %443 : vector<7x7x32xf32>
    %445 = arith.addf %431, %444 : vector<7x7x32xf32>
    %c0_398 = arith.constant 0 : index
    %c0_399 = arith.constant 0 : index
    %c3_400 = arith.constant 3 : index
    %c0_401 = arith.constant 0 : index
    %c0_402 = arith.constant 0 : index
    %446 = vector.load %arg17[%c0_398, %c0_399, %c3_400, %c0_401, %c0_402] : memref<2x2x10x10x32xf32, #tpu.memory_space<vmem>>, vector<1x1x7x7x32xf32>
    %447 = vector.shape_cast %446 : vector<1x1x7x7x32xf32> to vector<7x7x32xf32>
    %448 = vector.extract_strided_slice %6 {offsets = [42, 0], sizes = [1, 32], strides = [1, 1]} : vector<49x32xf32> to vector<1x32xf32>
    %449 = vector.shape_cast %448 : vector<1x32xf32> to vector<1x1x32xf32>
    %450 = vector.broadcast %449 : vector<1x1x32xf32> to vector<7x7x32xf32>
    %451 = arith.mulf %447, %450 : vector<7x7x32xf32>
    %452 = arith.addf %438, %451 : vector<7x7x32xf32>
    %c0_403 = arith.constant 0 : index
    %c1_404 = arith.constant 1 : index
    %c3_405 = arith.constant 3 : index
    %c0_406 = arith.constant 0 : index
    %c0_407 = arith.constant 0 : index
    %453 = vector.load %arg17[%c0_403, %c1_404, %c3_405, %c0_406, %c0_407] : memref<2x2x10x10x32xf32, #tpu.memory_space<vmem>>, vector<1x1x7x7x32xf32>
    %454 = vector.shape_cast %453 : vector<1x1x7x7x32xf32> to vector<7x7x32xf32>
    %455 = vector.extract_strided_slice %6 {offsets = [43, 0], sizes = [1, 32], strides = [1, 1]} : vector<49x32xf32> to vector<1x32xf32>
    %456 = vector.shape_cast %455 : vector<1x32xf32> to vector<1x1x32xf32>
    %457 = vector.broadcast %456 : vector<1x1x32xf32> to vector<7x7x32xf32>
    %458 = arith.mulf %454, %457 : vector<7x7x32xf32>
    %459 = arith.addf %445, %458 : vector<7x7x32xf32>
    %c0_408 = arith.constant 0 : index
    %c0_409 = arith.constant 0 : index
    %c3_410 = arith.constant 3 : index
    %c1_411 = arith.constant 1 : index
    %c0_412 = arith.constant 0 : index
    %460 = vector.load %arg17[%c0_408, %c0_409, %c3_410, %c1_411, %c0_412] : memref<2x2x10x10x32xf32, #tpu.memory_space<vmem>>, vector<1x1x7x7x32xf32>
    %461 = vector.shape_cast %460 : vector<1x1x7x7x32xf32> to vector<7x7x32xf32>
    %462 = vector.extract_strided_slice %6 {offsets = [44, 0], sizes = [1, 32], strides = [1, 1]} : vector<49x32xf32> to vector<1x32xf32>
    %463 = vector.shape_cast %462 : vector<1x32xf32> to vector<1x1x32xf32>
    %464 = vector.broadcast %463 : vector<1x1x32xf32> to vector<7x7x32xf32>
    %465 = arith.mulf %461, %464 : vector<7x7x32xf32>
    %466 = arith.addf %452, %465 : vector<7x7x32xf32>
    %c0_413 = arith.constant 0 : index
    %c1_414 = arith.constant 1 : index
    %c3_415 = arith.constant 3 : index
    %c1_416 = arith.constant 1 : index
    %c0_417 = arith.constant 0 : index
    %467 = vector.load %arg17[%c0_413, %c1_414, %c3_415, %c1_416, %c0_417] : memref<2x2x10x10x32xf32, #tpu.memory_space<vmem>>, vector<1x1x7x7x32xf32>
    %468 = vector.shape_cast %467 : vector<1x1x7x7x32xf32> to vector<7x7x32xf32>
    %469 = vector.extract_strided_slice %6 {offsets = [45, 0], sizes = [1, 32], strides = [1, 1]} : vector<49x32xf32> to vector<1x32xf32>
    %470 = vector.shape_cast %469 : vector<1x32xf32> to vector<1x1x32xf32>
    %471 = vector.broadcast %470 : vector<1x1x32xf32> to vector<7x7x32xf32>
    %472 = arith.mulf %468, %471 : vector<7x7x32xf32>
    %473 = arith.addf %459, %472 : vector<7x7x32xf32>
    %c0_418 = arith.constant 0 : index
    %c0_419 = arith.constant 0 : index
    %c3_420 = arith.constant 3 : index
    %c2_421 = arith.constant 2 : index
    %c0_422 = arith.constant 0 : index
    %474 = vector.load %arg17[%c0_418, %c0_419, %c3_420, %c2_421, %c0_422] : memref<2x2x10x10x32xf32, #tpu.memory_space<vmem>>, vector<1x1x7x7x32xf32>
    %475 = vector.shape_cast %474 : vector<1x1x7x7x32xf32> to vector<7x7x32xf32>
    %476 = vector.extract_strided_slice %6 {offsets = [46, 0], sizes = [1, 32], strides = [1, 1]} : vector<49x32xf32> to vector<1x32xf32>
    %477 = vector.shape_cast %476 : vector<1x32xf32> to vector<1x1x32xf32>
    %478 = vector.broadcast %477 : vector<1x1x32xf32> to vector<7x7x32xf32>
    %479 = arith.mulf %475, %478 : vector<7x7x32xf32>
    %480 = arith.addf %466, %479 : vector<7x7x32xf32>
    %c0_423 = arith.constant 0 : index
    %c1_424 = arith.constant 1 : index
    %c3_425 = arith.constant 3 : index
    %c2_426 = arith.constant 2 : index
    %c0_427 = arith.constant 0 : index
    %481 = vector.load %arg17[%c0_423, %c1_424, %c3_425, %c2_426, %c0_427] : memref<2x2x10x10x32xf32, #tpu.memory_space<vmem>>, vector<1x1x7x7x32xf32>
    %482 = vector.shape_cast %481 : vector<1x1x7x7x32xf32> to vector<7x7x32xf32>
    %483 = vector.extract_strided_slice %6 {offsets = [47, 0], sizes = [1, 32], strides = [1, 1]} : vector<49x32xf32> to vector<1x32xf32>
    %484 = vector.shape_cast %483 : vector<1x32xf32> to vector<1x1x32xf32>
    %485 = vector.broadcast %484 : vector<1x1x32xf32> to vector<7x7x32xf32>
    %486 = arith.mulf %482, %485 : vector<7x7x32xf32>
    %487 = arith.addf %473, %486 : vector<7x7x32xf32>
    %c0_428 = arith.constant 0 : index
    %c0_429 = arith.constant 0 : index
    %c3_430 = arith.constant 3 : index
    %c3_431 = arith.constant 3 : index
    %c0_432 = arith.constant 0 : index
    %488 = vector.load %arg17[%c0_428, %c0_429, %c3_430, %c3_431, %c0_432] : memref<2x2x10x10x32xf32, #tpu.memory_space<vmem>>, vector<1x1x7x7x32xf32>
    %489 = vector.shape_cast %488 : vector<1x1x7x7x32xf32> to vector<7x7x32xf32>
    %490 = vector.extract_strided_slice %6 {offsets = [48, 0], sizes = [1, 32], strides = [1, 1]} : vector<49x32xf32> to vector<1x32xf32>
    %491 = vector.shape_cast %490 : vector<1x32xf32> to vector<1x1x32xf32>
    %492 = vector.broadcast %491 : vector<1x1x32xf32> to vector<7x7x32xf32>
    %493 = arith.mulf %489, %492 : vector<7x7x32xf32>
    %494 = arith.addf %480, %493 : vector<7x7x32xf32>
    %495 = arith.addf %494, %487 : vector<7x7x32xf32>
    %c0_433 = arith.constant 0 : index
    %c0_434 = arith.constant 0 : index
    %496 = vector.load %arg5[%c0_433, %c0_434] : memref<1x32xf32, #tpu.memory_space<vmem>>, vector<1x32xf32>
    %497 = vector.shape_cast %496 : vector<1x32xf32> to vector<1x1x32xf32>
    %498 = vector.broadcast %497 : vector<1x1x32xf32> to vector<7x7x32xf32>
    %499 = arith.addf %495, %498 : vector<7x7x32xf32>
    %c0_435 = arith.constant 0 : index
    %c0_436 = arith.constant 0 : index
    %500 = vector.load %arg6[%c0_435, %c0_436] : memref<1x32xf32, #tpu.memory_space<vmem>>, vector<1x32xf32>
    %c0_437 = arith.constant 0 : index
    %c0_438 = arith.constant 0 : index
    %501 = vector.load %arg7[%c0_437, %c0_438] : memref<1x32xf32, #tpu.memory_space<vmem>>, vector<1x32xf32>
    %cst_439 = arith.constant dense<0.000000e+00> : vector<7x7xf32>
    %502 = vector.multi_reduction <add>, %499, %cst_439 [2] : vector<7x7x32xf32> to vector<7x7xf32>
    %503 = vector.shape_cast %502 : vector<7x7xf32> to vector<7x7x1xf32>
    %cst_440 = arith.constant 3.200000e+01 : f32
    %504 = vector.broadcast %cst_440 : f32 to vector<7x7x1xf32>
    %505 = arith.divf %503, %504 : vector<7x7x1xf32>
    %506 = vector.broadcast %505 : vector<7x7x1xf32> to vector<7x7x32xf32>
    %507 = arith.subf %499, %506 : vector<7x7x32xf32>
    %508 = arith.mulf %507, %507 : vector<7x7x32xf32>
    %cst_441 = arith.constant dense<0.000000e+00> : vector<7x7xf32>
    %509 = vector.multi_reduction <add>, %508, %cst_441 [2] : vector<7x7x32xf32> to vector<7x7xf32>
    %510 = vector.shape_cast %509 : vector<7x7xf32> to vector<7x7x1xf32>
    %cst_442 = arith.constant 3.200000e+01 : f32
    %511 = vector.broadcast %cst_442 : f32 to vector<7x7x1xf32>
    %512 = arith.divf %510, %511 : vector<7x7x1xf32>
    %513 = vector.broadcast %505 : vector<7x7x1xf32> to vector<7x7x32xf32>
    %514 = arith.subf %499, %513 : vector<7x7x32xf32>
    %cst_443 = arith.constant 9.99999997E-7 : f32
    %515 = vector.broadcast %cst_443 : f32 to vector<7x7x1xf32>
    %516 = arith.addf %512, %515 : vector<7x7x1xf32>
    %517 = math.rsqrt %516 : vector<7x7x1xf32>
    %518 = vector.broadcast %517 : vector<7x7x1xf32> to vector<7x7x32xf32>
    %519 = arith.mulf %514, %518 : vector<7x7x32xf32>
    %520 = vector.shape_cast %500 : vector<1x32xf32> to vector<1x1x32xf32>
    %521 = vector.broadcast %520 : vector<1x1x32xf32> to vector<7x7x32xf32>
    %522 = arith.mulf %519, %521 : vector<7x7x32xf32>
    %523 = vector.shape_cast %501 : vector<1x32xf32> to vector<1x1x32xf32>
    %524 = vector.broadcast %523 : vector<1x1x32xf32> to vector<7x7x32xf32>
    %525 = arith.addf %522, %524 : vector<7x7x32xf32>
    %526 = arith.mulf %525, %525 : vector<7x7x32xf32>
    %527 = arith.mulf %525, %526 : vector<7x7x32xf32>
    %cst_444 = arith.constant 4.471500e-02 : f32
    %528 = vector.broadcast %cst_444 : f32 to vector<7x7x32xf32>
    %529 = arith.mulf %528, %527 : vector<7x7x32xf32>
    %530 = arith.addf %525, %529 : vector<7x7x32xf32>
    %cst_445 = arith.constant 0.797884583 : f32
    %531 = vector.broadcast %cst_445 : f32 to vector<7x7x32xf32>
    %532 = arith.mulf %531, %530 : vector<7x7x32xf32>
    %533 = math.tanh %532 : vector<7x7x32xf32>
    %cst_446 = arith.constant 1.000000e+00 : f32
    %534 = vector.broadcast %cst_446 : f32 to vector<7x7x32xf32>
    %535 = arith.addf %534, %533 : vector<7x7x32xf32>
    %cst_447 = arith.constant 5.000000e-01 : f32
    %536 = vector.broadcast %cst_447 : f32 to vector<7x7x32xf32>
    %537 = arith.mulf %536, %535 : vector<7x7x32xf32>
    %538 = arith.mulf %525, %537 : vector<7x7x32xf32>
    %539 = vector.extract_strided_slice %538 {offsets = [0, 0, 0], sizes = [7, 1, 32], strides = [1, 1, 1]} : vector<7x7x32xf32> to vector<7x1x32xf32>
    %540 = vector.extract_strided_slice %538 {offsets = [0, 2, 0], sizes = [7, 1, 32], strides = [1, 1, 1]} : vector<7x7x32xf32> to vector<7x1x32xf32>
    %541 = vector.extract_strided_slice %538 {offsets = [0, 4, 0], sizes = [7, 1, 32], strides = [1, 1, 1]} : vector<7x7x32xf32> to vector<7x1x32xf32>
    %542 = vector.extract_strided_slice %538 {offsets = [0, 6, 0], sizes = [7, 1, 32], strides = [1, 1, 1]} : vector<7x7x32xf32> to vector<7x1x32xf32>
    %543 = tpu.concatenate %539, %540, %541, %542 in 1 : vector<7x1x32xf32>, vector<7x1x32xf32>, vector<7x1x32xf32>, vector<7x1x32xf32> -> vector<7x4x32xf32>
    %544 = vector.extract_strided_slice %538 {offsets = [0, 1, 0], sizes = [7, 1, 32], strides = [1, 1, 1]} : vector<7x7x32xf32> to vector<7x1x32xf32>
    %545 = vector.extract_strided_slice %538 {offsets = [0, 3, 0], sizes = [7, 1, 32], strides = [1, 1, 1]} : vector<7x7x32xf32> to vector<7x1x32xf32>
    %546 = vector.extract_strided_slice %538 {offsets = [0, 5, 0], sizes = [7, 1, 32], strides = [1, 1, 1]} : vector<7x7x32xf32> to vector<7x1x32xf32>
    %547 = tpu.concatenate %544, %545, %546 in 1 : vector<7x1x32xf32>, vector<7x1x32xf32>, vector<7x1x32xf32> -> vector<7x3x32xf32>
    %548 = vector.extract_strided_slice %543 {offsets = [0, 0, 0], sizes = [1, 4, 32], strides = [1, 1, 1]} : vector<7x4x32xf32> to vector<1x4x32xf32>
    %549 = vector.shape_cast %548 : vector<1x4x32xf32> to vector<4x32xf32>
    %c0_448 = arith.constant 0 : index
    %c0_449 = arith.constant 0 : index
    %c1_450 = arith.constant 1 : index
    %c1_451 = arith.constant 1 : index
    %c0_452 = arith.constant 0 : index
    %550 = vector.load %arg18[%c0_448, %c0_449, %c1_450, %c1_451, %c0_452] : memref<2x2x6x6x32xf32, #tpu.memory_space<vmem>>, vector<1x1x1x4x32xf32>
    %551 = vector.shape_cast %550 : vector<1x1x1x4x32xf32> to vector<4x32xf32>
    %552 = vector.shape_cast %549 : vector<4x32xf32> to vector<1x1x1x4x32xf32>
    tpu.vector_store %arg18[%c0_448, %c0_449, %c1_450, %c1_451, %c0_452], %552 {strides = array<i32>} : memref<2x2x6x6x32xf32, #tpu.memory_space<vmem>>, vector<1x1x1x4x32xf32>,
    %553 = vector.extract_strided_slice %547 {offsets = [0, 0, 0], sizes = [1, 3, 32], strides = [1, 1, 1]} : vector<7x3x32xf32> to vector<1x3x32xf32>
    %554 = vector.shape_cast %553 : vector<1x3x32xf32> to vector<3x32xf32>
    %c0_453 = arith.constant 0 : index
    %c1_454 = arith.constant 1 : index
    %c1_455 = arith.constant 1 : index
    %c1_456 = arith.constant 1 : index
    %c0_457 = arith.constant 0 : index
    %555 = vector.load %arg18[%c0_453, %c1_454, %c1_455, %c1_456, %c0_457] : memref<2x2x6x6x32xf32, #tpu.memory_space<vmem>>, vector<1x1x1x3x32xf32>
    %556 = vector.shape_cast %555 : vector<1x1x1x3x32xf32> to vector<3x32xf32>
    %557 = vector.shape_cast %554 : vector<3x32xf32> to vector<1x1x1x3x32xf32>
    tpu.vector_store %arg18[%c0_453, %c1_454, %c1_455, %c1_456, %c0_457], %557 {strides = array<i32>} : memref<2x2x6x6x32xf32, #tpu.memory_space<vmem>>, vector<1x1x1x3x32xf32>,
    %558 = vector.extract_strided_slice %543 {offsets = [1, 0, 0], sizes = [1, 4, 32], strides = [1, 1, 1]} : vector<7x4x32xf32> to vector<1x4x32xf32>
    %559 = vector.shape_cast %558 : vector<1x4x32xf32> to vector<4x32xf32>
    %c1_458 = arith.constant 1 : index
    %c0_459 = arith.constant 0 : index
    %c1_460 = arith.constant 1 : index
    %c1_461 = arith.constant 1 : index
    %c0_462 = arith.constant 0 : index
    %560 = vector.load %arg18[%c1_458, %c0_459, %c1_460, %c1_461, %c0_462] : memref<2x2x6x6x32xf32, #tpu.memory_space<vmem>>, vector<1x1x1x4x32xf32>
    %561 = vector.shape_cast %560 : vector<1x1x1x4x32xf32> to vector<4x32xf32>
    %562 = vector.shape_cast %559 : vector<4x32xf32> to vector<1x1x1x4x32xf32>
    tpu.vector_store %arg18[%c1_458, %c0_459, %c1_460, %c1_461, %c0_462], %562 {strides = array<i32>} : memref<2x2x6x6x32xf32, #tpu.memory_space<vmem>>, vector<1x1x1x4x32xf32>,
    %563 = vector.extract_strided_slice %547 {offsets = [1, 0, 0], sizes = [1, 3, 32], strides = [1, 1, 1]} : vector<7x3x32xf32> to vector<1x3x32xf32>
    %564 = vector.shape_cast %563 : vector<1x3x32xf32> to vector<3x32xf32>
    %c1_463 = arith.constant 1 : index
    %c1_464 = arith.constant 1 : index
    %c1_465 = arith.constant 1 : index
    %c1_466 = arith.constant 1 : index
    %c0_467 = arith.constant 0 : index
    %565 = vector.load %arg18[%c1_463, %c1_464, %c1_465, %c1_466, %c0_467] : memref<2x2x6x6x32xf32, #tpu.memory_space<vmem>>, vector<1x1x1x3x32xf32>
    %566 = vector.shape_cast %565 : vector<1x1x1x3x32xf32> to vector<3x32xf32>
    %567 = vector.shape_cast %564 : vector<3x32xf32> to vector<1x1x1x3x32xf32>
    tpu.vector_store %arg18[%c1_463, %c1_464, %c1_465, %c1_466, %c0_467], %567 {strides = array<i32>} : memref<2x2x6x6x32xf32, #tpu.memory_space<vmem>>, vector<1x1x1x3x32xf32>,
    %568 = vector.extract_strided_slice %543 {offsets = [2, 0, 0], sizes = [1, 4, 32], strides = [1, 1, 1]} : vector<7x4x32xf32> to vector<1x4x32xf32>
    %569 = vector.shape_cast %568 : vector<1x4x32xf32> to vector<4x32xf32>
    %c0_468 = arith.constant 0 : index
    %c0_469 = arith.constant 0 : index
    %c2_470 = arith.constant 2 : index
    %c1_471 = arith.constant 1 : index
    %c0_472 = arith.constant 0 : index
    %570 = vector.load %arg18[%c0_468, %c0_469, %c2_470, %c1_471, %c0_472] : memref<2x2x6x6x32xf32, #tpu.memory_space<vmem>>, vector<1x1x1x4x32xf32>
    %571 = vector.shape_cast %570 : vector<1x1x1x4x32xf32> to vector<4x32xf32>
    %572 = vector.shape_cast %569 : vector<4x32xf32> to vector<1x1x1x4x32xf32>
    tpu.vector_store %arg18[%c0_468, %c0_469, %c2_470, %c1_471, %c0_472], %572 {strides = array<i32>} : memref<2x2x6x6x32xf32, #tpu.memory_space<vmem>>, vector<1x1x1x4x32xf32>,
    %573 = vector.extract_strided_slice %547 {offsets = [2, 0, 0], sizes = [1, 3, 32], strides = [1, 1, 1]} : vector<7x3x32xf32> to vector<1x3x32xf32>
    %574 = vector.shape_cast %573 : vector<1x3x32xf32> to vector<3x32xf32>
    %c0_473 = arith.constant 0 : index
    %c1_474 = arith.constant 1 : index
    %c2_475 = arith.constant 2 : index
    %c1_476 = arith.constant 1 : index
    %c0_477 = arith.constant 0 : index
    %575 = vector.load %arg18[%c0_473, %c1_474, %c2_475, %c1_476, %c0_477] : memref<2x2x6x6x32xf32, #tpu.memory_space<vmem>>, vector<1x1x1x3x32xf32>
    %576 = vector.shape_cast %575 : vector<1x1x1x3x32xf32> to vector<3x32xf32>
    %577 = vector.shape_cast %574 : vector<3x32xf32> to vector<1x1x1x3x32xf32>
    tpu.vector_store %arg18[%c0_473, %c1_474, %c2_475, %c1_476, %c0_477], %577 {strides = array<i32>} : memref<2x2x6x6x32xf32, #tpu.memory_space<vmem>>, vector<1x1x1x3x32xf32>,
    %578 = vector.extract_strided_slice %543 {offsets = [3, 0, 0], sizes = [1, 4, 32], strides = [1, 1, 1]} : vector<7x4x32xf32> to vector<1x4x32xf32>
    %579 = vector.shape_cast %578 : vector<1x4x32xf32> to vector<4x32xf32>
    %c1_478 = arith.constant 1 : index
    %c0_479 = arith.constant 0 : index
    %c2_480 = arith.constant 2 : index
    %c1_481 = arith.constant 1 : index
    %c0_482 = arith.constant 0 : index
    %580 = vector.load %arg18[%c1_478, %c0_479, %c2_480, %c1_481, %c0_482] : memref<2x2x6x6x32xf32, #tpu.memory_space<vmem>>, vector<1x1x1x4x32xf32>
    %581 = vector.shape_cast %580 : vector<1x1x1x4x32xf32> to vector<4x32xf32>
    %582 = vector.shape_cast %579 : vector<4x32xf32> to vector<1x1x1x4x32xf32>
    tpu.vector_store %arg18[%c1_478, %c0_479, %c2_480, %c1_481, %c0_482], %582 {strides = array<i32>} : memref<2x2x6x6x32xf32, #tpu.memory_space<vmem>>, vector<1x1x1x4x32xf32>,
    %583 = vector.extract_strided_slice %547 {offsets = [3, 0, 0], sizes = [1, 3, 32], strides = [1, 1, 1]} : vector<7x3x32xf32> to vector<1x3x32xf32>
    %584 = vector.shape_cast %583 : vector<1x3x32xf32> to vector<3x32xf32>
    %c1_483 = arith.constant 1 : index
    %c1_484 = arith.constant 1 : index
    %c2_485 = arith.constant 2 : index
    %c1_486 = arith.constant 1 : index
    %c0_487 = arith.constant 0 : index
    %585 = vector.load %arg18[%c1_483, %c1_484, %c2_485, %c1_486, %c0_487] : memref<2x2x6x6x32xf32, #tpu.memory_space<vmem>>, vector<1x1x1x3x32xf32>
    %586 = vector.shape_cast %585 : vector<1x1x1x3x32xf32> to vector<3x32xf32>
    %587 = vector.shape_cast %584 : vector<3x32xf32> to vector<1x1x1x3x32xf32>
    tpu.vector_store %arg18[%c1_483, %c1_484, %c2_485, %c1_486, %c0_487], %587 {strides = array<i32>} : memref<2x2x6x6x32xf32, #tpu.memory_space<vmem>>, vector<1x1x1x3x32xf32>,
    %588 = vector.extract_strided_slice %543 {offsets = [4, 0, 0], sizes = [1, 4, 32], strides = [1, 1, 1]} : vector<7x4x32xf32> to vector<1x4x32xf32>
    %589 = vector.shape_cast %588 : vector<1x4x32xf32> to vector<4x32xf32>
    %c0_488 = arith.constant 0 : index
    %c0_489 = arith.constant 0 : index
    %c3_490 = arith.constant 3 : index
    %c1_491 = arith.constant 1 : index
    %c0_492 = arith.constant 0 : index
    %590 = vector.load %arg18[%c0_488, %c0_489, %c3_490, %c1_491, %c0_492] : memref<2x2x6x6x32xf32, #tpu.memory_space<vmem>>, vector<1x1x1x4x32xf32>
    %591 = vector.shape_cast %590 : vector<1x1x1x4x32xf32> to vector<4x32xf32>
    %592 = vector.shape_cast %589 : vector<4x32xf32> to vector<1x1x1x4x32xf32>
    tpu.vector_store %arg18[%c0_488, %c0_489, %c3_490, %c1_491, %c0_492], %592 {strides = array<i32>} : memref<2x2x6x6x32xf32, #tpu.memory_space<vmem>>, vector<1x1x1x4x32xf32>,
    %593 = vector.extract_strided_slice %547 {offsets = [4, 0, 0], sizes = [1, 3, 32], strides = [1, 1, 1]} : vector<7x3x32xf32> to vector<1x3x32xf32>
    %594 = vector.shape_cast %593 : vector<1x3x32xf32> to vector<3x32xf32>
    %c0_493 = arith.constant 0 : index
    %c1_494 = arith.constant 1 : index
    %c3_495 = arith.constant 3 : index
    %c1_496 = arith.constant 1 : index
    %c0_497 = arith.constant 0 : index
    %595 = vector.load %arg18[%c0_493, %c1_494, %c3_495, %c1_496, %c0_497] : memref<2x2x6x6x32xf32, #tpu.memory_space<vmem>>, vector<1x1x1x3x32xf32>
    %596 = vector.shape_cast %595 : vector<1x1x1x3x32xf32> to vector<3x32xf32>
    %597 = vector.shape_cast %594 : vector<3x32xf32> to vector<1x1x1x3x32xf32>
    tpu.vector_store %arg18[%c0_493, %c1_494, %c3_495, %c1_496, %c0_497], %597 {strides = array<i32>} : memref<2x2x6x6x32xf32, #tpu.memory_space<vmem>>, vector<1x1x1x3x32xf32>,
    %598 = vector.extract_strided_slice %543 {offsets = [5, 0, 0], sizes = [1, 4, 32], strides = [1, 1, 1]} : vector<7x4x32xf32> to vector<1x4x32xf32>
    %599 = vector.shape_cast %598 : vector<1x4x32xf32> to vector<4x32xf32>
    %c1_498 = arith.constant 1 : index
    %c0_499 = arith.constant 0 : index
    %c3_500 = arith.constant 3 : index
    %c1_501 = arith.constant 1 : index
    %c0_502 = arith.constant 0 : index
    %600 = vector.load %arg18[%c1_498, %c0_499, %c3_500, %c1_501, %c0_502] : memref<2x2x6x6x32xf32, #tpu.memory_space<vmem>>, vector<1x1x1x4x32xf32>
    %601 = vector.shape_cast %600 : vector<1x1x1x4x32xf32> to vector<4x32xf32>
    %602 = vector.shape_cast %599 : vector<4x32xf32> to vector<1x1x1x4x32xf32>
    tpu.vector_store %arg18[%c1_498, %c0_499, %c3_500, %c1_501, %c0_502], %602 {strides = array<i32>} : memref<2x2x6x6x32xf32, #tpu.memory_space<vmem>>, vector<1x1x1x4x32xf32>,
    %603 = vector.extract_strided_slice %547 {offsets = [5, 0, 0], sizes = [1, 3, 32], strides = [1, 1, 1]} : vector<7x3x32xf32> to vector<1x3x32xf32>
    %604 = vector.shape_cast %603 : vector<1x3x32xf32> to vector<3x32xf32>
    %c1_503 = arith.constant 1 : index
    %c1_504 = arith.constant 1 : index
    %c3_505 = arith.constant 3 : index
    %c1_506 = arith.constant 1 : index
    %c0_507 = arith.constant 0 : index
    %605 = vector.load %arg18[%c1_503, %c1_504, %c3_505, %c1_506, %c0_507] : memref<2x2x6x6x32xf32, #tpu.memory_space<vmem>>, vector<1x1x1x3x32xf32>
    %606 = vector.shape_cast %605 : vector<1x1x1x3x32xf32> to vector<3x32xf32>
    %607 = vector.shape_cast %604 : vector<3x32xf32> to vector<1x1x1x3x32xf32>
    tpu.vector_store %arg18[%c1_503, %c1_504, %c3_505, %c1_506, %c0_507], %607 {strides = array<i32>} : memref<2x2x6x6x32xf32, #tpu.memory_space<vmem>>, vector<1x1x1x3x32xf32>,
    %608 = vector.extract_strided_slice %543 {offsets = [6, 0, 0], sizes = [1, 4, 32], strides = [1, 1, 1]} : vector<7x4x32xf32> to vector<1x4x32xf32>
    %609 = vector.shape_cast %608 : vector<1x4x32xf32> to vector<4x32xf32>
    %c0_508 = arith.constant 0 : index
    %c0_509 = arith.constant 0 : index
    %c4_510 = arith.constant 4 : index
    %c1_511 = arith.constant 1 : index
    %c0_512 = arith.constant 0 : index
    %610 = vector.load %arg18[%c0_508, %c0_509, %c4_510, %c1_511, %c0_512] : memref<2x2x6x6x32xf32, #tpu.memory_space<vmem>>, vector<1x1x1x4x32xf32>
    %611 = vector.shape_cast %610 : vector<1x1x1x4x32xf32> to vector<4x32xf32>
    %612 = vector.shape_cast %609 : vector<4x32xf32> to vector<1x1x1x4x32xf32>
    tpu.vector_store %arg18[%c0_508, %c0_509, %c4_510, %c1_511, %c0_512], %612 {strides = array<i32>} : memref<2x2x6x6x32xf32, #tpu.memory_space<vmem>>, vector<1x1x1x4x32xf32>,
    %613 = vector.extract_strided_slice %547 {offsets = [6, 0, 0], sizes = [1, 3, 32], strides = [1, 1, 1]} : vector<7x3x32xf32> to vector<1x3x32xf32>
    %614 = vector.shape_cast %613 : vector<1x3x32xf32> to vector<3x32xf32>
    %c0_513 = arith.constant 0 : index
    %c1_514 = arith.constant 1 : index
    %c4_515 = arith.constant 4 : index
    %c1_516 = arith.constant 1 : index
    %c0_517 = arith.constant 0 : index
    %615 = vector.load %arg18[%c0_513, %c1_514, %c4_515, %c1_516, %c0_517] : memref<2x2x6x6x32xf32, #tpu.memory_space<vmem>>, vector<1x1x1x3x32xf32>
    %616 = vector.shape_cast %615 : vector<1x1x1x3x32xf32> to vector<3x32xf32>
    %617 = vector.shape_cast %614 : vector<3x32xf32> to vector<1x1x1x3x32xf32>
    tpu.vector_store %arg18[%c0_513, %c1_514, %c4_515, %c1_516, %c0_517], %617 {strides = array<i32>} : memref<2x2x6x6x32xf32, #tpu.memory_space<vmem>>, vector<1x1x1x3x32xf32>,
    %cst_518 = arith.constant 0.000000e+00 : f32
    %618 = vector.broadcast %cst_518 : f32 to vector<3x3x32xf32>
    %cst_519 = arith.constant 0.000000e+00 : f32
    %619 = vector.broadcast %cst_519 : f32 to vector<3x3x32xf32>
    %c0_520 = arith.constant 0 : index
    %c0_521 = arith.constant 0 : index
    %c0_522 = arith.constant 0 : index
    %c0_523 = arith.constant 0 : index
    %c0_524 = arith.constant 0 : index
    %620 = vector.load %arg18[%c0_520, %c0_521, %c0_522, %c0_523, %c0_524] : memref<2x2x6x6x32xf32, #tpu.memory_space<vmem>>, vector<1x1x3x3x32xf32>
    %621 = vector.shape_cast %620 : vector<1x1x3x3x32xf32> to vector<3x3x32xf32>
    %622 = vector.extract_strided_slice %7 {offsets = [0, 0], sizes = [1, 32], strides = [1, 1]} : vector<49x32xf32> to vector<1x32xf32>
    %623 = vector.shape_cast %622 : vector<1x32xf32> to vector<1x1x32xf32>
    %624 = vector.broadcast %623 : vector<1x1x32xf32> to vector<3x3x32xf32>
    %625 = arith.mulf %621, %624 : vector<3x3x32xf32>
    %626 = arith.addf %618, %625 : vector<3x3x32xf32>
    %c0_525 = arith.constant 0 : index
    %c1_526 = arith.constant 1 : index
    %c0_527 = arith.constant 0 : index
    %c0_528 = arith.constant 0 : index
    %c0_529 = arith.constant 0 : index
    %627 = vector.load %arg18[%c0_525, %c1_526, %c0_527, %c0_528, %c0_529] : memref<2x2x6x6x32xf32, #tpu.memory_space<vmem>>, vector<1x1x3x3x32xf32>
    %628 = vector.shape_cast %627 : vector<1x1x3x3x32xf32> to vector<3x3x32xf32>
    %629 = vector.extract_strided_slice %7 {offsets = [1, 0], sizes = [1, 32], strides = [1, 1]} : vector<49x32xf32> to vector<1x32xf32>
    %630 = vector.shape_cast %629 : vector<1x32xf32> to vector<1x1x32xf32>
    %631 = vector.broadcast %630 : vector<1x1x32xf32> to vector<3x3x32xf32>
    %632 = arith.mulf %628, %631 : vector<3x3x32xf32>
    %633 = arith.addf %619, %632 : vector<3x3x32xf32>
    %c0_530 = arith.constant 0 : index
    %c0_531 = arith.constant 0 : index
    %c0_532 = arith.constant 0 : index
    %c1_533 = arith.constant 1 : index
    %c0_534 = arith.constant 0 : index
    %634 = vector.load %arg18[%c0_530, %c0_531, %c0_532, %c1_533, %c0_534] : memref<2x2x6x6x32xf32, #tpu.memory_space<vmem>>, vector<1x1x3x3x32xf32>
    %635 = vector.shape_cast %634 : vector<1x1x3x3x32xf32> to vector<3x3x32xf32>
    %636 = vector.extract_strided_slice %7 {offsets = [2, 0], sizes = [1, 32], strides = [1, 1]} : vector<49x32xf32> to vector<1x32xf32>
    %637 = vector.shape_cast %636 : vector<1x32xf32> to vector<1x1x32xf32>
    %638 = vector.broadcast %637 : vector<1x1x32xf32> to vector<3x3x32xf32>
    %639 = arith.mulf %635, %638 : vector<3x3x32xf32>
    %640 = arith.addf %626, %639 : vector<3x3x32xf32>
    %c0_535 = arith.constant 0 : index
    %c1_536 = arith.constant 1 : index
    %c0_537 = arith.constant 0 : index
    %c1_538 = arith.constant 1 : index
    %c0_539 = arith.constant 0 : index
    %641 = vector.load %arg18[%c0_535, %c1_536, %c0_537, %c1_538, %c0_539] : memref<2x2x6x6x32xf32, #tpu.memory_space<vmem>>, vector<1x1x3x3x32xf32>
    %642 = vector.shape_cast %641 : vector<1x1x3x3x32xf32> to vector<3x3x32xf32>
    %643 = vector.extract_strided_slice %7 {offsets = [3, 0], sizes = [1, 32], strides = [1, 1]} : vector<49x32xf32> to vector<1x32xf32>
    %644 = vector.shape_cast %643 : vector<1x32xf32> to vector<1x1x32xf32>
    %645 = vector.broadcast %644 : vector<1x1x32xf32> to vector<3x3x32xf32>
    %646 = arith.mulf %642, %645 : vector<3x3x32xf32>
    %647 = arith.addf %633, %646 : vector<3x3x32xf32>
    %c0_540 = arith.constant 0 : index
    %c0_541 = arith.constant 0 : index
    %c0_542 = arith.constant 0 : index
    %c2_543 = arith.constant 2 : index
    %c0_544 = arith.constant 0 : index
    %648 = vector.load %arg18[%c0_540, %c0_541, %c0_542, %c2_543, %c0_544] : memref<2x2x6x6x32xf32, #tpu.memory_space<vmem>>, vector<1x1x3x3x32xf32>
    %649 = vector.shape_cast %648 : vector<1x1x3x3x32xf32> to vector<3x3x32xf32>
    %650 = vector.extract_strided_slice %7 {offsets = [4, 0], sizes = [1, 32], strides = [1, 1]} : vector<49x32xf32> to vector<1x32xf32>
    %651 = vector.shape_cast %650 : vector<1x32xf32> to vector<1x1x32xf32>
    %652 = vector.broadcast %651 : vector<1x1x32xf32> to vector<3x3x32xf32>
    %653 = arith.mulf %649, %652 : vector<3x3x32xf32>
    %654 = arith.addf %640, %653 : vector<3x3x32xf32>
    %c0_545 = arith.constant 0 : index
    %c1_546 = arith.constant 1 : index
    %c0_547 = arith.constant 0 : index
    %c2_548 = arith.constant 2 : index
    %c0_549 = arith.constant 0 : index
    %655 = vector.load %arg18[%c0_545, %c1_546, %c0_547, %c2_548, %c0_549] : memref<2x2x6x6x32xf32, #tpu.memory_space<vmem>>, vector<1x1x3x3x32xf32>
    %656 = vector.shape_cast %655 : vector<1x1x3x3x32xf32> to vector<3x3x32xf32>
    %657 = vector.extract_strided_slice %7 {offsets = [5, 0], sizes = [1, 32], strides = [1, 1]} : vector<49x32xf32> to vector<1x32xf32>
    %658 = vector.shape_cast %657 : vector<1x32xf32> to vector<1x1x32xf32>
    %659 = vector.broadcast %658 : vector<1x1x32xf32> to vector<3x3x32xf32>
    %660 = arith.mulf %656, %659 : vector<3x3x32xf32>
    %661 = arith.addf %647, %660 : vector<3x3x32xf32>
    %c0_550 = arith.constant 0 : index
    %c0_551 = arith.constant 0 : index
    %c0_552 = arith.constant 0 : index
    %c3_553 = arith.constant 3 : index
    %c0_554 = arith.constant 0 : index
    %662 = vector.load %arg18[%c0_550, %c0_551, %c0_552, %c3_553, %c0_554] : memref<2x2x6x6x32xf32, #tpu.memory_space<vmem>>, vector<1x1x3x3x32xf32>
    %663 = vector.shape_cast %662 : vector<1x1x3x3x32xf32> to vector<3x3x32xf32>
    %664 = vector.extract_strided_slice %7 {offsets = [6, 0], sizes = [1, 32], strides = [1, 1]} : vector<49x32xf32> to vector<1x32xf32>
    %665 = vector.shape_cast %664 : vector<1x32xf32> to vector<1x1x32xf32>
    %666 = vector.broadcast %665 : vector<1x1x32xf32> to vector<3x3x32xf32>
    %667 = arith.mulf %663, %666 : vector<3x3x32xf32>
    %668 = arith.addf %654, %667 : vector<3x3x32xf32>
    %c1_555 = arith.constant 1 : index
    %c0_556 = arith.constant 0 : index
    %c0_557 = arith.constant 0 : index
    %c0_558 = arith.constant 0 : index
    %c0_559 = arith.constant 0 : index
    %669 = vector.load %arg18[%c1_555, %c0_556, %c0_557, %c0_558, %c0_559] : memref<2x2x6x6x32xf32, #tpu.memory_space<vmem>>, vector<1x1x3x3x32xf32>
    %670 = vector.shape_cast %669 : vector<1x1x3x3x32xf32> to vector<3x3x32xf32>
    %671 = vector.extract_strided_slice %7 {offsets = [7, 0], sizes = [1, 32], strides = [1, 1]} : vector<49x32xf32> to vector<1x32xf32>
    %672 = vector.shape_cast %671 : vector<1x32xf32> to vector<1x1x32xf32>
    %673 = vector.broadcast %672 : vector<1x1x32xf32> to vector<3x3x32xf32>
    %674 = arith.mulf %670, %673 : vector<3x3x32xf32>
    %675 = arith.addf %661, %674 : vector<3x3x32xf32>
    %c1_560 = arith.constant 1 : index
    %c1_561 = arith.constant 1 : index
    %c0_562 = arith.constant 0 : index
    %c0_563 = arith.constant 0 : index
    %c0_564 = arith.constant 0 : index
    %676 = vector.load %arg18[%c1_560, %c1_561, %c0_562, %c0_563, %c0_564] : memref<2x2x6x6x32xf32, #tpu.memory_space<vmem>>, vector<1x1x3x3x32xf32>
    %677 = vector.shape_cast %676 : vector<1x1x3x3x32xf32> to vector<3x3x32xf32>
    %678 = vector.extract_strided_slice %7 {offsets = [8, 0], sizes = [1, 32], strides = [1, 1]} : vector<49x32xf32> to vector<1x32xf32>
    %679 = vector.shape_cast %678 : vector<1x32xf32> to vector<1x1x32xf32>
    %680 = vector.broadcast %679 : vector<1x1x32xf32> to vector<3x3x32xf32>
    %681 = arith.mulf %677, %680 : vector<3x3x32xf32>
    %682 = arith.addf %668, %681 : vector<3x3x32xf32>
    %c1_565 = arith.constant 1 : index
    %c0_566 = arith.constant 0 : index
    %c0_567 = arith.constant 0 : index
    %c1_568 = arith.constant 1 : index
    %c0_569 = arith.constant 0 : index
    %683 = vector.load %arg18[%c1_565, %c0_566, %c0_567, %c1_568, %c0_569] : memref<2x2x6x6x32xf32, #tpu.memory_space<vmem>>, vector<1x1x3x3x32xf32>
    %684 = vector.shape_cast %683 : vector<1x1x3x3x32xf32> to vector<3x3x32xf32>
    %685 = vector.extract_strided_slice %7 {offsets = [9, 0], sizes = [1, 32], strides = [1, 1]} : vector<49x32xf32> to vector<1x32xf32>
    %686 = vector.shape_cast %685 : vector<1x32xf32> to vector<1x1x32xf32>
    %687 = vector.broadcast %686 : vector<1x1x32xf32> to vector<3x3x32xf32>
    %688 = arith.mulf %684, %687 : vector<3x3x32xf32>
    %689 = arith.addf %675, %688 : vector<3x3x32xf32>
    %c1_570 = arith.constant 1 : index
    %c1_571 = arith.constant 1 : index
    %c0_572 = arith.constant 0 : index
    %c1_573 = arith.constant 1 : index
    %c0_574 = arith.constant 0 : index
    %690 = vector.load %arg18[%c1_570, %c1_571, %c0_572, %c1_573, %c0_574] : memref<2x2x6x6x32xf32, #tpu.memory_space<vmem>>, vector<1x1x3x3x32xf32>
    %691 = vector.shape_cast %690 : vector<1x1x3x3x32xf32> to vector<3x3x32xf32>
    %692 = vector.extract_strided_slice %7 {offsets = [10, 0], sizes = [1, 32], strides = [1, 1]} : vector<49x32xf32> to vector<1x32xf32>
    %693 = vector.shape_cast %692 : vector<1x32xf32> to vector<1x1x32xf32>
    %694 = vector.broadcast %693 : vector<1x1x32xf32> to vector<3x3x32xf32>
    %695 = arith.mulf %691, %694 : vector<3x3x32xf32>
    %696 = arith.addf %682, %695 : vector<3x3x32xf32>
    %c1_575 = arith.constant 1 : index
    %c0_576 = arith.constant 0 : index
    %c0_577 = arith.constant 0 : index
    %c2_578 = arith.constant 2 : index
    %c0_579 = arith.constant 0 : index
    %697 = vector.load %arg18[%c1_575, %c0_576, %c0_577, %c2_578, %c0_579] : memref<2x2x6x6x32xf32, #tpu.memory_space<vmem>>, vector<1x1x3x3x32xf32>
    %698 = vector.shape_cast %697 : vector<1x1x3x3x32xf32> to vector<3x3x32xf32>
    %699 = vector.extract_strided_slice %7 {offsets = [11, 0], sizes = [1, 32], strides = [1, 1]} : vector<49x32xf32> to vector<1x32xf32>
    %700 = vector.shape_cast %699 : vector<1x32xf32> to vector<1x1x32xf32>
    %701 = vector.broadcast %700 : vector<1x1x32xf32> to vector<3x3x32xf32>
    %702 = arith.mulf %698, %701 : vector<3x3x32xf32>
    %703 = arith.addf %689, %702 : vector<3x3x32xf32>
    %c1_580 = arith.constant 1 : index
    %c1_581 = arith.constant 1 : index
    %c0_582 = arith.constant 0 : index
    %c2_583 = arith.constant 2 : index
    %c0_584 = arith.constant 0 : index
    %704 = vector.load %arg18[%c1_580, %c1_581, %c0_582, %c2_583, %c0_584] : memref<2x2x6x6x32xf32, #tpu.memory_space<vmem>>, vector<1x1x3x3x32xf32>
    %705 = vector.shape_cast %704 : vector<1x1x3x3x32xf32> to vector<3x3x32xf32>
    %706 = vector.extract_strided_slice %7 {offsets = [12, 0], sizes = [1, 32], strides = [1, 1]} : vector<49x32xf32> to vector<1x32xf32>
    %707 = vector.shape_cast %706 : vector<1x32xf32> to vector<1x1x32xf32>
    %708 = vector.broadcast %707 : vector<1x1x32xf32> to vector<3x3x32xf32>
    %709 = arith.mulf %705, %708 : vector<3x3x32xf32>
    %710 = arith.addf %696, %709 : vector<3x3x32xf32>
    %c1_585 = arith.constant 1 : index
    %c0_586 = arith.constant 0 : index
    %c0_587 = arith.constant 0 : index
    %c3_588 = arith.constant 3 : index
    %c0_589 = arith.constant 0 : index
    %711 = vector.load %arg18[%c1_585, %c0_586, %c0_587, %c3_588, %c0_589] : memref<2x2x6x6x32xf32, #tpu.memory_space<vmem>>, vector<1x1x3x3x32xf32>
    %712 = vector.shape_cast %711 : vector<1x1x3x3x32xf32> to vector<3x3x32xf32>
    %713 = vector.extract_strided_slice %7 {offsets = [13, 0], sizes = [1, 32], strides = [1, 1]} : vector<49x32xf32> to vector<1x32xf32>
    %714 = vector.shape_cast %713 : vector<1x32xf32> to vector<1x1x32xf32>
    %715 = vector.broadcast %714 : vector<1x1x32xf32> to vector<3x3x32xf32>
    %716 = arith.mulf %712, %715 : vector<3x3x32xf32>
    %717 = arith.addf %703, %716 : vector<3x3x32xf32>
    %c0_590 = arith.constant 0 : index
    %c0_591 = arith.constant 0 : index
    %c1_592 = arith.constant 1 : index
    %c0_593 = arith.constant 0 : index
    %c0_594 = arith.constant 0 : index
    %718 = vector.load %arg18[%c0_590, %c0_591, %c1_592, %c0_593, %c0_594] : memref<2x2x6x6x32xf32, #tpu.memory_space<vmem>>, vector<1x1x3x3x32xf32>
    %719 = vector.shape_cast %718 : vector<1x1x3x3x32xf32> to vector<3x3x32xf32>
    %720 = vector.extract_strided_slice %7 {offsets = [14, 0], sizes = [1, 32], strides = [1, 1]} : vector<49x32xf32> to vector<1x32xf32>
    %721 = vector.shape_cast %720 : vector<1x32xf32> to vector<1x1x32xf32>
    %722 = vector.broadcast %721 : vector<1x1x32xf32> to vector<3x3x32xf32>
    %723 = arith.mulf %719, %722 : vector<3x3x32xf32>
    %724 = arith.addf %710, %723 : vector<3x3x32xf32>
    %c0_595 = arith.constant 0 : index
    %c1_596 = arith.constant 1 : index
    %c1_597 = arith.constant 1 : index
    %c0_598 = arith.constant 0 : index
    %c0_599 = arith.constant 0 : index
    %725 = vector.load %arg18[%c0_595, %c1_596, %c1_597, %c0_598, %c0_599] : memref<2x2x6x6x32xf32, #tpu.memory_space<vmem>>, vector<1x1x3x3x32xf32>
    %726 = vector.shape_cast %725 : vector<1x1x3x3x32xf32> to vector<3x3x32xf32>
    %727 = vector.extract_strided_slice %7 {offsets = [15, 0], sizes = [1, 32], strides = [1, 1]} : vector<49x32xf32> to vector<1x32xf32>
    %728 = vector.shape_cast %727 : vector<1x32xf32> to vector<1x1x32xf32>
    %729 = vector.broadcast %728 : vector<1x1x32xf32> to vector<3x3x32xf32>
    %730 = arith.mulf %726, %729 : vector<3x3x32xf32>
    %731 = arith.addf %717, %730 : vector<3x3x32xf32>
    %c0_600 = arith.constant 0 : index
    %c0_601 = arith.constant 0 : index
    %c1_602 = arith.constant 1 : index
    %c1_603 = arith.constant 1 : index
    %c0_604 = arith.constant 0 : index
    %732 = vector.load %arg18[%c0_600, %c0_601, %c1_602, %c1_603, %c0_604] : memref<2x2x6x6x32xf32, #tpu.memory_space<vmem>>, vector<1x1x3x3x32xf32>
    %733 = vector.shape_cast %732 : vector<1x1x3x3x32xf32> to vector<3x3x32xf32>
    %734 = vector.extract_strided_slice %7 {offsets = [16, 0], sizes = [1, 32], strides = [1, 1]} : vector<49x32xf32> to vector<1x32xf32>
    %735 = vector.shape_cast %734 : vector<1x32xf32> to vector<1x1x32xf32>
    %736 = vector.broadcast %735 : vector<1x1x32xf32> to vector<3x3x32xf32>
    %737 = arith.mulf %733, %736 : vector<3x3x32xf32>
    %738 = arith.addf %724, %737 : vector<3x3x32xf32>
    %c0_605 = arith.constant 0 : index
    %c1_606 = arith.constant 1 : index
    %c1_607 = arith.constant 1 : index
    %c1_608 = arith.constant 1 : index
    %c0_609 = arith.constant 0 : index
    %739 = vector.load %arg18[%c0_605, %c1_606, %c1_607, %c1_608, %c0_609] : memref<2x2x6x6x32xf32, #tpu.memory_space<vmem>>, vector<1x1x3x3x32xf32>
    %740 = vector.shape_cast %739 : vector<1x1x3x3x32xf32> to vector<3x3x32xf32>
    %741 = vector.extract_strided_slice %7 {offsets = [17, 0], sizes = [1, 32], strides = [1, 1]} : vector<49x32xf32> to vector<1x32xf32>
    %742 = vector.shape_cast %741 : vector<1x32xf32> to vector<1x1x32xf32>
    %743 = vector.broadcast %742 : vector<1x1x32xf32> to vector<3x3x32xf32>
    %744 = arith.mulf %740, %743 : vector<3x3x32xf32>
    %745 = arith.addf %731, %744 : vector<3x3x32xf32>
    %c0_610 = arith.constant 0 : index
    %c0_611 = arith.constant 0 : index
    %c1_612 = arith.constant 1 : index
    %c2_613 = arith.constant 2 : index
    %c0_614 = arith.constant 0 : index
    %746 = vector.load %arg18[%c0_610, %c0_611, %c1_612, %c2_613, %c0_614] : memref<2x2x6x6x32xf32, #tpu.memory_space<vmem>>, vector<1x1x3x3x32xf32>
    %747 = vector.shape_cast %746 : vector<1x1x3x3x32xf32> to vector<3x3x32xf32>
    %748 = vector.extract_strided_slice %7 {offsets = [18, 0], sizes = [1, 32], strides = [1, 1]} : vector<49x32xf32> to vector<1x32xf32>
    %749 = vector.shape_cast %748 : vector<1x32xf32> to vector<1x1x32xf32>
    %750 = vector.broadcast %749 : vector<1x1x32xf32> to vector<3x3x32xf32>
    %751 = arith.mulf %747, %750 : vector<3x3x32xf32>
    %752 = arith.addf %738, %751 : vector<3x3x32xf32>
    %c0_615 = arith.constant 0 : index
    %c1_616 = arith.constant 1 : index
    %c1_617 = arith.constant 1 : index
    %c2_618 = arith.constant 2 : index
    %c0_619 = arith.constant 0 : index
    %753 = vector.load %arg18[%c0_615, %c1_616, %c1_617, %c2_618, %c0_619] : memref<2x2x6x6x32xf32, #tpu.memory_space<vmem>>, vector<1x1x3x3x32xf32>
    %754 = vector.shape_cast %753 : vector<1x1x3x3x32xf32> to vector<3x3x32xf32>
    %755 = vector.extract_strided_slice %7 {offsets = [19, 0], sizes = [1, 32], strides = [1, 1]} : vector<49x32xf32> to vector<1x32xf32>
    %756 = vector.shape_cast %755 : vector<1x32xf32> to vector<1x1x32xf32>
    %757 = vector.broadcast %756 : vector<1x1x32xf32> to vector<3x3x32xf32>
    %758 = arith.mulf %754, %757 : vector<3x3x32xf32>
    %759 = arith.addf %745, %758 : vector<3x3x32xf32>
    %c0_620 = arith.constant 0 : index
    %c0_621 = arith.constant 0 : index
    %c1_622 = arith.constant 1 : index
    %c3_623 = arith.constant 3 : index
    %c0_624 = arith.constant 0 : index
    %760 = vector.load %arg18[%c0_620, %c0_621, %c1_622, %c3_623, %c0_624] : memref<2x2x6x6x32xf32, #tpu.memory_space<vmem>>, vector<1x1x3x3x32xf32>
    %761 = vector.shape_cast %760 : vector<1x1x3x3x32xf32> to vector<3x3x32xf32>
    %762 = vector.extract_strided_slice %7 {offsets = [20, 0], sizes = [1, 32], strides = [1, 1]} : vector<49x32xf32> to vector<1x32xf32>
    %763 = vector.shape_cast %762 : vector<1x32xf32> to vector<1x1x32xf32>
    %764 = vector.broadcast %763 : vector<1x1x32xf32> to vector<3x3x32xf32>
    %765 = arith.mulf %761, %764 : vector<3x3x32xf32>
    %766 = arith.addf %752, %765 : vector<3x3x32xf32>
    %c1_625 = arith.constant 1 : index
    %c0_626 = arith.constant 0 : index
    %c1_627 = arith.constant 1 : index
    %c0_628 = arith.constant 0 : index
    %c0_629 = arith.constant 0 : index
    %767 = vector.load %arg18[%c1_625, %c0_626, %c1_627, %c0_628, %c0_629] : memref<2x2x6x6x32xf32, #tpu.memory_space<vmem>>, vector<1x1x3x3x32xf32>
    %768 = vector.shape_cast %767 : vector<1x1x3x3x32xf32> to vector<3x3x32xf32>
    %769 = vector.extract_strided_slice %7 {offsets = [21, 0], sizes = [1, 32], strides = [1, 1]} : vector<49x32xf32> to vector<1x32xf32>
    %770 = vector.shape_cast %769 : vector<1x32xf32> to vector<1x1x32xf32>
    %771 = vector.broadcast %770 : vector<1x1x32xf32> to vector<3x3x32xf32>
    %772 = arith.mulf %768, %771 : vector<3x3x32xf32>
    %773 = arith.addf %759, %772 : vector<3x3x32xf32>
    %c1_630 = arith.constant 1 : index
    %c1_631 = arith.constant 1 : index
    %c1_632 = arith.constant 1 : index
    %c0_633 = arith.constant 0 : index
    %c0_634 = arith.constant 0 : index
    %774 = vector.load %arg18[%c1_630, %c1_631, %c1_632, %c0_633, %c0_634] : memref<2x2x6x6x32xf32, #tpu.memory_space<vmem>>, vector<1x1x3x3x32xf32>
    %775 = vector.shape_cast %774 : vector<1x1x3x3x32xf32> to vector<3x3x32xf32>
    %776 = vector.extract_strided_slice %7 {offsets = [22, 0], sizes = [1, 32], strides = [1, 1]} : vector<49x32xf32> to vector<1x32xf32>
    %777 = vector.shape_cast %776 : vector<1x32xf32> to vector<1x1x32xf32>
    %778 = vector.broadcast %777 : vector<1x1x32xf32> to vector<3x3x32xf32>
    %779 = arith.mulf %775, %778 : vector<3x3x32xf32>
    %780 = arith.addf %766, %779 : vector<3x3x32xf32>
    %c1_635 = arith.constant 1 : index
    %c0_636 = arith.constant 0 : index
    %c1_637 = arith.constant 1 : index
    %c1_638 = arith.constant 1 : index
    %c0_639 = arith.constant 0 : index
    %781 = vector.load %arg18[%c1_635, %c0_636, %c1_637, %c1_638, %c0_639] : memref<2x2x6x6x32xf32, #tpu.memory_space<vmem>>, vector<1x1x3x3x32xf32>
    %782 = vector.shape_cast %781 : vector<1x1x3x3x32xf32> to vector<3x3x32xf32>
    %783 = vector.extract_strided_slice %7 {offsets = [23, 0], sizes = [1, 32], strides = [1, 1]} : vector<49x32xf32> to vector<1x32xf32>
    %784 = vector.shape_cast %783 : vector<1x32xf32> to vector<1x1x32xf32>
    %785 = vector.broadcast %784 : vector<1x1x32xf32> to vector<3x3x32xf32>
    %786 = arith.mulf %782, %785 : vector<3x3x32xf32>
    %787 = arith.addf %773, %786 : vector<3x3x32xf32>
    %c1_640 = arith.constant 1 : index
    %c1_641 = arith.constant 1 : index
    %c1_642 = arith.constant 1 : index
    %c1_643 = arith.constant 1 : index
    %c0_644 = arith.constant 0 : index
    %788 = vector.load %arg18[%c1_640, %c1_641, %c1_642, %c1_643, %c0_644] : memref<2x2x6x6x32xf32, #tpu.memory_space<vmem>>, vector<1x1x3x3x32xf32>
    %789 = vector.shape_cast %788 : vector<1x1x3x3x32xf32> to vector<3x3x32xf32>
    %790 = vector.extract_strided_slice %7 {offsets = [24, 0], sizes = [1, 32], strides = [1, 1]} : vector<49x32xf32> to vector<1x32xf32>
    %791 = vector.shape_cast %790 : vector<1x32xf32> to vector<1x1x32xf32>
    %792 = vector.broadcast %791 : vector<1x1x32xf32> to vector<3x3x32xf32>
    %793 = arith.mulf %789, %792 : vector<3x3x32xf32>
    %794 = arith.addf %780, %793 : vector<3x3x32xf32>
    %c1_645 = arith.constant 1 : index
    %c0_646 = arith.constant 0 : index
    %c1_647 = arith.constant 1 : index
    %c2_648 = arith.constant 2 : index
    %c0_649 = arith.constant 0 : index
    %795 = vector.load %arg18[%c1_645, %c0_646, %c1_647, %c2_648, %c0_649] : memref<2x2x6x6x32xf32, #tpu.memory_space<vmem>>, vector<1x1x3x3x32xf32>
    %796 = vector.shape_cast %795 : vector<1x1x3x3x32xf32> to vector<3x3x32xf32>
    %797 = vector.extract_strided_slice %7 {offsets = [25, 0], sizes = [1, 32], strides = [1, 1]} : vector<49x32xf32> to vector<1x32xf32>
    %798 = vector.shape_cast %797 : vector<1x32xf32> to vector<1x1x32xf32>
    %799 = vector.broadcast %798 : vector<1x1x32xf32> to vector<3x3x32xf32>
    %800 = arith.mulf %796, %799 : vector<3x3x32xf32>
    %801 = arith.addf %787, %800 : vector<3x3x32xf32>
    %c1_650 = arith.constant 1 : index
    %c1_651 = arith.constant 1 : index
    %c1_652 = arith.constant 1 : index
    %c2_653 = arith.constant 2 : index
    %c0_654 = arith.constant 0 : index
    %802 = vector.load %arg18[%c1_650, %c1_651, %c1_652, %c2_653, %c0_654] : memref<2x2x6x6x32xf32, #tpu.memory_space<vmem>>, vector<1x1x3x3x32xf32>
    %803 = vector.shape_cast %802 : vector<1x1x3x3x32xf32> to vector<3x3x32xf32>
    %804 = vector.extract_strided_slice %7 {offsets = [26, 0], sizes = [1, 32], strides = [1, 1]} : vector<49x32xf32> to vector<1x32xf32>
    %805 = vector.shape_cast %804 : vector<1x32xf32> to vector<1x1x32xf32>
    %806 = vector.broadcast %805 : vector<1x1x32xf32> to vector<3x3x32xf32>
    %807 = arith.mulf %803, %806 : vector<3x3x32xf32>
    %808 = arith.addf %794, %807 : vector<3x3x32xf32>
    %c1_655 = arith.constant 1 : index
    %c0_656 = arith.constant 0 : index
    %c1_657 = arith.constant 1 : index
    %c3_658 = arith.constant 3 : index
    %c0_659 = arith.constant 0 : index
    %809 = vector.load %arg18[%c1_655, %c0_656, %c1_657, %c3_658, %c0_659] : memref<2x2x6x6x32xf32, #tpu.memory_space<vmem>>, vector<1x1x3x3x32xf32>
    %810 = vector.shape_cast %809 : vector<1x1x3x3x32xf32> to vector<3x3x32xf32>
    %811 = vector.extract_strided_slice %7 {offsets = [27, 0], sizes = [1, 32], strides = [1, 1]} : vector<49x32xf32> to vector<1x32xf32>
    %812 = vector.shape_cast %811 : vector<1x32xf32> to vector<1x1x32xf32>
    %813 = vector.broadcast %812 : vector<1x1x32xf32> to vector<3x3x32xf32>
    %814 = arith.mulf %810, %813 : vector<3x3x32xf32>
    %815 = arith.addf %801, %814 : vector<3x3x32xf32>
    %c0_660 = arith.constant 0 : index
    %c0_661 = arith.constant 0 : index
    %c2_662 = arith.constant 2 : index
    %c0_663 = arith.constant 0 : index
    %c0_664 = arith.constant 0 : index
    %816 = vector.load %arg18[%c0_660, %c0_661, %c2_662, %c0_663, %c0_664] : memref<2x2x6x6x32xf32, #tpu.memory_space<vmem>>, vector<1x1x3x3x32xf32>
    %817 = vector.shape_cast %816 : vector<1x1x3x3x32xf32> to vector<3x3x32xf32>
    %818 = vector.extract_strided_slice %7 {offsets = [28, 0], sizes = [1, 32], strides = [1, 1]} : vector<49x32xf32> to vector<1x32xf32>
    %819 = vector.shape_cast %818 : vector<1x32xf32> to vector<1x1x32xf32>
    %820 = vector.broadcast %819 : vector<1x1x32xf32> to vector<3x3x32xf32>
    %821 = arith.mulf %817, %820 : vector<3x3x32xf32>
    %822 = arith.addf %808, %821 : vector<3x3x32xf32>
    %c0_665 = arith.constant 0 : index
    %c1_666 = arith.constant 1 : index
    %c2_667 = arith.constant 2 : index
    %c0_668 = arith.constant 0 : index
    %c0_669 = arith.constant 0 : index
    %823 = vector.load %arg18[%c0_665, %c1_666, %c2_667, %c0_668, %c0_669] : memref<2x2x6x6x32xf32, #tpu.memory_space<vmem>>, vector<1x1x3x3x32xf32>
    %824 = vector.shape_cast %823 : vector<1x1x3x3x32xf32> to vector<3x3x32xf32>
    %825 = vector.extract_strided_slice %7 {offsets = [29, 0], sizes = [1, 32], strides = [1, 1]} : vector<49x32xf32> to vector<1x32xf32>
    %826 = vector.shape_cast %825 : vector<1x32xf32> to vector<1x1x32xf32>
    %827 = vector.broadcast %826 : vector<1x1x32xf32> to vector<3x3x32xf32>
    %828 = arith.mulf %824, %827 : vector<3x3x32xf32>
    %829 = arith.addf %815, %828 : vector<3x3x32xf32>
    %c0_670 = arith.constant 0 : index
    %c0_671 = arith.constant 0 : index
    %c2_672 = arith.constant 2 : index
    %c1_673 = arith.constant 1 : index
    %c0_674 = arith.constant 0 : index
    %830 = vector.load %arg18[%c0_670, %c0_671, %c2_672, %c1_673, %c0_674] : memref<2x2x6x6x32xf32, #tpu.memory_space<vmem>>, vector<1x1x3x3x32xf32>
    %831 = vector.shape_cast %830 : vector<1x1x3x3x32xf32> to vector<3x3x32xf32>
    %832 = vector.extract_strided_slice %7 {offsets = [30, 0], sizes = [1, 32], strides = [1, 1]} : vector<49x32xf32> to vector<1x32xf32>
    %833 = vector.shape_cast %832 : vector<1x32xf32> to vector<1x1x32xf32>
    %834 = vector.broadcast %833 : vector<1x1x32xf32> to vector<3x3x32xf32>
    %835 = arith.mulf %831, %834 : vector<3x3x32xf32>
    %836 = arith.addf %822, %835 : vector<3x3x32xf32>
    %c0_675 = arith.constant 0 : index
    %c1_676 = arith.constant 1 : index
    %c2_677 = arith.constant 2 : index
    %c1_678 = arith.constant 1 : index
    %c0_679 = arith.constant 0 : index
    %837 = vector.load %arg18[%c0_675, %c1_676, %c2_677, %c1_678, %c0_679] : memref<2x2x6x6x32xf32, #tpu.memory_space<vmem>>, vector<1x1x3x3x32xf32>
    %838 = vector.shape_cast %837 : vector<1x1x3x3x32xf32> to vector<3x3x32xf32>
    %839 = vector.extract_strided_slice %7 {offsets = [31, 0], sizes = [1, 32], strides = [1, 1]} : vector<49x32xf32> to vector<1x32xf32>
    %840 = vector.shape_cast %839 : vector<1x32xf32> to vector<1x1x32xf32>
    %841 = vector.broadcast %840 : vector<1x1x32xf32> to vector<3x3x32xf32>
    %842 = arith.mulf %838, %841 : vector<3x3x32xf32>
    %843 = arith.addf %829, %842 : vector<3x3x32xf32>
    %c0_680 = arith.constant 0 : index
    %c0_681 = arith.constant 0 : index
    %c2_682 = arith.constant 2 : index
    %c2_683 = arith.constant 2 : index
    %c0_684 = arith.constant 0 : index
    %844 = vector.load %arg18[%c0_680, %c0_681, %c2_682, %c2_683, %c0_684] : memref<2x2x6x6x32xf32, #tpu.memory_space<vmem>>, vector<1x1x3x3x32xf32>
    %845 = vector.shape_cast %844 : vector<1x1x3x3x32xf32> to vector<3x3x32xf32>
    %846 = vector.extract_strided_slice %7 {offsets = [32, 0], sizes = [1, 32], strides = [1, 1]} : vector<49x32xf32> to vector<1x32xf32>
    %847 = vector.shape_cast %846 : vector<1x32xf32> to vector<1x1x32xf32>
    %848 = vector.broadcast %847 : vector<1x1x32xf32> to vector<3x3x32xf32>
    %849 = arith.mulf %845, %848 : vector<3x3x32xf32>
    %850 = arith.addf %836, %849 : vector<3x3x32xf32>
    %c0_685 = arith.constant 0 : index
    %c1_686 = arith.constant 1 : index
    %c2_687 = arith.constant 2 : index
    %c2_688 = arith.constant 2 : index
    %c0_689 = arith.constant 0 : index
    %851 = vector.load %arg18[%c0_685, %c1_686, %c2_687, %c2_688, %c0_689] : memref<2x2x6x6x32xf32, #tpu.memory_space<vmem>>, vector<1x1x3x3x32xf32>
    %852 = vector.shape_cast %851 : vector<1x1x3x3x32xf32> to vector<3x3x32xf32>
    %853 = vector.extract_strided_slice %7 {offsets = [33, 0], sizes = [1, 32], strides = [1, 1]} : vector<49x32xf32> to vector<1x32xf32>
    %854 = vector.shape_cast %853 : vector<1x32xf32> to vector<1x1x32xf32>
    %855 = vector.broadcast %854 : vector<1x1x32xf32> to vector<3x3x32xf32>
    %856 = arith.mulf %852, %855 : vector<3x3x32xf32>
    %857 = arith.addf %843, %856 : vector<3x3x32xf32>
    %c0_690 = arith.constant 0 : index
    %c0_691 = arith.constant 0 : index
    %c2_692 = arith.constant 2 : index
    %c3_693 = arith.constant 3 : index
    %c0_694 = arith.constant 0 : index
    %858 = vector.load %arg18[%c0_690, %c0_691, %c2_692, %c3_693, %c0_694] : memref<2x2x6x6x32xf32, #tpu.memory_space<vmem>>, vector<1x1x3x3x32xf32>
    %859 = vector.shape_cast %858 : vector<1x1x3x3x32xf32> to vector<3x3x32xf32>
    %860 = vector.extract_strided_slice %7 {offsets = [34, 0], sizes = [1, 32], strides = [1, 1]} : vector<49x32xf32> to vector<1x32xf32>
    %861 = vector.shape_cast %860 : vector<1x32xf32> to vector<1x1x32xf32>
    %862 = vector.broadcast %861 : vector<1x1x32xf32> to vector<3x3x32xf32>
    %863 = arith.mulf %859, %862 : vector<3x3x32xf32>
    %864 = arith.addf %850, %863 : vector<3x3x32xf32>
    %c1_695 = arith.constant 1 : index
    %c0_696 = arith.constant 0 : index
    %c2_697 = arith.constant 2 : index
    %c0_698 = arith.constant 0 : index
    %c0_699 = arith.constant 0 : index
    %865 = vector.load %arg18[%c1_695, %c0_696, %c2_697, %c0_698, %c0_699] : memref<2x2x6x6x32xf32, #tpu.memory_space<vmem>>, vector<1x1x3x3x32xf32>
    %866 = vector.shape_cast %865 : vector<1x1x3x3x32xf32> to vector<3x3x32xf32>
    %867 = vector.extract_strided_slice %7 {offsets = [35, 0], sizes = [1, 32], strides = [1, 1]} : vector<49x32xf32> to vector<1x32xf32>
    %868 = vector.shape_cast %867 : vector<1x32xf32> to vector<1x1x32xf32>
    %869 = vector.broadcast %868 : vector<1x1x32xf32> to vector<3x3x32xf32>
    %870 = arith.mulf %866, %869 : vector<3x3x32xf32>
    %871 = arith.addf %857, %870 : vector<3x3x32xf32>
    %c1_700 = arith.constant 1 : index
    %c1_701 = arith.constant 1 : index
    %c2_702 = arith.constant 2 : index
    %c0_703 = arith.constant 0 : index
    %c0_704 = arith.constant 0 : index
    %872 = vector.load %arg18[%c1_700, %c1_701, %c2_702, %c0_703, %c0_704] : memref<2x2x6x6x32xf32, #tpu.memory_space<vmem>>, vector<1x1x3x3x32xf32>
    %873 = vector.shape_cast %872 : vector<1x1x3x3x32xf32> to vector<3x3x32xf32>
    %874 = vector.extract_strided_slice %7 {offsets = [36, 0], sizes = [1, 32], strides = [1, 1]} : vector<49x32xf32> to vector<1x32xf32>
    %875 = vector.shape_cast %874 : vector<1x32xf32> to vector<1x1x32xf32>
    %876 = vector.broadcast %875 : vector<1x1x32xf32> to vector<3x3x32xf32>
    %877 = arith.mulf %873, %876 : vector<3x3x32xf32>
    %878 = arith.addf %864, %877 : vector<3x3x32xf32>
    %c1_705 = arith.constant 1 : index
    %c0_706 = arith.constant 0 : index
    %c2_707 = arith.constant 2 : index
    %c1_708 = arith.constant 1 : index
    %c0_709 = arith.constant 0 : index
    %879 = vector.load %arg18[%c1_705, %c0_706, %c2_707, %c1_708, %c0_709] : memref<2x2x6x6x32xf32, #tpu.memory_space<vmem>>, vector<1x1x3x3x32xf32>
    %880 = vector.shape_cast %879 : vector<1x1x3x3x32xf32> to vector<3x3x32xf32>
    %881 = vector.extract_strided_slice %7 {offsets = [37, 0], sizes = [1, 32], strides = [1, 1]} : vector<49x32xf32> to vector<1x32xf32>
    %882 = vector.shape_cast %881 : vector<1x32xf32> to vector<1x1x32xf32>
    %883 = vector.broadcast %882 : vector<1x1x32xf32> to vector<3x3x32xf32>
    %884 = arith.mulf %880, %883 : vector<3x3x32xf32>
    %885 = arith.addf %871, %884 : vector<3x3x32xf32>
    %c1_710 = arith.constant 1 : index
    %c1_711 = arith.constant 1 : index
    %c2_712 = arith.constant 2 : index
    %c1_713 = arith.constant 1 : index
    %c0_714 = arith.constant 0 : index
    %886 = vector.load %arg18[%c1_710, %c1_711, %c2_712, %c1_713, %c0_714] : memref<2x2x6x6x32xf32, #tpu.memory_space<vmem>>, vector<1x1x3x3x32xf32>
    %887 = vector.shape_cast %886 : vector<1x1x3x3x32xf32> to vector<3x3x32xf32>
    %888 = vector.extract_strided_slice %7 {offsets = [38, 0], sizes = [1, 32], strides = [1, 1]} : vector<49x32xf32> to vector<1x32xf32>
    %889 = vector.shape_cast %888 : vector<1x32xf32> to vector<1x1x32xf32>
    %890 = vector.broadcast %889 : vector<1x1x32xf32> to vector<3x3x32xf32>
    %891 = arith.mulf %887, %890 : vector<3x3x32xf32>
    %892 = arith.addf %878, %891 : vector<3x3x32xf32>
    %c1_715 = arith.constant 1 : index
    %c0_716 = arith.constant 0 : index
    %c2_717 = arith.constant 2 : index
    %c2_718 = arith.constant 2 : index
    %c0_719 = arith.constant 0 : index
    %893 = vector.load %arg18[%c1_715, %c0_716, %c2_717, %c2_718, %c0_719] : memref<2x2x6x6x32xf32, #tpu.memory_space<vmem>>, vector<1x1x3x3x32xf32>
    %894 = vector.shape_cast %893 : vector<1x1x3x3x32xf32> to vector<3x3x32xf32>
    %895 = vector.extract_strided_slice %7 {offsets = [39, 0], sizes = [1, 32], strides = [1, 1]} : vector<49x32xf32> to vector<1x32xf32>
    %896 = vector.shape_cast %895 : vector<1x32xf32> to vector<1x1x32xf32>
    %897 = vector.broadcast %896 : vector<1x1x32xf32> to vector<3x3x32xf32>
    %898 = arith.mulf %894, %897 : vector<3x3x32xf32>
    %899 = arith.addf %885, %898 : vector<3x3x32xf32>
    %c1_720 = arith.constant 1 : index
    %c1_721 = arith.constant 1 : index
    %c2_722 = arith.constant 2 : index
    %c2_723 = arith.constant 2 : index
    %c0_724 = arith.constant 0 : index
    %900 = vector.load %arg18[%c1_720, %c1_721, %c2_722, %c2_723, %c0_724] : memref<2x2x6x6x32xf32, #tpu.memory_space<vmem>>, vector<1x1x3x3x32xf32>
    %901 = vector.shape_cast %900 : vector<1x1x3x3x32xf32> to vector<3x3x32xf32>
    %902 = vector.extract_strided_slice %7 {offsets = [40, 0], sizes = [1, 32], strides = [1, 1]} : vector<49x32xf32> to vector<1x32xf32>
    %903 = vector.shape_cast %902 : vector<1x32xf32> to vector<1x1x32xf32>
    %904 = vector.broadcast %903 : vector<1x1x32xf32> to vector<3x3x32xf32>
    %905 = arith.mulf %901, %904 : vector<3x3x32xf32>
    %906 = arith.addf %892, %905 : vector<3x3x32xf32>
    %c1_725 = arith.constant 1 : index
    %c0_726 = arith.constant 0 : index
    %c2_727 = arith.constant 2 : index
    %c3_728 = arith.constant 3 : index
    %c0_729 = arith.constant 0 : index
    %907 = vector.load %arg18[%c1_725, %c0_726, %c2_727, %c3_728, %c0_729] : memref<2x2x6x6x32xf32, #tpu.memory_space<vmem>>, vector<1x1x3x3x32xf32>
    %908 = vector.shape_cast %907 : vector<1x1x3x3x32xf32> to vector<3x3x32xf32>
    %909 = vector.extract_strided_slice %7 {offsets = [41, 0], sizes = [1, 32], strides = [1, 1]} : vector<49x32xf32> to vector<1x32xf32>
    %910 = vector.shape_cast %909 : vector<1x32xf32> to vector<1x1x32xf32>
    %911 = vector.broadcast %910 : vector<1x1x32xf32> to vector<3x3x32xf32>
    %912 = arith.mulf %908, %911 : vector<3x3x32xf32>
    %913 = arith.addf %899, %912 : vector<3x3x32xf32>
    %c0_730 = arith.constant 0 : index
    %c0_731 = arith.constant 0 : index
    %c3_732 = arith.constant 3 : index
    %c0_733 = arith.constant 0 : index
    %c0_734 = arith.constant 0 : index
    %914 = vector.load %arg18[%c0_730, %c0_731, %c3_732, %c0_733, %c0_734] : memref<2x2x6x6x32xf32, #tpu.memory_space<vmem>>, vector<1x1x3x3x32xf32>
    %915 = vector.shape_cast %914 : vector<1x1x3x3x32xf32> to vector<3x3x32xf32>
    %916 = vector.extract_strided_slice %7 {offsets = [42, 0], sizes = [1, 32], strides = [1, 1]} : vector<49x32xf32> to vector<1x32xf32>
    %917 = vector.shape_cast %916 : vector<1x32xf32> to vector<1x1x32xf32>
    %918 = vector.broadcast %917 : vector<1x1x32xf32> to vector<3x3x32xf32>
    %919 = arith.mulf %915, %918 : vector<3x3x32xf32>
    %920 = arith.addf %906, %919 : vector<3x3x32xf32>
    %c0_735 = arith.constant 0 : index
    %c1_736 = arith.constant 1 : index
    %c3_737 = arith.constant 3 : index
    %c0_738 = arith.constant 0 : index
    %c0_739 = arith.constant 0 : index
    %921 = vector.load %arg18[%c0_735, %c1_736, %c3_737, %c0_738, %c0_739] : memref<2x2x6x6x32xf32, #tpu.memory_space<vmem>>, vector<1x1x3x3x32xf32>
    %922 = vector.shape_cast %921 : vector<1x1x3x3x32xf32> to vector<3x3x32xf32>
    %923 = vector.extract_strided_slice %7 {offsets = [43, 0], sizes = [1, 32], strides = [1, 1]} : vector<49x32xf32> to vector<1x32xf32>
    %924 = vector.shape_cast %923 : vector<1x32xf32> to vector<1x1x32xf32>
    %925 = vector.broadcast %924 : vector<1x1x32xf32> to vector<3x3x32xf32>
    %926 = arith.mulf %922, %925 : vector<3x3x32xf32>
    %927 = arith.addf %913, %926 : vector<3x3x32xf32>
    %c0_740 = arith.constant 0 : index
    %c0_741 = arith.constant 0 : index
    %c3_742 = arith.constant 3 : index
    %c1_743 = arith.constant 1 : index
    %c0_744 = arith.constant 0 : index
    %928 = vector.load %arg18[%c0_740, %c0_741, %c3_742, %c1_743, %c0_744] : memref<2x2x6x6x32xf32, #tpu.memory_space<vmem>>, vector<1x1x3x3x32xf32>
    %929 = vector.shape_cast %928 : vector<1x1x3x3x32xf32> to vector<3x3x32xf32>
    %930 = vector.extract_strided_slice %7 {offsets = [44, 0], sizes = [1, 32], strides = [1, 1]} : vector<49x32xf32> to vector<1x32xf32>
    %931 = vector.shape_cast %930 : vector<1x32xf32> to vector<1x1x32xf32>
    %932 = vector.broadcast %931 : vector<1x1x32xf32> to vector<3x3x32xf32>
    %933 = arith.mulf %929, %932 : vector<3x3x32xf32>
    %934 = arith.addf %920, %933 : vector<3x3x32xf32>
    %c0_745 = arith.constant 0 : index
    %c1_746 = arith.constant 1 : index
    %c3_747 = arith.constant 3 : index
    %c1_748 = arith.constant 1 : index
    %c0_749 = arith.constant 0 : index
    %935 = vector.load %arg18[%c0_745, %c1_746, %c3_747, %c1_748, %c0_749] : memref<2x2x6x6x32xf32, #tpu.memory_space<vmem>>, vector<1x1x3x3x32xf32>
    %936 = vector.shape_cast %935 : vector<1x1x3x3x32xf32> to vector<3x3x32xf32>
    %937 = vector.extract_strided_slice %7 {offsets = [45, 0], sizes = [1, 32], strides = [1, 1]} : vector<49x32xf32> to vector<1x32xf32>
    %938 = vector.shape_cast %937 : vector<1x32xf32> to vector<1x1x32xf32>
    %939 = vector.broadcast %938 : vector<1x1x32xf32> to vector<3x3x32xf32>
    %940 = arith.mulf %936, %939 : vector<3x3x32xf32>
    %941 = arith.addf %927, %940 : vector<3x3x32xf32>
    %c0_750 = arith.constant 0 : index
    %c0_751 = arith.constant 0 : index
    %c3_752 = arith.constant 3 : index
    %c2_753 = arith.constant 2 : index
    %c0_754 = arith.constant 0 : index
    %942 = vector.load %arg18[%c0_750, %c0_751, %c3_752, %c2_753, %c0_754] : memref<2x2x6x6x32xf32, #tpu.memory_space<vmem>>, vector<1x1x3x3x32xf32>
    %943 = vector.shape_cast %942 : vector<1x1x3x3x32xf32> to vector<3x3x32xf32>
    %944 = vector.extract_strided_slice %7 {offsets = [46, 0], sizes = [1, 32], strides = [1, 1]} : vector<49x32xf32> to vector<1x32xf32>
    %945 = vector.shape_cast %944 : vector<1x32xf32> to vector<1x1x32xf32>
    %946 = vector.broadcast %945 : vector<1x1x32xf32> to vector<3x3x32xf32>
    %947 = arith.mulf %943, %946 : vector<3x3x32xf32>
    %948 = arith.addf %934, %947 : vector<3x3x32xf32>
    %c0_755 = arith.constant 0 : index
    %c1_756 = arith.constant 1 : index
    %c3_757 = arith.constant 3 : index
    %c2_758 = arith.constant 2 : index
    %c0_759 = arith.constant 0 : index
    %949 = vector.load %arg18[%c0_755, %c1_756, %c3_757, %c2_758, %c0_759] : memref<2x2x6x6x32xf32, #tpu.memory_space<vmem>>, vector<1x1x3x3x32xf32>
    %950 = vector.shape_cast %949 : vector<1x1x3x3x32xf32> to vector<3x3x32xf32>
    %951 = vector.extract_strided_slice %7 {offsets = [47, 0], sizes = [1, 32], strides = [1, 1]} : vector<49x32xf32> to vector<1x32xf32>
    %952 = vector.shape_cast %951 : vector<1x32xf32> to vector<1x1x32xf32>
    %953 = vector.broadcast %952 : vector<1x1x32xf32> to vector<3x3x32xf32>
    %954 = arith.mulf %950, %953 : vector<3x3x32xf32>
    %955 = arith.addf %941, %954 : vector<3x3x32xf32>
    %c0_760 = arith.constant 0 : index
    %c0_761 = arith.constant 0 : index
    %c3_762 = arith.constant 3 : index
    %c3_763 = arith.constant 3 : index
    %c0_764 = arith.constant 0 : index
    %956 = vector.load %arg18[%c0_760, %c0_761, %c3_762, %c3_763, %c0_764] : memref<2x2x6x6x32xf32, #tpu.memory_space<vmem>>, vector<1x1x3x3x32xf32>
    %957 = vector.shape_cast %956 : vector<1x1x3x3x32xf32> to vector<3x3x32xf32>
    %958 = vector.extract_strided_slice %7 {offsets = [48, 0], sizes = [1, 32], strides = [1, 1]} : vector<49x32xf32> to vector<1x32xf32>
    %959 = vector.shape_cast %958 : vector<1x32xf32> to vector<1x1x32xf32>
    %960 = vector.broadcast %959 : vector<1x1x32xf32> to vector<3x3x32xf32>
    %961 = arith.mulf %957, %960 : vector<3x3x32xf32>
    %962 = arith.addf %948, %961 : vector<3x3x32xf32>
    %963 = arith.addf %962, %955 : vector<3x3x32xf32>
    %c0_765 = arith.constant 0 : index
    %c0_766 = arith.constant 0 : index
    %964 = vector.load %arg9[%c0_765, %c0_766] : memref<1x32xf32, #tpu.memory_space<vmem>>, vector<1x32xf32>
    %965 = vector.shape_cast %964 : vector<1x32xf32> to vector<1x1x32xf32>
    %966 = vector.broadcast %965 : vector<1x1x32xf32> to vector<3x3x32xf32>
    %967 = arith.addf %963, %966 : vector<3x3x32xf32>
    %c0_767 = arith.constant 0 : index
    %c0_768 = arith.constant 0 : index
    %968 = vector.load %arg10[%c0_767, %c0_768] : memref<1x32xf32, #tpu.memory_space<vmem>>, vector<1x32xf32>
    %c0_769 = arith.constant 0 : index
    %c0_770 = arith.constant 0 : index
    %969 = vector.load %arg11[%c0_769, %c0_770] : memref<1x32xf32, #tpu.memory_space<vmem>>, vector<1x32xf32>
    %cst_771 = arith.constant dense<0.000000e+00> : vector<3x3xf32>
    %970 = vector.multi_reduction <add>, %967, %cst_771 [2] : vector<3x3x32xf32> to vector<3x3xf32>
    %971 = vector.shape_cast %970 : vector<3x3xf32> to vector<3x3x1xf32>
    %cst_772 = arith.constant 3.200000e+01 : f32
    %972 = vector.broadcast %cst_772 : f32 to vector<3x3x1xf32>
    %973 = arith.divf %971, %972 : vector<3x3x1xf32>
    %974 = vector.broadcast %973 : vector<3x3x1xf32> to vector<3x3x32xf32>
    %975 = arith.subf %967, %974 : vector<3x3x32xf32>
    %976 = arith.mulf %975, %975 : vector<3x3x32xf32>
    %cst_773 = arith.constant dense<0.000000e+00> : vector<3x3xf32>
    %977 = vector.multi_reduction <add>, %976, %cst_773 [2] : vector<3x3x32xf32> to vector<3x3xf32>
    %978 = vector.shape_cast %977 : vector<3x3xf32> to vector<3x3x1xf32>
    %cst_774 = arith.constant 3.200000e+01 : f32
    %979 = vector.broadcast %cst_774 : f32 to vector<3x3x1xf32>
    %980 = arith.divf %978, %979 : vector<3x3x1xf32>
    %981 = vector.broadcast %973 : vector<3x3x1xf32> to vector<3x3x32xf32>
    %982 = arith.subf %967, %981 : vector<3x3x32xf32>
    %cst_775 = arith.constant 9.99999997E-7 : f32
    %983 = vector.broadcast %cst_775 : f32 to vector<3x3x1xf32>
    %984 = arith.addf %980, %983 : vector<3x3x1xf32>
    %985 = math.rsqrt %984 : vector<3x3x1xf32>
    %986 = vector.broadcast %985 : vector<3x3x1xf32> to vector<3x3x32xf32>
    %987 = arith.mulf %982, %986 : vector<3x3x32xf32>
    %988 = vector.shape_cast %968 : vector<1x32xf32> to vector<1x1x32xf32>
    %989 = vector.broadcast %988 : vector<1x1x32xf32> to vector<3x3x32xf32>
    %990 = arith.mulf %987, %989 : vector<3x3x32xf32>
    %991 = vector.shape_cast %969 : vector<1x32xf32> to vector<1x1x32xf32>
    %992 = vector.broadcast %991 : vector<1x1x32xf32> to vector<3x3x32xf32>
    %993 = arith.addf %990, %992 : vector<3x3x32xf32>
    %994 = arith.mulf %993, %993 : vector<3x3x32xf32>
    %995 = arith.mulf %993, %994 : vector<3x3x32xf32>
    %cst_776 = arith.constant 4.471500e-02 : f32
    %996 = vector.broadcast %cst_776 : f32 to vector<3x3x32xf32>
    %997 = arith.mulf %996, %995 : vector<3x3x32xf32>
    %998 = arith.addf %993, %997 : vector<3x3x32xf32>
    %cst_777 = arith.constant 0.797884583 : f32
    %999 = vector.broadcast %cst_777 : f32 to vector<3x3x32xf32>
    %1000 = arith.mulf %999, %998 : vector<3x3x32xf32>
    %1001 = math.tanh %1000 : vector<3x3x32xf32>
    %cst_778 = arith.constant 1.000000e+00 : f32
    %1002 = vector.broadcast %cst_778 : f32 to vector<3x3x32xf32>
    %1003 = arith.addf %1002, %1001 : vector<3x3x32xf32>
    %cst_779 = arith.constant 5.000000e-01 : f32
    %1004 = vector.broadcast %cst_779 : f32 to vector<3x3x32xf32>
    %1005 = arith.mulf %1004, %1003 : vector<3x3x32xf32>
    %1006 = arith.mulf %993, %1005 : vector<3x3x32xf32>
    %1007 = vector.shape_cast %1006 : vector<3x3x32xf32> to vector<9x32xf32>
    %cst_780 = arith.constant dense<0.000000e+00> : vector<9x48xf32>
    %1008 = tpu.matmul %1007, %8, %cst_780 {dimension_numbers = #tpu.dot_dimension_numbers<[1], [0], [0], [1], [0, 0, 1, 1], [], []>, precision = #tpu.contract_precision<fp32>} : vector<9x32xf32>, vector<32x48xf32>, vector<9x48xf32> -> vector<9x48xf32>
    %1009 = vector.broadcast %9 : vector<1x48xf32> to vector<9x48xf32>
    %1010 = arith.addf %1008, %1009 : vector<9x48xf32>
    %c0_781 = arith.constant 0 : index
    %c0_782 = arith.constant 0 : index
    %1011 = vector.load %arg14[%c0_781, %c0_782] : memref<1x48xf32, #tpu.memory_space<vmem>>, vector<1x48xf32>
    %c0_783 = arith.constant 0 : index
    %c0_784 = arith.constant 0 : index
    %1012 = vector.load %arg15[%c0_783, %c0_784] : memref<1x48xf32, #tpu.memory_space<vmem>>, vector<1x48xf32>
    %cst_785 = arith.constant dense<0.000000e+00> : vector<9xf32>
    %1013 = vector.multi_reduction <add>, %1010, %cst_785 [1] : vector<9x48xf32> to vector<9xf32>
    %1014 = vector.shape_cast %1013 : vector<9xf32> to vector<9x1xf32>
    %cst_786 = arith.constant 4.800000e+01 : f32
    %1015 = vector.broadcast %cst_786 : f32 to vector<9x1xf32>
    %1016 = arith.divf %1014, %1015 : vector<9x1xf32>
    %1017 = vector.broadcast %1016 : vector<9x1xf32> to vector<9x48xf32>
    %1018 = arith.subf %1010, %1017 : vector<9x48xf32>
    %1019 = arith.mulf %1018, %1018 : vector<9x48xf32>
    %cst_787 = arith.constant dense<0.000000e+00> : vector<9xf32>
    %1020 = vector.multi_reduction <add>, %1019, %cst_787 [1] : vector<9x48xf32> to vector<9xf32>
    %1021 = vector.shape_cast %1020 : vector<9xf32> to vector<9x1xf32>
    %cst_788 = arith.constant 4.800000e+01 : f32
    %1022 = vector.broadcast %cst_788 : f32 to vector<9x1xf32>
    %1023 = arith.divf %1021, %1022 : vector<9x1xf32>
    %1024 = vector.broadcast %1016 : vector<9x1xf32> to vector<9x48xf32>
    %1025 = arith.subf %1010, %1024 : vector<9x48xf32>
    %cst_789 = arith.constant 9.99999997E-7 : f32
    %1026 = vector.broadcast %cst_789 : f32 to vector<9x1xf32>
    %1027 = arith.addf %1023, %1026 : vector<9x1xf32>
    %1028 = math.rsqrt %1027 : vector<9x1xf32>
    %1029 = vector.broadcast %1028 : vector<9x1xf32> to vector<9x48xf32>
    %1030 = arith.mulf %1025, %1029 : vector<9x48xf32>
    %1031 = vector.broadcast %1011 : vector<1x48xf32> to vector<9x48xf32>
    %1032 = arith.mulf %1030, %1031 : vector<9x48xf32>
    %1033 = vector.broadcast %1012 : vector<1x48xf32> to vector<9x48xf32>
    %1034 = arith.addf %1032, %1033 : vector<9x48xf32>
    %c0_790 = arith.constant 0 : index
    %c0_791 = arith.constant 0 : index
    %c0_792 = arith.constant 0 : index
    %1035 = vector.load %arg16[%c0_790, %c0_791, %c0_792] : memref<1x9x48xf32, #tpu.memory_space<vmem>>, vector<1x9x48xf32>
    %1036 = vector.shape_cast %1035 : vector<1x9x48xf32> to vector<9x48xf32>
    %1037 = vector.shape_cast %1034 : vector<9x48xf32> to vector<1x9x48xf32>
    tpu.vector_store %arg16[%c0_790, %c0_791, %c0_792], %1037 {strides = array<i32>} : memref<1x9x48xf32, #tpu.memory_space<vmem>>, vector<1x9x48xf32>,
    return
  }
  func.func @transform_0(%arg0: i32) -> (i32, i32, i32, i32, i32) {
    %c0_i32 = arith.constant 0 : i32
    %c0_i32_0 = arith.constant 0 : i32
    %c0_i32_1 = arith.constant 0 : i32
    %c0_i32_2 = arith.constant 0 : i32
    %c0_i32_3 = arith.constant 0 : i32
    return %arg0, %c0_i32, %c0_i32_0, %c0_i32_1, %c0_i32_2 : i32, i32, i32, i32, i32
  }
  func.func @transform_1(%arg0: i32) -> (i32, i32) {
    %c0_i32 = arith.constant 0 : i32
    %c0_i32_0 = arith.constant 0 : i32
    %c0_i32_1 = arith.constant 0 : i32
    return %c0_i32, %c0_i32_0 : i32, i32
  }
  func.func @transform_2(%arg0: i32) -> (i32, i32) {
    %c0_i32 = arith.constant 0 : i32
    %c0_i32_0 = arith.constant 0 : i32
    %c0_i32_1 = arith.constant 0 : i32
    return %c0_i32, %c0_i32_0 : i32, i32
  }
  func.func @transform_3(%arg0: i32) -> (i32, i32) {
    %c0_i32 = arith.constant 0 : i32
    %c0_i32_0 = arith.constant 0 : i32
    %c0_i32_1 = arith.constant 0 : i32
    return %c0_i32, %c0_i32_0 : i32, i32
  }
  func.func @transform_4(%arg0: i32) -> (i32, i32) {
    %c0_i32 = arith.constant 0 : i32
    %c0_i32_0 = arith.constant 0 : i32
    %c0_i32_1 = arith.constant 0 : i32
    return %c0_i32, %c0_i32_0 : i32, i32
  }
  func.func @transform_5(%arg0: i32) -> (i32, i32) {
    %c0_i32 = arith.constant 0 : i32
    %c0_i32_0 = arith.constant 0 : i32
    %c0_i32_1 = arith.constant 0 : i32
    return %c0_i32, %c0_i32_0 : i32, i32
  }
  func.func @transform_6(%arg0: i32) -> (i32, i32) {
    %c0_i32 = arith.constant 0 : i32
    %c0_i32_0 = arith.constant 0 : i32
    %c0_i32_1 = arith.constant 0 : i32
    return %c0_i32, %c0_i32_0 : i32, i32
  }
  func.func @transform_7(%arg0: i32) -> (i32, i32) {
    %c0_i32 = arith.constant 0 : i32
    %c0_i32_0 = arith.constant 0 : i32
    %c0_i32_1 = arith.constant 0 : i32
    return %c0_i32, %c0_i32_0 : i32, i32
  }
  func.func @transform_8(%arg0: i32) -> (i32, i32) {
    %c0_i32 = arith.constant 0 : i32
    %c0_i32_0 = arith.constant 0 : i32
    %c0_i32_1 = arith.constant 0 : i32
    return %c0_i32, %c0_i32_0 : i32, i32
  }
  func.func @transform_9(%arg0: i32) -> (i32, i32) {
    %c0_i32 = arith.constant 0 : i32
    %c0_i32_0 = arith.constant 0 : i32
    %c0_i32_1 = arith.constant 0 : i32
    return %c0_i32, %c0_i32_0 : i32, i32
  }
  func.func @transform_10(%arg0: i32) -> (i32, i32) {
    %c0_i32 = arith.constant 0 : i32
    %c0_i32_0 = arith.constant 0 : i32
    %c0_i32_1 = arith.constant 0 : i32
    return %c0_i32, %c0_i32_0 : i32, i32
  }
  func.func @transform_11(%arg0: i32) -> (i32, i32) {
    %c0_i32 = arith.constant 0 : i32
    %c0_i32_0 = arith.constant 0 : i32
    %c0_i32_1 = arith.constant 0 : i32
    return %c0_i32, %c0_i32_0 : i32, i32
  }
  func.func @transform_12(%arg0: i32) -> (i32, i32) {
    %c0_i32 = arith.constant 0 : i32
    %c0_i32_0 = arith.constant 0 : i32
    %c0_i32_1 = arith.constant 0 : i32
    return %c0_i32, %c0_i32_0 : i32, i32
  }
  func.func @transform_13(%arg0: i32) -> (i32, i32) {
    %c0_i32 = arith.constant 0 : i32
    %c0_i32_0 = arith.constant 0 : i32
    %c0_i32_1 = arith.constant 0 : i32
    return %c0_i32, %c0_i32_0 : i32, i32
  }
  func.func @transform_14(%arg0: i32) -> (i32, i32) {
    %c0_i32 = arith.constant 0 : i32
    %c0_i32_0 = arith.constant 0 : i32
    %c0_i32_1 = arith.constant 0 : i32
    return %c0_i32, %c0_i32_0 : i32, i32
  }
  func.func @transform_15(%arg0: i32) -> (i32, i32, i32) {
    %c0_i32 = arith.constant 0 : i32
    %c0_i32_0 = arith.constant 0 : i32
    %c0_i32_1 = arith.constant 0 : i32
    return %arg0, %c0_i32, %c0_i32_0 : i32, i32, i32
  }
}

</mosaic_0001>

<bundles_post_ra>
// kernel: _lambda_.1
= control target key start
LH: loop header
LB: loop body
LE: loop exit
PB: predicated region body
PF: predicated region fallthrough
CT: control target
= control target key end

     0   :  { %s7134_s18 = smov 0   ;;  %s9647_s0 = inlined_call_operand.vmem [shape: f32[2,2,16,8,4], index: 0, kind: input, shape index: {}]   ;;  %s9648_s1 = inlined_call_operand.vmem [shape: f32[4,32], index: 1, kind: input, shape index: {}]   ;;  %s9649_s2 = inlined_call_operand.vmem [shape: f32[1,32], index: 2, kind: input, shape index: {}]   ;;  %s9650_s3 = inlined_call_operand.vmem [shape: f32[49,32], index: 3, kind: input, shape index: {}]   ;;  %s9651_s4 = inlined_call_operand.vmem [shape: f32[1,32], index: 4, kind: input, shape index: {}]   ;;  %s9652_s5 = inlined_call_operand.vmem [shape: f32[1,32], index: 5, kind: input, shape index: {}]   ;;  %s9653_s6 = inlined_call_operand.vmem [shape: f32[1,32], index: 6, kind: input, shape index: {}]   ;;  %s9654_s7 = inlined_call_operand.vmem [shape: f32[49,32], index: 7, kind: input, shape index: {}]   ;;  %s9655_s8 = inlined_call_operand.vmem [shape: f32[1,32], index: 8, kind: input, shape index: {}]   ;;  %s9656_s9 = inlined_call_operand.vmem [shape: f32[1,32], index: 9, kind: input, shape index: {}]   ;;  %s9657_s10 = inlined_call_operand.vmem [shape: f32[1,32], index: 10, kind: input, shape index: {}]   ;;  %s9658_s11 = inlined_call_operand.vmem [shape: f32[32,48], index: 11, kind: input, shape index: {}]   ;;  %s9659_s12 = inlined_call_operand.vmem [shape: f32[1,48], index: 12, kind: input, shape index: {}]   ;;  %s9660_s13 = inlined_call_operand.vmem [shape: f32[1,48], index: 13, kind: input, shape index: {}]   ;;  %s9661_s14 = inlined_call_operand.vmem [shape: f32[1,48], index: 14, kind: input, shape index: {}]   ;;  %s9662_s15 = inlined_call_operand.vmem [shape: f32[2,9,48], index: 15, kind: output, shape index: {}]  }
   0x1 LB: > { %s6075_s19 = sadd.s32 4294967295, %s7050_s18   ;;  %p6079_p0 = scmp.ge.s32.totalorder %s7050_s18, 1  ;;  %s7050_s18 = sphi %s7134_s18, %s25_s18  }
   0x2   : > { %p437_p1 = scmp.lt.s32.totalorder %s7050_s18, 3 }
   0x4   : > { %p438_p2 = pnand %p6079_p0, %p437_p1 }
   0x6   : > { %441 = sbr.rel (%p438_p2) target bundleno = 1956 (0x7a4), region = 80 }
   0xd   : > { %v602_v0 = vld [vmem:[%s9648_s1] sm:$0xf]  ;;  %vm694_vm0 = vcmask 1043456   ;;  %p485_p3 = scmp.lt.s32.totalorder %s6075_s19, 1  ;;  %vm645_vm1 = vcmask 31744   ;;  %vm495_vm2 = vcmask 261120  }
   0xe   : > { %v696_v1 = vsel %vm694_vm0, %v602_v0, 0  ;;  %vm497_vm3 = vcmask 254976   ;;  %vm4260_vm4 = vcmask 260096   ;;  %vm577_vm5 = vcmask 259072  }
   0xf   : > { %v7145_v2 = vand.u32 4294901760, %v696_v1  ;;  %s10236_s19 = smov (!%p485_p3, %s6075_s19), 1  ;;  %vm4491_vm6 = vcmask 1040384   ;;  %vm4499_vm7 = vcmask 1041408   ;;  %vm4507_vm8 = vcmask 1042432  }
  0x10   : > { %s6114_s22 = sshll.u32 %s10236_s19, 8  ;;  %vm4533_vm9 = vcmask 256000   ;;  %vm4530_vm10 = vcmask 257024   ;;  %vm5977_vm11 = vcmask 385024   ;;  %vm5973_vm12 = vcmask 392192   ;;  %s6115_s17 = sshll.u32 %s10236_s19, 4 }
  0x11   : > { %6782 = vmatprep.subr.mxu1 %v7145_v2  ;;  %6356 = vmatprep.subr.mxu0 %v7145_v2  ;;  %v7153_v3 = vsub.f32 %v696_v1, %v7145_v2  ;;  %s7160_s25 = scalar_lea.vmem %s9647_s0, %s6114_s22  ;;  %s494_s24 = scalar_lea.vmem %s9662_s15, %s6115_s17 }
  0x12   : > { %6783 = vmatpush3.msra.mxu1 %v7145_v2  ;;  %6357 = vmatpush3.msra.mxu0 %v7145_v2  ;;  %v623_v4 = vld [vmem:[%s7160_s25] sm:$0xff]  ;;  %v629_v5 = vld [vmem:[%s7160_s25 + $0x30] sm:$0xff]  ;;  %v624_v6 = vld [vmem:[%s7160_s25 + $0x8] sm:$0xff] }
  0x13   : > { %6512 = vmatprep.subr.mxu1 %v7145_v2  ;;  %v7167_v7 = vand.u32 4294901760, %v7153_v3  ;;  %v647_v8 = vsel %vm645_vm1, %v623_v4, 0  ;;  %v665_v9 = vsel %vm645_vm1, %v629_v5, 0  ;;  %v650_v10 = vsel %vm645_vm1, %v624_v6, 0  ;;  %v630_v11 = vld [vmem:[%s7160_s25 + $0x38] sm:$0xff]  ;;  %v625_v12 = vld [vmem:[%s7160_s25 + $0x10] sm:$0xff] }
  0x14   : > { %v631_v13 = vld [vmem:[%s7160_s25 + $0x40] sm:$0xff]  ;;  %v7175_v14 = vand.u32 4294901760, %v647_v8  ;;  %v7177_v15 = vand.u32 4294901760, %v665_v9  ;;  %v7179_v16 = vand.u32 4294901760, %v650_v10  ;;  %v668_v17 = vsel %vm645_vm1, %v630_v11, 0  ;;  %v626_v18 = vld [vmem:[%s7160_s25 + $0x18] sm:$0xff] }
  0x15   : > { %v632_v19 = vld [vmem:[%s7160_s25 + $0x48] sm:$0xff]  ;;  %v7184_v20 = vand.u32 4294901760, %v668_v17  ;;  %v653_v21 = vsel %vm645_vm1, %v625_v12, 0  ;;  %v671_v22 = vsel %vm645_vm1, %v631_v13, 0  ;;  %v656_v23 = vsel %vm645_vm1, %v626_v18, 0  ;;  %v627_v48 = vld [vmem:[%s7160_s25 + $0x20] sm:$0xff] }
  0x16   : > { %9848 = vst [vmem:[#allocation4_spill] sm:$0xff] %v7175_v14  ;;  %9849 = vst [vmem:[#allocation5_spill] sm:$0xff] %v7177_v15  ;;  %v7190_v24 = vsub.f32 %v647_v8, %v7175_v14  ;;  %v7193_v25 = vsub.f32 %v665_v9, %v7177_v15  ;;  %v7196_v26 = vsub.f32 %v650_v10, %v7179_v16  ;;  %v7198_v27 = vand.u32 4294901760, %v653_v21  ;;  %v633_v49 = vld [vmem:[%s7160_s25 + $0x50] sm:$0xff]  ;;  %v628_v50 = vld [vmem:[%s7160_s25 + $0x28] sm:$0xff] }
  0x17   : > { %9850 = vst [vmem:[#allocation6_spill] sm:$0xff] %v7179_v16  ;;  %9851 = vst [vmem:[#allocation7_spill] sm:$0xff] %v7184_v20  ;;  %v7201_v28 = vsub.f32 %v668_v17, %v7184_v20  ;;  %v7203_v29 = vand.u32 4294901760, %v671_v22  ;;  %v7205_v30 = vand.u32 4294901760, %v656_v23  ;;  %v674_v31 = vsel %vm645_vm1, %v632_v19, 0  ;;  %v634_v59 = vld [vmem:[%s7160_s25 + $0x58] sm:$0xff] }
  0x18   : > { %9852 = vst [vmem:[#allocation8_spill] sm:$0xff] %v7198_v27  ;;  %v9680_v32 = vand.u32 4294901760, %v7190_v24  ;;  %v9672_v33 = vand.u32 4294901760, %v7193_v25  ;;  %v9679_v34 = vand.u32 4294901760, %v7196_v26  ;;  %v7212_v35 = vsub.f32 %v653_v21, %v7198_v27  ;;  %v635_v0 = vld [vmem:[%s7160_s25 + $0x60] sm:$0xff]  ;;  %v636_v12 = vld [vmem:[%s7160_s25 + $0x68] sm:$0xff] }
  0x19   : > { %9853 = vst [vmem:[#allocation9_spill] sm:$0xff] %v7203_v29  ;;  %9854 = vst [vmem:[#allocation10_spill] sm:$0xff] %v7205_v30  ;;  %v9671_v36 = vand.u32 4294901760, %v7201_v28  ;;  %v7216_v37 = vsub.f32 %v671_v22, %v7203_v29  ;;  %v7219_v38 = vsub.f32 %v656_v23, %v7205_v30  ;;  %v7221_v39 = vand.u32 4294901760, %v674_v31  ;;  %v637_v13 = vld [vmem:[%s7160_s25 + $0x70] sm:$0xff] }
  0x1a   : > { %v767_v40 = vsub.f32 %v7190_v24, %v9680_v32  ;;  %v827_v41 = vsub.f32 %v7193_v25, %v9672_v33  ;;  %v777_v42 = vsub.f32 %v7196_v26, %v9679_v34  ;;  %v9678_v43 = vand.u32 4294901760, %v7212_v35 }
  0x1b   : > { %9855 = vst [vmem:[#allocation11_spill] sm:$0xff] %v7221_v39  ;;  %v837_v44 = vsub.f32 %v7201_v28, %v9671_v36  ;;  %v9669_v45 = vand.u32 4294901760, %v7216_v37  ;;  %v9676_v46 = vand.u32 4294901760, %v7219_v38  ;;  %v7239_v47 = vsub.f32 %v674_v31, %v7221_v39 }
  0x1c   : > { %v768_v51 = vand.u32 4294901760, %v767_v40  ;;  %v828_v52 = vand.u32 4294901760, %v827_v41  ;;  %v778_v53 = vand.u32 4294901760, %v777_v42  ;;  %v787_v54 = vsub.f32 %v7212_v35, %v9678_v43  ;;  %v638_v41 = vld [vmem:[%s7160_s25 + $0x78] sm:$0xff] }
  0x1d   : > { %v838_v55 = vand.u32 4294901760, %v837_v44  ;;  %v847_v56 = vsub.f32 %v7216_v37, %v9669_v45  ;;  %v797_v57 = vsub.f32 %v7219_v38, %v9676_v46  ;;  %v9667_v58 = vand.u32 4294901760, %v7239_v47 }
  0x1e   : > { %6358 = vmatprep.mubr.f32.mxu0 %v768_v51  ;;  %6367 = vmatprep.mubr.f32.mxu1 %v828_v52  ;;  %v788_v60 = vand.u32 4294901760, %v787_v54  ;;  %v659_v61 = vsel %vm645_vm1, %v627_v48, 0  ;;  %v677_v62 = vsel %vm645_vm1, %v633_v49, 0  ;;  %v662_v63 = vsel %vm645_vm1, %v628_v50, 0 }
  0x1f   : > { %6359 = vmatmul.mubr.f32.vlgmr.msra.gmra.mrb[0].mxu0 %v778_v53  ;;  %6368 = vmatmul.mubr.f32.vlgmr.msra.gmra.mrb[0].mxu1 %v838_v55  ;;  %v848_v1 = vand.u32 4294901760, %v847_v56  ;;  %v798_v4 = vand.u32 4294901760, %v797_v57  ;;  %v857_v5 = vsub.f32 %v7239_v47, %v9667_v58  ;;  %v7262_v6 = vand.u32 4294901760, %v659_v61 }
  0x20   : > { %6513 = vmatpush3.msra.mxu1 %v7145_v2  ;;  %6361 = vmatprep.mubr.f32.mxu0 %v788_v60  ;;  %v7265_v8 = vand.u32 4294901760, %v677_v62  ;;  %v7267_v9 = vand.u32 4294901760, %v662_v63  ;;  %v680_v10 = vsel %vm645_vm1, %v634_v59, 0  ;;  %v928_v11 = vsub.f32 %v7153_v3, %v7167_v7 }
  0x21   : > { %9856 = vst [vmem:[#allocation12_spill] sm:$0xff] %v7262_v6  ;;  %6370 = vmatprep.mubr.f32.mxu1 %v848_v1  ;;  %v858_v17 = vand.u32 4294901760, %v857_v5  ;;  %v7275_v18 = vsub.f32 %v659_v61, %v7262_v6  ;;  %v7277_v19 = vand.u32 4294901760, %v680_v10  ;;  %v683_v21 = vsel %vm645_vm1, %v635_v0, 0 }
  0x22   : > { %9857 = vst [vmem:[#allocation13_spill] sm:$0xff] %v7265_v8  ;;  %9858 = vst [vmem:[#allocation14_spill] sm:$0xff] %v7267_v9  ;;  %v7281_v22 = vsub.f32 %v677_v62, %v7265_v8  ;;  %v7284_v23 = vsub.f32 %v662_v63, %v7267_v9  ;;  %v7286_v31 = vand.u32 4294901760, %v928_v11  ;;  %v7288_v40 = vand.u32 4294901760, %v683_v21  ;;  %v6085_v63 = vld [vmem:[%s7160_s25 + $0x80] sm:$0xff] }
  0x23   : > { %6362 = vmatmul.mubr.f32.gmra.mrb[2].mxu0 %v798_v4  ;;  %6371 = vmatmul.mubr.f32.gmra.mrb[2].mxu1 %v858_v17  ;;  %v9675_v42 = vand.u32 4294901760, %v7275_v18  ;;  %v7293_v44 = vsub.f32 %v680_v10, %v7277_v19  ;;  %v686_v48 = vsel %vm645_vm1, %v636_v12, 0  ;;  %v689_v49 = vsel %vm645_vm1, %v637_v13, 0  ;;  %v6086_v10 = vld [vmem:[%s7160_s25 + $0x88] sm:$0xff] }
  0x24   : > { %v9666_v50 = vand.u32 4294901760, %v7281_v22  ;;  %v9673_v51 = vand.u32 4294901760, %v7284_v23  ;;  %6382 = vmatprep.subr.mxu0 %v7286_v31  ;;  %v7301_v52 = vsub.f32 %v683_v21, %v7288_v40  ;;  %v7303_v53 = vand.u32 4294901760, %v686_v48  ;;  %6538 = vmatprep.subr.mxu1 %v7286_v31  ;;  %v6087_v21 = vld [vmem:[%s7160_s25 + $0x90] sm:$0xff] }
  0x25   : > { %v807_v54 = vsub.f32 %v7275_v18, %v9675_v42  ;;  %v9664_v55 = vand.u32 4294901760, %v7293_v44  ;;  %6383 = vmatpush3.msra.mxu0 %v7286_v31  ;;  %v7311_v56 = vand.u32 4294901760, %v689_v49  ;;  %v692_v57 = vsel %vm645_vm1, %v638_v41, 0  ;;  %v6093_v42 = vld [vmem:[%s7160_s25 + $0xc0] sm:$0xff] }
  0x26   : > { %v867_v59 = vsub.f32 %v7281_v22, %v9666_v50  ;;  %v817_v60 = vsub.f32 %v7284_v23, %v9673_v51  ;;  %v9663_v61 = vand.u32 4294901760, %v7301_v52  ;;  %v7322_v62 = vsub.f32 %v686_v48, %v7303_v53  ;;  %6408 = vmatprep.subr.mxu0 %v7153_v3  ;;  %v6092_v51 = vld [vmem:[%s7160_s25 + $0xb8] sm:$0xff] }
  0x27   : > { %v808_v0 = vand.u32 4294901760, %v807_v54  ;;  %v877_v1 = vsub.f32 %v7293_v44, %v9664_v55  ;;  %v7330_v4 = vsub.f32 %v689_v49, %v7311_v56  ;;  %v7332_v5 = vand.u32 4294901760, %v692_v57 }
  0x28   : > { %v868_v11 = vand.u32 4294901760, %v867_v59  ;;  %v818_v12 = vand.u32 4294901760, %v817_v60  ;;  %v887_v13 = vsub.f32 %v7301_v52, %v9663_v61  ;;  %v9665_v17 = vand.u32 4294901760, %v7322_v62  ;;  %v6088_v59 = vld [vmem:[%s7160_s25 + $0x98] sm:$0xff] }
  0x29   : > { %6364 = vmatprep.mubr.f32.mxu0 %v808_v0  ;;  %v878_v41 = vand.u32 4294901760, %v877_v1  ;;  %v9668_v48 = vand.u32 4294901760, %v7330_v4  ;;  %v7342_v49 = vsub.f32 %v692_v57, %v7332_v5  ;;  %v1839_v54 = vsel %vm645_vm1, %v6085_v63, 0 }
  0x2a   : > { %6373 = vmatprep.mubr.f32.mxu1 %v868_v11  ;;  %6365 = vmatmul.mubr.f32.gmra.mrb[4].mxu0 %v818_v12  ;;  %v888_v60 = vand.u32 4294901760, %v887_v13  ;;  %v897_v61 = vsub.f32 %v7322_v62, %v9665_v17  ;;  %v7349_v55 = vand.u32 4294901760, %v1839_v54  ;;  %v1842_v0 = vsel %vm645_vm1, %v6086_v10, 0  ;;  %v6089_v12 = vld [vmem:[%s7160_s25 + $0xa0] sm:$0xff]  ;;  %v6090_v13 = vld [vmem:[%s7160_s25 + $0xa8] sm:$0xff] }
  0x2b   : > { %6374 = vmatmul.mubr.f32.gmra.mrb[4].mxu1 %v878_v41  ;;  %6384 = vmatprep.mubr.f32.mxu0 %v7175_v14  ;;  %v907_v57 = vsub.f32 %v7330_v4, %v9668_v48  ;;  %v9670_v63 = vand.u32 4294901760, %v7342_v49  ;;  %v7357_v1 = vand.u32 4294901760, %v1842_v0  ;;  %v1845_v11 = vsel %vm645_vm1, %v6087_v21, 0 }
  0x2c   : > { %6376 = vmatprep.mubr.f32.mxu1 %v888_v60  ;;  %v898_v17 = vand.u32 4294901760, %v897_v61  ;;  %v7363_v10 = vsub.f32 %v1839_v54, %v7349_v55  ;;  %v7365_v41 = vand.u32 4294901760, %v1845_v11  ;;  %v1848_v50 = vsel %vm645_vm1, %v6088_v59, 0  ;;  %v6091_v60 = vld [vmem:[%s7160_s25 + $0xb0] sm:$0xff] }
  0x2d   : > { %v908_v58 = vand.u32 4294901760, %v907_v57  ;;  %v917_v48 = vsub.f32 %v7342_v49, %v9670_v63  ;;  %v7372_v45 = vsub.f32 %v1842_v0, %v7357_v1  ;;  %v7374_v21 = vand.u32 4294901760, %v1848_v50 }
  0x2e   : > { %6385 = vmatmul.mubr.f32.vlgmr.msra.gmra.mrb[0].mxu0 %v7179_v16  ;;  %v9674_v61 = vand.u32 4294901760, %v7363_v10  ;;  %v7380_v54 = vsub.f32 %v1845_v11, %v7365_v41  ;;  %v1851_v59 = vsel %vm645_vm1, %v6089_v12, 0  ;;  %v1854_v57 = vsel %vm645_vm1, %v6090_v13, 0 }
  0x2f   : > { %6377 = vmatmul.mubr.f32.gmra.mrb[6].mxu1 %v898_v17  ;;  %6387 = vmatprep.mubr.f32.mxu0 %v7198_v27  ;;  %v918_v0 = vand.u32 4294901760, %v917_v48  ;;  %v9677_v63 = vand.u32 4294901760, %v7372_v45  ;;  %v7387_v36 = vsub.f32 %v1848_v50, %v7374_v21  ;;  %v7389_v33 = vand.u32 4294901760, %v1851_v59  ;;  %v6096_v27 = vld [vmem:[%s7160_s25 + $0xd8] sm:$0xff] }
  0x30   : > { %6379 = vmatprep.mubr.f32.mxu1 %v908_v58  ;;  %v1955_v11 = vsub.f32 %v7363_v10, %v9674_v61  ;;  %v9681_v12 = vand.u32 4294901760, %v7380_v54  ;;  %v7396_v17 = vand.u32 4294901760, %v1854_v57  ;;  %v1857_v13 = vsel %vm645_vm1, %v6091_v60, 0  ;;  %6409 = vmatpush3.msra.mxu0 %v7153_v3 }
  0x31   : > { %9859 = vst [vmem:[#allocation15_spill] sm:$0xff] %v7387_v36  ;;  %v1965_v50 = vsub.f32 %v7372_v45, %v9677_v63  ;;  %v9686_v48 = vand.u32 4294901760, %v7387_v36  ;;  %v7405_v58 = vsub.f32 %v1851_v59, %v7389_v33  ;;  %v7407_v61 = vand.u32 4294901760, %v1857_v13  ;;  %6434 = vmatprep.subr.mxu0 %v7145_v2 }
  0x32   : > { %6388 = vmatmul.mubr.f32.gmra.mrb[2].mxu0 %v7205_v30  ;;  %v1956_v60 = vand.u32 4294901760, %v1955_v11  ;;  %v1975_v46 = vsub.f32 %v7380_v54, %v9681_v12  ;;  %v7416_v63 = vsub.f32 %v1854_v57, %v7396_v17  ;;  %v1860_v43 = vsel %vm645_vm1, %v6092_v51, 0  ;;  %v6094_v12 = vld [vmem:[%s7160_s25 + $0xc8] sm:$0xff]  ;;  %v6095_v30 = vld [vmem:[%s7160_s25 + $0xd0] sm:$0xff] }
  0x33   : > { %9860 = vst [vmem:[#allocation16_spill] sm:$0xff] %v7405_v58  ;;  %6380 = vmatmul.mubr.f32.gmra.mrb[8].mxu1 %v918_v0  ;;  %6390 = vmatprep.mubr.f32.mxu0 %v7262_v6  ;;  %v1966_v59 = vand.u32 4294901760, %v1965_v50  ;;  %v1985_v34 = vsub.f32 %v7387_v36, %v9686_v48  ;;  %v9691_v11 = vand.u32 4294901760, %v7405_v58  ;;  %v7425_v32 = vsub.f32 %v1857_v13, %v7407_v61  ;;  %v6100_v36 = vld [vmem:[%s7160_s25 + $0xf8] sm:$0xff] }
  0x34   : > { %9861 = vst [vmem:[#allocation17_spill] sm:$0xff] %v7416_v63  ;;  %6514 = vmatprep.mubr.f32.mxu1 %v1956_v60  ;;  %v1976_v57 = vand.u32 4294901760, %v1975_v46  ;;  %v9696_v51 = vand.u32 4294901760, %v7416_v63  ;;  %v7430_v0 = vand.u32 4294901760, %v1860_v43  ;;  %v1863_v6 = vsel %vm645_vm1, %v6093_v42, 0 }
  0x35   : > { %9862 = vst [vmem:[#allocation18_spill] sm:$0xff] %v7425_v32  ;;  %v1995_v50 = vsub.f32 %v7405_v58, %v9691_v11  ;;  %v9701_v48 = vand.u32 4294901760, %v7425_v32  ;;  %v7437_v13 = vand.u32 4294901760, %v1863_v6  ;;  %v1866_v42 = vsel %vm645_vm1, %v6094_v12, 0  ;;  %v6099_v58 = vld [vmem:[%s7160_s25 + $0xf0] sm:$0xff] }
  0x36   : > { %6391 = vmatmul.mubr.f32.gmra.mrb[4].mxu0 %v7267_v9  ;;  %v2005_v46 = vsub.f32 %v7416_v63, %v9696_v51  ;;  %v7445_v60 = vsub.f32 %v1860_v43, %v7430_v0  ;;  %v1869_v16 = vsel %vm645_vm1, %v6095_v30, 0  ;;  %v1986_v11 = vand.u32 4294901760, %v1985_v34  ;;  %v6097_v43 = vld [vmem:[%s7160_s25 + $0xe0] sm:$0xff]  ;;  %v6098_v63 = vld [vmem:[%s7160_s25 + $0xe8] sm:$0xff] }
  0x37   : > { %6515 = vmatmul.mubr.f32.vlgmr.msra.gmra.mrb[10].mxu1 %v1966_v59  ;;  %6393 = vmatprep.mubr.f32.mxu0 %v7177_v15  ;;  %v2015_v9 = vsub.f32 %v7425_v32, %v9701_v48  ;;  %v7454_v14 = vsub.f32 %v1863_v6, %v7437_v13  ;;  %v7456_v51 = vand.u32 4294901760, %v1866_v42  ;;  %v1996_v30 = vand.u32 4294901760, %v1995_v50 }
  0x38   : > { %6539 = vmatpush3.msra.mxu1 %v7286_v31  ;;  %6517 = vmatprep.mubr.f32.mxu1 %v1976_v57  ;;  %v9710_v12 = vand.u32 4294901760, %v7445_v60  ;;  %v7462_v59 = vand.u32 4294901760, %v1869_v16  ;;  %v1872_v34 = vsel %vm645_vm1, %v6096_v27, 0  ;;  %v2006_v15 = vand.u32 4294901760, %v2005_v46 }
  0x39   : > { %v7467_v6 = vsub.f32 %v1866_v42, %v7456_v51  ;;  %v7469_v32 = vand.u32 4294901760, %v1872_v34  ;;  %6564 = vmatprep.subr.mxu1 %v7153_v3  ;;  %v1875_v57 = vsel %vm645_vm1, %v6097_v43, 0  ;;  %v1878_v50 = vsel %vm645_vm1, %v6098_v63, 0 }
  0x3a   : > { %6394 = vmatmul.mubr.f32.gmra.mrb[6].mxu0 %v7184_v20  ;;  %v2025_v31 = vsub.f32 %v7445_v60, %v9710_v12  ;;  %v7478_v27 = vsub.f32 %v1869_v16, %v7462_v59  ;;  %v2016_v46 = vand.u32 4294901760, %v2015_v9  ;;  %v7487_v20 = vand.u32 4294901760, %v1875_v57 }
  0x3b   : > { %6518 = vmatmul.mubr.f32.gmra.mrb[12].mxu1 %v1986_v11  ;;  %6396 = vmatprep.mubr.f32.mxu0 %v7203_v29  ;;  %v7485_v48 = vsub.f32 %v1872_v34, %v7469_v32  ;;  %v9863_v16 = vand.u32 4294901760, %v7454_v14  ;;  %v7494_v63 = vand.u32 4294901760, %v1878_v50  ;;  %v1881_v11 = vsel %vm645_vm1, %v6099_v58, 0 }
  0x3c   : > { %6520 = vmatprep.mubr.f32.mxu1 %v1996_v30  ;;  %v7498_v9 = vsub.f32 %v1875_v57, %v7487_v20  ;;  %v2026_v34 = vand.u32 4294901760, %v2025_v31  ;;  %v7501_v42 = vand.u32 4294901760, %v1881_v11  ;;  %v1884_v30 = vsel %vm645_vm1, %v6100_v36, 0 }
  0x3d   : > { %v2035_v12 = vsub.f32 %v7454_v14, %v9863_v16  ;;  %v9864_v16 = vand.u32 4294901760, %v7467_v6  ;;  %v9717_v29 = vand.u32 4294901760, %v7485_v48  ;;  %v7510_v58 = vsub.f32 %v1878_v50, %v7494_v63 }
  0x3e   : > { %6397 = vmatmul.mubr.f32.gmra.mrb[8].mxu0 %v7221_v39  ;;  %v7512_v57 = vand.u32 4294901760, %v1884_v30  ;;  %v9865_v39 = vand.u32 4294901760, %v7478_v27 }
  0x3f   : > { %6521 = vmatmul.mubr.f32.gmra.mrb[14].mxu1 %v2006_v15  ;;  %6399 = vmatprep.mubr.f32.mxu0 %v7265_v8  ;;  %v2045_v43 = vsub.f32 %v7467_v6, %v9864_v16  ;;  %v2036_v31 = vand.u32 4294901760, %v2035_v12  ;;  %v2074_v15 = vand.u32 4294901760, %v7498_v9  ;;  %v7519_v8 = vsub.f32 %v1881_v11, %v7501_v42 }
  0x40   : > { %6523 = vmatprep.mubr.f32.mxu1 %v2016_v46  ;;  %v2055_v36 = vsub.f32 %v7478_v27, %v9865_v39  ;;  %v2065_v46 = vsub.f32 %v7485_v48, %v9717_v29  ;;  %v9718_v12 = vand.u32 4294901760, %v7510_v58  ;;  %v7528_v16 = vsub.f32 %v1884_v30, %v7512_v57 }
  0x41   : > { %v2046_v50 = vand.u32 4294901760, %v2045_v43  ;;  %v2075_v11 = vsub.f32 %v7498_v9, %v2074_v15 }
  0x42   : > { %6400 = vmatmul.mubr.f32.gmra.mrb[10].mxu0 %v7277_v19  ;;  %v2056_v39 = vand.u32 4294901760, %v2055_v36  ;;  %v2066_v43 = vand.u32 4294901760, %v2065_v46  ;;  %v2085_v29 = vsub.f32 %v7510_v58, %v9718_v12  ;;  %v2104_v30 = vand.u32 4294901760, %v7528_v16 }
  0x43   : > { %6524 = vmatmul.mubr.f32.gmra.mrb[16].mxu1 %v2026_v34  ;;  %6402 = vmatprep.mubr.f32.mxu0 %v7288_v40  ;;  %v2094_v34 = vand.u32 4294901760, %v7519_v8 }
  0x44   : > { %6526 = vmatprep.mubr.f32.mxu1 %v2036_v31  ;;  %v2076_v31 = vand.u32 4294901760, %v2075_v11  ;;  %v2105_v46 = vsub.f32 %v7528_v16, %v2104_v30  ;;  %v9869_v11 = vand.u32 4294901760, %v7219_v38 }
  0x45   : > { %v2095_v36 = vsub.f32 %v7519_v8, %v2094_v34 }
  0x46   : > { %6403 = vmatmul.mubr.f32.gmra.mrb[12].mxu0 %v7303_v53 }
  0x47   : > { %6527 = vmatmul.mubr.f32.gmra.mrb[18].mxu1 %v2046_v50  ;;  %6405 = vmatprep.mubr.f32.mxu0 %v7311_v56  ;;  %v2086_v50 = vand.u32 4294901760, %v2085_v29  ;;  %v2096_v12 = vand.u32 4294901760, %v2095_v36  ;;  %v9867_v29 = vand.u32 4294901760, %v7196_v26  ;;  %v9879_v36 = vand.u32 4294901760, %v7281_v22 }
  0x48   : > { %6529 = vmatprep.mubr.f32.mxu1 %v2056_v39  ;;  %v2106_v39 = vand.u32 4294901760, %v2105_v46  ;;  %v9888_v46 = vld [vmem:[#allocation8_spill] sm:$0xff] }
  0x4a   : > { %6406 = vmatmul.mubr.f32.gmra.mrb[14].mxu0 %v7332_v5 }
  0x4b   : > { %6530 = vmatmul.mubr.f32.gmra.mrb[20].mxu1 %v2066_v43  ;;  %6410 = vmatprep.mubr.f32.mxu0 %v7190_v24  ;;  %v9875_v43 = vand.u32 4294901760, %v7216_v37 }
  0x4c   : > { %6532 = vmatprep.mubr.f32.mxu1 %v2076_v31  ;;  %v9877_v31 = vand.u32 4294901760, %v7239_v47 }
  0x4e   : > { %6411 = vmatmul.mubr.f32.vlgmr.msra.gmra.mrb[0].mxu0 %v7196_v26  ;;  %v9871_v26 = vand.u32 4294901760, %v7284_v23 }
  0x4f   : > { %6533 = vmatmul.mubr.f32.gmra.mrb[22].mxu1 %v2086_v50  ;;  %6413 = vmatprep.mubr.f32.mxu0 %v7212_v35  ;;  %v9880_v50 = vld [vmem:[#allocation18_spill] sm:$0xff] }
  0x50   : > { %6535 = vmatprep.mubr.f32.mxu1 %v2096_v12  ;;  %6435 = vmatpush3.msra.mxu0 %v7145_v2  ;;  %v9868_v12 = vand.u32 4294901760, %v7212_v35  ;;  %v9872_v35 = vand.u32 4294901760, %v7193_v25 }
  0x51   : > { %6460 = vmatprep.subr.mxu0 %v7167_v7 }
  0x52   : > { %6414 = vmatmul.mubr.f32.gmra.mrb[2].mxu0 %v7219_v38  ;;  %v9873_v38 = vand.u32 4294901760, %v7201_v28 }
  0x53   : > { %6536 = vmatmul.mubr.f32.gmra.mrb[24].mxu1 %v2106_v39  ;;  %6416 = vmatprep.mubr.f32.mxu0 %v7275_v18  ;;  %v9889_v39 = vld [vmem:[#allocation10_spill] sm:$0xff] }
  0x54   : > { %6540 = vmatprep.mubr.f32.mxu1 %v7349_v55 }
  0x56   : > { %6417 = vmatmul.mubr.f32.gmra.mrb[4].mxu0 %v7284_v23  ;;  %v9876_v23 = vld [vmem:[#allocation16_spill] sm:$0xff] }
  0x57   : > { %6541 = vmatmul.mubr.f32.vlgmr.msra.gmra.mrb[10].mxu1 %v7357_v1  ;;  %6419 = vmatprep.mubr.f32.mxu0 %v7193_v25  ;;  %v9878_v25 = vld [vmem:[#allocation17_spill] sm:$0xff] }
  0x58   : > { %6565 = vmatpush3.msra.mxu1 %v7153_v3  ;;  %6543 = vmatprep.mubr.f32.mxu1 %v7365_v41  ;;  %v9866_v3 = vand.u32 4294901760, %v7190_v24  ;;  %v9870_v24 = vand.u32 4294901760, %v7275_v18  ;;  %v9874_v18 = vld [vmem:[#allocation15_spill] sm:$0xff] }
  0x59   : > { %6590 = vmatprep.subr.mxu1 %v7145_v2 }
  0x5a   : > { %6420 = vmatmul.mubr.f32.gmra.mrb[6].mxu0 %v7201_v28  ;;  %v9881_v28 = vand.u32 4294901760, %v7293_v44 }
  0x5b   : > { %6544 = vmatmul.mubr.f32.gmra.mrb[12].mxu1 %v7374_v21  ;;  %6422 = vmatprep.mubr.f32.mxu0 %v7216_v37  ;;  %v9882_v37 = vand.u32 4294901760, %v7301_v52 }
  0x5c   : > { %6546 = vmatprep.mubr.f32.mxu1 %v7389_v33 }
  0x5e   : > { %6423 = vmatmul.mubr.f32.gmra.mrb[8].mxu0 %v7239_v47  ;;  %v9883_v47 = vand.u32 4294901760, %v7322_v62 }
  0x5f   : > { %6547 = vmatmul.mubr.f32.gmra.mrb[14].mxu1 %v7396_v17  ;;  %6425 = vmatprep.mubr.f32.mxu0 %v7281_v22  ;;  %v9884_v22 = vand.u32 4294901760, %v7330_v4 }
  0x60   : > { %6549 = vmatprep.mubr.f32.mxu1 %v7407_v61 }
  0x62   : > { %6426 = vmatmul.mubr.f32.gmra.mrb[10].mxu0 %v7293_v44  ;;  %v9719_v44 = vmov 0.0  }
  0x63   : > { %6550 = vmatmul.mubr.f32.gmra.mrb[16].mxu1 %v7430_v0  ;;  %6428 = vmatprep.mubr.f32.mxu0 %v7301_v52  ;;  %539 = vst.msk [vmem:[#allocation2 + $0x150] sm:$0xff] %vm495_vm2, %v9719_v44  ;;  %496 = vst.msk [vmem:[#allocation2] sm:$0xff] %vm495_vm2, %v9719_v44  ;;  %v9885_v52 = vand.u32 4294901760, %v7342_v49 }
  0x64   : > { %6552 = vmatprep.mubr.f32.mxu1 %v7437_v13  ;;  %540 = vst.msk [vmem:[#allocation2 + $0x158] sm:$0x3] %vm497_vm3, %v9719_v44  ;;  %498 = vst.msk [vmem:[#allocation2 + $0x8] sm:$0x3] %vm497_vm3, %v9719_v44 }
  0x65   : > { %499 = vst.msk [vmem:[#allocation2 + $0x10] sm:$0xff] %vm495_vm2, %v9719_v44  ;;  %501 = vst.msk [vmem:[#allocation2 + $0x20] sm:$0xff] %vm495_vm2, %v9719_v44 }
  0x66   : > { %6429 = vmatmul.mubr.f32.gmra.mrb[12].mxu0 %v7322_v62  ;;  %500 = vst.msk [vmem:[#allocation2 + $0x18] sm:$0x3] %vm497_vm3, %v9719_v44  ;;  %502 = vst.msk [vmem:[#allocation2 + $0x28] sm:$0x3] %vm497_vm3, %v9719_v44  ;;  %v9886_v62 = vld [vmem:[#allocation4_spill] sm:$0xff] }
  0x67   : > { %6553 = vmatmul.mubr.f32.gmra.mrb[18].mxu1 %v7456_v51  ;;  %6431 = vmatprep.mubr.f32.mxu0 %v7330_v4  ;;  %503 = vst.msk [vmem:[#allocation2 + $0x30] sm:$0xff] %vm495_vm2, %v9719_v44  ;;  %505 = vst.msk [vmem:[#allocation2 + $0x40] sm:$0xff] %vm495_vm2, %v9719_v44  ;;  %v9887_v4 = vld [vmem:[#allocation6_spill] sm:$0xff] }
  0x68   : > { %6555 = vmatprep.mubr.f32.mxu1 %v7462_v59  ;;  %504 = vst.msk [vmem:[#allocation2 + $0x38] sm:$0x3] %vm497_vm3, %v9719_v44  ;;  %506 = vst.msk [vmem:[#allocation2 + $0x48] sm:$0x3] %vm497_vm3, %v9719_v44 }
  0x69   : > { %507 = vst.msk [vmem:[#allocation2 + $0x50] sm:$0xff] %vm495_vm2, %v9719_v44  ;;  %509 = vst.msk [vmem:[#allocation2 + $0x60] sm:$0xff] %vm495_vm2, %v9719_v44 }
  0x6a   : > { %6432 = vmatmul.mubr.f32.gmra.mrb[14].mxu0 %v7342_v49  ;;  %508 = vst.msk [vmem:[#allocation2 + $0x58] sm:$0x3] %vm497_vm3, %v9719_v44  ;;  %510 = vst.msk [vmem:[#allocation2 + $0x68] sm:$0x3] %vm497_vm3, %v9719_v44  ;;  %v9890_v49 = vld [vmem:[#allocation12_spill] sm:$0xff] }
  0x6b   : > { %6556 = vmatmul.mubr.f32.gmra.mrb[20].mxu1 %v7469_v32  ;;  %6436 = vmatprep.mubr.f32.mxu0 %v9866_v3  ;;  %511 = vst.msk [vmem:[#allocation2 + $0x70] sm:$0xff] %vm495_vm2, %v9719_v44  ;;  %513 = vst.msk [vmem:[#allocation2 + $0x80] sm:$0xff] %vm495_vm2, %v9719_v44  ;;  %v9891_v3 = vand.u32 4294901760, %v7363_v10 }
  0x6c   : > { %6558 = vmatprep.mubr.f32.mxu1 %v7487_v20  ;;  %512 = vst.msk [vmem:[#allocation2 + $0x78] sm:$0x3] %vm497_vm3, %v9719_v44  ;;  %514 = vst.msk [vmem:[#allocation2 + $0x88] sm:$0x3] %vm497_vm3, %v9719_v44 }
  0x6d   : > { %515 = vst.msk [vmem:[#allocation2 + $0x90] sm:$0xff] %vm495_vm2, %v9719_v44  ;;  %517 = vst.msk [vmem:[#allocation2 + $0xa0] sm:$0xff] %vm495_vm2, %v9719_v44 }
  0x6e   : > { %6437 = vmatmul.mubr.f32.vlgmr.msra.gmra.mrb[0].mxu0 %v9867_v29  ;;  %516 = vst.msk [vmem:[#allocation2 + $0x98] sm:$0x3] %vm497_vm3, %v9719_v44  ;;  %518 = vst.msk [vmem:[#allocation2 + $0xa8] sm:$0x3] %vm497_vm3, %v9719_v44  ;;  %v9892_v29 = vld [vmem:[#allocation14_spill] sm:$0xff] }
  0x6f   : > { %6559 = vmatmul.mubr.f32.gmra.mrb[22].mxu1 %v7494_v63  ;;  %6439 = vmatprep.mubr.f32.mxu0 %v9868_v12  ;;  %519 = vst.msk [vmem:[#allocation2 + $0xb0] sm:$0xff] %vm495_vm2, %v9719_v44  ;;  %521 = vst.msk [vmem:[#allocation2 + $0xc0] sm:$0xff] %vm495_vm2, %v9719_v44  ;;  %v9893_v12 = vand.u32 4294901760, %v7372_v45 }
  0x70   : > { %6561 = vmatprep.mubr.f32.mxu1 %v7501_v42  ;;  %6461 = vmatpush3.msra.mxu0 %v7167_v7  ;;  %520 = vst.msk [vmem:[#allocation2 + $0xb8] sm:$0x3] %vm497_vm3, %v9719_v44  ;;  %522 = vst.msk [vmem:[#allocation2 + $0xc8] sm:$0x3] %vm497_vm3, %v9719_v44 }
  0x71   : > { %6486 = vmatprep.subr.mxu0 %v7145_v2  ;;  %523 = vst.msk [vmem:[#allocation2 + $0xd0] sm:$0xff] %vm495_vm2, %v9719_v44  ;;  %525 = vst.msk [vmem:[#allocation2 + $0xe0] sm:$0xff] %vm495_vm2, %v9719_v44 }
  0x72   : > { %6440 = vmatmul.mubr.f32.gmra.mrb[2].mxu0 %v9869_v11  ;;  %524 = vst.msk [vmem:[#allocation2 + $0xd8] sm:$0x3] %vm497_vm3, %v9719_v44  ;;  %526 = vst.msk [vmem:[#allocation2 + $0xe8] sm:$0x3] %vm497_vm3, %v9719_v44  ;;  %v9894_v11 = vld [vmem:[#allocation5_spill] sm:$0xff] }
  0x73   : > { %6562 = vmatmul.mubr.f32.gmra.mrb[24].mxu1 %v7512_v57  ;;  %6442 = vmatprep.mubr.f32.mxu0 %v9870_v24  ;;  %527 = vst.msk [vmem:[#allocation2 + $0xf0] sm:$0xff] %vm495_vm2, %v9719_v44  ;;  %529 = vst.msk [vmem:[#allocation2 + $0x100] sm:$0xff] %vm495_vm2, %v9719_v44  ;;  %v9895_v24 = vand.u32 4294901760, %v7380_v54 }
  0x74   : > { %6566 = vmatprep.mubr.f32.mxu1 %v7363_v10  ;;  %528 = vst.msk [vmem:[#allocation2 + $0xf8] sm:$0x3] %vm497_vm3, %v9719_v44  ;;  %530 = vst.msk [vmem:[#allocation2 + $0x108] sm:$0x3] %vm497_vm3, %v9719_v44  ;;  %v9898_v10 = vld [vmem:[#allocation9_spill] sm:$0xff] }
  0x75   : > { %531 = vst.msk [vmem:[#allocation2 + $0x110] sm:$0xff] %vm495_vm2, %v9719_v44  ;;  %533 = vst.msk [vmem:[#allocation2 + $0x120] sm:$0xff] %vm495_vm2, %v9719_v44 }
  0x76   : > { %6443 = vmatmul.mubr.f32.gmra.mrb[4].mxu0 %v9871_v26  ;;  %532 = vst.msk [vmem:[#allocation2 + $0x118] sm:$0x3] %vm497_vm3, %v9719_v44  ;;  %534 = vst.msk [vmem:[#allocation2 + $0x128] sm:$0x3] %vm497_vm3, %v9719_v44  ;;  %v9896_v26 = vld [vmem:[#allocation7_spill] sm:$0xff] }
  0x77   : > { %6567 = vmatmul.mubr.f32.vlgmr.msra.gmra.mrb[10].mxu1 %v7372_v45  ;;  %6445 = vmatprep.mubr.f32.mxu0 %v9872_v35  ;;  %535 = vst.msk [vmem:[#allocation2 + $0x130] sm:$0xff] %vm495_vm2, %v9719_v44  ;;  %537 = vst.msk [vmem:[#allocation2 + $0x140] sm:$0xff] %vm495_vm2, %v9719_v44  ;;  %v9897_v35 = vand.u32 4294901760, %v9874_v18  ;;  %v9900_v45 = vld [vmem:[#allocation11_spill] sm:$0xff] }
  0x78   : > { %6591 = vmatpush3.msra.mxu1 %v7145_v2  ;;  %6569 = vmatprep.mubr.f32.mxu1 %v7380_v54  ;;  %536 = vst.msk [vmem:[#allocation2 + $0x138] sm:$0x3] %vm497_vm3, %v9719_v44  ;;  %538 = vst.msk [vmem:[#allocation2 + $0x148] sm:$0x3] %vm497_vm3, %v9719_v44  ;;  %v9903_v54 = vand.u32 4294901760, %v9880_v50 }
  0x79   : > { %6616 = vmatprep.subr.mxu1 %v7167_v7  ;;  %541 = vst.msk [vmem:[#allocation2 + $0x160] sm:$0xff] %vm495_vm2, %v9719_v44  ;;  %543 = vst.msk [vmem:[#allocation2 + $0x170] sm:$0xff] %vm495_vm2, %v9719_v44 }
  0x7a   : > { %6446 = vmatmul.mubr.f32.gmra.mrb[6].mxu0 %v9873_v38  ;;  %542 = vst.msk [vmem:[#allocation2 + $0x168] sm:$0x3] %vm497_vm3, %v9719_v44  ;;  %544 = vst.msk [vmem:[#allocation2 + $0x178] sm:$0x3] %vm497_vm3, %v9719_v44  ;;  %v9899_v38 = vand.u32 4294901760, %v9876_v23 }
  0x7b   : > { %6570 = vmatmul.mubr.f32.gmra.mrb[12].mxu1 %v9874_v18  ;;  %6448 = vmatprep.mubr.f32.mxu0 %v9875_v43  ;;  %545 = vst.msk [vmem:[#allocation2 + $0x180] sm:$0xff] %vm495_vm2, %v9719_v44  ;;  %547 = vst.msk [vmem:[#allocation2 + $0x190] sm:$0xff] %vm495_vm2, %v9719_v44  ;;  %v9901_v43 = vand.u32 4294901760, %v9878_v25  ;;  %v9904_v18 = vand.u32 4294901760, %v7445_v60 }
  0x7c   : > { %6572 = vmatprep.mubr.f32.mxu1 %v9876_v23  ;;  %546 = vst.msk [vmem:[#allocation2 + $0x188] sm:$0x3] %vm497_vm3, %v9719_v44  ;;  %548 = vst.msk [vmem:[#allocation2 + $0x198] sm:$0x3] %vm497_vm3, %v9719_v44  ;;  %v9905_v23 = vand.u32 4294901760, %v7454_v14 }
  0x7d   : > { %549 = vst.msk [vmem:[#allocation2 + $0x1a0] sm:$0xff] %vm495_vm2, %v9719_v44  ;;  %551 = vst.msk [vmem:[#allocation2 + $0x1b0] sm:$0xff] %vm495_vm2, %v9719_v44 }
  0x7e   : > { %6449 = vmatmul.mubr.f32.gmra.mrb[8].mxu0 %v9877_v31  ;;  %550 = vst.msk [vmem:[#allocation2 + $0x1a8] sm:$0x3] %vm497_vm3, %v9719_v44  ;;  %552 = vst.msk [vmem:[#allocation2 + $0x1b8] sm:$0x3] %vm497_vm3, %v9719_v44  ;;  %v9906_v31 = vand.u32 4294901760, %v7467_v6 }
  0x7f   : > { %6573 = vmatmul.mubr.f32.gmra.mrb[14].mxu1 %v9878_v25  ;;  %6451 = vmatprep.mubr.f32.mxu0 %v9879_v36  ;;  %553 = vst.msk [vmem:[#allocation2 + $0x1c0] sm:$0xff] %vm495_vm2, %v9719_v44  ;;  %557 = vst.msk [vmem:[#allocation2 + $0x1e0] sm:$0xff] %vm495_vm2, %v9719_v44  ;;  %v9907_v25 = vand.u32 4294901760, %v7478_v27 }
  0x80   : > { %6575 = vmatprep.mubr.f32.mxu1 %v9880_v50  ;;  %554 = vst.msk [vmem:[#allocation2 + $0x1c8] sm:$0x3] %vm497_vm3, %v9719_v44  ;;  %558 = vst.msk [vmem:[#allocation2 + $0x1e8] sm:$0x3] %vm497_vm3, %v9719_v44 }
  0x81   : > { %559 = vst.msk [vmem:[#allocation2 + $0x1f0] sm:$0xff] %vm495_vm2, %v9719_v44  ;;  %561 = vst.msk [vmem:[#allocation2 + $0x200] sm:$0xff] %vm495_vm2, %v9719_v44 }
  0x82   : > { %6452 = vmatmul.mubr.f32.gmra.mrb[10].mxu0 %v9881_v28  ;;  %560 = vst.msk [vmem:[#allocation2 + $0x1f8] sm:$0x3] %vm497_vm3, %v9719_v44  ;;  %562 = vst.msk [vmem:[#allocation2 + $0x208] sm:$0x3] %vm497_vm3, %v9719_v44 }
  0x83   : > { %6576 = vmatmul.mubr.f32.gmra.mrb[16].mxu1 %v7445_v60  ;;  %6454 = vmatprep.mubr.f32.mxu0 %v9882_v37  ;;  %563 = vst.msk [vmem:[#allocation2 + $0x210] sm:$0xff] %vm495_vm2, %v9719_v44  ;;  %565 = vst.msk [vmem:[#allocation2 + $0x220] sm:$0xff] %vm495_vm2, %v9719_v44  ;;  %v9908_v60 = vand.u32 4294901760, %v7485_v48  ;;  %v7957_v37 = vld [vmem:[%s9650_s3 + $0x8] sm:$0xff] }
  0x84   : > { %6578 = vmatprep.mubr.f32.mxu1 %v7454_v14  ;;  %564 = vst.msk [vmem:[#allocation2 + $0x218] sm:$0x3] %vm497_vm3, %v9719_v44  ;;  %566 = vst.msk [vmem:[#allocation2 + $0x228] sm:$0x3] %vm497_vm3, %v9719_v44  ;;  %v9909_v14 = vand.u32 4294901760, %v7510_v58 }
  0x85   : > { %567 = vst.msk [vmem:[#allocation2 + $0x230] sm:$0xff] %vm495_vm2, %v9719_v44  ;;  %569 = vst.msk [vmem:[#allocation2 + $0x240] sm:$0xff] %vm495_vm2, %v9719_v44 }
  0x86   : > { %6455 = vmatmul.mubr.f32.gmra.mrb[12].mxu0 %v9883_v47  ;;  %568 = vst.msk [vmem:[#allocation2 + $0x238] sm:$0x3] %vm497_vm3, %v9719_v44  ;;  %570 = vst.msk [vmem:[#allocation2 + $0x248] sm:$0x3] %vm497_vm3, %v9719_v44  ;;  %v3160_v47 = vld [vmem:[#allocation2 + $0x3] sm:$0x7f] }
  0x87   : > { %6579 = vmatmul.mubr.f32.gmra.mrb[18].mxu1 %v7467_v6  ;;  %6457 = vmatprep.mubr.f32.mxu0 %v9884_v22  ;;  %571 = vst.msk [vmem:[#allocation2 + $0x250] sm:$0xff] %vm495_vm2, %v9719_v44  ;;  %573 = vst.msk [vmem:[#allocation2 + $0x260] sm:$0xff] %vm495_vm2, %v9719_v44 }
  0x88   : > { %6581 = vmatprep.mubr.f32.mxu1 %v7478_v27  ;;  %572 = vst.msk [vmem:[#allocation2 + $0x258] sm:$0x3] %vm497_vm3, %v9719_v44  ;;  %574 = vst.msk [vmem:[#allocation2 + $0x268] sm:$0x3] %vm497_vm3, %v9719_v44 }
  0x8a   : > { %6458 = vmatmul.mubr.f32.gmra.mrb[14].mxu0 %v9885_v52 }
  0x8b   : > { %6582 = vmatmul.mubr.f32.gmra.mrb[20].mxu1 %v7485_v48  ;;  %6462 = vmatprep.mubr.f32.mxu0 %v9886_v62 }
  0x8c   : > { %6584 = vmatprep.mubr.f32.mxu1 %v7498_v9 }
  0x8e   : > { %6463 = vmatmul.mubr.f32.vlgmr.msra.gmra.mrb[0].mxu0 %v9887_v4 }
  0x8f   : > { %6585 = vmatmul.mubr.f32.gmra.mrb[22].mxu1 %v7510_v58  ;;  %6465 = vmatprep.mubr.f32.mxu0 %v9888_v46  ;;  %v3110_v58 = vld [vmem:[#allocation2 + $0x2] sm:$0x7f] }
  0x90   : > { %6587 = vmatprep.mubr.f32.mxu1 %v7519_v8  ;;  %6487 = vmatpush3.msra.mxu0 %v7145_v2 }
  0x92   : > { %6466 = vmatmul.mubr.f32.gmra.mrb[2].mxu0 %v9889_v39 }
  0x93   : > { %6588 = vmatmul.mubr.f32.gmra.mrb[24].mxu1 %v7528_v16  ;;  %6468 = vmatprep.mubr.f32.mxu0 %v9890_v49  ;;  %v3035_v16 = vld [vmem:[#allocation2 + $0xa0] sm:$0x7f] }
  0x94   : > { %6592 = vmatprep.mubr.f32.mxu1 %v9891_v3 }
  0x96   : > { %6469 = vmatmul.mubr.f32.gmra.mrb[4].mxu0 %v9892_v29 }
  0x97   : > { %6593 = vmatmul.mubr.f32.vlgmr.msra.gmra.mrb[10].mxu1 %v9893_v12  ;;  %6471 = vmatprep.mubr.f32.mxu0 %v9894_v11 }
  0x98   : > { %6617 = vmatpush3.msra.mxu1 %v7167_v7  ;;  %6595 = vmatprep.mubr.f32.mxu1 %v9895_v24  ;;  %v9902_v7 = vld [vmem:[#allocation13_spill] sm:$0xff]  ;;  %v3186_v24 = vld [vmem:[#allocation2 + $0x140] sm:$0x7f] }
  0x99   : > { %6642 = vmatprep.subr.mxu1 %v7145_v2 }
  0x9a   : > { %6472 = vmatmul.mubr.f32.gmra.mrb[6].mxu0 %v9896_v26 }
  0x9b   : > { %6596 = vmatmul.mubr.f32.gmra.mrb[12].mxu1 %v9897_v35  ;;  %6474 = vmatprep.mubr.f32.mxu0 %v9898_v10 }
  0x9c   : > { %6598 = vmatprep.mubr.f32.mxu1 %v9899_v38 }
  0x9e   : > { %6475 = vmatmul.mubr.f32.gmra.mrb[8].mxu0 %v9900_v45 }
  0x9f   : > { %6599 = vmatmul.mubr.f32.gmra.mrb[14].mxu1 %v9901_v43  ;;  %6477 = vmatprep.mubr.f32.mxu0 %v9902_v7 }
  0xa0   : > { %6601 = vmatprep.mubr.f32.mxu1 %v9903_v54 }
  0xa2   : > { %6478 = vmatmul.mubr.f32.gmra.mrb[10].mxu0 %v7277_v19 }
  0xa3   : > { %6602 = vmatmul.mubr.f32.gmra.mrb[16].mxu1 %v9904_v18  ;;  %6480 = vmatprep.mubr.f32.mxu0 %v7288_v40 }
  0xa4   : > { %6604 = vmatprep.mubr.f32.mxu1 %v9905_v23 }
  0xa6   : > { %6481 = vmatmul.mubr.f32.gmra.mrb[12].mxu0 %v7303_v53 }
  0xa7   : > { %6605 = vmatmul.mubr.f32.gmra.mrb[18].mxu1 %v9906_v31  ;;  %6483 = vmatprep.mubr.f32.mxu0 %v7311_v56 }
  0xa8   : > { %6607 = vmatprep.mubr.f32.mxu1 %v9907_v25 }
  0xaa   : > { %6484 = vmatmul.mubr.f32.gmra.mrb[14].mxu0 %v7332_v5 }
  0xab   : > { %6608 = vmatmul.mubr.f32.gmra.mrb[20].mxu1 %v9908_v60  ;;  %6488 = vmatprep.mubr.f32.mxu0 %v9886_v62  ;;  %v3237_v60 = vld [vmem:[#allocation2 + $0x141] sm:$0x7f] }
  0xac   : > { %6610 = vmatprep.mubr.f32.mxu1 %v2074_v15 }
  0xae   : > { %6489 = vmatmul.mubr.f32.vlgmr.msra.gmra.mrb[0].mxu0 %v9887_v4  ;;  %v3135_v4 = vld [vmem:[#allocation2 + $0xa2] sm:$0x7f] }
  0xaf   : > { %6611 = vmatmul.mubr.f32.gmra.mrb[22].mxu1 %v9909_v14  ;;  %6491 = vmatprep.mubr.f32.mxu0 %v9888_v46 }
  0xb0   : > { %6613 = vmatprep.mubr.f32.mxu1 %v2094_v34  ;;  %v3085_v34 = vld [vmem:[#allocation2 + $0xa1] sm:$0x7f] }
  0xb2   : > { %6492 = vmatmul.mubr.f32.gmra.mrb[2].mxu0 %v9889_v39 }
  0xb3   : > { %6614 = vmatmul.mubr.f32.gmra.mrb[24].mxu1 %v2104_v30  ;;  %6494 = vmatprep.mubr.f32.mxu0 %v9890_v49 }
  0xb4   : > { %6618 = vmatprep.mubr.f32.mxu1 %v7349_v55 }
  0xb6   : > { %6495 = vmatmul.mubr.f32.gmra.mrb[4].mxu0 %v9892_v29  ;;  %v3212_v29 = vld [vmem:[#allocation2 + $0x1e0] sm:$0x7f] }
  0xb7   : > { %6619 = vmatmul.mubr.f32.vlgmr.msra.gmra.mrb[10].mxu1 %v7357_v1  ;;  %6497 = vmatprep.mubr.f32.mxu0 %v9894_v11 }
  0xb8   : > { %6643 = vmatpush3.msra.mxu1 %v7145_v2  ;;  %6621 = vmatprep.mubr.f32.mxu1 %v7365_v41 }
  0xba   : > { %6498 = vmatmul.mubr.f32.gmra.mrb[6].mxu0 %v9896_v26 }
  0xbb   : > { %6622 = vmatmul.mubr.f32.gmra.mrb[12].mxu1 %v7374_v21  ;;  %6500 = vmatprep.mubr.f32.mxu0 %v9898_v10 }
  0xbc   : > { %6624 = vmatprep.mubr.f32.mxu1 %v7389_v33 }
  0xbe   : > { %6501 = vmatmul.mubr.f32.gmra.mrb[8].mxu0 %v9900_v45  ;;  %v7984_v45 = vld [vmem:[%s9649_s2] ss:$0 sm:$0xff] }
  0xbf   : > { %6625 = vmatmul.mubr.f32.gmra.mrb[14].mxu1 %v7396_v17  ;;  %6503 = vmatprep.mubr.f32.mxu0 %v9902_v7  ;;  %9924 = vst [vmem:[#allocation13_spill] sm:$0xff] %v7984_v45  ;;  %v3262_v7 = vld [vmem:[#allocation2 + $0x1e1] sm:$0x7f] }
  0xc0   : > { %6627 = vmatprep.mubr.f32.mxu1 %v7407_v61 }
  0xc2   : > { %6504 = vmatmul.mubr.f32.gmra.mrb[10].mxu0 %v7277_v19 }
  0xc3   : > { %6628 = vmatmul.mubr.f32.gmra.mrb[16].mxu1 %v7430_v0  ;;  %6506 = vmatprep.mubr.f32.mxu0 %v7288_v40 }
  0xc4   : > { %6630 = vmatprep.mubr.f32.mxu1 %v7437_v13 }
  0xc6   : > { %6507 = vmatmul.mubr.f32.gmra.mrb[12].mxu0 %v7303_v53 }
  0xc7   : > { %6631 = vmatmul.mubr.f32.gmra.mrb[18].mxu1 %v7456_v51  ;;  %6509 = vmatprep.mubr.f32.mxu0 %v7311_v56 }
  0xc8   : > { %6633 = vmatprep.mubr.f32.mxu1 %v7462_v59 }
  0xca   : > { %6510 = vmatmul.mubr.f32.gmra.mrb[14].mxu0 %v7332_v5  ;;  %v3016_v5 = vlaneseq }
  0xcb   : > { %6634 = vmatmul.mubr.f32.gmra.mrb[20].mxu1 %v7469_v32 }
  0xcc   : > { %6636 = vmatprep.mubr.f32.mxu1 %v7487_v20 }
  0xcf   : > { %6637 = vmatmul.mubr.f32.gmra.mrb[22].mxu1 %v7494_v63 }
  0xd0   : > { %6639 = vmatprep.mubr.f32.mxu1 %v7501_v42 }
  0xd3   : > { %6640 = vmatmul.mubr.f32.gmra.mrb[24].mxu1 %v7512_v57 }
  0xd4   : > { %6644 = vmatprep.mubr.f32.mxu1 %v7349_v55 }
  0xd7   : > { %6645 = vmatmul.mubr.f32.vlgmr.msra.gmra.mrb[10].mxu1 %v7357_v1  ;;  %v7907_v1 = vshrl.u32 %v3016_v5, 7 }
  0xd8   : > { %6647 = vmatprep.mubr.f32.mxu1 %v7365_v41 }
  0xd9   : > { %9910 = vst [vmem:[#allocation15_spill] sm:$0xff] %v7907_v1  ;;  %v7910_v41 = vsub.s32 0, %v7907_v1  ;;  %v7931_v6 = vsub.s32 6, %v7907_v1  ;;  %v7934_v27 = vsub.s32 1, %v7907_v1  ;;  %v7948_v30 = vsub.s32 5, %v7907_v1 }
  0xda   : > { %v7965_v46 = vsub.s32 7, %v7907_v1 }
  0xdb   : > { %6648 = vmatmul.mubr.f32.gmra.mrb[12].mxu1 %v7374_v21  ;;  %9911 = vst [vmem:[#allocation16_spill] sm:$0xff] %v7910_v41  ;;  %v7913_v21 = vsub.s32 2, %v7907_v1  ;;  %9914 = vst [vmem:[#allocation4_spill] sm:$0xff] %v7931_v6  ;;  %v7969_v39 = vrot.slane %v7957_v37, %v7910_v41  ;;  %v7992_v14 = vrot.slane %v7957_v37, %v7934_v27 }
  0xdc   : > { %6650 = vmatprep.mubr.f32.mxu1 %v7389_v33  ;;  %9915 = vst [vmem:[#allocation6_spill] sm:$0xff] %v7934_v27  ;;  %9919 = vst [vmem:[#allocation14_spill] sm:$0xff] %v7948_v30 }
  0xdd   : > { %9912 = vst [vmem:[#allocation17_spill] sm:$0xff] %v7913_v21  ;;  %9921 = vst [vmem:[#allocation7_spill] sm:$0xff] %v7965_v46  ;;  %v7978_v35 = vrot.slane %v7957_v37, %v7913_v21  ;;  %v3223_v38 = vmul.f32 %v7969_v39, %v3212_v29 }
  0xde   : > { %9922 = vst [vmem:[#allocation9_spill] sm:$0xff] %v7969_v39 }
  0xdf   : > { %6651 = vmatmul.mubr.f32.gmra.mrb[14].mxu1 %v7396_v17  ;;  %v7919_v17 = vsub.s32 4, %v7907_v1  ;;  %9923 = vst [vmem:[#allocation11_spill] sm:$0xff] %v7978_v35 }
  0xe0   : > { %6653 = vmatprep.mubr.f32.mxu1 %v7407_v61  ;;  %v604_v61 = vld [vmem:[%s9650_s3] sm:$0xff] }
  0xe1   : > { %9913 = vst [vmem:[#allocation18_spill] sm:$0xff] %v7919_v17  ;;  %v7922_v48 = vrot.slane %v604_v61, %v7910_v41  ;;  %v7951_v36 = vrot.slane %v604_v61, %v7931_v6  ;;  %v7960_v22 = vrot.slane %v604_v61, %v7948_v30  ;;  %v7974_v26 = vrot.slane %v604_v61, %v7965_v46 }
  0xe2   : > { %v7996_v5 = vrot.slane %v7957_v37, %v7919_v17 }
  0xe3   : > { %6654 = vmatmul.mubr.f32.gmra.mrb[16].mxu1 %v7430_v0  ;;  %v3009_v0 = vld [vmem:[#allocation2] sm:$0x7f]  ;;  %9920 = vst [vmem:[#allocation5_spill] sm:$0xff] %v7960_v22  ;;  %v3171_v3 = vmul.f32 %v7951_v36, %v3160_v47  ;;  %v3146_v11 = vmul.f32 %v7960_v22, %v3135_v4  ;;  %v3197_v31 = vmul.f32 %v7974_v26, %v3186_v24 }
  0xe4   : > { %6656 = vmatprep.mubr.f32.mxu1 %v7437_v13  ;;  %v3060_v13 = vld [vmem:[#allocation2 + $0x1] sm:$0x7f]  ;;  %9925 = vst [vmem:[#allocation19_spill] sm:$0xff] %v7996_v5  ;;  %v8053_v24 = vrot.slane %v7957_v37, %v7948_v30  ;;  %v8132_v22 = vrot.slane %v7957_v37, %v7965_v46 }
  0xe6   : > { %9943 = vst [vmem:[#allocation37_spill] sm:$0xff] %v8132_v22 }
  0xe7   : > { %6657 = vmatmul.mubr.f32.gmra.mrb[18].mxu1 %v7456_v51  ;;  %v7925_v51 = vrot.slane %v604_v61, %v7913_v21 }
  0xe8   : > { %6659 = vmatprep.mubr.f32.mxu1 %v7462_v59  ;;  %v7928_v59 = vrot.slane %v604_v61, %v7919_v17 }
  0xe9   : > { %v3071_v9 = vmul.f32 %v7925_v51, %v3060_v13 }
  0xea   : > { %v3121_v28 = vmul.f32 %v7928_v59, %v3110_v58 }
  0xeb   : > { %6660 = vmatmul.mubr.f32.gmra.mrb[20].mxu1 %v7469_v32 }
  0xec   : > { %6662 = vmatprep.mubr.f32.mxu1 %v7487_v20 }
  0xef   : > { %6663 = vmatmul.mubr.f32.gmra.mrb[22].mxu1 %v7494_v63  ;;  %v3020_v63 = vmul.f32 %v7922_v48, %v3009_v0  ;;  %v3273_v0 = vmul.f32 %v7978_v35, %v3262_v7  ;;  %v608_v7 = vld [vmem:[%s9650_s3 + $0x20] sm:$0xff] }
  0xf0   : > { %6665 = vmatprep.mubr.f32.mxu1 %v7501_v42  ;;  %v7937_v42 = vsub.s32 3, %v7907_v1  ;;  %v8111_v44 = vrot.slane %v608_v7, %v7948_v30  ;;  %v8114_v1 = vrot.slane %v608_v7, %v7965_v46 }
  0xf1   : > { %v3078_v50 = vadd.f32 %v3071_v9, %v3020_v63  ;;  %v3312_v9 = vld [vmem:[#allocation2 + $0x1e2] sm:$0x7f] }
  0xf2   : > { %v7886_v2 = vpop.f32.mrb[0].mxu1  ;;  %9916 = vst [vmem:[#allocation8_spill] sm:$0xff] %v7937_v42  ;;  %v7945_v15 = vrot.slane %v604_v61, %v7937_v42  ;;  %9937 = vst [vmem:[#allocation31_spill] sm:$0xff] %v8111_v44 }
  0xf3   : > { %6666 = vmatmul.mubr.f32.gmra.mrb[24].mxu1 %v7512_v57  ;;  %v7889_v33 = vpop.f32.mrb[1].mxu1  ;;  %v7942_v57 = vrot.slane %v604_v61, %v7934_v27  ;;  %v3128_v49 = vadd.f32 %v3121_v28, %v3078_v50  ;;  %v841_v13 = vadd.f32 %v7886_v2, %v7984_v45  ;;  %v3248_v28 = vmul.f32 %v7992_v14, %v3237_v60 }
  0xf4   : > { %9918 = vst [vmem:[#allocation12_spill] sm:$0xff] %v7945_v15  ;;  %v3096_v62 = vmul.f32 %v7945_v15, %v3085_v34  ;;  %v8004_v58 = vadd.f32 %v7984_v45, %v7889_v33  ;;  %9938 = vst [vmem:[#allocation32_spill] sm:$0xff] %v8114_v1 }
  0xf5   : > { %9917 = vst [vmem:[#allocation10_spill] sm:$0xff] %v7942_v57  ;;  %v3046_v52 = vmul.f32 %v7942_v57, %v3035_v16  ;;  %v3178_v10 = vadd.f32 %v3171_v3, %v3128_v49  ;;  %v8027_v49 = vrot.slane %v7957_v37, %v7937_v42 }
  0xf6   : > { %v7891_v8 = vpop.f32.mrb[2].mxu1 }
  0xf7   : > { %v7893_v19 = vpop.f32.mrb[3].mxu1  ;;  %v3103_v12 = vadd.f32 %v3096_v62, %v3046_v52  ;;  %v3230_v61 = vadd.f32 %v3223_v38, %v3178_v10  ;;  %v8010_v47 = vadd.f32 %v7891_v8, %v7984_v45  ;;  %v3287_v62 = vld [vmem:[#allocation2 + $0x142] sm:$0x7f]  ;;  %v606_v8 = vld [vmem:[%s9650_s3 + $0x10] sm:$0xff] }
  0xf8   : > { %v8014_v2 = vadd.f32 %v7984_v45, %v7893_v19  ;;  %v3298_v38 = vmul.f32 %v8027_v49, %v3287_v62  ;;  %v8079_v60 = vrot.slane %v606_v8, %v7948_v30  ;;  %v8138_v35 = vrot.slane %v606_v8, %v7937_v42 }
  0xf9   : > { %v3153_v23 = vadd.f32 %v3146_v11, %v3103_v12  ;;  %v3280_v19 = vadd.f32 %v3273_v0, %v3230_v61  ;;  %v8082_v61 = vrot.slane %v606_v8, %v7965_v46  ;;  %v609_v0 = vld [vmem:[%s9650_s3 + $0x28] sm:$0xff] }
  0xfa   : > { %9928 = vst [vmem:[#allocation22_spill] sm:$0xff] %v8079_v60  ;;  %9945 = vst [vmem:[#allocation39_spill] sm:$0xff] %v8138_v35 }
  0xfb   : > { %v3204_v50 = vadd.f32 %v3197_v31, %v3153_v23  ;;  %v8072_v23 = vrot.slane %v606_v8, %v7913_v21  ;;  %9929 = vst [vmem:[#allocation23_spill] sm:$0xff] %v8082_v61 }
  0xfd   : > { %9926 = vst [vmem:[#allocation20_spill] sm:$0xff] %v8072_v23 }
  0xfe   : > { %v7895_v40 = vpop.f32.mrb[4].mxu1 }
  0xff   : > { %v7897_v53 = vpop.f32.mrb[5].mxu1  ;;  %v8018_v52 = vadd.f32 %v7895_v40, %v7984_v45  ;;  %v3323_v40 = vmul.f32 %v7996_v5, %v3312_v9  ;;  %v8135_v5 = vrot.slane %v606_v8, %v7934_v27 }
 0x100   : > { %v8023_v4 = vadd.f32 %v7984_v45, %v7897_v53 }
 0x101   : > { %v3330_v31 = vadd.f32 %v3323_v40, %v3280_v19  ;;  %v8102_v19 = vrot.slane %v608_v7, %v7910_v41  ;;  %v8105_v40 = vrot.slane %v608_v7, %v7937_v42  ;;  %9944 = vst [vmem:[#allocation38_spill] sm:$0xff] %v8135_v5 }
 0x102   : > { %v7899_v32 = vpop.f32.mrb[6].mxu1 }
 0x103   : > { %v7901_v20 = vpop.f32.mrb[7].mxu1  ;;  %v8036_v3 = vadd.f32 %v7899_v32, %v7984_v45  ;;  %9934 = vst [vmem:[#allocation28_spill] sm:$0xff] %v8102_v19  ;;  %9935 = vst [vmem:[#allocation29_spill] sm:$0xff] %v8105_v40 }
 0x104   : > { %v8040_v53 = vadd.f32 %v7984_v45, %v7901_v20  ;;  %v607_v20 = vld [vmem:[%s9650_s3 + $0x18] sm:$0xff] }
 0x105   : > { %v8092_v9 = vrot.slane %v607_v20, %v7937_v42  ;;  %v8149_v5 = vrot.slane %v607_v20, %v7910_v41  ;;  %v8152_v35 = vrot.slane %v607_v20, %v7913_v21 }
 0x106   : > { %v7903_v55 = vpop.f32.mrb[8].mxu1 }
 0x107   : > { %v7905_v56 = vpop.f32.mrb[9].mxu1  ;;  %v8044_v29 = vadd.f32 %v7903_v55, %v7984_v45  ;;  %v3255_v55 = vadd.f32 %v3248_v28, %v3204_v50  ;;  %9931 = vst [vmem:[#allocation25_spill] sm:$0xff] %v8092_v9  ;;  %9948 = vst [vmem:[#allocation42_spill] sm:$0xff] %v8149_v5 }
 0x108   : > { %v8048_v12 = vadd.f32 %v7984_v45, %v7905_v56  ;;  %v8062_v56 = vrot.slane %v7957_v37, %v7931_v6  ;;  %9949 = vst [vmem:[#allocation43_spill] sm:$0xff] %v8152_v35 }
 0x181   : > { %v6490_v43 = vpop.f32.mrb[0].mxu0 }
 0x182   : > { %v6784_v54 = vadd.f32 %v6490_v43, %v7984_v45  ;;  %v1695_v18 = vpop.f32.mrb[1].mxu0 }
 0x183   : > { %v6785_v25 = vadd.f32 %v7984_v45, %v1695_v18  ;;  %v8069_v18 = vrot.slane %v606_v8, %v7910_v41 }
 0x184   : > { %1792 = vst.msk [vmem:[#allocation2 + $0x151] sm:$0xff] %vm495_vm2, %v6784_v54  ;;  %v3337_v54 = vld [vmem:[#allocation2 + $0x143] sm:$0x7f] }
 0x185   : > { %1790 = vst.msk [vmem:[#allocation2 + $0x11] sm:$0xff] %vm495_vm2, %v6785_v25  ;;  %v6493_v63 = vpop.f32.mrb[2].mxu0  ;;  %v8076_v25 = vrot.slane %v606_v8, %v7919_v17  ;;  %v3348_v62 = vmul.f32 %v8053_v24, %v3337_v54  ;;  %v8123_v54 = vrot.slane %v609_v0, %v7919_v17 }
 0x186   : > { %v6786_v16 = vadd.f32 %v6493_v63, %v7984_v45  ;;  %v1707_v34 = vpop.f32.mrb[3].mxu0  ;;  %v8089_v63 = vrot.slane %v607_v20, %v7934_v27 }
 0x187   : > { %v6787_v33 = vadd.f32 %v7984_v45, %v1707_v34  ;;  %9927 = vst [vmem:[#allocation21_spill] sm:$0xff] %v8076_v25  ;;  %v8098_v34 = vrot.slane %v607_v20, %v7931_v6  ;;  %9941 = vst [vmem:[#allocation35_spill] sm:$0xff] %v8123_v54 }
 0x188   : > { %1796 = vst.msk [vmem:[#allocation2 + $0x161] sm:$0xff] %vm495_vm2, %v6786_v16  ;;  %9930 = vst [vmem:[#allocation24_spill] sm:$0xff] %v8089_v63  ;;  %v8095_v16 = vrot.slane %v607_v20, %v7919_v17 }
 0x189   : > { %1794 = vst.msk [vmem:[#allocation2 + $0x21] sm:$0xff] %vm495_vm2, %v6787_v33  ;;  %v6496_v11 = vpop.f32.mrb[4].mxu0  ;;  %9933 = vst [vmem:[#allocation27_spill] sm:$0xff] %v8098_v34  ;;  %v3305_v33 = vadd.f32 %v3298_v38, %v3255_v55  ;;  %v8117_v55 = vrot.slane %v609_v0, %v7934_v27  ;;  %v8120_v38 = vrot.slane %v609_v0, %v7913_v21 }
 0x18a   : > { %v6788_v32 = vadd.f32 %v6496_v11, %v7984_v45  ;;  %v1719_v10 = vpop.f32.mrb[5].mxu0  ;;  %9932 = vst [vmem:[#allocation26_spill] sm:$0xff] %v8095_v16 }
 0x18b   : > { %v6789_v43 = vadd.f32 %v7984_v45, %v1719_v10  ;;  %9939 = vst [vmem:[#allocation33_spill] sm:$0xff] %v8117_v55  ;;  %9940 = vst [vmem:[#allocation34_spill] sm:$0xff] %v8120_v38  ;;  %v3187_v37 = vld [vmem:[#allocation2 + $0x150] sm:$0x7f] }
 0x18c   : > { %1800 = vst.msk [vmem:[#allocation2 + $0x171] sm:$0xff] %vm495_vm2, %v6788_v32  ;;  %v3362_v50 = vld [vmem:[#allocation2 + $0x10] sm:$0x7f] }
 0x18d   : > { %1798 = vst.msk [vmem:[#allocation2 + $0x31] sm:$0xff] %vm495_vm2, %v6789_v43  ;;  %v6499_v28 = vpop.f32.mrb[6].mxu0  ;;  %v3010_v11 = vld [vmem:[#allocation2 + $0x10] sm:$0x7f]  ;;  %v8108_v43 = vrot.slane %v608_v7, %v7913_v21 }
 0x18e   : > { %v3061_v32 = vld [vmem:[#allocation2 + $0x11] sm:$0x7f]  ;;  %v6791_v10 = vadd.f32 %v6499_v28, %v841_v13  ;;  %v8126_v13 = vrot.slane %v609_v0, %v7931_v6  ;;  %v3373_v28 = vmul.f32 %v8062_v56, %v3362_v50  ;;  %v3021_v15 = vmul.f32 %v7922_v48, %v3010_v11  ;;  %v1731_v54 = vpop.f32.mrb[7].mxu0 }
 0x18f   : > { %9936 = vst [vmem:[#allocation30_spill] sm:$0xff] %v8108_v43  ;;  %v3072_v57 = vmul.f32 %v7925_v51, %v3061_v32  ;;  %v8142_v50 = vadd.f32 %v3348_v62, %v3305_v33  ;;  %v3238_v22 = vld [vmem:[#allocation2 + $0x151] sm:$0x7f]  ;;  %v6793_v38 = vadd.f32 %v1731_v54, %v8004_v58  ;;  %v8155_v11 = vrot.slane %v607_v20, %v7948_v30 }
 0x190   : > { %9942 = vst [vmem:[#allocation36_spill] sm:$0xff] %v8126_v13  ;;  %1804 = vst.msk [vmem:[#allocation2 + $0x181] sm:$0xff] %vm495_vm2, %v6791_v10  ;;  %v3011_v39 = vld [vmem:[#allocation2 + $0x20] sm:$0x7f]  ;;  %v8145_v10 = vrot.slane %v606_v8, %v7931_v6  ;;  %v3288_v32 = vld [vmem:[#allocation2 + $0x152] sm:$0x7f]  ;;  %v8158_v62 = vrot.slane %v607_v20, %v7965_v46  ;;  %v8161_v8 = vrot.slane %v608_v7, %v7934_v27 }
 0x191   : > { %v3062_v13 = vld [vmem:[#allocation2 + $0x21] sm:$0x7f]  ;;  %9946 = vst [vmem:[#allocation40_spill] sm:$0xff] %v8142_v50  ;;  %9950 = vst [vmem:[#allocation44_spill] sm:$0xff] %v8155_v11  ;;  %v3338_v45 = vld [vmem:[#allocation2 + $0x153] sm:$0x7f]  ;;  %v8164_v58 = vrot.slane %v608_v7, %v7919_v17  ;;  %v8167_v54 = vrot.slane %v608_v7, %v7931_v6  ;;  %v3022_v5 = vmul.f32 %v7922_v48, %v3011_v39 }
 0x192   : > { %9947 = vst [vmem:[#allocation41_spill] sm:$0xff] %v8145_v10  ;;  %v3412_v33 = vld [vmem:[#allocation2 + $0x11] sm:$0x7f]  ;;  %9951 = vst [vmem:[#allocation45_spill] sm:$0xff] %v8158_v62  ;;  %v3073_v11 = vmul.f32 %v7925_v51, %v3062_v13  ;;  %v3380_v50 = vadd.f32 %v3373_v28, %v3330_v31  ;;  %v8173_v62 = vrot.slane %v609_v0, %v7910_v41  ;;  %v6502_v10 = vpop.f32.mrb[8].mxu0 }
 0x193   : > { %9952 = vst [vmem:[#allocation46_spill] sm:$0xff] %v8161_v8  ;;  %9953 = vst [vmem:[#allocation47_spill] sm:$0xff] %v8164_v58  ;;  %v3111_v21 = vld [vmem:[#allocation2 + $0x12] sm:$0x7f]  ;;  %v3079_v27 = vadd.f32 %v3072_v57, %v3021_v15  ;;  %v3188_v8 = vld [vmem:[#allocation2 + $0x160] sm:$0x7f]  ;;  %v8176_v7 = vrot.slane %v609_v0, %v7937_v42  ;;  %v8179_v6 = vrot.slane %v609_v0, %v7948_v30 }
 0x194   : > { %9954 = vst [vmem:[#allocation48_spill] sm:$0xff] %v8167_v54  ;;  %v3161_v35 = vld [vmem:[#allocation2 + $0x13] sm:$0x7f]  ;;  %1802 = vst.msk [vmem:[#allocation2 + $0x41] sm:$0xff] %vm495_vm2, %v6793_v38  ;;  %v8182_v39 = vrot.slane %v609_v0, %v7965_v46  ;;  %v8185_v31 = vmul.f32 %v7974_v26, %v3187_v37  ;;  %v8188_v38 = vmul.f32 %v7992_v14, %v3238_v22  ;;  %v3239_v57 = vld [vmem:[#allocation2 + $0x161] sm:$0x7f] }
 0x195   : > { %v3462_v20 = vld [vmem:[#allocation2 + $0x12] sm:$0x7f]  ;;  %9955 = vst [vmem:[#allocation49_spill] sm:$0xff] %v8173_v62  ;;  %9956 = vst [vmem:[#allocation50_spill] sm:$0xff] %v8176_v7  ;;  %v3289_v15 = vld [vmem:[#allocation2 + $0x162] sm:$0x7f]  ;;  %v6795_v13 = vadd.f32 %v6502_v10, %v8010_v47  ;;  %v3423_v42 = vmul.f32 %v8069_v18, %v3412_v33  ;;  %v8193_v41 = vmul.f32 %v8027_v49, %v3288_v32 }
 0x196   : > { %v3012_v17 = vld [vmem:[#allocation2 + $0x30] sm:$0x7f]  ;;  %9957 = vst [vmem:[#allocation51_spill] sm:$0xff] %v8179_v6  ;;  %9958 = vst [vmem:[#allocation52_spill] sm:$0xff] %v8182_v39  ;;  %v1743_v28 = vpop.f32.mrb[9].mxu0  ;;  %v8196_v30 = vmul.f32 %v8053_v24, %v3338_v45  ;;  %v3122_v0 = vmul.f32 %v7928_v59, %v3111_v21  ;;  %v3080_v6 = vadd.f32 %v3073_v11, %v3022_v5 }
 0x197   : > { %v3063_v58 = vld [vmem:[#allocation2 + $0x31] sm:$0x7f]  ;;  %9959 = vst [vmem:[#allocation53_spill] sm:$0xff] %v8188_v38  ;;  %9960 = vst [vmem:[#allocation54_spill] sm:$0xff] %v8193_v41  ;;  %v3339_v37 = vld [vmem:[#allocation2 + $0x163] sm:$0x7f]  ;;  %v6797_v22 = vadd.f32 %v1743_v28, %v8014_v2  ;;  %v3023_v47 = vmul.f32 %v7922_v48, %v3012_v17  ;;  %v3430_v33 = vadd.f32 %v3423_v42, %v3380_v50 }
 0x198   : > { %9961 = vst [vmem:[#allocation55_spill] sm:$0xff] %v8196_v30  ;;  %v3112_v46 = vld [vmem:[#allocation2 + $0x22] sm:$0x7f]  ;;  %v3074_v10 = vmul.f32 %v7925_v51, %v3063_v58  ;;  %1808 = vst.msk [vmem:[#allocation2 + $0x191] sm:$0xff] %vm495_vm2, %v6795_v13  ;;  %v6505_v32 = vpop.f32.mrb[10].mxu0  ;;  %v3129_v45 = vadd.f32 %v3122_v0, %v3079_v27  ;;  %v3172_v30 = vmul.f32 %v7951_v36, %v3161_v35 }
 0x199   : > { %v3162_v39 = vld [vmem:[#allocation2 + $0x23] sm:$0x7f]  ;;  %v3512_v62 = vld [vmem:[#allocation2 + $0x13] sm:$0x7f]  ;;  %1806 = vst.msk [vmem:[#allocation2 + $0x51] sm:$0xff] %vm495_vm2, %v6797_v22  ;;  %v6799_v2 = vadd.f32 %v6505_v32, %v8018_v52  ;;  %v1755_v5 = vpop.f32.mrb[11].mxu0  ;;  %v3473_v11 = vmul.f32 %v8072_v23, %v3462_v20  ;;  %v8208_v17 = vmul.f32 %v7974_v26, %v3188_v8  ;;  %v8211_v58 = vmul.f32 %v7992_v14, %v3239_v57 }
 0x19a   : > { %v3363_v7 = vld [vmem:[#allocation2 + $0x20] sm:$0x7f]  ;;  %v3189_v21 = vld [vmem:[#allocation2 + $0x170] sm:$0x7f]  ;;  %v3123_v42 = vmul.f32 %v7928_v59, %v3112_v46  ;;  %v6801_v13 = vadd.f32 %v1755_v5, %v8023_v4  ;;  %v6508_v28 = vpop.f32.mrb[12].mxu0  ;;  %v8216_v0 = vmul.f32 %v8027_v49, %v3289_v15  ;;  %v8219_v52 = vmul.f32 %v8053_v24, %v3339_v37 }
 0x19b   : > { %v3240_v41 = vld [vmem:[#allocation2 + $0x171] sm:$0x7f]  ;;  %9962 = vst [vmem:[#allocation56_spill] sm:$0xff] %v8208_v17  ;;  %9963 = vst [vmem:[#allocation57_spill] sm:$0xff] %v8211_v58  ;;  %v3173_v8 = vmul.f32 %v7951_v36, %v3162_v39  ;;  %v3013_v22 = vld [vmem:[#allocation2 + $0x40] sm:$0x7f]  ;;  %v6803_v46 = vadd.f32 %v6508_v28, %v8036_v3  ;;  %v8225_v58 = vmul.f32 %v8062_v56, %v3363_v7 }
 0x19c   : > { %v3290_v27 = vld [vmem:[#allocation2 + $0x172] sm:$0x7f]  ;;  %9964 = vst [vmem:[#allocation58_spill] sm:$0xff] %v8216_v0  ;;  %9965 = vst [vmem:[#allocation59_spill] sm:$0xff] %v8219_v52  ;;  %v3064_v57 = vld [vmem:[#allocation2 + $0x41] sm:$0x7f]  ;;  %v3130_v32 = vadd.f32 %v3123_v42, %v3080_v6  ;;  %v3081_v5 = vadd.f32 %v3074_v10, %v3023_v47  ;;  %v3480_v37 = vadd.f32 %v3473_v11, %v3430_v33 }
 0x19d   : > { %v3340_v50 = vld [vmem:[#allocation2 + $0x173] sm:$0x7f]  ;;  %1812 = vst.msk [vmem:[#allocation2 + $0x1a1] sm:$0xff] %vm495_vm2, %v6799_v2  ;;  %9966 = vst [vmem:[#allocation60_spill] sm:$0xff] %v8225_v58  ;;  %v3413_v4 = vld [vmem:[#allocation2 + $0x21] sm:$0x7f]  ;;  %v8228_v39 = vadd.f32 %v3172_v30, %v3129_v45  ;;  %v8231_v54 = vmul.f32 %v7974_v26, %v3189_v21  ;;  %v8234_v2 = vmul.f32 %v7992_v14, %v3240_v41 }
 0x19e   : > { %v3113_v35 = vld [vmem:[#allocation2 + $0x32] sm:$0x7f]  ;;  %1810 = vst.msk [vmem:[#allocation2 + $0x61] sm:$0xff] %vm495_vm2, %v6801_v13  ;;  %v3190_v6 = vld [vmem:[#allocation2 + $0x180] sm:$0x7f]  ;;  %1816 = vst.msk [vmem:[#allocation2 + $0x1b1] sm:$0xff] %vm495_vm2, %v6803_v46  ;;  %v3523_v7 = vmul.f32 %v8076_v25, %v3512_v62  ;;  %v3024_v30 = vmul.f32 %v7922_v48, %v3013_v22  ;;  %v3075_v45 = vmul.f32 %v7925_v51, %v3064_v57 }
 0x19f   : > { %v3163_v20 = vld [vmem:[#allocation2 + $0x33] sm:$0x7f]  ;;  %9967 = vst [vmem:[#allocation61_spill] sm:$0xff] %v8231_v54  ;;  %9968 = vst [vmem:[#allocation62_spill] sm:$0xff] %v8234_v2  ;;  %v1767_v3 = vpop.f32.mrb[13].mxu0  ;;  %v3124_v10 = vmul.f32 %v7928_v59, %v3113_v35  ;;  %v8243_v41 = vmul.f32 %v8027_v49, %v3290_v27  ;;  %v8246_v13 = vmul.f32 %v8053_v24, %v3340_v50 }
 0x1a0   : > { %v3364_v15 = vld [vmem:[#allocation2 + $0x30] sm:$0x7f]  ;;  %v3241_v33 = vld [vmem:[#allocation2 + $0x181] sm:$0x7f]  ;;  %v6805_v21 = vadd.f32 %v1767_v3, %v8040_v53  ;;  %v6511_v42 = vpop.f32.mrb[14].mxu0  ;;  %v3174_v62 = vmul.f32 %v7951_v36, %v3163_v20  ;;  %v8250_v22 = vadd.f32 %v3173_v8, %v3130_v32  ;;  %v8256_v50 = vadd.f32 %v3523_v7, %v3480_v37 }
 0x1a1   : > { %v3537_v52 = vld [vmem:[#allocation2 + $0x150] sm:$0x7f]  ;;  %v3291_v11 = vld [vmem:[#allocation2 + $0x182] sm:$0x7f]  ;;  %9969 = vst [vmem:[#allocation63_spill] sm:$0xff] %v8243_v41  ;;  %9970 = vst [vmem:[#allocation64_spill] sm:$0xff] %v8246_v13  ;;  %v6807_v35 = vadd.f32 %v6511_v42, %v8044_v29  ;;  %v3131_v57 = vadd.f32 %v3124_v10, %v3081_v5  ;;  %v8253_v53 = vmul.f32 %v8062_v56, %v3364_v15 }
 0x1a2   : > { %v3587_v0 = vld [vmem:[#allocation2 + $0x151] sm:$0x7f]  ;;  %v3341_v46 = vld [vmem:[#allocation2 + $0x183] sm:$0x7f]  ;;  %1814 = vst.msk [vmem:[#allocation2 + $0x71] sm:$0xff] %vm495_vm2, %v6805_v21  ;;  %v8260_v29 = vmul.f32 %v8079_v60, %v3537_v52  ;;  %v8269_v10 = vmul.f32 %v8069_v18, %v3413_v4  ;;  %v8272_v37 = vmul.f32 %v7974_v26, %v3190_v6  ;;  %v3082_v7 = vadd.f32 %v3075_v45, %v3024_v30 }
 0x1a3   : > { %v3637_v47 = vld [vmem:[#allocation2 + $0x152] sm:$0x7f]  ;;  %v3712_v58 = vld [vmem:[#allocation2 + $0x20] sm:$0x7f]  ;;  %9971 = vst [vmem:[#allocation65_spill] sm:$0xff] %v8253_v53  ;;  %1820 = vst.msk [vmem:[#allocation2 + $0x1c1] sm:$0xff] %vm495_vm2, %v6807_v35  ;;  %v8263_v8 = vmul.f32 %v8082_v61, %v3587_v0  ;;  %v8280_v53 = vmul.f32 %v8027_v49, %v3291_v11  ;;  %v8283_v4 = vmul.f32 %v8053_v24, %v3341_v46 }
 0x1a4   : > { %v3414_v28 = vld [vmem:[#allocation2 + $0x31] sm:$0x7f]  ;;  %v3762_v13 = vld [vmem:[#allocation2 + $0x21] sm:$0x7f]  ;;  %v8266_v32 = vmul.f32 %v8089_v63, %v3637_v47  ;;  %9974 = vst [vmem:[#allocation68_spill] sm:$0xff] %v8269_v10  ;;  %9975 = vst [vmem:[#allocation69_spill] sm:$0xff] %v8272_v37  ;;  %v8277_v47 = vmul.f32 %v7992_v14, %v3241_v33  ;;  %v8292_v11 = vmul.f32 %v8095_v16, %v3712_v58 }
 0x1a5   : > { %v3687_v2 = vld [vmem:[#allocation2 + $0x153] sm:$0x7f]  ;;  %v3114_v20 = vld [vmem:[#allocation2 + $0x42] sm:$0x7f]  ;;  %9972 = vst [vmem:[#allocation66_spill] sm:$0xff] %v8263_v8  ;;  %9977 = vst [vmem:[#allocation71_spill] sm:$0xff] %v8280_v53  ;;  %v8295_v46 = vmul.f32 %v8069_v18, %v3414_v28 }
 0x1a6   : > { %v3014_v3 = vld [vmem:[#allocation2 + $0x50] sm:$0x7f]  ;;  %9973 = vst [vmem:[#allocation67_spill] sm:$0xff] %v8266_v32  ;;  %v3812_v5 = vld [vmem:[#allocation2 + $0x22] sm:$0x7f]  ;;  %9976 = vst [vmem:[#allocation70_spill] sm:$0xff] %v8277_v47  ;;  %v8286_v30 = vmul.f32 %v8092_v9, %v3687_v2 }
 0x1a7   : > { %v3065_v27 = vld [vmem:[#allocation2 + $0x51] sm:$0x7f]  ;;  %v3862_v15 = vld [vmem:[#allocation2 + $0x23] sm:$0x7f]  ;;  %v3025_v52 = vmul.f32 %v7922_v48, %v3014_v3  ;;  %9978 = vst [vmem:[#allocation72_spill] sm:$0xff] %v8283_v4  ;;  %v8288_v3 = vadd.f32 %v3174_v62, %v3131_v57  ;;  %9980 = vst [vmem:[#allocation74_spill] sm:$0xff] %v8295_v46  ;;  %v8300_v62 = vmul.f32 %v8098_v34, %v3762_v13 }
 0x1a8   : > { %v3164_v21 = vld [vmem:[#allocation2 + $0x43] sm:$0x7f]  ;;  %v3076_v0 = vmul.f32 %v7925_v51, %v3065_v27  ;;  %9979 = vst [vmem:[#allocation73_spill] sm:$0xff] %v8286_v30  ;;  %v3125_v27 = vmul.f32 %v7928_v59, %v3114_v20  ;;  %v3191_v32 = vld [vmem:[#allocation2 + $0x190] sm:$0x7f]  ;;  %v1779_v37 = vpop.f32.mrb[15].mxu0  ;;  %v8303_v57 = vmul.f32 %v8102_v19, %v3812_v5  ;;  %v8307_v46 = vmul.f32 %v8108_v43, %v3862_v15 }
 0x1a9   : > { %v3365_v42 = vld [vmem:[#allocation2 + $0x40] sm:$0x7f]  ;;  %v3242_v33 = vld [vmem:[#allocation2 + $0x191] sm:$0x7f]  ;;  %v6809_v28 = vadd.f32 %v1779_v37, %v8048_v12 }
 0x1aa   : > { %v3415_v35 = vld [vmem:[#allocation2 + $0x41] sm:$0x7f]  ;;  %v3292_v4 = vld [vmem:[#allocation2 + $0x192] sm:$0x7f]  ;;  %v3132_v20 = vadd.f32 %v3125_v27, %v3082_v7  ;;  %v3083_v58 = vadd.f32 %v3076_v0, %v3025_v52  ;;  %9981 = vst [vmem:[#allocation75_spill] sm:$0xff] %v8307_v46 }
 0x1ab   : > { %v3887_v41 = vld [vmem:[#allocation2 + $0x160] sm:$0x7f]  ;;  %v3115_v53 = vld [vmem:[#allocation2 + $0x52] sm:$0x7f]  ;;  %v8317_v52 = vmul.f32 %v8069_v18, %v3415_v35  ;;  %1818 = vst.msk [vmem:[#allocation2 + $0x81] sm:$0xff] %vm495_vm2, %v6809_v28  ;;  %v8331_v35 = vmul.f32 %v7974_v26, %v3191_v32 }
 0x1ac   : > { %v3015_v6 = vld [vmem:[#allocation2 + $0x60] sm:$0x7f]  ;;  %v3342_v8 = vld [vmem:[#allocation2 + $0x193] sm:$0x7f]  ;;  %v8314_v7 = vmul.f32 %v8105_v40, %v3887_v41  ;;  %v3126_v12 = vmul.f32 %v7928_v59, %v3115_v53  ;;  %v8334_v53 = vmul.f32 %v7992_v14, %v3242_v33 }
 0x1ad   : > { %v3937_v45 = vld [vmem:[#allocation2 + $0x161] sm:$0x7f]  ;;  %v3026_v2 = vmul.f32 %v7922_v48, %v3015_v6  ;;  %v3165_v54 = vld [vmem:[#allocation2 + $0x53] sm:$0x7f]  ;;  %v3175_v48 = vmul.f32 %v7951_v36, %v3164_v21  ;;  %9984 = vst [vmem:[#allocation78_spill] sm:$0xff] %v8317_v52  ;;  %9988 = vst [vmem:[#allocation82_spill] sm:$0xff] %v8331_v35  ;;  %v8337_v52 = vmul.f32 %v8027_v49, %v3292_v4 }
 0x1ae   : > { %v3987_v10 = vld [vmem:[#allocation2 + $0x162] sm:$0x7f]  ;;  %v3366_v17 = vld [vmem:[#allocation2 + $0x50] sm:$0x7f]  ;;  %9983 = vst [vmem:[#allocation77_spill] sm:$0xff] %v8314_v7  ;;  %v8322_v21 = vmul.f32 %v8111_v44, %v3937_v45  ;;  %9989 = vst [vmem:[#allocation83_spill] sm:$0xff] %v8334_v53  ;;  %v3176_v53 = vmul.f32 %v7951_v36, %v3165_v54 }
 0x1af   : > { %v4037_v38 = vld [vmem:[#allocation2 + $0x163] sm:$0x7f]  ;;  %v3416_v13 = vld [vmem:[#allocation2 + $0x51] sm:$0x7f]  ;;  %9990 = vst [vmem:[#allocation84_spill] sm:$0xff] %v8337_v52  ;;  %v6646_v7 = vpop.f32.mrb[10].mxu1  ;;  %v8347_v4 = vmul.f32 %v8062_v56, %v3366_v17 }
 0x1b0   : > { %v3066_v47 = vld [vmem:[#allocation2 + $0x61] sm:$0x7f]  ;;  %9985 = vst [vmem:[#allocation79_spill] sm:$0xff] %v8322_v21  ;;  %v8328_v41 = vmul.f32 %v8117_v55, %v4037_v38  ;;  %v4062_v45 = vld [vmem:[#allocation2 + $0x30] sm:$0x7f]  ;;  %v8339_v21 = vadd.f32 %v3175_v48, %v3132_v20  ;;  %v3133_v38 = vadd.f32 %v3126_v12, %v3083_v58  ;;  %v2883_v35 = vpop.f32.mrb[11].mxu1 }
 0x1b1   : > { %v3077_v30 = vmul.f32 %v7925_v51, %v3066_v47  ;;  %v8311_v51 = vmul.f32 %v8062_v56, %v3365_v42  ;;  %v3192_v47 = vld [vmem:[#allocation2 + $0x1a0] sm:$0x7f]  ;;  %v8325_v42 = vmul.f32 %v8114_v1, %v3987_v10  ;;  %v8342_v10 = vmul.f32 %v8053_v24, %v3342_v8  ;;  %v4112_v46 = vld [vmem:[#allocation2 + $0x31] sm:$0x7f]  ;;  %v8354_v8 = vld [vmem:[%s9650_s3 + $0x30] ss:$0 sm:$0xff] }
 0x1b2   : > { %v3243_v6 = vld [vmem:[#allocation2 + $0x1a1] sm:$0x7f]  ;;  %9987 = vst [vmem:[#allocation81_spill] sm:$0xff] %v8328_v41  ;;  %v3368_v41 = vld [vmem:[#allocation2 + $0x70] sm:$0x7f]  ;;  %9994 = vst [vmem:[#allocation86_spill] sm:$0xff] %v8354_v8  ;;  %v8357_v12 = vmul.f32 %v7974_v26, %v3192_v47 }
 0x1b3   : > { %9982 = vst [vmem:[#allocation76_spill] sm:$0xff] %v8311_v51  ;;  %v3293_v5 = vld [vmem:[#allocation2 + $0x1a2] sm:$0x7f]  ;;  %9986 = vst [vmem:[#allocation80_spill] sm:$0xff] %v8325_v42  ;;  %v3084_v51 = vadd.f32 %v3077_v30, %v3026_v2  ;;  %v4162_v33 = vld [vmem:[#allocation2 + $0x32] sm:$0x7f]  ;;  %v8360_v54 = vmul.f32 %v7992_v14, %v3243_v6 }
 0x1b4   : > { %v3343_v37 = vld [vmem:[#allocation2 + $0x1a3] sm:$0x7f]  ;;  %9991 = vst [vmem:[#allocation85_spill] sm:$0xff] %v8342_v10  ;;  %v3418_v2 = vld [vmem:[#allocation2 + $0x71] sm:$0x7f]  ;;  %9995 = vst [vmem:[#allocation87_spill] sm:$0xff] %v8357_v12  ;;  %v8363_v17 = vmul.f32 %v8027_v49, %v3293_v5  ;;  %v8367_v10 = vmul.f32 %v8069_v18, %v3416_v13 }
 0x1b5   : > { %v3116_v15 = vld [vmem:[#allocation2 + $0x62] sm:$0x7f]  ;;  %v4212_v58 = vld [vmem:[#allocation2 + $0x33] sm:$0x7f]  ;;  %9996 = vst [vmem:[#allocation88_spill] sm:$0xff] %v8360_v54  ;;  %v8370_v52 = vmul.f32 %v8053_v24, %v3343_v37  ;;  %v6649_v49 = vpop.f32.mrb[12].mxu1 }
 0x1b6   : > { %v3166_v0 = vld [vmem:[#allocation2 + $0x63] sm:$0x7f]  ;;  %v3127_v30 = vmul.f32 %v7928_v59, %v3116_v15  ;;  %9997 = vst [vmem:[#allocation89_spill] sm:$0xff] %v8363_v17  ;;  %9998 = vst [vmem:[#allocation90_spill] sm:$0xff] %v8367_v10  ;;  %v3713_v6 = vld [vmem:[#allocation2 + $0x30] sm:$0x7f] }
 0x1b7   : > { %v3367_v27 = vld [vmem:[#allocation2 + $0x60] sm:$0x7f]  ;;  %v9992_v42 = vld [vmem:[#allocation13_spill] sm:$0xff]  ;;  %9999 = vst [vmem:[#allocation91_spill] sm:$0xff] %v8370_v52  ;;  %v3177_v26 = vmul.f32 %v7951_v36, %v3166_v0  ;;  %v3763_v5 = vld [vmem:[#allocation2 + $0x31] sm:$0x7f]  ;;  %v8387_v0 = vmul.f32 %v8062_v56, %v3368_v41 }
 0x1b8   : > { %v3417_v28 = vld [vmem:[#allocation2 + $0x61] sm:$0x7f]  ;;  %v6810_v32 = vadd.f32 %v6646_v7, %v9992_v42  ;;  %9993 = vst [vmem:[#allocation13_spill] sm:$0xff] %v8347_v4  ;;  %v6811_v20 = vadd.f32 %v9992_v42, %v2883_v35  ;;  %v3134_v4 = vadd.f32 %v3127_v30, %v3084_v51  ;;  %v8374_v14 = vmul.f32 %v8062_v56, %v3367_v27  ;;  %v2895_v17 = vpop.f32.mrb[13].mxu1  ;;  %v10001_v54 = vld [vmem:[#allocation34_spill] sm:$0xff]  ;;  %v10004_v30 = vld [vmem:[#allocation35_spill] sm:$0xff] }
 0x1b9   : > { %v3463_v48 = vld [vmem:[#allocation2 + $0x22] sm:$0x7f]  ;;  %v6812_v13 = vadd.f32 %v6649_v49, %v9992_v42  ;;  %v8381_v24 = vmul.f32 %v10001_v54, %v4062_v45  ;;  %v3813_v51 = vld [vmem:[#allocation2 + $0x32] sm:$0x7f]  ;;  %v8384_v36 = vmul.f32 %v8069_v18, %v3417_v28  ;;  %10003 = vst [vmem:[#allocation94_spill] sm:$0xff] %v8387_v0  ;;  %v6813_v27 = vadd.f32 %v9992_v42, %v2895_v17 }
 0x1ba   : > { %v3513_v7 = vld [vmem:[#allocation2 + $0x23] sm:$0x7f]  ;;  %2980 = vst.msk [vmem:[#allocation2 + $0x1f1] sm:$0xff] %vm495_vm2, %v6810_v32  ;;  %10000 = vst [vmem:[#allocation92_spill] sm:$0xff] %v8374_v14  ;;  %v8377_v32 = vadd.f32 %v3176_v53, %v3133_v38  ;;  %v3863_v37 = vld [vmem:[#allocation2 + $0x33] sm:$0x7f]  ;;  %v8398_v14 = vmul.f32 %v8354_v8, %v4212_v58  ;;  %v8401_v28 = vmul.f32 %v8072_v23, %v3463_v48 }
 0x1bb   : > { %v3538_v59 = vld [vmem:[#allocation2 + $0x160] sm:$0x7f]  ;;  %2978 = vst.msk [vmem:[#allocation2 + $0xb1] sm:$0xff] %vm495_vm2, %v6811_v20  ;;  %10002 = vst [vmem:[#allocation93_spill] sm:$0xff] %v8384_v36  ;;  %v8391_v20 = vmul.f32 %v10004_v30, %v4112_v46  ;;  %v3888_v49 = vld [vmem:[#allocation2 + $0x170] sm:$0x7f]  ;;  %v8404_v56 = vmul.f32 %v8076_v25, %v3513_v7  ;;  %v8409_v0 = vadd.f32 %v3177_v26, %v3134_v4 }
 0x1bc   : > { %v3588_v15 = vld [vmem:[#allocation2 + $0x161] sm:$0x7f]  ;;  %v3938_v52 = vld [vmem:[#allocation2 + $0x171] sm:$0x7f]  ;;  %2984 = vst.msk [vmem:[#allocation2 + $0x201] sm:$0xff] %vm495_vm2, %v6812_v13  ;;  %10006 = vst [vmem:[#allocation95_spill] sm:$0xff] %v8398_v14  ;;  %v8413_v58 = vmul.f32 %v8079_v60, %v3538_v59  ;;  %v8429_v59 = vmul.f32 %v8098_v34, %v3763_v5 }
 0x1bd   : > { %v3638_v35 = vld [vmem:[#allocation2 + $0x162] sm:$0x7f]  ;;  %v3988_v45 = vld [vmem:[#allocation2 + $0x172] sm:$0x7f]  ;;  %10008 = vst [vmem:[#allocation97_spill] sm:$0xff] %v8409_v0  ;;  %2982 = vst.msk [vmem:[#allocation2 + $0xc1] sm:$0xff] %vm495_vm2, %v6813_v27  ;;  %v8416_v48 = vmul.f32 %v8082_v61, %v3588_v15 }
 0x1be   : > { %v3688_v47 = vld [vmem:[#allocation2 + $0x163] sm:$0x7f]  ;;  %v4038_v41 = vld [vmem:[#allocation2 + $0x173] sm:$0x7f]  ;;  %v6652_v13 = vpop.f32.mrb[14].mxu1  ;;  %v8419_v7 = vmul.f32 %v8089_v63, %v3638_v35  ;;  %10012 = vst [vmem:[#allocation101_spill] sm:$0xff] %v8429_v59 }
 0x1bf   : > { %v10005_v53 = vld [vmem:[#allocation36_spill] sm:$0xff]  ;;  %v6814_v12 = vadd.f32 %v6652_v13, %v9992_v42  ;;  %v8423_v4 = vmul.f32 %v8092_v9, %v3688_v47  ;;  %v3464_v26 = vld [vmem:[#allocation2 + $0x32] sm:$0x7f]  ;;  %v8436_v13 = vmul.f32 %v8108_v43, %v3863_v37  ;;  %v8439_v47 = vmul.f32 %v8105_v40, %v3888_v49 }
 0x1c0   : > { %v8394_v38 = vmul.f32 %v10005_v53, %v4162_v33  ;;  %v4063_v46 = vld [vmem:[#allocation2 + $0x40] sm:$0x7f]  ;;  %v8407_v33 = vmul.f32 %v8069_v18, %v3418_v2  ;;  %10009 = vst [vmem:[#allocation98_spill] sm:$0xff] %v8419_v7  ;;  %v2907_v18 = vpop.f32.mrb[15].mxu1  ;;  %v8426_v2 = vmul.f32 %v8095_v16, %v3713_v6  ;;  %v3514_v15 = vld [vmem:[#allocation2 + $0x33] sm:$0x7f]  ;;  %v8449_v37 = vmul.f32 %v8117_v55, %v4038_v41 }
 0x1c1   : > { %v4113_v17 = vld [vmem:[#allocation2 + $0x41] sm:$0x7f]  ;;  %10010 = vst [vmem:[#allocation99_spill] sm:$0xff] %v8423_v4  ;;  %v3213_v27 = vld [vmem:[#allocation2 + $0x1f0] sm:$0x7f]  ;;  %v6815_v35 = vadd.f32 %v9992_v42, %v2907_v18  ;;  %10014 = vst [vmem:[#allocation103_spill] sm:$0xff] %v8436_v13  ;;  %v8452_v49 = vmul.f32 %v10001_v54, %v4063_v46  ;;  %v8465_v41 = vmul.f32 %v8072_v23, %v3464_v26 }
 0x1c2   : > { %10007 = vst [vmem:[#allocation96_spill] sm:$0xff] %v8407_v33  ;;  %v4163_v36 = vld [vmem:[#allocation2 + $0x42] sm:$0x7f]  ;;  %10011 = vst [vmem:[#allocation100_spill] sm:$0xff] %v8426_v2  ;;  %v8433_v33 = vmul.f32 %v8102_v19, %v3813_v51  ;;  %v3539_v0 = vld [vmem:[#allocation2 + $0x170] sm:$0x7f]  ;;  %v8443_v2 = vmul.f32 %v8111_v44, %v3938_v52  ;;  %v8446_v51 = vmul.f32 %v8114_v1, %v3988_v45 }
 0x1c3   : > { %v4213_v10 = vld [vmem:[#allocation2 + $0x43] sm:$0x7f]  ;;  %10015 = vst [vmem:[#allocation104_spill] sm:$0xff] %v8439_v47  ;;  %v3589_v6 = vld [vmem:[#allocation2 + $0x171] sm:$0x7f]  ;;  %2988 = vst.msk [vmem:[#allocation2 + $0x211] sm:$0xff] %vm495_vm2, %v6814_v12  ;;  %v8456_v12 = vmul.f32 %v10004_v30, %v4113_v17  ;;  %v8459_v52 = vmul.f32 %v10005_v53, %v4163_v36  ;;  %v8471_v30 = vmul.f32 %v8076_v25, %v3514_v15 }
 0x1c4   : > { %10013 = vst [vmem:[#allocation102_spill] sm:$0xff] %v8433_v33  ;;  %v3639_v14 = vld [vmem:[#allocation2 + $0x172] sm:$0x7f]  ;;  %10016 = vst [vmem:[#allocation105_spill] sm:$0xff] %v8443_v2  ;;  %v3714_v18 = vld [vmem:[#allocation2 + $0x40] sm:$0x7f]  ;;  %v8462_v45 = vmul.f32 %v8354_v8, %v4213_v10  ;;  %v8482_v15 = vmul.f32 %v8082_v61, %v3589_v6 }
 0x1c5   : > { %v3689_v4 = vld [vmem:[#allocation2 + $0x173] sm:$0x7f]  ;;  %10017 = vst [vmem:[#allocation106_spill] sm:$0xff] %v8446_v51  ;;  %10018 = vst [vmem:[#allocation107_spill] sm:$0xff] %v8449_v37  ;;  %v3764_v47 = vld [vmem:[#allocation2 + $0x41] sm:$0x7f]  ;;  %v8485_v25 = vmul.f32 %v8089_v63, %v3639_v14  ;;  %v8493_v44 = vmul.f32 %v8095_v16, %v3714_v18 }
 0x1c6   : > { %v3036_v5 = vld [vmem:[#allocation2 + $0xb0] sm:$0x7f]  ;;  %10019 = vst [vmem:[#allocation108_spill] sm:$0xff] %v8452_v49  ;;  %2986 = vst.msk [vmem:[#allocation2 + $0xd1] sm:$0xff] %vm495_vm2, %v6815_v35  ;;  %v6655_v13 = vpop.f32.mrb[16].mxu1  ;;  %v10023_v37 = vld [vmem:[#allocation9_spill] sm:$0xff] }
 0x1c7   : > { %v3086_v59 = vld [vmem:[#allocation2 + $0xb1] sm:$0x7f]  ;;  %10020 = vst [vmem:[#allocation109_spill] sm:$0xff] %v8456_v12  ;;  %10021 = vst [vmem:[#allocation110_spill] sm:$0xff] %v8459_v52  ;;  %v3814_v46 = vld [vmem:[#allocation2 + $0x42] sm:$0x7f]  ;;  %v3224_v49 = vmul.f32 %v10023_v37, %v3213_v27  ;;  %v6816_v54 = vadd.f32 %v6655_v13, %v9992_v42 }
 0x1c8   : > { %v3387_v40 = vld [vmem:[#allocation2 + $0xb0] sm:$0x7f]  ;;  %10022 = vst [vmem:[#allocation111_spill] sm:$0xff] %v8462_v45  ;;  %v2919_v35 = vpop.f32.mrb[17].mxu1  ;;  %v10024_v2 = vld [vmem:[#allocation37_spill] sm:$0xff]  ;;  %10025 = vst [vmem:[#allocation9_spill] sm:$0xff] %v8471_v30  ;;  %v8499_v6 = vmul.f32 %v8102_v19, %v3814_v46 }
 0x1c9   : > { %v3263_v51 = vld [vmem:[#allocation2 + $0x1f1] sm:$0x7f]  ;;  %v3398_v55 = vmul.f32 %v10024_v2, %v3387_v40  ;;  %v10027_v8 = vld [vmem:[#allocation12_spill] sm:$0xff]  ;;  %v6817_v26 = vadd.f32 %v9992_v42, %v2919_v35  ;;  %v10028_v52 = vld [vmem:[#allocation41_spill] sm:$0xff]  ;;  %2992 = vst.msk [vmem:[#allocation2 + $0x221] sm:$0xff] %vm495_vm2, %v6816_v54  ;;  %v8479_v40 = vmul.f32 %v8079_v60, %v3539_v0  ;;  %v6658_v1 = vpop.f32.mrb[18].mxu1  ;;  %v8496_v0 = vmul.f32 %v8098_v34, %v3764_v47 }
 0x1ca   : > { %v3562_v17 = vld [vmem:[#allocation2 + $0x1f0] sm:$0x7f]  ;;  %v3097_v45 = vmul.f32 %v10027_v8, %v3086_v59  ;;  %v3214_v27 = vld [vmem:[#allocation2 + $0x200] sm:$0x7f]  ;;  %10030 = vst [vmem:[#allocation12_spill] sm:$0xff] %v8482_v15  ;;  %10031 = vst [vmem:[#allocation41_spill] sm:$0xff] %v8485_v25  ;;  %v8488_v59 = vmul.f32 %v8092_v9, %v3689_v4  ;;  %v3231_v14 = vadd.f32 %v3224_v49, %v8228_v39 }
 0x1cb   : > { %v3313_v36 = vld [vmem:[#allocation2 + $0x1f2] sm:$0x7f]  ;;  %v3573_v12 = vmul.f32 %v10028_v52, %v3562_v17  ;;  %v3037_v23 = vld [vmem:[#allocation2 + $0xc0] sm:$0x7f]  ;;  %2990 = vst.msk [vmem:[#allocation2 + $0xe1] sm:$0xff] %vm495_vm2, %v6817_v26  ;;  %10035 = vst [vmem:[#allocation113_spill] sm:$0xff] %v8496_v0  ;;  %v6818_v9 = vadd.f32 %v6658_v1, %v9992_v42  ;;  %v3225_v47 = vmul.f32 %v10023_v37, %v3214_v27 }
 0x1cc   : > { %v10026_v53 = vld [vmem:[#allocation10_spill] sm:$0xff]  ;;  %10032 = vst [vmem:[#allocation112_spill] sm:$0xff] %v8488_v59  ;;  %v3087_v17 = vld [vmem:[#allocation2 + $0xc1] sm:$0x7f]  ;;  %10036 = vst [vmem:[#allocation114_spill] sm:$0xff] %v8499_v6 }
 0x1cd   : > { %v3047_v10 = vmul.f32 %v10026_v53, %v3036_v5  ;;  %v3437_v13 = vld [vmem:[#allocation2 + $0xb1] sm:$0x7f]  ;;  %10029 = vst [vmem:[#allocation10_spill] sm:$0xff] %v8479_v40  ;;  %v10033_v5 = vld [vmem:[#allocation11_spill] sm:$0xff]  ;;  %v10037_v63 = vld [vmem:[#allocation40_spill] sm:$0xff]  ;;  %v3580_v60 = vadd.f32 %v3573_v12, %v8256_v50  ;;  %v3048_v39 = vmul.f32 %v10026_v53, %v3037_v23  ;;  %v3098_v1 = vmul.f32 %v10027_v8, %v3087_v17 }
 0x1ce   : > { %v3274_v35 = vmul.f32 %v10033_v5, %v3263_v51  ;;  %v3612_v54 = vld [vmem:[#allocation2 + $0x1f1] sm:$0x7f]  ;;  %10034 = vst [vmem:[#allocation11_spill] sm:$0xff] %v8493_v44  ;;  %v2931_v51 = vpop.f32.mrb[19].mxu1  ;;  %v3405_v61 = vadd.f32 %v3398_v55, %v10037_v63  ;;  %v10038_v59 = vld [vmem:[#allocation19_spill] sm:$0xff]  ;;  %2996 = vst.msk [vmem:[#allocation2 + $0x231] sm:$0xff] %vm495_vm2, %v6818_v9 }
 0x1cf   : > { %v3136_v4 = vld [vmem:[#allocation2 + $0xb2] sm:$0x7f]  ;;  %v8506_v18 = vmul.f32 %v10038_v59, %v3313_v36  ;;  %v3104_v16 = vadd.f32 %v3097_v45, %v3047_v10  ;;  %v3264_v34 = vld [vmem:[#allocation2 + $0x201] sm:$0x7f]  ;;  %v6819_v46 = vadd.f32 %v9992_v42, %v2931_v51  ;;  %v10041_v36 = vld [vmem:[#allocation5_spill] sm:$0xff]  ;;  %v6661_v23 = vpop.f32.mrb[20].mxu1 }
 0x1d0   : > { %v3487_v26 = vld [vmem:[#allocation2 + $0xb2] sm:$0x7f]  ;;  %v3314_v19 = vld [vmem:[#allocation2 + $0x202] sm:$0x7f]  ;;  %v3147_v45 = vmul.f32 %v10041_v36, %v3136_v4  ;;  %v8520_v25 = vadd.f32 %v3274_v35, %v3231_v14  ;;  %v6820_v9 = vadd.f32 %v6661_v23, %v9992_v42  ;;  %v3232_v4 = vadd.f32 %v3225_v47, %v8250_v22 }
 0x1d1   : > { %v3038_v49 = vld [vmem:[#allocation2 + $0xd0] sm:$0x7f]  ;;  %2994 = vst.msk [vmem:[#allocation2 + $0xf1] sm:$0xff] %vm495_vm2, %v6819_v46  ;;  %v10042_v0 = vld [vmem:[#allocation39_spill] sm:$0xff]  ;;  %v3137_v40 = vld [vmem:[#allocation2 + $0xc2] sm:$0x7f]  ;;  %v8527_v33 = vmul.f32 %v10038_v59, %v3314_v19 }
 0x1d2   : > { %v3088_v6 = vld [vmem:[#allocation2 + $0xd1] sm:$0x7f]  ;;  %v3049_v27 = vmul.f32 %v10026_v53, %v3038_v49  ;;  %v3498_v17 = vmul.f32 %v10042_v0, %v3487_v26  ;;  %v3154_v43 = vadd.f32 %v3147_v45, %v3104_v16  ;;  %v3275_v49 = vmul.f32 %v10033_v5, %v3264_v34  ;;  %v3039_v23 = vld [vmem:[#allocation2 + $0xe0] sm:$0x7f]  ;;  %3000 = vst.msk [vmem:[#allocation2 + $0x241] sm:$0xff] %vm495_vm2, %v6820_v9 }
 0x1d3   : > { %v10039_v63 = vld [vmem:[#allocation38_spill] sm:$0xff]  ;;  %v3099_v51 = vmul.f32 %v10027_v8, %v3088_v6  ;;  %v3216_v6 = vld [vmem:[#allocation2 + $0x220] sm:$0x7f]  ;;  %v3105_v26 = vadd.f32 %v3098_v1, %v3048_v39  ;;  %v3050_v47 = vmul.f32 %v10026_v53, %v3039_v23  ;;  %v3148_v39 = vmul.f32 %v10041_v36, %v3137_v40 }
 0x1d4   : > { %v3448_v55 = vmul.f32 %v10039_v63, %v3437_v13  ;;  %v10040_v50 = vld [vmem:[#allocation42_spill] sm:$0xff]  ;;  %v2943_v13 = vpop.f32.mrb[21].mxu1  ;;  %v3089_v30 = vld [vmem:[#allocation2 + $0xe1] sm:$0x7f]  ;;  %v3227_v34 = vmul.f32 %v10023_v37, %v3216_v6 }
 0x1d5   : > { %v3623_v12 = vmul.f32 %v10040_v50, %v3612_v54  ;;  %v3215_v10 = vld [vmem:[#allocation2 + $0x210] sm:$0x7f]  ;;  %v6821_v46 = vadd.f32 %v9992_v42, %v2943_v13  ;;  %v3106_v22 = vadd.f32 %v3099_v51, %v3049_v27  ;;  %v6664_v19 = vpop.f32.mrb[22].mxu1  ;;  %v8541_v27 = vadd.f32 %v3275_v49, %v3232_v4  ;;  %v3139_v13 = vld [vmem:[#allocation2 + $0xe2] sm:$0x7f] }
 0x1d6   : > { %v3662_v44 = vld [vmem:[#allocation2 + $0x1f2] sm:$0x7f]  ;;  %v3455_v15 = vadd.f32 %v3448_v55, %v3405_v61  ;;  %v3226_v35 = vmul.f32 %v10023_v37, %v3215_v10  ;;  %v3100_v55 = vmul.f32 %v10027_v8, %v3089_v30  ;;  %v2955_v45 = vpop.f32.mrb[23].mxu1  ;;  %v3316_v4 = vld [vmem:[#allocation2 + $0x222] sm:$0x7f] }
 0x1d7   : > { %v3630_v54 = vadd.f32 %v3623_v12, %v3580_v60  ;;  %v3138_v14 = vld [vmem:[#allocation2 + $0xd2] sm:$0x7f]  ;;  %2998 = vst.msk [vmem:[#allocation2 + $0x101] sm:$0xff] %vm495_vm2, %v6821_v46  ;;  %v6822_v12 = vadd.f32 %v6664_v19, %v9992_v42  ;;  %v6823_v6 = vadd.f32 %v9992_v42, %v2955_v45  ;;  %v3155_v46 = vadd.f32 %v3148_v39, %v3105_v26  ;;  %v3266_v19 = vld [vmem:[#allocation2 + $0x221] sm:$0x7f] }
 0x1d8   : > { %v10043_v60 = vld [vmem:[#allocation43_spill] sm:$0xff]  ;;  %v3265_v16 = vld [vmem:[#allocation2 + $0x211] sm:$0x7f]  ;;  %v3505_v10 = vadd.f32 %v3498_v17, %v3455_v15  ;;  %v3149_v51 = vmul.f32 %v10041_v36, %v3138_v14  ;;  %v3233_v40 = vadd.f32 %v3226_v35, %v8288_v3  ;;  %v3107_v7 = vadd.f32 %v3100_v55, %v3050_v47  ;;  %v6667_v3 = vpop.f32.mrb[24].mxu1  ;;  %v3737_v47 = vld [vmem:[#allocation2 + $0xc0] sm:$0x7f] }
 0x1d9   : > { %v3673_v61 = vmul.f32 %v10043_v60, %v3662_v44  ;;  %v3315_v1 = vld [vmem:[#allocation2 + $0x212] sm:$0x7f]  ;;  %v8539_v44 = vadd.f32 %v8185_v31, %v3154_v43  ;;  %v3276_v23 = vmul.f32 %v10033_v5, %v3265_v16  ;;  %3004 = vst.msk [vmem:[#allocation2 + $0x251] sm:$0xff] %vm495_vm2, %v6822_v12  ;;  %3002 = vst.msk [vmem:[#allocation2 + $0x111] sm:$0xff] %vm495_vm2, %v6823_v6  ;;  %v2967_v14 = vpop.f32.mrb[25].mxu1  ;;  %v10044_v12 = vld [vmem:[#allocation56_spill] sm:$0xff] }
 0x1da   : > { %v3217_v30 = vld [vmem:[#allocation2 + $0x230] sm:$0x7f]  ;;  %v8549_v43 = vmul.f32 %v10038_v59, %v3315_v1  ;;  %v3156_v31 = vadd.f32 %v3149_v51, %v3106_v22  ;;  %v3150_v26 = vmul.f32 %v10041_v36, %v3139_v13  ;;  %v6824_v35 = vadd.f32 %v6667_v3, %v9992_v42 }
 0x1db   : > { %v3680_v9 = vadd.f32 %v3673_v61, %v3630_v54  ;;  %v3040_v15 = vld [vmem:[#allocation2 + $0xf0] sm:$0x7f]  ;;  %v3234_v54 = vadd.f32 %v3227_v34, %v8339_v21  ;;  %v3228_v49 = vmul.f32 %v10023_v37, %v3217_v30  ;;  %v3555_v61 = vadd.f32 %v8260_v29, %v3505_v10  ;;  %v10046_v30 = vld [vmem:[#allocation61_spill] sm:$0xff] }
 0x1dc   : > { %v3090_v17 = vld [vmem:[#allocation2 + $0xf1] sm:$0x7f]  ;;  %v3277_v22 = vmul.f32 %v10033_v5, %v3266_v19  ;;  %v3051_v34 = vmul.f32 %v10026_v53, %v3040_v15  ;;  %v6825_v1 = vadd.f32 %v9992_v42, %v2967_v14  ;;  %v8563_v45 = vadd.f32 %v10044_v12, %v3155_v46  ;;  %3008 = vst.msk [vmem:[#allocation2 + $0x261] sm:$0xff] %vm495_vm2, %v6824_v35  ;;  %v10048_v46 = vld [vmem:[#allocation44_spill] sm:$0xff] }
 0x1dd   : > { %v3730_v16 = vadd.f32 %v8292_v11, %v3680_v9  ;;  %v3267_v55 = vld [vmem:[#allocation2 + $0x231] sm:$0x7f]  ;;  %v3101_v39 = vmul.f32 %v10027_v8, %v3090_v17  ;;  %v8565_v51 = vadd.f32 %v3276_v23, %v3233_v40  ;;  %v8568_v29 = vmul.f32 %v10038_v59, %v3316_v4  ;;  %v3787_v23 = vld [vmem:[#allocation2 + $0xc1] sm:$0x7f] }
 0x1de   : > { %v3317_v21 = vld [vmem:[#allocation2 + $0x232] sm:$0x7f]  ;;  %v3157_v11 = vadd.f32 %v3150_v26, %v3107_v7  ;;  %v3041_v9 = vld [vmem:[#allocation2 + $0x100] sm:$0x7f]  ;;  %v8572_v6 = vadd.f32 %v10046_v30, %v3156_v31  ;;  %v8574_v19 = vadd.f32 %v3277_v22, %v3234_v54  ;;  %v3235_v42 = vadd.f32 %v3228_v49, %v8377_v32  ;;  %3006 = vst.msk [vmem:[#allocation2 + $0x121] sm:$0xff] %vm495_vm2, %v6825_v1  ;;  %v10054_v1 = vld [vmem:[#allocation45_spill] sm:$0xff] }
 0x1df   : > { %10045 = vst [vmem:[#allocation40_spill] sm:$0xff] %v8568_v29  ;;  %v3140_v10 = vld [vmem:[#allocation2 + $0xf2] sm:$0x7f]  ;;  %v3091_v13 = vld [vmem:[#allocation2 + $0x101] sm:$0x7f]  ;;  %v3748_v40 = vmul.f32 %v10048_v46, %v3737_v47  ;;  %v3278_v15 = vmul.f32 %v10033_v5, %v3267_v55  ;;  %v8581_v7 = vmul.f32 %v10038_v59, %v3317_v21  ;;  %v3780_v31 = vadd.f32 %v8300_v62, %v3730_v16  ;;  %v10051_v47 = vld [vmem:[#allocation69_spill] sm:$0xff] }
 0x1e0   : > { %10047 = vst [vmem:[#allocation19_spill] sm:$0xff] %v8574_v19  ;;  %v3218_v17 = vld [vmem:[#allocation2 + $0x240] sm:$0x7f]  ;;  %v10050_v3 = vld [vmem:[#allocation66_spill] sm:$0xff]  ;;  %v3108_v35 = vadd.f32 %v3101_v39, %v3051_v34  ;;  %v3151_v32 = vmul.f32 %v10041_v36, %v3140_v10  ;;  %v3052_v49 = vmul.f32 %v10026_v53, %v3041_v9  ;;  %v3102_v14 = vmul.f32 %v10027_v8, %v3091_v13  ;;  %v10053_v55 = vld [vmem:[#allocation67_spill] sm:$0xff] }
 0x1e1   : > { %10049 = vst [vmem:[#allocation38_spill] sm:$0xff] %v8581_v7  ;;  %v3268_v4 = vld [vmem:[#allocation2 + $0x241] sm:$0x7f]  ;;  %v3605_v26 = vadd.f32 %v10050_v3, %v3555_v61  ;;  %v8589_v22 = vadd.f32 %v10051_v47, %v3157_v11  ;;  %v3798_v12 = vmul.f32 %v10054_v1, %v3787_v23  ;;  %v3830_v30 = vadd.f32 %v8303_v57, %v3780_v31  ;;  %v10057_v8 = vld [vmem:[#allocation47_spill] sm:$0xff]  ;;  %v10058_v11 = vld [vmem:[#allocation73_spill] sm:$0xff] }
 0x1e2   : > { %v3912_v54 = vld [vmem:[#allocation2 + $0x200] sm:$0x7f]  ;;  %v8594_v16 = vadd.f32 %v3278_v15, %v3235_v42  ;;  %v8597_v34 = vmul.f32 %v10023_v37, %v3218_v17  ;;  %v8600_v53 = vmul.f32 %v10033_v5, %v3268_v4  ;;  %v10059_v9 = vld [vmem:[#allocation75_spill] sm:$0xff]  ;;  %v4137_v57 = vld [vmem:[#allocation2 + $0xd1] sm:$0x7f]  ;;  %v3331_v42 = vadd.f32 %v8506_v18, %v8520_v25 }
 0x1e3   : > { %10052 = vst [vmem:[#allocation42_spill] sm:$0xff] %v8589_v22  ;;  %v3655_v21 = vadd.f32 %v10053_v55, %v3605_v26  ;;  %v3837_v61 = vld [vmem:[#allocation2 + $0xc2] sm:$0x7f]  ;;  %v3923_v39 = vmul.f32 %v10057_v8, %v3912_v54  ;;  %v3880_v13 = vadd.f32 %v10059_v9, %v3830_v30  ;;  %v4087_v26 = vld [vmem:[#allocation2 + $0xd0] sm:$0x7f]  ;;  %v8609_v37 = vadd.f32 %v3151_v32, %v3108_v35  ;;  %v10068_v32 = vld [vmem:[#allocation51_spill] sm:$0xff] }
 0x1e4   : > { %v3962_v3 = vld [vmem:[#allocation2 + $0x201] sm:$0x7f]  ;;  %10055 = vst [vmem:[#allocation5_spill] sm:$0xff] %v8594_v16  ;;  %10056 = vst [vmem:[#allocation39_spill] sm:$0xff] %v8600_v53  ;;  %v10060_v31 = vld [vmem:[#allocation53_spill] sm:$0xff]  ;;  %v8611_v15 = vadd.f32 %v3102_v14, %v3052_v49  ;;  %v8622_v49 = vmul.f32 %v10068_v32, %v4137_v57 }
 0x1e5   : > { %v3388_v62 = vld [vmem:[#allocation2 + $0xc0] sm:$0x7f]  ;;  %v3705_v10 = vadd.f32 %v10058_v11, %v3655_v21  ;;  %v3256_v47 = vadd.f32 %v10060_v31, %v8539_v44  ;;  %v10062_v5 = vld [vmem:[#allocation46_spill] sm:$0xff]  ;;  %v3930_v30 = vadd.f32 %v3923_v39, %v3880_v13  ;;  %v10066_v19 = vld [vmem:[#allocation49_spill] sm:$0xff] }
 0x1e6   : > { %v4012_v23 = vld [vmem:[#allocation2 + $0x202] sm:$0x7f]  ;;  %10061 = vst [vmem:[#allocation43_spill] sm:$0xff] %v8611_v15  ;;  %v3848_v17 = vmul.f32 %v10062_v5, %v3837_v61  ;;  %v4187_v55 = vld [vmem:[#allocation2 + $0xd2] sm:$0x7f]  ;;  %v3399_v14 = vmul.f32 %v10024_v2, %v3388_v62 }
 0x1e7   : > { %v10063_v4 = vld [vmem:[#allocation48_spill] sm:$0xff]  ;;  %v3755_v21 = vadd.f32 %v3748_v40, %v3705_v10  ;;  %v10064_v11 = vld [vmem:[#allocation54_spill] sm:$0xff]  ;;  %v4023_v25 = vmul.f32 %v10066_v19, %v4012_v23  ;;  %v10069_v39 = vld [vmem:[#allocation55_spill] sm:$0xff] }
 0x1e8   : > { %v3973_v54 = vmul.f32 %v10063_v4, %v3962_v3  ;;  %v3306_v9 = vadd.f32 %v10064_v11, %v3256_v47  ;;  %v10065_v7 = vld [vmem:[#allocation60_spill] sm:$0xff]  ;;  %v10067_v18 = vld [vmem:[#allocation50_spill] sm:$0xff] }
 0x1e9   : > { %v3381_v16 = vadd.f32 %v10065_v7, %v3331_v42  ;;  %v3438_v29 = vld [vmem:[#allocation2 + $0xc1] sm:$0x7f]  ;;  %v8619_v35 = vmul.f32 %v10067_v18, %v4087_v26  ;;  %v3805_v40 = vadd.f32 %v3798_v12, %v3755_v21  ;;  %v3738_v42 = vld [vmem:[#allocation2 + $0xd0] sm:$0x7f] }
 0x1ea   : > { %v3488_v44 = vld [vmem:[#allocation2 + $0xc2] sm:$0x7f]  ;;  %v3980_v3 = vadd.f32 %v3973_v54, %v3930_v30  ;;  %v3356_v10 = vadd.f32 %v10069_v39, %v3306_v9  ;;  %v3788_v11 = vld [vmem:[#allocation2 + $0xd1] sm:$0x7f]  ;;  %v3449_v26 = vmul.f32 %v10039_v63, %v3438_v29 }
 0x1eb   : > { %v3563_v31 = vld [vmem:[#allocation2 + $0x200] sm:$0x7f]  ;;  %v3499_v57 = vmul.f32 %v10042_v0, %v3488_v44  ;;  %v3855_v62 = vadd.f32 %v3848_v17, %v3805_v40  ;;  %v3838_v21 = vld [vmem:[#allocation2 + $0xd2] sm:$0x7f]  ;;  %v8640_v29 = vmul.f32 %v10054_v1, %v3788_v11  ;;  %v10072_v39 = vld [vmem:[#allocation77_spill] sm:$0xff] }
 0x1ec   : > { %v3613_v61 = vld [vmem:[#allocation2 + $0x201] sm:$0x7f]  ;;  %v3574_v53 = vmul.f32 %v10028_v52, %v3563_v31  ;;  %v4030_v15 = vadd.f32 %v4023_v25, %v3980_v3  ;;  %v3406_v12 = vadd.f32 %v3399_v14, %v3356_v10  ;;  %v3913_v30 = vld [vmem:[#allocation2 + $0x210] sm:$0x7f]  ;;  %v8646_v40 = vmul.f32 %v10062_v5, %v3838_v21  ;;  %v10073_v10 = vld [vmem:[#allocation57_spill] sm:$0xff] }
 0x1ed   : > { %v10070_v13 = vld [vmem:[#allocation68_spill] sm:$0xff]  ;;  %v3963_v44 = vld [vmem:[#allocation2 + $0x211] sm:$0x7f]  ;;  %v3905_v31 = vadd.f32 %v10072_v39, %v3855_v62 }
 0x1ee   : > { %v3431_v7 = vadd.f32 %v10070_v13, %v3381_v16  ;;  %v3663_v47 = vld [vmem:[#allocation2 + $0x202] sm:$0x7f]  ;;  %v3624_v16 = vmul.f32 %v10040_v50, %v3613_v61  ;;  %v4080_v17 = vadd.f32 %v8381_v24, %v4030_v15  ;;  %v3456_v25 = vadd.f32 %v3449_v26, %v3406_v12  ;;  %v4013_v14 = vld [vmem:[#allocation2 + $0x212] sm:$0x7f] }
 0x1ef   : > { %v10071_v22 = vld [vmem:[#allocation52_spill] sm:$0xff]  ;;  %v3674_v9 = vmul.f32 %v10043_v60, %v3663_v47  ;;  %v8649_v61 = vmul.f32 %v10057_v8, %v3913_v30  ;;  %v3257_v13 = vadd.f32 %v10073_v10, %v8563_v45  ;;  %v3389_v47 = vld [vmem:[#allocation2 + $0xd0] sm:$0x7f]  ;;  %v8661_v12 = vmul.f32 %v10066_v19, %v4013_v14  ;;  %v10076_v30 = vld [vmem:[#allocation65_spill] sm:$0xff] }
 0x1f0   : > { %v8628_v23 = vmul.f32 %v10071_v22, %v4187_v55  ;;  %v3481_v54 = vadd.f32 %v8401_v28, %v3431_v7  ;;  %v8637_v55 = vmul.f32 %v10048_v46, %v3738_v42  ;;  %v4088_v3 = vld [vmem:[#allocation2 + $0xe0] sm:$0x7f]  ;;  %v3332_v7 = vadd.f32 %v8527_v33, %v8541_v27  ;;  %v10074_v42 = vld [vmem:[#allocation79_spill] sm:$0xff]  ;;  %v10075_v21 = vld [vmem:[#allocation58_spill] sm:$0xff] }
 0x1f1   : > { %v3955_v24 = vadd.f32 %v10074_v42, %v3905_v31  ;;  %v3506_v15 = vadd.f32 %v3499_v57, %v3456_v25  ;;  %v4138_v26 = vld [vmem:[#allocation2 + $0xe1] sm:$0x7f]  ;;  %v4130_v62 = vadd.f32 %v8391_v20, %v4080_v17  ;;  %v3307_v45 = vadd.f32 %v10075_v21, %v3257_v13  ;;  %v10078_v20 = vld [vmem:[#allocation59_spill] sm:$0xff]  ;;  %v10079_v14 = vld [vmem:[#allocation74_spill] sm:$0xff] }
 0x1f2   : > { %v3531_v28 = vadd.f32 %v8404_v56, %v3481_v54  ;;  %v8657_v56 = vmul.f32 %v10063_v4, %v3963_v44  ;;  %v4188_v54 = vld [vmem:[#allocation2 + $0xe2] sm:$0x7f]  ;;  %v3382_v39 = vadd.f32 %v10076_v30, %v3332_v7  ;;  %v3439_v44 = vld [vmem:[#allocation2 + $0xd1] sm:$0x7f]  ;;  %v8671_v25 = vmul.f32 %v10068_v32, %v4138_v26 }
 0x1f3   : > { %v10077_v33 = vld [vmem:[#allocation80_spill] sm:$0xff]  ;;  %v3556_v31 = vadd.f32 %v8413_v58, %v3506_v15  ;;  %v3357_v17 = vadd.f32 %v10078_v20, %v3307_v45  ;;  %v3489_v13 = vld [vmem:[#allocation2 + $0xd2] sm:$0x7f]  ;;  %v10080_v7 = vld [vmem:[#allocation81_spill] sm:$0xff]  ;;  %v3450_v21 = vmul.f32 %v10039_v63, %v3439_v44 }
 0x1f4   : > { %v3581_v11 = vadd.f32 %v3574_v53, %v3531_v28  ;;  %v4005_v27 = vadd.f32 %v10077_v33, %v3955_v24  ;;  %v8668_v53 = vmul.f32 %v10067_v18, %v4088_v3  ;;  %v3400_v28 = vmul.f32 %v10024_v2, %v3389_v47  ;;  %v3564_v3 = vld [vmem:[#allocation2 + $0x210] sm:$0x7f]  ;;  %v3789_v44 = vld [vmem:[#allocation2 + $0xe1] sm:$0x7f] }
 0x1f5   : > { %v3432_v10 = vadd.f32 %v10079_v14, %v3382_v39  ;;  %v3606_v24 = vadd.f32 %v8416_v48, %v3556_v31  ;;  %v3614_v15 = vld [vmem:[#allocation2 + $0x211] sm:$0x7f]  ;;  %v10082_v48 = vld [vmem:[#allocation100_spill] sm:$0xff] }
 0x1f6   : > { %v3631_v57 = vadd.f32 %v3624_v16, %v3581_v11  ;;  %v4055_v42 = vadd.f32 %v10080_v7, %v4005_v27  ;;  %v8679_v16 = vmul.f32 %v10071_v22, %v4188_v54  ;;  %v4180_v11 = vadd.f32 %v8394_v38, %v4130_v62  ;;  %v3664_v45 = vld [vmem:[#allocation2 + $0x212] sm:$0x7f]  ;;  %v3739_v27 = vld [vmem:[#allocation2 + $0xe0] sm:$0x7f] }
 0x1f7   : > { %v3407_v26 = vadd.f32 %v3400_v28, %v3357_v17  ;;  %v3482_v47 = vadd.f32 %v8465_v41, %v3432_v10  ;;  %v10081_v39 = vld [vmem:[#allocation98_spill] sm:$0xff]  ;;  %v3500_v54 = vmul.f32 %v10042_v0, %v3489_v13  ;;  %v3575_v38 = vmul.f32 %v10028_v52, %v3564_v3  ;;  %v10084_v17 = vld [vmem:[#allocation99_spill] sm:$0xff]  ;;  %v3839_v7 = vld [vmem:[#allocation2 + $0xe2] sm:$0x7f] }
 0x1f8   : > { %v3681_v58 = vadd.f32 %v3674_v9, %v3631_v57  ;;  %v4105_v30 = vadd.f32 %v8619_v35, %v4055_v42  ;;  %v3656_v33 = vadd.f32 %v10081_v39, %v3606_v24  ;;  %v10083_v57 = vld [vmem:[#allocation9_spill] sm:$0xff]  ;;  %v3625_v62 = vmul.f32 %v10040_v50, %v3614_v15  ;;  %v10086_v13 = vld [vmem:[#allocation95_spill] sm:$0xff]  ;;  %v3889_v3 = vld [vmem:[#allocation2 + $0x180] sm:$0x7f] }
 0x1f9   : > { %v3457_v31 = vadd.f32 %v3450_v21, %v3407_v26  ;;  %v3532_v20 = vadd.f32 %v10083_v57, %v3482_v47  ;;  %v10085_v35 = vld [vmem:[#allocation101_spill] sm:$0xff]  ;;  %v3675_v10 = vmul.f32 %v10043_v60, %v3664_v45  ;;  %v4230_v24 = vadd.f32 %v10086_v13, %v4180_v11  ;;  %v8704_v45 = vld [vmem:[%s9651_s4] ss:$0 sm:$0xff]  ;;  %v10089_v11 = vld [vmem:[#allocation10_spill] sm:$0xff] }
 0x1fa   : > { %v3731_v9 = vadd.f32 %v10082_v48, %v3681_v58  ;;  %v4155_v41 = vadd.f32 %v8622_v49, %v4105_v30  ;;  %v3706_v28 = vadd.f32 %v10084_v17, %v3656_v33  ;;  %v3864_v42 = vld [vmem:[#allocation2 + $0x43] sm:$0x7f]  ;;  %v3750_v21 = vmul.f32 %v10048_v46, %v3739_v27  ;;  %v10087_v49 = vld [vmem:[#allocation102_spill] sm:$0xff]  ;;  %10088 = vst [vmem:[#allocation56_spill] sm:$0xff] %v8704_v45 }
 0x1fb   : > { %v3507_v58 = vadd.f32 %v3500_v54, %v3457_v31  ;;  %v3582_v26 = vadd.f32 %v3575_v38, %v3532_v20  ;;  %v3800_v39 = vmul.f32 %v10054_v1, %v3789_v44  ;;  %v3914_v33 = vld [vmem:[#allocation2 + $0x220] sm:$0x7f]  ;;  %v3850_v27 = vmul.f32 %v10062_v5, %v3839_v7  ;;  %v10090_v31 = vld [vmem:[#allocation30_spill] sm:$0xff]  ;;  %v10091_v38 = vld [vmem:[#allocation103_spill] sm:$0xff] }
 0x1fc   : > { %v3781_v14 = vadd.f32 %v10085_v35, %v3731_v9  ;;  %v4205_v15 = vadd.f32 %v8628_v23, %v4155_v41  ;;  %v3756_v47 = vadd.f32 %v8637_v55, %v3706_v28  ;;  %v3939_v48 = vld [vmem:[#allocation2 + $0x181] sm:$0x7f]  ;;  %v3875_v23 = vmul.f32 %v10090_v31, %v3864_v42  ;;  %v10092_v41 = vld [vmem:[#allocation29_spill] sm:$0xff] }
 0x1fd   : > { %v3557_v9 = vadd.f32 %v10089_v11, %v3507_v58  ;;  %v3632_v54 = vadd.f32 %v3625_v62, %v3582_v26  ;;  %v3964_v57 = vld [vmem:[#allocation2 + $0x221] sm:$0x7f]  ;;  %v8712_v17 = vmul.f32 %v10092_v41, %v3889_v3  ;;  %v3925_v62 = vmul.f32 %v10057_v8, %v3914_v33  ;;  %v10094_v58 = vld [vmem:[#allocation31_spill] sm:$0xff] }
 0x1fe   : > { %v3831_v30 = vadd.f32 %v10087_v49, %v3781_v14  ;;  %v4237_v55 = vadd.f32 %v4230_v24, %v4205_v15  ;;  %v3806_v20 = vadd.f32 %v8640_v29, %v3756_v47  ;;  %v3989_v28 = vld [vmem:[#allocation2 + $0x182] sm:$0x7f]  ;;  %v8717_v7 = vmul.f32 %v10094_v58, %v3939_v48  ;;  %v4064_v48 = vld [vmem:[#allocation2 + $0x50] sm:$0x7f] }
 0x1ff   : > { %v4014_v35 = vld [vmem:[#allocation2 + $0x222] sm:$0x7f]  ;;  %v3682_v49 = vadd.f32 %v3675_v10, %v3632_v54  ;;  %v3975_v3 = vmul.f32 %v10063_v4, %v3964_v57  ;;  %v4089_v54 = vld [vmem:[#allocation2 + $0xf0] sm:$0x7f] }
 0x200   : > { %v3881_v44 = vadd.f32 %v10091_v38, %v3831_v30  ;;  %v10093_v14 = vld [vmem:[#allocation12_spill] sm:$0xff]  ;;  %v8720_v24 = vadd.f32 %v8704_v45, %v4237_v55  ;;  %v3856_v29 = vadd.f32 %v8646_v40, %v3806_v20  ;;  %v10096_v15 = vld [vmem:[#allocation41_spill] sm:$0xff]  ;;  %v10097_v30 = vld [vmem:[#allocation11_spill] sm:$0xff]  ;;  %v4025_v33 = vmul.f32 %v10066_v19, %v4014_v35 }
 0x201   : > { %v3607_v13 = vadd.f32 %v10093_v14, %v3557_v9  ;;  %v4039_v42 = vld [vmem:[#allocation2 + $0x183] sm:$0x7f]  ;;  %v3732_v11 = vadd.f32 %v10097_v30, %v3682_v49  ;;  %v10103_v35 = vld [vmem:[#allocation62_spill] sm:$0xff]  ;;  %v3333_v30 = vadd.f32 %v8549_v43, %v8565_v51 }
 0x202   : > { %10095 = vst [vmem:[#allocation61_spill] sm:$0xff] %v8720_v24  ;;  %v3931_v26 = vadd.f32 %v8649_v61, %v3881_v44  ;;  %v10098_v10 = vld [vmem:[#allocation32_spill] sm:$0xff]  ;;  %v4261_v55 = vsel %vm4260_vm4, %v8720_v24, 0.0  ;;  %v10100_v20 = vld [vmem:[#allocation33_spill] sm:$0xff]  ;;  %v10109_v43 = vld [vmem:[#allocation106_spill] sm:$0xff] }
 0x203   : > { %v3657_v47 = vadd.f32 %v10096_v15, %v3607_v13  ;;  %v8728_v9 = vmul.f32 %v10098_v10, %v3989_v28  ;;  %v10099_v38 = vld [vmem:[#allocation104_spill] sm:$0xff]  ;;  %v8736_v57 = vmul.f32 %v10100_v20, %v4039_v42  ;;  %4262 = vadd.xlane.f32.xlu0 %v4261_v55  ;;  %v10102_v28 = vld [vmem:[#allocation113_spill] sm:$0xff]  ;;  %v3258_v15 = vadd.f32 %v10103_v35, %v8572_v6 }
 0x204   : > { %v3906_v40 = vadd.f32 %v10099_v38, %v3856_v29  ;;  %v3981_v61 = vadd.f32 %v8657_v56, %v3931_v26  ;;  %v3390_v44 = vld [vmem:[#allocation2 + $0xe0] sm:$0x7f]  ;;  %v3782_v49 = vadd.f32 %v10102_v28, %v3732_v11  ;;  %v10104_v10 = vld [vmem:[#allocation105_spill] sm:$0xff]  ;;  %v10105_v26 = vld [vmem:[#allocation34_spill] sm:$0xff]  ;;  %v8748_v38 = vmul.f32 %v10067_v18, %v4089_v54 }
 0x205   : > { %v10101_v14 = vld [vmem:[#allocation112_spill] sm:$0xff]  ;;  %v4075_v42 = vmul.f32 %v10105_v26, %v4064_v48  ;;  %v10107_v11 = vld [vmem:[#allocation63_spill] sm:$0xff] }
 0x206   : > { %v3707_v13 = vadd.f32 %v10101_v14, %v3657_v47  ;;  %v3465_v24 = vld [vmem:[#allocation2 + $0x42] sm:$0x7f]  ;;  %v3956_v29 = vadd.f32 %v10104_v10, %v3906_v40  ;;  %v4031_v56 = vadd.f32 %v8661_v12, %v3981_v61  ;;  %v10106_v47 = vld [vmem:[#allocation114_spill] sm:$0xff]  ;;  %v3308_v28 = vadd.f32 %v10107_v11, %v3258_v15  ;;  %v10114_v11 = vld [vmem:[#allocation107_spill] sm:$0xff] }
 0x207   : > { %v3832_v14 = vadd.f32 %v10106_v47, %v3782_v49  ;;  %v10108_v20 = vld [vmem:[#allocation76_spill] sm:$0xff]  ;;  %v3401_v12 = vmul.f32 %v10024_v2, %v3390_v44  ;;  %v4114_v2 = vld [vmem:[#allocation2 + $0x51] sm:$0x7f] }
 0x208   : > { %v3757_v55 = vadd.f32 %v3750_v21, %v3707_v13  ;;  %v3383_v6 = vadd.f32 %v10108_v20, %v3333_v30  ;;  %v3440_v35 = vld [vmem:[#allocation2 + $0xe1] sm:$0x7f]  ;;  %v4006_v51 = vadd.f32 %v10109_v43, %v3956_v29  ;;  %v10113_v13 = vld [vmem:[#allocation78_spill] sm:$0xff]  ;;  %v10115_v30 = vld [vmem:[#allocation109_spill] sm:$0xff] }
 0x209   : > { %v3515_v19 = vld [vmem:[#allocation2 + $0x43] sm:$0x7f]  ;;  %v3882_v54 = vadd.f32 %v3875_v23, %v3832_v14  ;;  %v3451_v29 = vmul.f32 %v10039_v63, %v3440_v35  ;;  %v10117_v14 = vld [vmem:[#allocation110_spill] sm:$0xff] }
 0x20a   : > { %v10110_v58 = vld [vmem:[#allocation108_spill] sm:$0xff]  ;;  %v3807_v61 = vadd.f32 %v3800_v39, %v3757_v55  ;;  %v3433_v49 = vadd.f32 %v10113_v13, %v3383_v6  ;;  %v4056_v20 = vadd.f32 %v10114_v11, %v4006_v51  ;;  %v10116_v43 = vld [vmem:[#allocation21_spill] sm:$0xff] }
 0x20b   : > { %v4081_v10 = vadd.f32 %v10110_v58, %v4031_v56  ;;  %v10111_v40 = vld [vmem:[#allocation20_spill] sm:$0xff]  ;;  %v3526_v58 = vmul.f32 %v10116_v43, %v3515_v19  ;;  %v3932_v44 = vadd.f32 %v3925_v62, %v3882_v54  ;;  %v10119_v54 = vld [vmem:[#allocation22_spill] sm:$0xff] }
 0x20c   : > { %v3476_v48 = vmul.f32 %v10111_v40, %v3465_v24  ;;  %v10112_v18 = vld [vmem:[#allocation64_spill] sm:$0xff]  ;;  %v3857_v56 = vadd.f32 %v3850_v27, %v3807_v61 }
 0x20d   : > { %v3358_v21 = vadd.f32 %v10112_v18, %v3308_v28  ;;  %v3490_v47 = vld [vmem:[#allocation2 + $0xe2] sm:$0x7f]  ;;  %v4131_v26 = vadd.f32 %v10115_v30, %v4081_v10  ;;  %v4106_v18 = vadd.f32 %v8668_v53, %v4056_v20  ;;  %v3982_v35 = vadd.f32 %v3975_v3, %v3932_v44  ;;  %v3715_v3 = vld [vmem:[#allocation2 + $0x50] sm:$0x7f]  ;;  %v10120_v30 = vld [vmem:[#allocation111_spill] sm:$0xff] }
 0x20e   : > { %v3565_v15 = vld [vmem:[#allocation2 + $0x220] sm:$0x7f]  ;;  %v3483_v39 = vadd.f32 %v3476_v48, %v3433_v49  ;;  %v3501_v6 = vmul.f32 %v10042_v0, %v3490_v47  ;;  %v3907_v10 = vadd.f32 %v8712_v17, %v3857_v56  ;;  %v10118_v48 = vld [vmem:[#allocation35_spill] sm:$0xff] }
 0x20f   : > { %v3408_v24 = vadd.f32 %v3401_v12, %v3358_v21  ;;  %v3540_v23 = vld [vmem:[#allocation2 + $0x180] sm:$0x7f]  ;;  %v4181_v28 = vadd.f32 %v10117_v14, %v4131_v26  ;;  %v3576_v51 = vmul.f32 %v10028_v52, %v3565_v15  ;;  %v4156_v12 = vadd.f32 %v8671_v25, %v4106_v18  ;;  %v4164_v47 = vld [vmem:[#allocation2 + $0x52] sm:$0x7f] }
 0x210   : > { %v3615_v55 = vld [vmem:[#allocation2 + $0x221] sm:$0x7f]  ;;  %v3533_v19 = vadd.f32 %v3526_v58, %v3483_v39  ;;  %v4125_v61 = vmul.f32 %v10118_v48, %v4114_v2  ;;  %v3551_v21 = vmul.f32 %v10119_v54, %v3540_v23  ;;  %v3957_v26 = vadd.f32 %v8717_v7, %v3907_v10  ;;  %v10121_v58 = vld [vmem:[#allocation23_spill] sm:$0xff]  ;;  %v3765_v23 = vld [vmem:[#allocation2 + $0x51] sm:$0x7f] }
 0x211   : > { %v3458_v13 = vadd.f32 %v3451_v29, %v3408_v24  ;;  %v3590_v27 = vld [vmem:[#allocation2 + $0x181] sm:$0x7f]  ;;  %v3626_v53 = vmul.f32 %v10040_v50, %v3615_v55  ;;  %v4032_v49 = vadd.f32 %v4025_v33, %v3982_v35  ;;  %v4206_v20 = vadd.f32 %v8679_v16, %v4156_v12  ;;  %v4139_v24 = vld [vmem:[#allocation2 + $0xf1] sm:$0x7f] }
 0x212   : > { %v3665_v62 = vld [vmem:[#allocation2 + $0x222] sm:$0x7f]  ;;  %v3583_v11 = vadd.f32 %v3576_v51, %v3533_v19  ;;  %v4231_v29 = vadd.f32 %v10120_v30, %v4181_v28  ;;  %v3601_v25 = vmul.f32 %v10121_v58, %v3590_v27  ;;  %v4007_v56 = vadd.f32 %v8728_v9, %v3957_v26  ;;  %v10124_v16 = vld [vmem:[#allocation26_spill] sm:$0xff]  ;;  %v10127_v26 = vld [vmem:[#allocation27_spill] sm:$0xff] }
 0x213   : > { %v3508_v15 = vadd.f32 %v3501_v6, %v3458_v13  ;;  %v3640_v17 = vld [vmem:[#allocation2 + $0x182] sm:$0x7f]  ;;  %v3676_v2 = vmul.f32 %v10043_v60, %v3665_v62  ;;  %v4082_v44 = vadd.f32 %v4075_v42, %v4032_v49  ;;  %v3726_v10 = vmul.f32 %v10124_v16, %v3715_v3  ;;  %v4189_v13 = vld [vmem:[#allocation2 + $0xf2] sm:$0x7f] }
 0x214   : > { %v3633_v7 = vadd.f32 %v3626_v53, %v3583_v11  ;;  %v3690_v33 = vld [vmem:[#allocation2 + $0x183] sm:$0x7f]  ;;  %v4238_v55 = vadd.f32 %v4231_v29, %v4206_v20  ;;  %v4057_v28 = vadd.f32 %v8736_v57, %v4007_v56  ;;  %v4214_v19 = vld [vmem:[#allocation2 + $0x53] sm:$0x7f]  ;;  %v4150_v12 = vmul.f32 %v10068_v32, %v4139_v24 }
 0x215   : > { %v3558_v39 = vadd.f32 %v3551_v21, %v3508_v15  ;;  %v10122_v18 = vld [vmem:[#allocation36_spill] sm:$0xff]  ;;  %v4132_v35 = vadd.f32 %v4125_v61, %v4082_v44  ;;  %v3740_v42 = vld [vmem:[#allocation2 + $0xf0] sm:$0x7f]  ;;  %v10126_v21 = vld [vmem:[#allocation25_spill] sm:$0xff]  ;;  %v3776_v49 = vmul.f32 %v10127_v26, %v3765_v23  ;;  %v4200_v29 = vmul.f32 %v10071_v22, %v4189_v13 }
 0x216   : > { %v4175_v14 = vmul.f32 %v10122_v18, %v4164_v47  ;;  %v10123_v6 = vld [vmem:[#allocation24_spill] sm:$0xff]  ;;  %v3683_v9 = vadd.f32 %v3676_v2, %v3633_v7  ;;  %v8783_v62 = vadd.f32 %v8704_v45, %v4238_v55  ;;  %v3701_v53 = vmul.f32 %v10126_v21, %v3690_v33  ;;  %v3815_v47 = vld [vmem:[#allocation2 + $0x52] sm:$0x7f]  ;;  %v10130_v55 = vld [vmem:[#allocation97_spill] sm:$0xff] }
 0x217   : > { %v3651_v51 = vmul.f32 %v10123_v6, %v3640_v17  ;;  %v3608_v27 = vadd.f32 %v3601_v25, %v3558_v39  ;;  %v3141_v15 = vld [vmem:[#allocation2 + $0x102] sm:$0x7f]  ;;  %v4107_v11 = vadd.f32 %v8748_v38, %v4057_v28  ;;  %v3790_v3 = vld [vmem:[#allocation2 + $0xf1] sm:$0x7f]  ;;  %v3751_v56 = vmul.f32 %v10048_v46, %v3740_v42 }
 0x218   : > { %10125 = vst [vmem:[#allocation44_spill] sm:$0xff] %v8783_v62  ;;  %v4182_v57 = vadd.f32 %v4175_v14, %v4132_v35  ;;  %v3733_v17 = vadd.f32 %v3726_v10, %v3683_v9  ;;  %v3865_v20 = vld [vmem:[#allocation2 + $0x53] sm:$0x7f]  ;;  %v4264_v30 = vsel %vm4260_vm4, %v8783_v62, 0.0  ;;  %v3318_v44 = vld [vmem:[#allocation2 + $0x242] sm:$0x7f]  ;;  %v3236_v14 = vadd.f32 %v8597_v34, %v10130_v55 }
 0x219   : > { %v3658_v61 = vadd.f32 %v3651_v51, %v3608_v27  ;;  %v10128_v25 = vld [vmem:[#allocation86_spill] sm:$0xff]  ;;  %4265 = vadd.xlane.f32.xlu1 %v4264_v30  ;;  %v4157_v24 = vadd.f32 %v4150_v12, %v4107_v11  ;;  %v10129_v38 = vld [vmem:[#allocation28_spill] sm:$0xff]  ;;  %v3152_v51 = vmul.f32 %v10041_v36, %v3141_v15  ;;  %v3801_v10 = vmul.f32 %v10054_v1, %v3790_v3  ;;  %v10133_v34 = vld [vmem:[#allocation43_spill] sm:$0xff] }
 0x21a   : > { %v4225_v2 = vmul.f32 %v10128_v25, %v4214_v19  ;;  %v3783_v7 = vadd.f32 %v3776_v49, %v3733_v17  ;;  %v3826_v33 = vmul.f32 %v10129_v38, %v3815_v47  ;;  %v3840_v23 = vld [vmem:[#allocation2 + $0xf2] sm:$0x7f]  ;;  %v3876_v28 = vmul.f32 %v10090_v31, %v3865_v20 }
 0x21b   : > { %v3708_v39 = vadd.f32 %v3701_v53, %v3658_v61  ;;  %v3915_v35 = vld [vmem:[#allocation2 + $0x230] sm:$0x7f]  ;;  %v4207_v13 = vadd.f32 %v4200_v29, %v4157_v24  ;;  %v8805_v49 = vmul.f32 %v10038_v59, %v3318_v44  ;;  %v3159_v47 = vadd.f32 %v3152_v51, %v10133_v34  ;;  %v10134_v20 = vld [vmem:[#allocation39_spill] sm:$0xff]  ;;  %v10139_v44 = vld [vmem:[#allocation40_spill] sm:$0xff] }
 0x21c   : > { %v4232_v19 = vadd.f32 %v4225_v2, %v4182_v57  ;;  %v3833_v9 = vadd.f32 %v3826_v33, %v3783_v7  ;;  %v3890_v42 = vld [vmem:[#allocation2 + $0x190] sm:$0x7f]  ;;  %v3851_v36 = vmul.f32 %v10062_v5, %v3840_v23  ;;  %v3926_v57 = vmul.f32 %v10057_v8, %v3915_v35 }
 0x21d   : > { %v3758_v27 = vadd.f32 %v3751_v56, %v3708_v39  ;;  %v10131_v12 = vld [vmem:[#allocation82_spill] sm:$0xff]  ;;  %10132 = vst [vmem:[#allocation66_spill] sm:$0xff] %v8805_v49  ;;  %v8811_v30 = vadd.f32 %v10134_v20, %v3236_v14  ;;  %v10138_v56 = vld [vmem:[#allocation19_spill] sm:$0xff]  ;;  %v4115_v20 = vld [vmem:[#allocation2 + $0x61] sm:$0x7f] }
 0x21e   : > { %v8802_v53 = vadd.f32 %v10131_v12, %v8609_v37  ;;  %v3965_v15 = vld [vmem:[#allocation2 + $0x231] sm:$0x7f]  ;;  %v4239_v11 = vadd.f32 %v4232_v19, %v4207_v13  ;;  %v3883_v17 = vadd.f32 %v3876_v28, %v3833_v9  ;;  %v3901_v37 = vmul.f32 %v10092_v41, %v3890_v42  ;;  %v10141_v14 = vld [vmem:[#allocation87_spill] sm:$0xff]  ;;  %v4065_v19 = vld [vmem:[#allocation2 + $0x60] sm:$0x7f] }
 0x21f   : > { %v3808_v61 = vadd.f32 %v3801_v10, %v3758_v27  ;;  %v3940_v3 = vld [vmem:[#allocation2 + $0x191] sm:$0x7f]  ;;  %10135 = vst [vmem:[#allocation69_spill] sm:$0xff] %v8811_v30  ;;  %v3334_v24 = vadd.f32 %v10139_v44, %v10138_v56  ;;  %v3976_v55 = vmul.f32 %v10063_v4, %v3965_v15  ;;  %v8823_v10 = vadd.f32 %v10141_v14, %v3159_v47  ;;  %v10143_v28 = vld [vmem:[#allocation31_spill] sm:$0xff]  ;;  %v10145_v42 = vld [vmem:[#allocation13_spill] sm:$0xff] }
 0x220   : > { %v4015_v29 = vld [vmem:[#allocation2 + $0x232] sm:$0x7f]  ;;  %v8819_v7 = vadd.f32 %v8704_v45, %v4239_v11  ;;  %v3933_v23 = vadd.f32 %v3926_v57, %v3883_v17  ;;  %v3951_v35 = vmul.f32 %v10143_v28, %v3940_v3 }
 0x221   : > { %v10136_v25 = vld [vmem:[#allocation42_spill] sm:$0xff]  ;;  %v3858_v33 = vadd.f32 %v3851_v36, %v3808_v61  ;;  %10142 = vst [vmem:[#allocation73_spill] sm:$0xff] %v8823_v10  ;;  %v10144_v27 = vld [vmem:[#allocation71_spill] sm:$0xff]  ;;  %v3384_v12 = vadd.f32 %v10145_v42, %v3334_v24  ;;  %v10146_v61 = vld [vmem:[#allocation49_spill] sm:$0xff] }
 0x222   : > { %v10137_v59 = vld [vmem:[#allocation70_spill] sm:$0xff]  ;;  %10140 = vst [vmem:[#allocation67_spill] sm:$0xff] %v8819_v7  ;;  %v4267_v34 = vsel %vm4260_vm4, %v8819_v7, 0.0  ;;  %v3983_v36 = vadd.f32 %v3976_v55, %v3933_v23  ;;  %v4026_v17 = vmul.f32 %v10146_v61, %v4015_v29  ;;  %v4090_v7 = vld [vmem:[#allocation2 + $0x100] sm:$0x7f] }
 0x223   : > { %v3259_v2 = vadd.f32 %v10137_v59, %v10136_v25  ;;  %v3391_v39 = vld [vmem:[#allocation2 + $0xf0] sm:$0x7f]  ;;  %v3908_v11 = vadd.f32 %v3901_v37, %v3858_v33  ;;  %4268 = vadd.xlane.f32.xlu0 %v4267_v34  ;;  %v10147_v25 = vld [vmem:[#allocation72_spill] sm:$0xff]  ;;  %v10148_v59 = vld [vmem:[#allocation37_spill] sm:$0xff] }
 0x224   : > { %v3466_v51 = vld [vmem:[#allocation2 + $0x52] sm:$0x7f]  ;;  %v3402_v56 = vmul.f32 %v10148_v59, %v3391_v39  ;;  %v4033_v37 = vadd.f32 %v4026_v17, %v3983_v36  ;;  %v4165_v34 = vld [vmem:[#allocation2 + $0x62] sm:$0x7f] }
 0x225   : > { %v3990_v13 = vld [vmem:[#allocation2 + $0x192] sm:$0x7f]  ;;  %v3309_v9 = vadd.f32 %v10144_v27, %v3259_v2  ;;  %v3477_v24 = vmul.f32 %v10111_v40, %v3466_v51  ;;  %v3958_v14 = vadd.f32 %v3951_v35, %v3908_v11  ;;  %v10150_v27 = vld [vmem:[#allocation32_spill] sm:$0xff]  ;;  %v4126_v35 = vmul.f32 %v10118_v48, %v4115_v20 }
 0x226   : > { %v3441_v15 = vld [vmem:[#allocation2 + $0xf1] sm:$0x7f]  ;;  %v4001_v42 = vmul.f32 %v10150_v27, %v3990_v13  ;;  %v4140_v36 = vld [vmem:[#allocation2 + $0x101] sm:$0x7f] }
 0x227   : > { %v3516_v57 = vld [vmem:[#allocation2 + $0x53] sm:$0x7f]  ;;  %v3359_v3 = vadd.f32 %v10147_v25, %v3309_v9  ;;  %v3452_v49 = vmul.f32 %v10039_v63, %v3441_v15 }
 0x228   : > { %v4040_v47 = vld [vmem:[#allocation2 + $0x193] sm:$0x7f]  ;;  %v3527_v39 = vmul.f32 %v10116_v43, %v3516_v57  ;;  %v4008_v25 = vadd.f32 %v4001_v42, %v3958_v14  ;;  %v4215_v42 = vld [vmem:[#allocation2 + $0x63] sm:$0x7f] }
 0x229   : > { %v10149_v44 = vld [vmem:[#allocation90_spill] sm:$0xff]  ;;  %v3409_v62 = vadd.f32 %v3402_v56, %v3359_v3 }
 0x22a   : > { %v3434_v2 = vadd.f32 %v10149_v44, %v3384_v12  ;;  %v10151_v33 = vld [vmem:[#allocation34_spill] sm:$0xff]  ;;  %v10152_v12 = vld [vmem:[#allocation33_spill] sm:$0xff] }
 0x22b   : > { %v4076_v23 = vmul.f32 %v10151_v33, %v4065_v19  ;;  %v3491_v29 = vld [vmem:[#allocation2 + $0xf2] sm:$0x7f]  ;;  %v4051_v44 = vmul.f32 %v10152_v12, %v4040_v47  ;;  %v4190_v19 = vld [vmem:[#allocation2 + $0x102] sm:$0x7f]  ;;  %v3459_v17 = vadd.f32 %v3452_v49, %v3409_v62 }
 0x22c   : > { %v3566_v55 = vld [vmem:[#allocation2 + $0x230] sm:$0x7f]  ;;  %v3484_v9 = vadd.f32 %v3477_v24, %v3434_v2  ;;  %v3502_v30 = vmul.f32 %v10042_v0, %v3491_v29  ;;  %v4176_v24 = vmul.f32 %v10122_v18, %v4165_v34 }
 0x22d   : > { %v4083_v51 = vadd.f32 %v4076_v23, %v4033_v37  ;;  %v3541_v13 = vld [vmem:[#allocation2 + $0x190] sm:$0x7f]  ;;  %v3577_v3 = vmul.f32 %v10028_v52, %v3566_v55  ;;  %v4058_v15 = vadd.f32 %v4051_v44, %v4008_v25  ;;  %v4151_v55 = vmul.f32 %v10068_v32, %v4140_v36  ;;  %v3716_v25 = vld [vmem:[#allocation2 + $0x60] sm:$0x7f] }
 0x22e   : > { %v3616_v11 = vld [vmem:[#allocation2 + $0x231] sm:$0x7f]  ;;  %v3534_v10 = vadd.f32 %v3527_v39, %v3484_v9  ;;  %v3509_v20 = vadd.f32 %v3502_v30, %v3459_v17  ;;  %v3552_v37 = vmul.f32 %v10119_v54, %v3541_v13  ;;  %v3741_v44 = vld [vmem:[#allocation2 + $0x100] sm:$0x7f] }
 0x22f   : > { %v10153_v56 = vld [vmem:[#allocation50_spill] sm:$0xff]  ;;  %v4133_v57 = vadd.f32 %v4126_v35, %v4083_v51  ;;  %v3627_v62 = vmul.f32 %v10040_v50, %v3616_v11  ;;  %v3766_v13 = vld [vmem:[#allocation2 + $0x61] sm:$0x7f] }
 0x230   : > { %v4101_v2 = vmul.f32 %v10153_v56, %v4090_v7  ;;  %v3591_v47 = vld [vmem:[#allocation2 + $0x191] sm:$0x7f]  ;;  %v3584_v23 = vadd.f32 %v3577_v3, %v3534_v10  ;;  %v4201_v7 = vmul.f32 %v10071_v22, %v4190_v19  ;;  %v3559_v34 = vadd.f32 %v3552_v37, %v3509_v20  ;;  %v3791_v10 = vld [vmem:[#allocation2 + $0x101] sm:$0x7f]  ;;  %v8854_v11 = vld [vmem:[%s9650_s3 + $0x30] ss:$0 sm:$0xff] }
 0x231   : > { %v3666_v14 = vld [vmem:[#allocation2 + $0x232] sm:$0x7f]  ;;  %v4183_v39 = vadd.f32 %v4176_v24, %v4133_v57  ;;  %v3602_v51 = vmul.f32 %v10121_v58, %v3591_v47  ;;  %v4226_v36 = vmul.f32 %v8854_v11, %v4215_v42  ;;  %v3727_v47 = vmul.f32 %v10124_v16, %v3716_v25  ;;  %v3866_v20 = vld [vmem:[#allocation2 + $0x63] sm:$0x7f] }
 0x232   : > { %v3641_v49 = vld [vmem:[#allocation2 + $0x192] sm:$0x7f]  ;;  %v4108_v9 = vadd.f32 %v4101_v2, %v4058_v15  ;;  %v3634_v35 = vadd.f32 %v3627_v62, %v3584_v23  ;;  %v3677_v30 = vmul.f32 %v10043_v60, %v3666_v14  ;;  %v3816_v15 = vld [vmem:[#allocation2 + $0x62] sm:$0x7f]  ;;  %v3752_v14 = vmul.f32 %v10048_v46, %v3741_v44 }
 0x233   : > { %v3691_v29 = vld [vmem:[#allocation2 + $0x193] sm:$0x7f]  ;;  %v3652_v19 = vmul.f32 %v10123_v6, %v3641_v49  ;;  %v3841_v2 = vld [vmem:[#allocation2 + $0x102] sm:$0x7f]  ;;  %v3609_v57 = vadd.f32 %v3602_v51, %v3559_v34  ;;  %v4233_v23 = vadd.f32 %v4226_v36, %v4183_v39  ;;  %v3777_v62 = vmul.f32 %v10127_v26, %v3766_v13 }
 0x234   : > { %v4158_v17 = vadd.f32 %v4151_v55, %v4108_v9  ;;  %v3702_v3 = vmul.f32 %v10126_v21, %v3691_v29  ;;  %v3684_v24 = vadd.f32 %v3677_v30, %v3634_v35  ;;  %v3802_v9 = vmul.f32 %v10054_v1, %v3791_v10  ;;  %v3891_v42 = vld [vmem:[#allocation2 + $0x1a0] sm:$0x7f]  ;;  %v10154_v39 = vld [vmem:[#allocation83_spill] sm:$0xff]  ;;  %v10155_v13 = vld [vmem:[#allocation5_spill] sm:$0xff] }
 0x235   : > { %v3916_v55 = vld [vmem:[#allocation2 + $0x240] sm:$0x7f]  ;;  %v3659_v49 = vadd.f32 %v3652_v19, %v3609_v57  ;;  %v3827_v29 = vmul.f32 %v10129_v38, %v3816_v15  ;;  %v3852_v34 = vmul.f32 %v10062_v5, %v3841_v2  ;;  %v3877_v44 = vmul.f32 %v10090_v31, %v3866_v20 }
 0x236   : > { %v4208_v37 = vadd.f32 %v4201_v7, %v4158_v17  ;;  %v3734_v6 = vadd.f32 %v3727_v47, %v3684_v24  ;;  %v3941_v51 = vld [vmem:[#allocation2 + $0x1a1] sm:$0x7f]  ;;  %v3260_v7 = vadd.f32 %v10154_v39, %v8802_v53  ;;  %v10156_v17 = vld [vmem:[#allocation38_spill] sm:$0xff]  ;;  %v3902_v19 = vmul.f32 %v10092_v41, %v3891_v42 }
 0x237   : > { %v3392_v35 = vld [vmem:[#allocation2 + $0x100] sm:$0x7f]  ;;  %v3335_v10 = vadd.f32 %v10156_v17, %v10155_v13  ;;  %v3709_v36 = vadd.f32 %v3702_v3, %v3659_v49  ;;  %v3927_v15 = vmul.f32 %v10057_v8, %v3916_v55  ;;  %v3952_v24 = vmul.f32 %v10143_v28, %v3941_v51  ;;  %v10160_v51 = vld [vmem:[#allocation85_spill] sm:$0xff] }
 0x238   : > { %v4240_v25 = vadd.f32 %v4233_v23, %v4208_v37  ;;  %v3966_v30 = vld [vmem:[#allocation2 + $0x241] sm:$0x7f]  ;;  %v3784_v1 = vadd.f32 %v3777_v62, %v3734_v6  ;;  %v3403_v3 = vmul.f32 %v10148_v59, %v3392_v35 }
 0x239   : > { %v3467_v57 = vld [vmem:[#allocation2 + $0x62] sm:$0x7f]  ;;  %v3759_v31 = vadd.f32 %v3752_v14, %v3709_v36  ;;  %v3977_v6 = vmul.f32 %v10063_v4, %v3966_v30  ;;  %v4091_v36 = vld [vmem:[#allocation2 + $0x110] sm:$0x7f] }
 0x23a   : > { %v8873_v2 = vadd.f32 %v8704_v45, %v4240_v25  ;;  %v3991_v47 = vld [vmem:[#allocation2 + $0x1a2] sm:$0x7f]  ;;  %v3834_v13 = vadd.f32 %v3827_v29, %v3784_v1  ;;  %v4066_v25 = vld [vmem:[#allocation2 + $0x70] sm:$0x7f] }
 0x23b   : > { %v4016_v20 = vld [vmem:[#allocation2 + $0x242] sm:$0x7f]  ;;  %v3809_v14 = vadd.f32 %v3802_v9, %v3759_v31  ;;  %v4002_v29 = vmul.f32 %v10150_v27, %v3991_v47  ;;  %v4077_v31 = vmul.f32 %v10151_v33, %v4066_v25  ;;  %v4141_v47 = vld [vmem:[#allocation2 + $0x111] sm:$0x7f] }
 0x23c   : > { %10157 = vst [vmem:[#allocation75_spill] sm:$0xff] %v8873_v2  ;;  %v10158_v37 = vld [vmem:[#allocation84_spill] sm:$0xff]  ;;  %v4270_v55 = vsel %vm4260_vm4, %v8873_v2, 0.0  ;;  %v10161_v45 = vld [vmem:[#allocation93_spill] sm:$0xff]  ;;  %v3884_v1 = vadd.f32 %v3877_v44, %v3834_v13  ;;  %v4027_v35 = vmul.f32 %v10146_v61, %v4016_v20  ;;  %v4166_v20 = vld [vmem:[#allocation2 + $0x72] sm:$0x7f] }
 0x23d   : > { %v3310_v23 = vadd.f32 %v10158_v37, %v3260_v7  ;;  %v10159_v53 = vld [vmem:[#allocation92_spill] sm:$0xff]  ;;  %v3478_v7 = vmul.f32 %v10111_v40, %v3467_v57  ;;  %4271 = vadd.xlane.f32.xlu1 %v4270_v55  ;;  %v4116_v37 = vld [vmem:[#allocation2 + $0x71] sm:$0x7f] }
 0x23e   : > { %v3385_v39 = vadd.f32 %v10159_v53, %v3335_v10  ;;  %v3442_v62 = vld [vmem:[#allocation2 + $0x101] sm:$0x7f]  ;;  %v4216_v25 = vld [vmem:[#allocation2 + $0x73] sm:$0x7f] }
 0x23f   : > { %v3517_v42 = vld [vmem:[#allocation2 + $0x63] sm:$0x7f]  ;;  %v3360_v17 = vadd.f32 %v10160_v51, %v3310_v23  ;;  %v3453_v2 = vmul.f32 %v10039_v63, %v3442_v62 }
 0x240   : > { %v4041_v49 = vld [vmem:[#allocation2 + $0x1a3] sm:$0x7f]  ;;  %v3435_v28 = vadd.f32 %v10161_v45, %v3385_v39  ;;  %v3528_v23 = vmul.f32 %v10116_v43, %v3517_v42  ;;  %v3859_v45 = vadd.f32 %v3852_v34, %v3809_v14  ;;  %v3934_v39 = vadd.f32 %v3927_v15, %v3884_v1 }
 0x241   : > { %v3492_v30 = vld [vmem:[#allocation2 + $0x102] sm:$0x7f]  ;;  %v3410_v53 = vadd.f32 %v3403_v3, %v3360_v17  ;;  %v4052_v57 = vmul.f32 %v10152_v12, %v4041_v49  ;;  %v4102_v42 = vmul.f32 %v10153_v56, %v4091_v36  ;;  %v4127_v34 = vmul.f32 %v10118_v48, %v4116_v37  ;;  %v4191_v17 = vld [vmem:[#allocation2 + $0x112] sm:$0x7f] }
 0x242   : > { %v3567_v10 = vld [vmem:[#allocation2 + $0x240] sm:$0x7f]  ;;  %v3485_v59 = vadd.f32 %v3478_v7, %v3435_v28  ;;  %v3503_v55 = vmul.f32 %v10042_v0, %v3492_v30  ;;  %v3909_v62 = vadd.f32 %v3902_v19, %v3859_v45  ;;  %v3984_v28 = vadd.f32 %v3977_v6, %v3934_v39  ;;  %v3717_v36 = vld [vmem:[#allocation2 + $0x70] sm:$0x7f] }
 0x243   : > { %v3542_v9 = vld [vmem:[#allocation2 + $0x1a0] sm:$0x7f]  ;;  %v3460_v13 = vadd.f32 %v3453_v2, %v3410_v53  ;;  %v3578_v3 = vmul.f32 %v10028_v52, %v3567_v10  ;;  %v4152_v10 = vmul.f32 %v10068_v32, %v4141_v47  ;;  %v4177_v19 = vmul.f32 %v10122_v18, %v4166_v20  ;;  %v3792_v47 = vld [vmem:[#allocation2 + $0x111] sm:$0x7f] }
 0x244   : > { %v3617_v44 = vld [vmem:[#allocation2 + $0x241] sm:$0x7f]  ;;  %v3535_v51 = vadd.f32 %v3528_v23, %v3485_v59  ;;  %v3553_v14 = vmul.f32 %v10119_v54, %v3542_v9  ;;  %v3959_v30 = vadd.f32 %v3952_v24, %v3909_v62  ;;  %v4034_v59 = vadd.f32 %v4027_v35, %v3984_v28  ;;  %v3767_v35 = vld [vmem:[#allocation2 + $0x71] sm:$0x7f] }
 0x245   : > { %v3592_v15 = vld [vmem:[#allocation2 + $0x1a1] sm:$0x7f]  ;;  %v3510_v7 = vadd.f32 %v3503_v55, %v3460_v13  ;;  %v3628_v2 = vmul.f32 %v10040_v50, %v3617_v44  ;;  %v3742_v13 = vld [vmem:[#allocation2 + $0x110] sm:$0x7f]  ;;  %v4202_v44 = vmul.f32 %v10071_v22, %v4191_v17  ;;  %v4227_v24 = vmul.f32 %v8854_v11, %v4216_v25 }
 0x246   : > { %v3667_v49 = vld [vmem:[#allocation2 + $0x242] sm:$0x7f]  ;;  %v3585_v1 = vadd.f32 %v3578_v3, %v3535_v51  ;;  %v3603_v37 = vmul.f32 %v10121_v58, %v3592_v15  ;;  %v4009_v9 = vadd.f32 %v4002_v29, %v3959_v30  ;;  %v4084_v55 = vadd.f32 %v4077_v31, %v4034_v59  ;;  %v3817_v15 = vld [vmem:[#allocation2 + $0x72] sm:$0x7f] }
 0x247   : > { %v3642_v6 = vld [vmem:[#allocation2 + $0x1a2] sm:$0x7f]  ;;  %v3560_v53 = vadd.f32 %v3553_v14, %v3510_v7  ;;  %v3678_v45 = vmul.f32 %v10043_v60, %v3667_v49  ;;  %v3728_v28 = vmul.f32 %v10124_v16, %v3717_v36  ;;  %v3842_v7 = vld [vmem:[#allocation2 + $0x112] sm:$0x7f]  ;;  %v3753_v29 = vmul.f32 %v10048_v46, %v3742_v13 }
 0x248   : > { %v3635_v23 = vadd.f32 %v3628_v2, %v3585_v1  ;;  %v3692_v39 = vld [vmem:[#allocation2 + $0x1a3] sm:$0x7f]  ;;  %v4059_v14 = vadd.f32 %v4052_v57, %v4009_v9  ;;  %v4134_v49 = vadd.f32 %v4127_v34, %v4084_v55  ;;  %v3867_v31 = vld [vmem:[#allocation2 + $0x73] sm:$0x7f]  ;;  %v3778_v25 = vmul.f32 %v10127_v26, %v3767_v35 }
 0x249   : > { %v3610_v51 = vadd.f32 %v3603_v37, %v3560_v53  ;;  %v10162_v20 = vld [vmem:[#allocation24_spill] sm:$0xff]  ;;  %v3703_v1 = vmul.f32 %v10126_v21, %v3692_v39  ;;  %v10163_v30 = vld [vmem:[#allocation45_spill] sm:$0xff]  ;;  %v3892_v53 = vld [vmem:[#allocation2 + $0x1b0] sm:$0x7f]  ;;  %v3828_v36 = vmul.f32 %v10129_v38, %v3817_v15  ;;  %v3853_v57 = vmul.f32 %v10062_v5, %v3842_v7 }
 0x24a   : > { %v3653_v3 = vmul.f32 %v10162_v20, %v3642_v6  ;;  %v3685_v62 = vadd.f32 %v3678_v45, %v3635_v23  ;;  %v3803_v59 = vmul.f32 %v10163_v30, %v3792_v47  ;;  %v3917_v6 = vld [vmem:[#allocation2 + $0x250] sm:$0x7f]  ;;  %v4109_v37 = vadd.f32 %v4102_v42, %v4059_v14  ;;  %v10169_v5 = vld [vmem:[#allocation31_spill] sm:$0xff] }
 0x24b   : > { %v4184_v23 = vadd.f32 %v4177_v19, %v4134_v49  ;;  %v3942_v34 = vld [vmem:[#allocation2 + $0x1b1] sm:$0x7f]  ;;  %v3903_v47 = vmul.f32 %v10092_v41, %v3892_v53  ;;  %v3928_v42 = vmul.f32 %v10057_v8, %v3917_v6  ;;  %v10167_v19 = vld [vmem:[#allocation69_spill] sm:$0xff]  ;;  %v10172_v8 = vld [vmem:[#allocation91_spill] sm:$0xff] }
 0x24c   : > { %v3660_v17 = vadd.f32 %v3653_v3, %v3610_v51  ;;  %v3735_v2 = vadd.f32 %v3728_v28, %v3685_v62  ;;  %v10164_v9 = vld [vmem:[#allocation30_spill] sm:$0xff]  ;;  %v10165_v51 = vld [vmem:[#allocation73_spill] sm:$0xff]  ;;  %v10166_v3 = vld [vmem:[#allocation88_spill] sm:$0xff]  ;;  %v4159_v28 = vadd.f32 %v4152_v10, %v4109_v37 }
 0x24d   : > { %v3878_v13 = vmul.f32 %v10164_v9, %v3867_v31  ;;  %v3967_v55 = vld [vmem:[#allocation2 + $0x251] sm:$0x7f]  ;;  %v3261_v62 = vadd.f32 %v10166_v3, %v10165_v51  ;;  %v4234_v30 = vadd.f32 %v4227_v24, %v4184_v23 }
 0x24e   : > { %v3710_v45 = vadd.f32 %v3703_v1, %v3660_v17  ;;  %v3785_v39 = vadd.f32 %v3778_v25, %v3735_v2  ;;  %v3393_v35 = vld [vmem:[#allocation2 + $0x110] sm:$0x7f]  ;;  %v3953_v1 = vmul.f32 %v10169_v5, %v3942_v34  ;;  %v10170_v2 = vld [vmem:[#allocation89_spill] sm:$0xff]  ;;  %v4209_v9 = vadd.f32 %v4202_v44, %v4159_v28  ;;  %v4067_v28 = vld [vmem:[#allocation2 + $0x80] sm:$0x7f] }
 0x24f   : > { %v10168_v14 = vld [vmem:[#allocation66_spill] sm:$0xff]  ;;  %v3311_v31 = vadd.f32 %v10170_v2, %v3261_v62  ;;  %v3978_v51 = vmul.f32 %v10063_v4, %v3967_v55  ;;  %v10174_v62 = vld [vmem:[#allocation96_spill] sm:$0xff] }
 0x250   : > { %v3336_v15 = vadd.f32 %v10168_v14, %v10167_v19  ;;  %v3760_v49 = vadd.f32 %v3753_v29, %v3710_v45  ;;  %v3835_v7 = vadd.f32 %v3828_v36, %v3785_v39  ;;  %v3992_v17 = vld [vmem:[#allocation2 + $0x1b2] sm:$0x7f]  ;;  %v10173_v29 = vld [vmem:[#allocation37_spill] sm:$0xff]  ;;  %v4241_v34 = vadd.f32 %v4234_v30, %v4209_v9 }
 0x251   : > { %v3468_v25 = vld [vmem:[#allocation2 + $0x72] sm:$0x7f]  ;;  %v3361_v19 = vadd.f32 %v10172_v8, %v3311_v31  ;;  %v3404_v36 = vmul.f32 %v10173_v29, %v3393_v35  ;;  %v4003_v39 = vmul.f32 %v10150_v27, %v3992_v17  ;;  %v4117_v31 = vld [vmem:[#allocation2 + $0x81] sm:$0x7f] }
 0x252   : > { %v10171_v10 = vld [vmem:[#allocation94_spill] sm:$0xff]  ;;  %v3810_v3 = vadd.f32 %v3803_v59, %v3760_v49  ;;  %v3885_v6 = vadd.f32 %v3878_v13, %v3835_v7  ;;  %v3479_v44 = vmul.f32 %v10111_v40, %v3468_v25  ;;  %v10175_v49 = vld [vmem:[#allocation56_spill] sm:$0xff] }
 0x253   : > { %v3386_v37 = vadd.f32 %v10171_v10, %v3336_v15  ;;  %v3443_v53 = vld [vmem:[#allocation2 + $0x111] sm:$0x7f]  ;;  %v3411_v15 = vadd.f32 %v3404_v36, %v3361_v19  ;;  %v8929_v8 = vadd.f32 %v10175_v49, %v4241_v34  ;;  %v4078_v10 = vmul.f32 %v10151_v33, %v4067_v28 }
 0x254   : > { %v4017_v41 = vld [vmem:[#allocation2 + $0x252] sm:$0x7f]  ;;  %v3860_v23 = vadd.f32 %v3853_v57, %v3810_v3  ;;  %v3935_v55 = vadd.f32 %v3928_v42, %v3885_v6  ;;  %v3454_v59 = vmul.f32 %v10039_v63, %v3443_v53  ;;  %v4128_v36 = vmul.f32 %v10118_v48, %v4117_v31 }
 0x255   : > { %v3518_v45 = vld [vmem:[#allocation2 + $0x73] sm:$0x7f]  ;;  %v3436_v14 = vadd.f32 %v10174_v62, %v3386_v37  ;;  %v4028_v35 = vmul.f32 %v10146_v61, %v4017_v41  ;;  %v4273_v63 = vsel %vm4260_vm4, %v8929_v8, 0.0 }
 0x256   : > { %v3493_v24 = vld [vmem:[#allocation2 + $0x112] sm:$0x7f]  ;;  %v3529_v9 = vmul.f32 %v10116_v43, %v3518_v45  ;;  %v3910_v17 = vadd.f32 %v3903_v47, %v3860_v23  ;;  %v3985_v2 = vadd.f32 %v3978_v51, %v3935_v55  ;;  %v3461_v57 = vadd.f32 %v3454_v59, %v3411_v15  ;;  %4274 = vadd.xlane.f32.xlu0 %v4273_v63  ;;  %v4092_v47 = vld [vmem:[#allocation2 + $0x120] sm:$0x7f] }
 0x257   : > { %v3568_v13 = vld [vmem:[#allocation2 + $0x250] sm:$0x7f]  ;;  %v3486_v30 = vadd.f32 %v3479_v44, %v3436_v14  ;;  %v3504_v42 = vmul.f32 %v10042_v0, %v3493_v24  ;;  %v4167_v51 = vld [vmem:[#allocation2 + $0x82] sm:$0x7f]  ;;  %v4103_v55 = vmul.f32 %v10153_v56, %v4092_v47 }
 0x258   : > { %v3543_v7 = vld [vmem:[#allocation2 + $0x1b0] sm:$0x7f]  ;;  %v3579_v41 = vmul.f32 %v10028_v52, %v3568_v13  ;;  %v3960_v43 = vadd.f32 %v3953_v1, %v3910_v17  ;;  %v4035_v3 = vadd.f32 %v4028_v35, %v3985_v2  ;;  %v4142_v44 = vld [vmem:[#allocation2 + $0x121] sm:$0x7f] }
 0x259   : > { %v4042_v40 = vld [vmem:[#allocation2 + $0x1b3] sm:$0x7f]  ;;  %v3536_v37 = vadd.f32 %v3529_v9, %v3486_v30  ;;  %v3511_v6 = vadd.f32 %v3504_v42, %v3461_v57  ;;  %v3554_v19 = vmul.f32 %v10119_v54, %v3543_v7  ;;  %v3718_v23 = vld [vmem:[#allocation2 + $0x80] sm:$0x7f]  ;;  %v4178_v54 = vmul.f32 %v10122_v18, %v4167_v51 }
 0x25a   : > { %v3618_v25 = vld [vmem:[#allocation2 + $0x251] sm:$0x7f]  ;;  %v4053_v0 = vmul.f32 %v10152_v12, %v4042_v40  ;;  %v4010_v14 = vadd.f32 %v4003_v39, %v3960_v43  ;;  %v4085_v52 = vadd.f32 %v4078_v10, %v4035_v3  ;;  %v4192_v30 = vld [vmem:[#allocation2 + $0x122] sm:$0x7f]  ;;  %v4153_v7 = vmul.f32 %v10068_v32, %v4142_v44 }
 0x25b   : > { %v3593_v53 = vld [vmem:[#allocation2 + $0x1b1] sm:$0x7f]  ;;  %v3586_v45 = vadd.f32 %v3579_v41, %v3536_v37  ;;  %v3629_v34 = vmul.f32 %v10040_v50, %v3618_v25  ;;  %v3561_v24 = vadd.f32 %v3554_v19, %v3511_v6  ;;  %v3768_v9 = vld [vmem:[#allocation2 + $0x81] sm:$0x7f]  ;;  %v3729_v2 = vmul.f32 %v10124_v16, %v3718_v23 }
 0x25c   : > { %v3668_v29 = vld [vmem:[#allocation2 + $0x252] sm:$0x7f]  ;;  %v3604_v1 = vmul.f32 %v10121_v58, %v3593_v53  ;;  %v4060_v13 = vadd.f32 %v4053_v0, %v4010_v14  ;;  %v4135_v35 = vadd.f32 %v4128_v36, %v4085_v52  ;;  %v4217_v17 = vld [vmem:[#allocation2 + $0x83] sm:$0x7f]  ;;  %v4203_v63 = vmul.f32 %v10071_v22, %v4192_v30 }
 0x25d   : > { %v3643_v62 = vld [vmem:[#allocation2 + $0x1b2] sm:$0x7f]  ;;  %v3636_v28 = vadd.f32 %v3629_v34, %v3586_v45  ;;  %v3679_v15 = vmul.f32 %v10043_v60, %v3668_v29  ;;  %v3743_v40 = vld [vmem:[#allocation2 + $0x120] sm:$0x7f]  ;;  %v3779_v37 = vmul.f32 %v10127_v26, %v3768_v9  ;;  %v4228_v53 = vmul.f32 %v8854_v11, %v4217_v17  ;;  %v10176_v0 = vld [vmem:[#allocation45_spill] sm:$0xff] }
 0x25e   : > { %v3693_v59 = vld [vmem:[#allocation2 + $0x1b3] sm:$0x7f]  ;;  %v3611_v50 = vadd.f32 %v3604_v1, %v3561_v24  ;;  %v3654_v39 = vmul.f32 %v10162_v20, %v3643_v62  ;;  %v4110_v31 = vadd.f32 %v4103_v55, %v4060_v13  ;;  %v4185_v57 = vadd.f32 %v4178_v54, %v4135_v35  ;;  %v3818_v25 = vld [vmem:[#allocation2 + $0x82] sm:$0x7f] }
 0x25f   : > { %v3686_v58 = vadd.f32 %v3679_v15, %v3636_v28  ;;  %v3704_v60 = vmul.f32 %v10126_v21, %v3693_v59  ;;  %v3793_v20 = vld [vmem:[#allocation2 + $0x121] sm:$0x7f]  ;;  %v3754_v3 = vmul.f32 %v10048_v46, %v3743_v40  ;;  %v3829_v51 = vmul.f32 %v10129_v38, %v3818_v25  ;;  %v10177_v26 = vld [vmem:[#allocation30_spill] sm:$0xff]  ;;  %v10179_v55 = vld [vmem:[#allocation47_spill] sm:$0xff] }
 0x260   : > { %v3661_v42 = vadd.f32 %v3654_v39, %v3611_v50  ;;  %v4160_v41 = vadd.f32 %v4153_v7, %v4110_v31  ;;  %v3868_v16 = vld [vmem:[#allocation2 + $0x83] sm:$0x7f]  ;;  %v4235_v21 = vadd.f32 %v4228_v53, %v4185_v57  ;;  %v3804_v36 = vmul.f32 %v10176_v0, %v3793_v20  ;;  %v10178_v24 = vld [vmem:[#allocation46_spill] sm:$0xff] }
 0x261   : > { %v3736_v10 = vadd.f32 %v3729_v2, %v3686_v58  ;;  %v3843_v6 = vld [vmem:[#allocation2 + $0x122] sm:$0x7f]  ;;  %v3879_v62 = vmul.f32 %v10177_v26, %v3868_v16  ;;  %v4068_v30 = vld [vmem:[#allocation2 + $0x90] sm:$0x7f]  ;;  %v10181_v0 = vmov 0.0  }
 0x262   : > { %v3711_v43 = vadd.f32 %v3704_v60, %v3661_v42  ;;  %v4210_v19 = vadd.f32 %v4203_v63, %v4160_v41  ;;  %v3918_v45 = vld [vmem:[#allocation2 + $0x260] sm:$0x7f]  ;;  %v3854_v1 = vmul.f32 %v10178_v24, %v3843_v6  ;;  %v10180_v59 = vld [vmem:[#allocation29_spill] sm:$0xff]  ;;  %v4118_v2 = vld [vmem:[#allocation2 + $0x91] sm:$0x7f]  ;;  %v4079_v57 = vmul.f32 %v10151_v33, %v4068_v30 }
 0x263   : > { %v3786_v47 = vadd.f32 %v3779_v37, %v3736_v10  ;;  %v3893_v14 = vld [vmem:[#allocation2 + $0x1c0] sm:$0x7f]  ;;  %v3929_v54 = vmul.f32 %v10179_v55, %v3918_v45  ;;  %v4093_v42 = vld [vmem:[#allocation2 + $0x130] sm:$0x7f]  ;;  %v4129_v10 = vmul.f32 %v10118_v48, %v4118_v2  ;;  %579 = vst.msk [vmem:[#allocation3 + $0x8] sm:$0x3f] %vm577_vm5, %v10181_v0 }
 0x264   : > { %v3761_v29 = vadd.f32 %v3754_v3, %v3711_v43  ;;  %v4242_v52 = vadd.f32 %v4235_v21, %v4210_v19  ;;  %v3968_v46 = vld [vmem:[#allocation2 + $0x261] sm:$0x7f]  ;;  %v3904_v13 = vmul.f32 %v10180_v59, %v3893_v14  ;;  %v4143_v37 = vld [vmem:[#allocation2 + $0x131] sm:$0x7f]  ;;  %v4104_v41 = vmul.f32 %v10153_v56, %v4093_v42  ;;  %585 = vst.msk [vmem:[#allocation3 + $0x38] sm:$0x3f] %vm577_vm5, %v10181_v0 }
 0x265   : > { %v3836_v34 = vadd.f32 %v3829_v51, %v3786_v47  ;;  %v3943_v38 = vld [vmem:[#allocation2 + $0x1c1] sm:$0x7f]  ;;  %v3979_v39 = vmul.f32 %v10063_v4, %v3968_v46  ;;  %v4168_v4 = vld [vmem:[#allocation2 + $0x92] sm:$0x7f]  ;;  %v4154_v16 = vmul.f32 %v10068_v32, %v4143_v37  ;;  %578 = vst.msk [vmem:[#allocation3] sm:$0x3f] %vm577_vm5, %v10181_v0 }
 0x266   : > { %v3811_v44 = vadd.f32 %v3804_v36, %v3761_v29  ;;  %v8960_v28 = vadd.f32 %v10175_v49, %v4242_v52  ;;  %v4018_v35 = vld [vmem:[#allocation2 + $0x262] sm:$0x7f]  ;;  %v3954_v58 = vmul.f32 %v10169_v5, %v3943_v38  ;;  %v4193_v43 = vld [vmem:[#allocation2 + $0x132] sm:$0x7f]  ;;  %580 = vst.msk [vmem:[#allocation3 + $0x10] sm:$0x3f] %vm577_vm5, %v10181_v0 }
 0x267   : > { %v3886_v23 = vadd.f32 %v3879_v62, %v3836_v34  ;;  %v3993_v9 = vld [vmem:[#allocation2 + $0x1c2] sm:$0x7f]  ;;  %v4029_v49 = vmul.f32 %v10146_v61, %v4018_v35  ;;  %v4179_v61 = vmul.f32 %v10122_v18, %v4168_v4  ;;  %v4218_v3 = vld [vmem:[#allocation2 + $0x93] sm:$0x7f]  ;;  %v4204_v51 = vmul.f32 %v10071_v22, %v4193_v43  ;;  %v7043_v18 = vld [vmem:[%s9651_s4] ss:$0 sm:$0xff] }
 0x268   : > { %v3861_v15 = vadd.f32 %v3854_v1, %v3811_v44  ;;  %v4276_v7 = vsel %vm4260_vm4, %v8960_v28, 0.0  ;;  %v4043_v31 = vld [vmem:[#allocation2 + $0x1c3] sm:$0x7f]  ;;  %v4004_v25 = vmul.f32 %v10150_v27, %v3993_v9  ;;  %v4229_v48 = vmul.f32 %v8854_v11, %v4218_v3  ;;  %581 = vst.msk [vmem:[#allocation3 + $0x18] sm:$0x3f] %vm577_vm5, %v10181_v0  ;;  %v10184_v55 = vld [vmem:[#allocation67_spill] sm:$0xff] }
 0x269   : > { %v3936_v50 = vadd.f32 %v3929_v54, %v3886_v23  ;;  %4277 = vadd.xlane.f32.xlu1 %v4276_v7  ;;  %v4054_v5 = vmul.f32 %v10152_v12, %v4043_v31  ;;  %582 = vst.msk [vmem:[#allocation3 + $0x20] sm:$0x3f] %vm577_vm5, %v10181_v0  ;;  %583 = vst.msk [vmem:[#allocation3 + $0x28] sm:$0x3f] %vm577_vm5, %v10181_v0  ;;  %v10182_v36 = vld [vmem:[#allocation61_spill] sm:$0xff]  ;;  %v10183_v52 = vld [vmem:[#allocation44_spill] sm:$0xff] }
 0x26a   : > { %v3911_v17 = vadd.f32 %v3904_v13, %v3861_v15  ;;  %584 = vst.msk [vmem:[#allocation3 + $0x30] sm:$0x3f] %vm577_vm5, %v10181_v0  ;;  %586 = vst.msk [vmem:[#allocation3 + $0x40] sm:$0x3f] %vm577_vm5, %v10181_v0  ;;  %v10185_v35 = vld [vmem:[#allocation75_spill] sm:$0xff] }
 0x26b   : > { %v3986_v40 = vadd.f32 %v3979_v39, %v3936_v50  ;;  %587 = vst.msk [vmem:[#allocation3 + $0x48] sm:$0x3f] %vm577_vm5, %v10181_v0  ;;  %588 = vst.msk [vmem:[#allocation3 + $0x50] sm:$0x3f] %vm577_vm5, %v10181_v0 }
 0x26c   : > { %v3961_v60 = vadd.f32 %v3954_v58, %v3911_v17  ;;  %589 = vst.msk [vmem:[#allocation3 + $0x58] sm:$0x3f] %vm577_vm5, %v10181_v0  ;;  %590 = vst.msk [vmem:[#allocation3 + $0x60] sm:$0x3f] %vm577_vm5, %v10181_v0 }
 0x26d   : > { %v4036_v63 = vadd.f32 %v4029_v49, %v3986_v40  ;;  %591 = vst.msk [vmem:[#allocation3 + $0x68] sm:$0x3f] %vm577_vm5, %v10181_v0  ;;  %592 = vst.msk [vmem:[#allocation3 + $0x70] sm:$0x3f] %vm577_vm5, %v10181_v0 }
 0x26e   : > { %v4011_v20 = vadd.f32 %v4004_v25, %v3961_v60  ;;  %593 = vst.msk [vmem:[#allocation3 + $0x78] sm:$0x3f] %vm577_vm5, %v10181_v0  ;;  %594 = vst.msk [vmem:[#allocation3 + $0x80] sm:$0x3f] %vm577_vm5, %v10181_v0 }
 0x26f   : > { %v4086_v53 = vadd.f32 %v4079_v57, %v4036_v63  ;;  %596 = vst.msk [vmem:[#allocation3 + $0x90] sm:$0x3f] %vm577_vm5, %v10181_v0  ;;  %597 = vst.msk [vmem:[#allocation3 + $0x98] sm:$0x3f] %vm577_vm5, %v10181_v0 }
 0x270   : > { %v4061_v33 = vadd.f32 %v4054_v5, %v4011_v20  ;;  %598 = vst.msk [vmem:[#allocation3 + $0xa0] sm:$0x3f] %vm577_vm5, %v10181_v0  ;;  %599 = vst.msk [vmem:[#allocation3 + $0xa8] sm:$0x3f] %vm577_vm5, %v10181_v0  ;;  %v9065_v5 = vld [vmem:[%s9652_s5] ss:$0 sm:$0xff] }
 0x271   : > { %v4136_v47 = vadd.f32 %v4129_v10, %v4086_v53  ;;  %600 = vst.msk [vmem:[#allocation3 + $0xb0] sm:$0x3f] %vm577_vm5, %v10181_v0  ;;  %v9070_v53 = vld [vmem:[%s9653_s6] ss:$0 sm:$0xff] }
 0x272   : > { %v4111_v27 = vadd.f32 %v4104_v41, %v4061_v33 }
 0x273   : > { %v4186_v6 = vadd.f32 %v4179_v61, %v4136_v47 }
 0x274   : > { %v4161_v19 = vadd.f32 %v4154_v16, %v4111_v27 }
 0x275   : > { %v4236_v12 = vadd.f32 %v4229_v48, %v4186_v6 }
 0x276   : > { %v4211_v21 = vadd.f32 %v4204_v51, %v4161_v19 }
 0x278   : > { %v4243_v29 = vadd.f32 %v4236_v12, %v4211_v21 }
 0x27a   : > { %v8980_v56 = vadd.f32 %v7043_v18, %v4243_v29 }
 0x27c   : > { %v4279_v32 = vsel %vm4260_vm4, %v8980_v56, 0.0 }
 0x27d   : > { %4280 = vadd.xlane.f32.xlu0 %v4279_v32 }
 0x290   : > { %v4263_v22 = vpop.xlane.xlu0 %4262 }
 0x291   : > { %v4283_v11 = vmul.f32 0.03125, %v4263_v22  ;;  %v10187_v22 = vld [vmem:[#allocation16_spill] sm:$0xff] }
 0x293   : > { %v4290_v45 = vsub.f32 %v10182_v36, %v4283_v11  ;;  %v10188_v36 = vld [vmem:[#allocation17_spill] sm:$0xff] }
 0x295   : > { %v4297_v34 = vmul.f32 %v4290_v45, %v4290_v45 }
 0x297   : > { %v4304_v26 = vsel %vm4260_vm4, %v4297_v34, 0.0  ;;  %v4559_v34 = vld [vmem:[#allocation3] sm:$0x7] }
 0x298   : > { %4305 = vadd.xlane.f32.xlu1 %v4304_v26  ;;  %v4586_v26 = vld [vmem:[#allocation3 + $0x1] sm:$0x7] }
 0x2a6   : > { %v4266_v62 = vpop.xlane.xlu1 %4265 }
 0x2a7   : > { %v4284_v14 = vmul.f32 0.03125, %v4266_v62 }
 0x2a9   : > { %v4291_v44 = vsub.f32 %v10183_v52, %v4284_v14  ;;  %v10189_v14 = vld [vmem:[#allocation6_spill] sm:$0xff] }
 0x2ab   : > { %v4298_v24 = vmul.f32 %v4291_v44, %v4291_v44 }
 0x2ad   : > { %v4307_v1 = vsel %vm4260_vm4, %v4298_v24, 0.0 }
 0x2ae   : > { %4308 = vadd.xlane.f32.xlu1 %v4307_v1  ;;  %v10191_v1 = vld [vmem:[#allocation18_spill] sm:$0xff] }
 0x2b0   : > { %v4269_v46 = vpop.xlane.xlu0 %4268 }
 0x2b1   : > { %v4285_v23 = vmul.f32 0.03125, %v4269_v46 }
 0x2b3   : > { %v9033_v54 = vsub.f32 %v10184_v55, %v4285_v23 }
 0x2b5   : > { %v4299_v38 = vmul.f32 %v9033_v54, %v9033_v54 }
 0x2b7   : > { %v4310_v15 = vsel %vm4260_vm4, %v4299_v38, 0.0 }
 0x2b8   : > { %4311 = vadd.xlane.f32.xlu0 %v4310_v15  ;;  %v4573_v15 = vld [vmem:[#allocation3 + $0x30] sm:$0x7] }
 0x2ca   : > { %v4272_v59 = vpop.xlane.xlu1 %4271 }
 0x2cb   : > { %v4286_v13 = vmul.f32 0.03125, %v4272_v59 }
 0x2cd   : > { %v9039_v30 = vsub.f32 %v10185_v35, %v4286_v13  ;;  %v4599_v13 = vld [vmem:[#allocation3 + $0x31] sm:$0x7]  ;;  %v4612_v35 = vld [vmem:[#allocation3 + $0x2] sm:$0x7] }
 0x2cf   : > { %v4300_v50 = vmul.f32 %v9039_v30, %v9039_v30 }
 0x2d1   : > { %v4313_v39 = vsel %vm4260_vm4, %v4300_v50, 0.0 }
 0x2d2   : > { %4314 = vadd.xlane.f32.xlu0 %v4313_v39 }
 0x2e3   : > { %v4275_v9 = vpop.xlane.xlu0 %4274 }
 0x2e4   : > { %v4287_v7 = vmul.f32 0.03125, %v4275_v9  ;;  %v10192_v9 = vld [vmem:[#allocation14_spill] sm:$0xff] }
 0x2e6   : > { %v9045_v17 = vsub.f32 %v8929_v8, %v4287_v7 }
 0x2e8   : > { %v4301_v58 = vmul.f32 %v9045_v17, %v9045_v17 }
 0x2ea   : > { %v4316_v2 = vsel %vm4260_vm4, %v4301_v58, 0.0 }
 0x2eb   : > { %4317 = vadd.xlane.f32.xlu1 %v4316_v2 }
 0x2f6   : > { %v4278_v40 = vpop.xlane.xlu1 %4277 }
 0x2f7   : > { %v4288_v49 = vmul.f32 0.03125, %v4278_v40  ;;  %v4625_v40 = vld [vmem:[#allocation3 + $0x32] sm:$0x7] }
 0x2f9   : > { %v9051_v31 = vsub.f32 %v8960_v28, %v4288_v49  ;;  %v10193_v49 = vld [vmem:[#allocation4_spill] sm:$0xff] }
 0x2fb   : > { %v4302_v57 = vmul.f32 %v9051_v31, %v9051_v31 }
 0x2fd   : > { %v4319_v42 = vsel %vm4260_vm4, %v4302_v57, 0.0 }
 0x2fe   : > { %4320 = vadd.xlane.f32.xlu0 %v4319_v42 }
 0x30a   : > { %v4281_v60 = vpop.xlane.xlu0 %4280 }
 0x30b   : > { %v4289_v8 = vmul.f32 0.03125, %v4281_v60 }
 0x30d   : > { %v9057_v25 = vsub.f32 %v8980_v56, %v4289_v8  ;;  %v611_v56 = vld [vmem:[%s9654_s7] sm:$0xff] }
 0x30e   : > { %v9082_v11 = vrot.slane %v611_v56, %v10187_v22  ;;  %v9090_v52 = vrot.slane %v611_v56, %v10189_v14  ;;  %v9096_v46 = vrot.slane %v611_v56, %v10191_v1  ;;  %v9102_v7 = vrot.slane %v611_v56, %v10192_v9 }
 0x30f   : > { %10186 = vst [vmem:[#allocation53_spill] sm:$0xff] %v9057_v25  ;;  %v4303_v4 = vmul.f32 %v9057_v25, %v9057_v25  ;;  %v9106_v57 = vrot.slane %v611_v56, %v10193_v49 }
 0x310   : > { %v4566_v38 = vmul.f32 %v9082_v11, %v4559_v34  ;;  %v4580_v8 = vmul.f32 %v9090_v52, %v4573_v15 }
 0x311   : > { %v4322_v63 = vsel %vm4260_vm4, %v4303_v4, 0.0 }
 0x312   : > { %4323 = vadd.xlane.f32.xlu1 %v4322_v63  ;;  %v4619_v63 = vmul.f32 %v9096_v46, %v4612_v35 }
 0x325   : > { %v4306_v10 = vpop.xlane.xlu1 %4305 }
 0x326   : > { %v4325_v28 = vmul.f32 0.03125, %v4306_v10  ;;  %v4638_v10 = vld [vmem:[#allocation3 + $0x3] sm:$0x7] }
 0x328   : > { %v4332_v37 = vadd.f32 1e-06, %v4325_v28 }
 0x32a   : > { %6998 = vrsqrt.f32 %v4332_v37 }
 0x334   : > { %v6999_v20 = vpop.eup %6998 }
 0x335   : > { %v4346_v41 = vmul.f32 %v6999_v20, %v4290_v45  ;;  %v9085_v45 = vrot.slane %v611_v56, %v10188_v36 }
 0x337   : > { %v4359_v61 = vmul.f32 %v9065_v5, %v4346_v41  ;;  %v4593_v59 = vmul.f32 %v9085_v45, %v4586_v26  ;;  %v4666_v26 = vld [vmem:[#allocation3 + $0x90] sm:$0x7] }
 0x339   : > { %v4372_v33 = vadd.f32 %v9070_v53, %v4359_v61  ;;  %v4596_v41 = vadd.f32 %v4593_v59, %v4566_v38  ;;  %v9116_v61 = vld [vmem:[%s9654_s7 + $0x8] sm:$0xff] }
 0x33b   : > { %v4309_v43 = vpop.xlane.xlu1 %4308  ;;  %v4379_v47 = vmul.f32 %v4372_v33, %v4372_v33 }
 0x33c   : > { %v4326_v3 = vmul.f32 0.03125, %v4309_v43  ;;  %v4632_v43 = vmul.f32 %v9102_v7, %v4625_v40  ;;  %v4692_v40 = vld [vmem:[#allocation3 + $0x91] sm:$0x7] }
 0x33d   : > { %v4386_v27 = vmul.f32 %v4379_v47, %v4372_v33 }
 0x33e   : > { %v4333_v16 = vadd.f32 1e-06, %v4326_v3  ;;  %v10194_v3 = vld [vmem:[#allocation7_spill] sm:$0xff] }
 0x33f   : > { %v4393_v51 = vmul.f32 0.044715, %v4386_v27 }
 0x340   : > { %7000 = vrsqrt.f32 %v4333_v16  ;;  %v9120_v16 = vrot.slane %v611_v56, %v10194_v3 }
 0x341   : > { %v4400_v6 = vadd.f32 %v4393_v51, %v4372_v33 }
 0x343   : > { %v4407_v21 = vmul.f32 0.7978846, %v4400_v6 }
 0x345   : > { %v4312_v48 = vpop.xlane.xlu0 %4311  ;;  %7002 = vtanh.f32 %v4407_v21 }
 0x346   : > { %v4327_v19 = vmul.f32 0.03125, %v4312_v48  ;;  %v4645_v48 = vmul.f32 %v9106_v57, %v4638_v10 }
 0x348   : > { %v4334_v12 = vadd.f32 1e-06, %v4327_v19 }
 0x34a   : > { %v7001_v29 = vpop.eup %7000  ;;  %7004 = vrsqrt.f32 %v4334_v12 }
 0x34b   : > { %v4347_v18 = vmul.f32 %v7001_v29, %v4291_v44  ;;  %v10190_v44 = vld [vmem:[#allocation8_spill] sm:$0xff]  ;;  %v4622_v29 = vadd.f32 %v4619_v63, %v4596_v41  ;;  %v4718_v41 = vld [vmem:[#allocation3 + $0x92] sm:$0x7] }
 0x34c   : > { %v9093_v24 = vrot.slane %v611_v56, %v10190_v44  ;;  %v9130_v56 = vrot.slane %v9116_v61, %v10187_v22 }
 0x34d   : > { %v4360_v32 = vmul.f32 %v9065_v5, %v4347_v18  ;;  %v4652_v18 = vld [vmem:[#allocation3 + $0x60] sm:$0x7] }
 0x34e   : > { %v4606_v4 = vmul.f32 %v9093_v24, %v4599_v13  ;;  %10195 = vst [vmem:[#allocation48_spill] sm:$0xff] %v9130_v56  ;;  %v4659_v59 = vmul.f32 %v9120_v16, %v4652_v18  ;;  %v9142_v13 = vrot.slane %v9116_v61, %v10189_v14  ;;  %v9170_v18 = vrot.slane %v9116_v61, %v10193_v49 }
 0x34f   : > { %v9079_v0 = vadd.f32 %v9070_v53, %v4360_v32  ;;  %v7003_v23 = vpop.eup %7002 }
 0x350   : > { %v4421_v39 = vadd.f32 1.0, %v7003_v23  ;;  %v4609_v21 = vadd.f32 %v4606_v4, %v4580_v8  ;;  %10196 = vst [vmem:[#allocation54_spill] sm:$0xff] %v9142_v13  ;;  %v9154_v4 = vrot.slane %v9116_v61, %v10190_v44 }
 0x351   : > { %v4380_v62 = vmul.f32 %v9079_v0, %v9079_v0 }
 0x352   : > { %v4428_v42 = vmul.f32 0.5, %v4421_v39  ;;  %v4635_v15 = vadd.f32 %v4632_v43, %v4609_v21  ;;  %v4673_v39 = vmul.f32 %v9130_v56, %v4666_v26  ;;  %10198 = vst [vmem:[#allocation51_spill] sm:$0xff] %v9154_v4 }
 0x353   : > { %v4387_v55 = vmul.f32 %v4380_v62, %v9079_v0 }
 0x354   : > { %v7005_v50 = vpop.eup %7004 }
 0x355   : > { %v4394_v58 = vmul.f32 0.044715, %v4387_v55  ;;  %v4348_v2 = vmul.f32 %v7005_v50, %v9033_v54  ;;  %v4435_v54 = vmul.f32 %v4428_v42, %v4372_v33  ;;  %v4648_v50 = vadd.f32 %v4645_v48, %v4622_v29 }
 0x357   : > { %v4401_v28 = vadd.f32 %v4394_v58, %v9079_v0  ;;  %v4361_v37 = vmul.f32 %v9065_v5, %v4348_v2  ;;  %v4449_v6 = vrot.slane %v4435_v54, 1  ;;  %v4463_v19 = vrot.slane %v4435_v54, 2  ;;  %v4679_v58 = vld [vmem:[#allocation3 + $0x61] sm:$0x7] }
 0x358   : > { %v4477_v33 = vrot.slane %v4435_v54, 3  ;;  %v9148_v2 = vrot.slane %v9116_v61, %v10188_v36  ;;  %v4686_v8 = vmul.f32 %v9142_v13, %v4679_v58  ;;  %v4676_v10 = vadd.f32 %v4673_v39, %v4648_v50 }
 0x359   : > { %v4408_v47 = vmul.f32 0.7978846, %v4401_v28  ;;  %v9123_v27 = vadd.f32 %v9070_v53, %v4361_v37  ;;  %v4492_v32 = vsel %vm4491_vm6, %v4435_v54, %v4449_v6  ;;  %v4515_v34 = vsel %vm4491_vm6, %v4449_v6, %v4463_v19  ;;  %v4705_v37 = vld [vmem:[#allocation3 + $0x62] sm:$0x7] }
 0x35a   : > { %v4500_v62 = vsel %vm4499_vm7, %v4492_v32, %v4463_v19  ;;  %v4522_v23 = vsel %vm4499_vm7, %v4515_v34, %v4477_v33  ;;  %10197 = vst [vmem:[#allocation60_spill] sm:$0xff] %v9148_v2  ;;  %v4699_v28 = vmul.f32 %v9148_v2, %v4692_v40  ;;  %v4712_v48 = vmul.f32 %v9154_v4, %v4705_v37 }
 0x35b   : > { %7006 = vtanh.f32 %v4408_v47  ;;  %v4381_v12 = vmul.f32 %v9123_v27, %v9123_v27  ;;  %v4508_v38 = vsel %vm4507_vm8, %v4500_v62, %v4477_v33  ;;  %4534 = vst.msk [vmem:[#allocation3 + $0x39] sm:$0x7] %vm4533_vm9, %v4522_v23  ;;  %v9164_v6 = vrot.slane %v9116_v61, %v10192_v9  ;;  %v9177_v62 = vld [vmem:[%s9654_s7 + $0x10] sm:$0xff] }
 0x35c   : > { %4531 = vst.msk [vmem:[#allocation3 + $0x9] sm:$0xf] %vm4530_vm10, %v4508_v38  ;;  %v4702_v33 = vadd.f32 %v4699_v28, %v4676_v10 }
 0x35d   : > { %v4388_v55 = vmul.f32 %v4381_v12, %v9123_v27  ;;  %v4731_v12 = vld [vmem:[#allocation3 + $0x63] sm:$0x7] }
 0x35e   : > { %v4738_v23 = vmul.f32 %v9164_v6, %v4731_v12 }
 0x35f   : > { %v4315_v60 = vpop.xlane.xlu0 %4314  ;;  %v4395_v35 = vmul.f32 0.044715, %v4388_v55 }
 0x360   : > { %v4328_v20 = vmul.f32 0.03125, %v4315_v60  ;;  %v4662_v60 = vadd.f32 %v4659_v59, %v4635_v15  ;;  %v9185_v15 = vrot.slane %v9116_v61, %v10194_v3 }
 0x361   : > { %v4402_v42 = vadd.f32 %v4395_v35, %v9123_v27 }
 0x362   : > { %v4335_v51 = vadd.f32 1e-06, %v4328_v20  ;;  %v9159_v20 = vrot.slane %v9116_v61, %v10191_v1  ;;  %10200 = vst [vmem:[#allocation68_spill] sm:$0xff] %v9185_v15  ;;  %v4757_v39 = vld [vmem:[#allocation3 + $0x38] sm:$0x7] }
 0x363   : > { %v4409_v63 = vmul.f32 0.7978846, %v4402_v42  ;;  %v4744_v34 = vld [vmem:[#allocation3 + $0x8] sm:$0x7]  ;;  %v9192_v42 = vrot.slane %v9177_v62, %v10187_v22 }
 0x364   : > { %7008 = vrsqrt.f32 %v4335_v51  ;;  %10199 = vst [vmem:[#allocation55_spill] sm:$0xff] %v9159_v20  ;;  %v4689_v51 = vadd.f32 %v4686_v8, %v4662_v60  ;;  %v4725_v21 = vmul.f32 %v9159_v20, %v4718_v41  ;;  %v4560_v12 = vld [vmem:[#allocation3 + $0x8] sm:$0x7] }
 0x365   : > { %v7007_v54 = vpop.eup %7006  ;;  %7010 = vtanh.f32 %v4409_v63  ;;  %10201 = vst [vmem:[#allocation52_spill] sm:$0xff] %v9192_v42 }
 0x366   : > { %v4422_v47 = vadd.f32 1.0, %v7007_v54  ;;  %v4728_v38 = vadd.f32 %v4725_v21, %v4702_v33  ;;  %v4764_v54 = vmul.f32 %v9185_v15, %v4757_v39  ;;  %v9205_v21 = vrot.slane %v9177_v62, %v10189_v14 }
 0x368   : > { %v4429_v29 = vmul.f32 0.5, %v4422_v47  ;;  %10202 = vst [vmem:[#allocation77_spill] sm:$0xff] %v9205_v21 }
 0x36a   : > { %v4436_v26 = vmul.f32 %v4429_v29, %v9079_v0  ;;  %v4751_v0 = vmul.f32 %v9170_v18, %v4744_v34  ;;  %v4587_v29 = vld [vmem:[#allocation3 + $0x9] sm:$0x7] }
 0x36c   : > { %v4450_v59 = vrot.slane %v4436_v26, 1  ;;  %v4464_v35 = vrot.slane %v4436_v26, 2  ;;  %v4478_v50 = vrot.slane %v4436_v26, 3 }
 0x36e   : > { %v7009_v43 = vpop.eup %7008  ;;  %v4493_v60 = vsel %vm4491_vm6, %v4436_v26, %v4450_v59  ;;  %v4516_v8 = vsel %vm4491_vm6, %v4450_v59, %v4464_v35  ;;  %v4783_v26 = vld [vmem:[#allocation3 + $0x39] sm:$0x7]  ;;  %v4796_v59 = vld [vmem:[#allocation3 + $0xa] sm:$0x7] }
 0x36f   : > { %v4349_v19 = vmul.f32 %v7009_v43, %v9039_v30  ;;  %v4715_v30 = vadd.f32 %v4712_v48, %v4689_v51  ;;  %v7011_v10 = vpop.eup %7010  ;;  %v4501_v28 = vsel %vm4499_vm7, %v4493_v60, %v4464_v35  ;;  %v4523_v37 = vsel %vm4499_vm7, %v4516_v8, %v4478_v50  ;;  %v4770_v43 = vld [vmem:[#allocation3 + $0x9] sm:$0x7]  ;;  %v4600_v8 = vld [vmem:[#allocation3 + $0x39] sm:$0x7] }
 0x370   : > { %v4509_v47 = vsel %vm4507_vm8, %v4501_v28, %v4478_v50  ;;  %4538 = vst.msk [vmem:[#allocation3 + $0x99] sm:$0x7] %vm4533_vm9, %v4523_v37  ;;  %v4423_v51 = vadd.f32 1.0, %v7011_v10  ;;  %v4777_v34 = vmul.f32 %v9192_v42, %v4770_v43  ;;  %v9215_v35 = vrot.slane %v9177_v62, %v10190_v44  ;;  %v4809_v43 = vld [vmem:[#allocation3 + $0x3a] sm:$0x7] }
 0x371   : > { %v4362_v32 = vmul.f32 %v9065_v5, %v4349_v19  ;;  %v4741_v63 = vadd.f32 %v4738_v23, %v4715_v30  ;;  %v4754_v19 = vadd.f32 %v4751_v0, %v4728_v38  ;;  %4536 = vst.msk [vmem:[#allocation3 + $0x69] sm:$0xf] %vm4530_vm10, %v4509_v47  ;;  %v9210_v30 = vrot.slane %v9177_v62, %v10188_v36 }
 0x372   : > { %10204 = vst [vmem:[#allocation79_spill] sm:$0xff] %v9215_v35  ;;  %v9219_v50 = vrot.slane %v9177_v62, %v10191_v1  ;;  %v4594_v60 = vmul.f32 %v9085_v45, %v4587_v29  ;;  %v9227_v10 = vrot.slane %v9177_v62, %v10192_v9  ;;  %v9231_v28 = vrot.slane %v9177_v62, %v10193_v49 }
 0x373   : > { %v9181_v55 = vadd.f32 %v9070_v53, %v4362_v32  ;;  %v4430_v32 = vmul.f32 0.5, %v4423_v51  ;;  %10203 = vst [vmem:[#allocation57_spill] sm:$0xff] %v9210_v30  ;;  %v4767_v38 = vadd.f32 %v4764_v54, %v4741_v63  ;;  %v4780_v39 = vadd.f32 %v4777_v34, %v4754_v19  ;;  %v4822_v51 = vld [vmem:[#allocation3 + $0xb] sm:$0x7] }
 0x374   : > { %v4790_v63 = vmul.f32 %v9205_v21, %v4783_v26  ;;  %v4803_v54 = vmul.f32 %v9210_v30, %v4796_v59 }
 0x375   : > { %v4382_v58 = vmul.f32 %v9181_v55, %v9181_v55  ;;  %v4437_v0 = vmul.f32 %v4430_v32, %v9123_v27 }
 0x376   : > { %v4793_v47 = vadd.f32 %v4790_v63, %v4767_v38  ;;  %v4806_v34 = vadd.f32 %v4803_v54, %v4780_v39  ;;  %v9243_v38 = vld [vmem:[%s9654_s7 + $0x18] sm:$0xff]  ;;  %v4829_v39 = vmul.f32 %v9219_v50, %v4822_v51 }
 0x377   : > { %v4389_v41 = vmul.f32 %v4382_v58, %v9181_v55  ;;  %v4567_v58 = vmul.f32 %v9082_v11, %v4560_v12  ;;  %v4451_v37 = vrot.slane %v4437_v0, 1  ;;  %v4465_v27 = vrot.slane %v4437_v0, 2  ;;  %v4613_v12 = vld [vmem:[#allocation3 + $0xa] sm:$0x7] }
 0x378   : > { %v4318_v40 = vpop.xlane.xlu1 %4317  ;;  %v4835_v26 = vld [vmem:[#allocation3 + $0x68] sm:$0x7]  ;;  %v9259_v51 = vrot.slane %v9243_v38, %v10187_v22 }
 0x379   : > { %v4329_v61 = vmul.f32 0.03125, %v4318_v40  ;;  %v4396_v33 = vmul.f32 0.044715, %v4389_v41  ;;  %v4574_v40 = vld [vmem:[#allocation3 + $0x38] sm:$0x7]  ;;  %v4479_v41 = vrot.slane %v4437_v0, 3  ;;  %v4494_v29 = vsel %vm4491_vm6, %v4437_v0, %v4451_v37 }
 0x37a   : > { %v4581_v19 = vmul.f32 %v9090_v52, %v4574_v40  ;;  %v4517_v32 = vsel %vm4491_vm6, %v4451_v37, %v4465_v27  ;;  %v4502_v25 = vsel %vm4499_vm7, %v4494_v29, %v4465_v27  ;;  %v4816_v40 = vmul.f32 %v9215_v35, %v4809_v43  ;;  %v4653_v63 = vld [vmem:[#allocation3 + $0x68] sm:$0x7]  ;;  %v4639_v43 = vld [vmem:[#allocation3 + $0xb] sm:$0x7]  ;;  %10205 = vst [vmem:[#allocation58_spill] sm:$0xff] %v9259_v51 }
 0x37b   : > { %v4336_v48 = vadd.f32 1e-06, %v4329_v61  ;;  %v4403_v23 = vadd.f32 %v4396_v33, %v9181_v55  ;;  %v4607_v33 = vmul.f32 %v9093_v24, %v4600_v8  ;;  %v4524_v59 = vsel %vm4499_vm7, %v4517_v32, %v4479_v41  ;;  %v4861_v32 = vld [vmem:[#allocation3 + $0x69] sm:$0x7] }
 0x37c   : > { %v4842_v8 = vmul.f32 %v9227_v10, %v4835_v26  ;;  %v4510_v0 = vsel %vm4507_vm8, %v4502_v25, %v4479_v41  ;;  %4542 = vst.msk [vmem:[#allocation3 + $0x41] sm:$0x7] %vm4533_vm9, %v4524_v59  ;;  %v4819_v37 = vadd.f32 %v4816_v40, %v4793_v47  ;;  %v9255_v27 = vrot.slane %v9177_v62, %v10194_v3  ;;  %v4667_v25 = vld [vmem:[#allocation3 + $0x98] sm:$0x7] }
 0x37d   : > { %7012 = vrsqrt.f32 %v4336_v48  ;;  %v4410_v61 = vmul.f32 0.7978846, %v4403_v23  ;;  %v4848_v48 = vld [vmem:[#allocation3 + $0x98] sm:$0x7]  ;;  %v4597_v23 = vadd.f32 %v4594_v60, %v4567_v58  ;;  %v4620_v60 = vmul.f32 %v9096_v46, %v4613_v12  ;;  %4540 = vst.msk [vmem:[#allocation3 + $0x11] sm:$0xf] %vm4530_vm10, %v4510_v0 }
 0x37e   : > { %v4855_v58 = vmul.f32 %v9231_v28, %v4848_v48  ;;  %v4610_v54 = vadd.f32 %v4607_v33, %v4581_v19  ;;  %v4832_v29 = vadd.f32 %v4829_v39, %v4806_v34  ;;  %v4845_v26 = vadd.f32 %v4842_v8, %v4819_v37  ;;  %v4874_v59 = vld [vmem:[#allocation3 + $0x99] sm:$0x7] }
 0x37f   : > { %7014 = vtanh.f32 %v4410_v61  ;;  %v4626_v61 = vld [vmem:[#allocation3 + $0x3a] sm:$0x7]  ;;  %v4623_v48 = vadd.f32 %v4620_v60, %v4597_v23  ;;  %v4660_v62 = vmul.f32 %v9120_v16, %v4653_v63  ;;  %v9266_v33 = vrot.slane %v9243_v38, %v10189_v14 }
 0x380   : > { %v4633_v47 = vmul.f32 %v9102_v7, %v4626_v61  ;;  %v4858_v19 = vadd.f32 %v4855_v58, %v4832_v29  ;;  %v4646_v34 = vmul.f32 %v9106_v57, %v4639_v43  ;;  %v4674_v0 = vmul.f32 %v9130_v56, %v4667_v25  ;;  %v4887_v61 = vld [vmem:[#allocation3 + $0x6a] sm:$0x7] }
 0x381   : > { %10206 = vst [vmem:[#allocation65_spill] sm:$0xff] %v9266_v33  ;;  %v4881_v60 = vmul.f32 %v9259_v51, %v4874_v59  ;;  %v9275_v58 = vrot.slane %v9243_v38, %v10188_v36  ;;  %v9279_v63 = vrot.slane %v9243_v38, %v10190_v44  ;;  %v4680_v43 = vld [vmem:[#allocation3 + $0x69] sm:$0x7]  ;;  %v4693_v59 = vld [vmem:[#allocation3 + $0x99] sm:$0x7]  ;;  %v9286_v56 = vrot.slane %v9243_v38, %v10191_v1 }
 0x382   : > { %v4636_v8 = vadd.f32 %v4633_v47, %v4610_v54  ;;  %v4649_v37 = vadd.f32 %v4646_v34, %v4623_v48  ;;  %v4900_v54 = vld [vmem:[#allocation3 + $0x9a] sm:$0x7]  ;;  %v4894_v34 = vmul.f32 %v9266_v33, %v4887_v61 }
 0x383   : > { %10207 = vst [vmem:[#allocation80_spill] sm:$0xff] %v9279_v63  ;;  %10208 = vst [vmem:[#allocation59_spill] sm:$0xff] %v9286_v56 }
 0x384   : > { %v4677_v51 = vadd.f32 %v4674_v0, %v4649_v37  ;;  %v9297_v0 = vrot.slane %v9243_v38, %v10192_v9 }
 0x387   : > { %v7013_v41 = vpop.eup %7012 }
 0x388   : > { %v4350_v12 = vmul.f32 %v7013_v41, %v9045_v17  ;;  %v4868_v17 = vmul.f32 %v9255_v27, %v4861_v32 }
 0x389   : > { %v7015_v25 = vpop.eup %7014 }
 0x38a   : > { %v4363_v23 = vmul.f32 %v9065_v5, %v4350_v12  ;;  %v4871_v32 = vadd.f32 %v4868_v17, %v4845_v26  ;;  %v4663_v12 = vadd.f32 %v4660_v62, %v4636_v8  ;;  %v4424_v47 = vadd.f32 1.0, %v7015_v25  ;;  %v4913_v17 = vld [vmem:[#allocation3 + $0x6b] sm:$0x7] }
 0x38b   : > { %v4321_v40 = vpop.xlane.xlu0 %4320  ;;  %v4907_v62 = vmul.f32 %v9275_v58, %v4900_v54  ;;  %v4706_v8 = vld [vmem:[#allocation3 + $0x6a] sm:$0x7] }
 0x38c   : > { %v4330_v39 = vmul.f32 0.03125, %v4321_v40  ;;  %v9282_v41 = vadd.f32 %v9070_v53, %v4363_v23  ;;  %v4884_v40 = vadd.f32 %v4881_v60, %v4858_v19  ;;  %v4926_v23 = vld [vmem:[#allocation3 + $0x10] sm:$0x7]  ;;  %v4431_v26 = vmul.f32 0.5, %v4424_v47  ;;  %v4732_v54 = vld [vmem:[#allocation3 + $0x6b] sm:$0x7] }
 0x38d   : > { %v4700_v19 = vmul.f32 %v9148_v2, %v4693_v59  ;;  %v4897_v25 = vadd.f32 %v4894_v34, %v4871_v32  ;;  %v4920_v59 = vmul.f32 %v9279_v63, %v4913_v17  ;;  %v4713_v32 = vmul.f32 %v9154_v4, %v4706_v8 }
 0x38e   : > { %v4337_v29 = vadd.f32 1e-06, %v4330_v39  ;;  %v4383_v48 = vmul.f32 %v9282_v41, %v9282_v41  ;;  %v4687_v39 = vmul.f32 %v9142_v13, %v4680_v43  ;;  %v4438_v61 = vmul.f32 %v4431_v26, %v9181_v55  ;;  %v4745_v55 = vld [vmem:[#allocation3 + $0x10] sm:$0x7]  ;;  %v4939_v26 = vld [vmem:[#allocation3 + $0x40] sm:$0x7] }
 0x38f   : > { %v4910_v33 = vadd.f32 %v4907_v62, %v4884_v40  ;;  %v4933_v43 = vmul.f32 %v9286_v56, %v4926_v23  ;;  %v4703_v47 = vadd.f32 %v4700_v19, %v4677_v51  ;;  %v615_v51 = vld [vmem:[%s9654_s7 + $0x20] sm:$0xff]  ;;  %v4923_v23 = vadd.f32 %v4920_v59, %v4897_v25  ;;  %v4952_v56 = vld [vmem:[#allocation3 + $0x11] sm:$0x7] }
 0x390   : > { %7016 = vrsqrt.f32 %v4337_v29  ;;  %v4390_v60 = vmul.f32 %v4383_v48, %v9282_v41  ;;  %v4690_v37 = vadd.f32 %v4687_v39, %v4663_v12  ;;  %v4719_v29 = vld [vmem:[#allocation3 + $0x9a] sm:$0x7]  ;;  %v9304_v48 = vrot.slane %v9243_v38, %v10193_v49 }
 0x391   : > { %v4452_v34 = vrot.slane %v4438_v61, 1  ;;  %v4466_v2 = vrot.slane %v4438_v61, 2  ;;  %v4480_v12 = vrot.slane %v4438_v61, 3  ;;  %v4726_v39 = vmul.f32 %v9159_v20, %v4719_v29 }
 0x392   : > { %v4397_v13 = vmul.f32 0.044715, %v4390_v60  ;;  %10209 = vst [vmem:[#allocation74_spill] sm:$0xff] %v9304_v48  ;;  %v4716_v62 = vadd.f32 %v4713_v32, %v4690_v37  ;;  %v4739_v17 = vmul.f32 %v9164_v6, %v4732_v54  ;;  %v4936_v60 = vadd.f32 %v4933_v43, %v4910_v33  ;;  %v4758_v43 = vld [vmem:[#allocation3 + $0x40] sm:$0x7] }
 0x393   : > { %v4495_v19 = vsel %vm4491_vm6, %v4438_v61, %v4452_v34  ;;  %v4518_v8 = vsel %vm4491_vm6, %v4452_v34, %v4466_v2  ;;  %v4729_v4 = vadd.f32 %v4726_v39, %v4703_v47  ;;  %v4752_v63 = vmul.f32 %v9170_v18, %v4745_v55  ;;  %v4965_v54 = vld [vmem:[#allocation3 + $0x41] sm:$0x7] }
 0x394   : > { %v4404_v40 = vadd.f32 %v4397_v13, %v9282_v41  ;;  %v4503_v29 = vsel %vm4499_vm7, %v4495_v19, %v4466_v2  ;;  %v4525_v13 = vsel %vm4499_vm7, %v4518_v8, %v4480_v12  ;;  %v4946_v37 = vmul.f32 %v9297_v0, %v4939_v26 }
 0x395   : > { %v4511_v25 = vsel %vm4507_vm8, %v4503_v29, %v4480_v12  ;;  %4546 = vst.msk [vmem:[#allocation3 + $0xa1] sm:$0x7] %vm4533_vm9, %v4525_v13  ;;  %v9323_v61 = vrot.slane %v9243_v38, %v10194_v3  ;;  %v9326_v33 = vrot.slane %v615_v51, %v10187_v22  ;;  %v4959_v47 = vmul.f32 %v9304_v48, %v4952_v56  ;;  %v4978_v38 = vld [vmem:[#allocation3 + $0x12] sm:$0x7]  ;;  %v9343_v56 = vld [vmem:[%s9654_s7 + $0x28] sm:$0xff] }
 0x396   : > { %v4411_v20 = vmul.f32 0.7978846, %v4404_v40  ;;  %4544 = vst.msk [vmem:[#allocation3 + $0x71] sm:$0xf] %vm4530_vm10, %v4511_v25  ;;  %v9331_v59 = vrot.slane %v615_v51, %v10189_v14  ;;  %v4742_v32 = vadd.f32 %v4739_v17, %v4716_v62  ;;  %v4949_v12 = vadd.f32 %v4946_v37, %v4923_v23  ;;  %v4771_v40 = vld [vmem:[#allocation3 + $0x11] sm:$0x7] }
 0x397   : > { %10210 = vst [vmem:[#allocation81_spill] sm:$0xff] %v9323_v61  ;;  %10211 = vst [vmem:[#allocation98_spill] sm:$0xff] %v9326_v33  ;;  %v9335_v39 = vrot.slane %v615_v51, %v10188_v36  ;;  %v9338_v55 = vrot.slane %v615_v51, %v10190_v44  ;;  %v9346_v26 = vrot.slane %v615_v51, %v10191_v1  ;;  %v4784_v13 = vld [vmem:[#allocation3 + $0x41] sm:$0x7]  ;;  %v4797_v25 = vld [vmem:[#allocation3 + $0x12] sm:$0x7] }
 0x398   : > { %7018 = vtanh.f32 %v4411_v20  ;;  %10212 = vst [vmem:[#allocation100_spill] sm:$0xff] %v9331_v59  ;;  %v4962_v20 = vadd.f32 %v4959_v47, %v4936_v60  ;;  %v4755_v62 = vadd.f32 %v4752_v63, %v4729_v4  ;;  %v4972_v19 = vmul.f32 %v9323_v61, %v4965_v54  ;;  %v4561_v63 = vld [vmem:[#allocation3 + $0x10] sm:$0x7]  ;;  %v4575_v61 = vld [vmem:[#allocation3 + $0x40] sm:$0x7] }
 0x399   : > { %10213 = vst [vmem:[#allocation9_spill] sm:$0xff] %v9335_v39  ;;  %v9352_v8 = vrot.slane %v615_v51, %v10192_v9  ;;  %v9355_v29 = vrot.slane %v615_v51, %v10193_v49  ;;  %v4985_v37 = vmul.f32 %v9326_v33, %v4978_v38  ;;  %v4778_v4 = vmul.f32 %v9192_v42, %v4771_v40  ;;  %v5004_v33 = vld [vmem:[#allocation3 + $0x13] sm:$0x7] }
 0x39a   : > { %v7017_v2 = vpop.eup %7016  ;;  %v4975_v54 = vadd.f32 %v4972_v19, %v4949_v12  ;;  %v9367_v48 = vrot.slane %v9343_v56, %v10187_v22  ;;  %v4791_v40 = vmul.f32 %v9205_v21, %v4784_v13  ;;  %v4804_v12 = vmul.f32 %v9210_v30, %v4797_v25 }
 0x39b   : > { %v4351_v34 = vmul.f32 %v7017_v2, %v9051_v31  ;;  %v4765_v31 = vmul.f32 %v9185_v15, %v4758_v43  ;;  %v4588_v43 = vld [vmem:[#allocation3 + $0x11] sm:$0x7]  ;;  %v4988_v38 = vadd.f32 %v4985_v37, %v4962_v20  ;;  %v4568_v19 = vmul.f32 %v9082_v11, %v4561_v63  ;;  %v4627_v63 = vld [vmem:[#allocation3 + $0x42] sm:$0x7] }
 0x39c   : > { %v4595_v22 = vmul.f32 %v9085_v45, %v4588_v43  ;;  %v9381_v37 = vrot.slane %v9343_v56, %v10189_v14  ;;  %v9385_v25 = vrot.slane %v9343_v56, %v10188_v36  ;;  %v4823_v11 = vld [vmem:[#allocation3 + $0x13] sm:$0x7] }
 0x39d   : > { %v4364_v23 = vmul.f32 %v9065_v5, %v4351_v34  ;;  %v4768_v2 = vadd.f32 %v4765_v31, %v4742_v32  ;;  %v9363_v34 = vrot.slane %v615_v51, %v10194_v3  ;;  %v4991_v32 = vld [vmem:[#allocation3 + $0x42] sm:$0x7]  ;;  %v4781_v31 = vadd.f32 %v4778_v4, %v4755_v62  ;;  %v4614_v45 = vld [vmem:[#allocation3 + $0x12] sm:$0x7] }
 0x39e   : > { %v4810_v51 = vld [vmem:[#allocation3 + $0x42] sm:$0x7]  ;;  %v4998_v13 = vmul.f32 %v9331_v59, %v4991_v32  ;;  %v4640_v14 = vld [vmem:[#allocation3 + $0x13] sm:$0x7]  ;;  %v4836_v36 = vld [vmem:[#allocation3 + $0x70] sm:$0x7]  ;;  %v4830_v59 = vmul.f32 %v9219_v50, %v4823_v11 }
 0x39f   : > { %v4324_v17 = vpop.xlane.xlu1 %4323  ;;  %v9360_v47 = vadd.f32 %v9070_v53, %v4364_v23  ;;  %v4794_v42 = vadd.f32 %v4791_v40, %v4768_v2  ;;  %v5011_v2 = vmul.f32 %v9335_v39, %v5004_v33  ;;  %v4817_v4 = vmul.f32 %v9215_v35, %v4810_v51  ;;  %v5056_v35 = vld [vmem:[#allocation3 + $0xa1] sm:$0x7] }
 0x3a0   : > { %v4331_v60 = vmul.f32 0.03125, %v4324_v17  ;;  %v4601_v17 = vld [vmem:[#allocation3 + $0x41] sm:$0x7]  ;;  %v5001_v32 = vadd.f32 %v4998_v13, %v4975_v54  ;;  %v4598_v40 = vadd.f32 %v4595_v22, %v4568_v19  ;;  %v4621_v51 = vmul.f32 %v9096_v46, %v4614_v45 }
 0x3a1   : > { %v4384_v23 = vmul.f32 %v9360_v47, %v9360_v47  ;;  %v4608_v20 = vmul.f32 %v9093_v24, %v4601_v17  ;;  %v9390_v24 = vrot.slane %v9343_v56, %v10190_v44  ;;  %v4820_v30 = vadd.f32 %v4817_v4, %v4794_v42 }
 0x3a2   : > { %v4338_v15 = vadd.f32 1e-06, %v4331_v60  ;;  %v4582_v60 = vmul.f32 %v9090_v52, %v4575_v61  ;;  %v5017_v52 = vld [vmem:[#allocation3 + $0x70] sm:$0x7]  ;;  %v4807_v61 = vadd.f32 %v4804_v12, %v4781_v31  ;;  %v5030_v31 = vld [vmem:[#allocation3 + $0xa0] sm:$0x7]  ;;  %v4843_v54 = vmul.f32 %v9227_v10, %v4836_v36 }
 0x3a3   : > { %v4391_v62 = vmul.f32 %v4384_v23, %v9360_v47  ;;  %v5014_v23 = vadd.f32 %v5011_v2, %v4988_v38  ;;  %v5024_v44 = vmul.f32 %v9338_v55, %v5017_v52  ;;  %v5043_v12 = vld [vmem:[#allocation3 + $0x71] sm:$0x7]  ;;  %v4634_v19 = vmul.f32 %v9102_v7, %v4627_v63  ;;  %v4875_v36 = vld [vmem:[#allocation3 + $0xa1] sm:$0x7] }
 0x3a4   : > { %7020 = vrsqrt.f32 %v4338_v15  ;;  %v7019_v15 = vpop.eup %7018  ;;  %v4611_v33 = vadd.f32 %v4608_v20, %v4582_v60  ;;  %v4647_v42 = vmul.f32 %v9106_v57, %v4640_v14  ;;  %v4849_v20 = vld [vmem:[#allocation3 + $0xa0] sm:$0x7]  ;;  %v4624_v13 = vadd.f32 %v4621_v51, %v4598_v40  ;;  %v4654_v7 = vld [vmem:[#allocation3 + $0x70] sm:$0x7] }
 0x3a5   : > { %v4425_v43 = vadd.f32 1.0, %v7019_v15  ;;  %v4398_v17 = vmul.f32 0.044715, %v4391_v62  ;;  %v4833_v15 = vadd.f32 %v4830_v59, %v4807_v61  ;;  %v5027_v60 = vadd.f32 %v5024_v44, %v5001_v32  ;;  %v4862_v62 = vld [vmem:[#allocation3 + $0x71] sm:$0x7] }
 0x3a6   : > { %v5037_v11 = vmul.f32 %v9346_v26, %v5030_v31  ;;  %v5050_v2 = vmul.f32 %v9352_v8, %v5043_v12  ;;  %v4846_v46 = vadd.f32 %v4843_v54, %v4820_v30  ;;  %v4637_v45 = vadd.f32 %v4634_v19, %v4611_v33  ;;  %v10214_v30 = vld [vmem:[#allocation53_spill] sm:$0xff]  ;;  %v4888_v44 = vld [vmem:[#allocation3 + $0x72] sm:$0x7]  ;;  %v4668_v19 = vld [vmem:[#allocation3 + $0xa0] sm:$0x7] }
 0x3a7   : > { %v4432_v39 = vmul.f32 0.5, %v4425_v43  ;;  %v4405_v21 = vadd.f32 %v4398_v17, %v9360_v47  ;;  %v4869_v63 = vmul.f32 %v9255_v27, %v4862_v62  ;;  %v4650_v62 = vadd.f32 %v4647_v42, %v4624_v13 }
 0x3a8   : > { %v5040_v57 = vadd.f32 %v5037_v11, %v5014_v23  ;;  %v5053_v32 = vadd.f32 %v5050_v2, %v5027_v60  ;;  %v10215_v60 = vld [vmem:[#allocation58_spill] sm:$0xff] }
 0x3a9   : > { %v4439_v38 = vmul.f32 %v4432_v39, %v9282_v41  ;;  %v4412_v22 = vmul.f32 0.7978846, %v4405_v21  ;;  %v5063_v41 = vmul.f32 %v9355_v29, %v5056_v35  ;;  %v5069_v21 = vld [vmem:[#allocation3 + $0x72] sm:$0x7]  ;;  %v4856_v39 = vmul.f32 %v9231_v28, %v4849_v20 }
 0x3aa   : > { %v4661_v35 = vmul.f32 %v9120_v16, %v4654_v7  ;;  %v5076_v51 = vmul.f32 %v9363_v34, %v5069_v21  ;;  %v4872_v54 = vadd.f32 %v4869_v63, %v4846_v46  ;;  %v9423_v16 = vrot.slane %v9343_v56, %v10192_v9  ;;  %v10216_v46 = vld [vmem:[#allocation65_spill] sm:$0xff]  ;;  %v10217_v21 = vld [vmem:[#allocation48_spill] sm:$0xff] }
 0x3ab   : > { %v4453_v59 = vrot.slane %v4439_v38, 1  ;;  %v4467_v52 = vrot.slane %v4439_v38, 2  ;;  %v4481_v61 = vrot.slane %v4439_v38, 3  ;;  %7022 = vtanh.f32 %v4412_v22  ;;  %v5095_v22 = vld [vmem:[#allocation3 + $0x73] sm:$0x7] }
 0x3ac   : > { %v4859_v23 = vadd.f32 %v4856_v39, %v4833_v15  ;;  %v9419_v15 = vrot.slane %v9343_v56, %v10191_v1  ;;  %v4882_v20 = vmul.f32 %v10215_v60, %v4875_v36  ;;  %v5066_v11 = vadd.f32 %v5063_v41, %v5040_v57  ;;  %v4694_v41 = vld [vmem:[#allocation3 + $0xa1] sm:$0x7] }
 0x3ad   : > { %v4496_v14 = vsel %vm4491_vm6, %v4439_v38, %v4453_v59  ;;  %v4519_v43 = vsel %vm4491_vm6, %v4453_v59, %v4467_v52  ;;  %v5082_v38 = vld [vmem:[#allocation3 + $0xa2] sm:$0x7]  ;;  %v5079_v2 = vadd.f32 %v5076_v51, %v5053_v32  ;;  %v4895_v59 = vmul.f32 %v10216_v46, %v4888_v44 }
 0x3ae   : > { %v7021_v4 = vpop.eup %7020  ;;  %v4504_v40 = vsel %vm4499_vm7, %v4496_v14, %v4467_v52  ;;  %v4526_v33 = vsel %vm4499_vm7, %v4519_v43, %v4481_v61  ;;  %v4901_v52 = vld [vmem:[#allocation3 + $0xa2] sm:$0x7]  ;;  %v9432_v1 = vrot.slane %v9343_v56, %v10193_v49  ;;  %v4885_v7 = vadd.f32 %v4882_v20, %v4859_v23  ;;  %v10218_v43 = vld [vmem:[#allocation54_spill] sm:$0xff] }
 0x3af   : > { %v4352_v17 = vmul.f32 %v7021_v4, %v10214_v30  ;;  %v4512_v31 = vsel %vm4507_vm8, %v4504_v40, %v4481_v61  ;;  %4550 = vst.msk [vmem:[#allocation3 + $0x49] sm:$0x7] %vm4533_vm9, %v4526_v33  ;;  %v4681_v61 = vld [vmem:[#allocation3 + $0x71] sm:$0x7]  ;;  %v4664_v9 = vadd.f32 %v4661_v35, %v4637_v45  ;;  %v4675_v39 = vmul.f32 %v10217_v21, %v4668_v19  ;;  %v10219_v33 = vld [vmem:[#allocation80_spill] sm:$0xff] }
 0x3b0   : > { %4548 = vst.msk [vmem:[#allocation3 + $0x19] sm:$0xf] %vm4530_vm10, %v4512_v31  ;;  %v4914_v4 = vld [vmem:[#allocation3 + $0x73] sm:$0x7]  ;;  %v5102_v13 = vmul.f32 %v9381_v37, %v5095_v22  ;;  %v4898_v57 = vadd.f32 %v4895_v59, %v4872_v54  ;;  %v9441_v63 = vrot.slane %v9343_v56, %v10194_v3  ;;  %v4908_v49 = vmul.f32 %v9275_v58, %v4901_v52  ;;  %v4720_v44 = vld [vmem:[#allocation3 + $0xa2] sm:$0x7] }
 0x3b1   : > { %v4365_v12 = vmul.f32 %v9065_v5, %v4352_v17  ;;  %v4678_v14 = vadd.f32 %v4675_v39, %v4650_v62  ;;  %v4688_v45 = vmul.f32 %v10218_v43, %v4681_v61  ;;  %v4707_v30 = vld [vmem:[#allocation3 + $0x72] sm:$0x7]  ;;  %v4921_v23 = vmul.f32 %v10219_v33, %v4914_v4  ;;  %v10220_v54 = vld [vmem:[#allocation60_spill] sm:$0xff]  ;;  %v10221_v52 = vld [vmem:[#allocation51_spill] sm:$0xff] }
 0x3b2   : > { %v5105_v40 = vadd.f32 %v5102_v13, %v5079_v2  ;;  %v4733_v35 = vld [vmem:[#allocation3 + $0x73] sm:$0x7]  ;;  %v4911_v3 = vadd.f32 %v4908_v49, %v4885_v7  ;;  %v4701_v19 = vmul.f32 %v10220_v54, %v4694_v41 }
 0x3b3   : > { %v9427_v5 = vadd.f32 %v9070_v53, %v4365_v12  ;;  %v5089_v53 = vmul.f32 %v9367_v48, %v5082_v38  ;;  %v4691_v56 = vadd.f32 %v4688_v45, %v4664_v9  ;;  %v4924_v59 = vadd.f32 %v4921_v23, %v4898_v57  ;;  %v9459_v57 = vld [vmem:[%s9654_s7 + $0x30] ss:$0 sm:$0xff] }
 0x3b4   : > { %v4704_v39 = vadd.f32 %v4701_v19, %v4678_v14  ;;  %v4740_v41 = vmul.f32 %v9164_v6, %v4733_v35 }
 0x3b5   : > { %v4385_v42 = vmul.f32 %v9427_v5, %v9427_v5  ;;  %v7023_v17 = vpop.eup %7022  ;;  %v5092_v36 = vadd.f32 %v5089_v53, %v5066_v11  ;;  %v4714_v11 = vmul.f32 %v10221_v52, %v4707_v30 }
 0x3b6   : > { %v4426_v31 = vadd.f32 1.0, %v7023_v17  ;;  %v5121_v12 = vld [vmem:[#allocation3 + $0x48] sm:$0x7] }
 0x3b7   : > { %v4392_v32 = vmul.f32 %v4385_v42, %v9427_v5  ;;  %v5147_v51 = vld [vmem:[#allocation3 + $0x49] sm:$0x7]  ;;  %v5108_v22 = vld [vmem:[#allocation3 + $0x18] sm:$0x7]  ;;  %v5128_v20 = vmul.f32 %v9390_v24, %v5121_v12  ;;  %v5186_v14 = vld [vmem:[#allocation3 + $0x1b] sm:$0x7]  ;;  %v4717_v17 = vadd.f32 %v4714_v11, %v4691_v56 }
 0x3b8   : > { %v5134_v62 = vld [vmem:[#allocation3 + $0x19] sm:$0x7]  ;;  %v4433_v2 = vmul.f32 0.5, %v4426_v31  ;;  %v5115_v61 = vmul.f32 %v9385_v25, %v5108_v22  ;;  %v5173_v21 = vld [vmem:[#allocation3 + $0x4a] sm:$0x7]  ;;  %v5154_v13 = vmul.f32 %v9423_v16, %v5147_v51  ;;  %v5193_v51 = vmul.f32 %v9459_v57, %v5186_v14 }
 0x3b9   : > { %v4399_v38 = vmul.f32 0.044715, %v4392_v32  ;;  %v5160_v4 = vld [vmem:[#allocation3 + $0x1a] sm:$0x7]  ;;  %v5131_v9 = vadd.f32 %v5128_v20, %v5105_v40  ;;  %v5141_v45 = vmul.f32 %v9419_v15, %v5134_v62  ;;  %v4940_v30 = vld [vmem:[#allocation3 + $0x48] sm:$0x7] }
 0x3ba   : > { %v10222_v42 = vld [vmem:[#allocation55_spill] sm:$0xff]  ;;  %v4440_v49 = vmul.f32 %v4433_v2, %v9360_v47  ;;  %v5118_v43 = vadd.f32 %v5115_v61, %v5092_v36  ;;  %v5167_v40 = vmul.f32 %v9432_v1, %v5160_v4  ;;  %v4947_v36 = vmul.f32 %v9297_v0, %v4940_v30  ;;  %v4759_v62 = vld [vmem:[#allocation3 + $0x48] sm:$0x7] }
 0x3bb   : > { %v4727_v53 = vmul.f32 %v10222_v42, %v4720_v44  ;;  %v4406_v7 = vadd.f32 %v4399_v38, %v9427_v5  ;;  %v5157_v23 = vadd.f32 %v5154_v13, %v5131_v9  ;;  %v5180_v44 = vmul.f32 %v9441_v63, %v5173_v21  ;;  %v4927_v12 = vld [vmem:[#allocation3 + $0x18] sm:$0x7]  ;;  %v4966_v4 = vld [vmem:[#allocation3 + $0x49] sm:$0x7]  ;;  %v9477_v13 = vld [vmem:[%s9655_s8] ss:$0 sm:$0xff] }
 0x3bc   : > { %v4454_v6 = vrot.slane %v4440_v49, 1  ;;  %v4468_v35 = vrot.slane %v4440_v49, 2  ;;  %v4482_v47 = vrot.slane %v4440_v49, 3  ;;  %v5144_v31 = vadd.f32 %v5141_v45, %v5118_v43  ;;  %v4746_v20 = vld [vmem:[#allocation3 + $0x18] sm:$0x7]  ;;  %v10224_v45 = vld [vmem:[#allocation68_spill] sm:$0xff] }
 0x3bd   : > { %v4413_v32 = vmul.f32 0.7978846, %v4406_v7  ;;  %v4730_v54 = vadd.f32 %v4727_v53, %v4704_v39  ;;  %v5183_v22 = vadd.f32 %v5180_v44, %v5157_v23  ;;  %v10223_v2 = vld [vmem:[#allocation59_spill] sm:$0xff]  ;;  %v4743_v21 = vadd.f32 %v4740_v41, %v4717_v17  ;;  %v4785_v14 = vld [vmem:[#allocation3 + $0x49] sm:$0x7]  ;;  %v10226_v23 = vld [vmem:[#allocation74_spill] sm:$0xff] }
 0x3be   : > { %v4497_v19 = vsel %vm4491_vm6, %v4440_v49, %v4454_v6  ;;  %v4520_v56 = vsel %vm4491_vm6, %v4454_v6, %v4468_v35  ;;  %v5170_v38 = vadd.f32 %v5167_v40, %v5144_v31  ;;  %v4934_v61 = vmul.f32 %v10223_v2, %v4927_v12  ;;  %v4953_v7 = vld [vmem:[#allocation3 + $0x19] sm:$0x7]  ;;  %v10225_v17 = vld [vmem:[#allocation81_spill] sm:$0xff] }
 0x3bf   : > { %7024 = vtanh.f32 %v4413_v32  ;;  %v4505_v52 = vsel %vm4499_vm7, %v4497_v19, %v4468_v35  ;;  %v4527_v11 = vsel %vm4499_vm7, %v4520_v56, %v4482_v47  ;;  %v4950_v53 = vadd.f32 %v4947_v36, %v4924_v59  ;;  %v4772_v9 = vld [vmem:[#allocation3 + $0x19] sm:$0x7]  ;;  %v4992_v40 = vld [vmem:[#allocation3 + $0x4a] sm:$0x7]  ;;  %v10227_v35 = vld [vmem:[#allocation52_spill] sm:$0xff] }
 0x3c0   : > { %v4513_v42 = vsel %vm4507_vm8, %v4505_v52, %v4482_v47  ;;  %4554 = vst.msk [vmem:[#allocation3 + $0xa9] sm:$0x7] %vm4533_vm9, %v4527_v11  ;;  %v5196_v39 = vadd.f32 %v5193_v51, %v5170_v38  ;;  %v4937_v49 = vadd.f32 %v4934_v61, %v4911_v3  ;;  %v4753_v43 = vmul.f32 %v9170_v18, %v4746_v20  ;;  %v4979_v3 = vld [vmem:[#allocation3 + $0x1a] sm:$0x7]  ;;  %v10228_v51 = vld [vmem:[#allocation77_spill] sm:$0xff]  ;;  %v10229_v20 = vld [vmem:[#allocation100_spill] sm:$0xff] }
 0x3c1   : > { %4552 = vst.msk [vmem:[#allocation3 + $0x79] sm:$0xf] %vm4530_vm10, %v4513_v42  ;;  %v4766_v41 = vmul.f32 %v10224_v45, %v4759_v62  ;;  %v4973_v32 = vmul.f32 %v10225_v17, %v4966_v4  ;;  %v4960_v59 = vmul.f32 %v10226_v23, %v4953_v7  ;;  %v4779_v47 = vmul.f32 %v10227_v35, %v4772_v9  ;;  %v4798_v36 = vld [vmem:[#allocation3 + $0x1a] sm:$0x7]  ;;  %v4811_v38 = vld [vmem:[#allocation3 + $0x4a] sm:$0x7] }
 0x3c2   : > { %v5199_v30 = vadd.f32 %v5196_v39, %v5183_v22  ;;  %v4756_v44 = vadd.f32 %v4753_v43, %v4730_v54  ;;  %v4792_v18 = vmul.f32 %v10228_v51, %v4785_v14  ;;  %v4999_v62 = vmul.f32 %v10229_v20, %v4992_v40  ;;  %v10230_v11 = vld [vmem:[#allocation98_spill] sm:$0xff]  ;;  %v5005_v4 = vld [vmem:[#allocation3 + $0x1b] sm:$0x7] }
 0x3c3   : > { %v4769_v6 = vadd.f32 %v4766_v41, %v4743_v21  ;;  %v4976_v12 = vadd.f32 %v4973_v32, %v4950_v53  ;;  %v4963_v19 = vadd.f32 %v4960_v59, %v4937_v49  ;;  %v4986_v61 = vmul.f32 %v10230_v11, %v4979_v3  ;;  %v10231_v21 = vld [vmem:[#allocation57_spill] sm:$0xff]  ;;  %v10232_v9 = vld [vmem:[#allocation79_spill] sm:$0xff] }
 0x3c4   : > { %v9485_v31 = vadd.f32 %v9477_v13, %v5199_v30  ;;  %v4782_v56 = vadd.f32 %v4779_v47, %v4756_v44  ;;  %v4805_v42 = vmul.f32 %v10231_v21, %v4798_v36  ;;  %v4818_v49 = vmul.f32 %v10232_v9, %v4811_v38  ;;  %v4824_v43 = vld [vmem:[#allocation3 + $0x1b] sm:$0x7]  ;;  %v10233_v44 = vld [vmem:[#allocation9_spill] sm:$0xff] }
 0x3c5   : > { %v4795_v54 = vadd.f32 %v4792_v18, %v4769_v6  ;;  %v5002_v53 = vadd.f32 %v4999_v62, %v4976_v12  ;;  %v4989_v45 = vadd.f32 %v4986_v61, %v4963_v19  ;;  %v5012_v6 = vmul.f32 %v10233_v44, %v5005_v4 }
 0x3c6   : > { %v5214_v22 = vsel %vm4533_vm9, %v9485_v31, 0.0  ;;  %v4808_v41 = vadd.f32 %v4805_v42, %v4782_v56  ;;  %v4831_v35 = vmul.f32 %v9219_v50, %v4824_v43 }
 0x3c7   : > { %5215 = vadd.xlane.f32.xlu0 %v5214_v22  ;;  %v4821_v40 = vadd.f32 %v4818_v49, %v4795_v54  ;;  %v5031_v12 = vld [vmem:[#allocation3 + $0xa8] sm:$0x7]  ;;  %v5015_v36 = vadd.f32 %v5012_v6, %v4989_v45 }
 0x3c8   : > { %v5018_v7 = vld [vmem:[#allocation3 + $0x78] sm:$0x7]  ;;  %v4850_v18 = vld [vmem:[#allocation3 + $0xa8] sm:$0x7]  ;;  %v4834_v56 = vadd.f32 %v4831_v35, %v4808_v41  ;;  %v5038_v61 = vmul.f32 %v9346_v26, %v5031_v12 }
 0x3c9   : > { %v7025_v52 = vpop.eup %7024  ;;  %v4837_v14 = vld [vmem:[#allocation3 + $0x78] sm:$0x7]  ;;  %v5025_v32 = vmul.f32 %v9338_v55, %v5018_v7  ;;  %v4857_v50 = vmul.f32 %v9231_v28, %v4850_v18  ;;  %v5057_v42 = vld [vmem:[#allocation3 + $0xa9] sm:$0x7] }
 0x3ca   : > { %v4427_v39 = vadd.f32 1.0, %v7025_v52  ;;  %v5044_v59 = vld [vmem:[#allocation3 + $0x79] sm:$0x7]  ;;  %v4844_v51 = vmul.f32 %v9227_v10, %v4837_v14  ;;  %v5041_v9 = vadd.f32 %v5038_v61, %v5015_v36  ;;  %v4876_v49 = vld [vmem:[#allocation3 + $0xa9] sm:$0x7] }
 0x3cb   : > { %v5028_v3 = vadd.f32 %v5025_v32, %v5002_v53  ;;  %v5051_v19 = vmul.f32 %v9352_v8, %v5044_v59  ;;  %v4863_v38 = vld [vmem:[#allocation3 + $0x79] sm:$0x7]  ;;  %v4860_v41 = vadd.f32 %v4857_v50, %v4834_v56  ;;  %v5083_v59 = vld [vmem:[#allocation3 + $0xaa] sm:$0x7]  ;;  %v5019_v50 = vld [vmem:[#allocation3 + $0x80] sm:$0x7] }
 0x3cc   : > { %v4434_v30 = vmul.f32 0.5, %v4427_v39  ;;  %v4847_v54 = vadd.f32 %v4844_v51, %v4821_v40  ;;  %v5070_v4 = vld [vmem:[#allocation3 + $0x7a] sm:$0x7]  ;;  %v4870_v39 = vmul.f32 %v9255_v27, %v4863_v38  ;;  %v4883_v40 = vmul.f32 %v10215_v60, %v4876_v49 }
 0x3cd   : > { %v5054_v10 = vadd.f32 %v5051_v19, %v5028_v3  ;;  %v4889_v43 = vld [vmem:[#allocation3 + $0x7a] sm:$0x7]  ;;  %v5077_v28 = vmul.f32 %v9363_v34, %v5070_v4  ;;  %v5090_v36 = vmul.f32 %v9367_v48, %v5083_v59 }
 0x3ce   : > { %v4441_v47 = vmul.f32 %v4434_v30, %v9427_v5  ;;  %v4873_v14 = vadd.f32 %v4870_v39, %v4847_v54  ;;  %v5064_v30 = vmul.f32 %v9355_v29, %v5057_v42  ;;  %v5096_v27 = vld [vmem:[#allocation3 + $0x7b] sm:$0x7]  ;;  %v4896_v6 = vmul.f32 %v10216_v46, %v4889_v43 }
 0x3cf   : > { %v5080_v32 = vadd.f32 %v5077_v28, %v5054_v10  ;;  %v4915_v3 = vld [vmem:[#allocation3 + $0x7b] sm:$0x7]  ;;  %v5103_v12 = vmul.f32 %v9381_v37, %v5096_v27  ;;  %v4886_v51 = vadd.f32 %v4883_v40, %v4860_v41 }
 0x3d0   : > { %v4455_v22 = vrot.slane %v4441_v47, 1  ;;  %v4469_v62 = vrot.slane %v4441_v47, 2  ;;  %v4483_v52 = vrot.slane %v4441_v47, 3  ;;  %v5067_v35 = vadd.f32 %v5064_v30, %v5041_v9 }
 0x3d1   : > { %v4899_v18 = vadd.f32 %v4896_v6, %v4873_v14  ;;  %v5106_v19 = vadd.f32 %v5103_v12, %v5080_v32  ;;  %v4922_v38 = vmul.f32 %v10219_v33, %v4915_v3  ;;  %v5032_v6 = vld [vmem:[#allocation3 + $0xb0] sm:$0x7]  ;;  %v5026_v3 = vmul.f32 %v9338_v55, %v5019_v50  ;;  %v5045_v12 = vld [vmem:[#allocation3 + $0x81] sm:$0x7] }
 0x3d2   : > { %v4498_v5 = vsel %vm4491_vm6, %v4441_v47, %v4455_v22  ;;  %v4521_v21 = vsel %vm4491_vm6, %v4455_v22, %v4469_v62  ;;  %v4902_v47 = vld [vmem:[#allocation3 + $0xaa] sm:$0x7]  ;;  %v5093_v22 = vadd.f32 %v5090_v36, %v5067_v35  ;;  %v5052_v55 = vmul.f32 %v9352_v8, %v5045_v12 }
 0x3d3   : > { %v4506_v53 = vsel %vm4499_vm7, %v4498_v5, %v4469_v62  ;;  %v4528_v7 = vsel %vm4499_vm7, %v4521_v21, %v4483_v52  ;;  %v4909_v56 = vmul.f32 %v9275_v58, %v4902_v47  ;;  %v4925_v4 = vadd.f32 %v4922_v38, %v4899_v18 }
 0x3d4   : > { %v4514_v45 = vsel %vm4507_vm8, %v4506_v53, %v4483_v52  ;;  %4558 = vst.msk [vmem:[#allocation3 + $0x51] sm:$0x7] %vm4533_vm9, %v4528_v7  ;;  %v5039_v38 = vmul.f32 %v9346_v26, %v5032_v6  ;;  %v5123_v26 = vld [vmem:[#allocation3 + $0x58] sm:$0x7] }
 0x3d5   : > { %4556 = vst.msk [vmem:[#allocation3 + $0x21] sm:$0xf] %vm4530_vm10, %v4514_v45  ;;  %v4912_v61 = vadd.f32 %v4909_v56, %v4886_v51 }
 0x3db   : > { %v5122_v62 = vld [vmem:[#allocation3 + $0x50] sm:$0x7] }
 0x3dc   : > { %v5148_v52 = vld [vmem:[#allocation3 + $0x51] sm:$0x7]  ;;  %v5109_v60 = vld [vmem:[#allocation3 + $0x20] sm:$0x7]  ;;  %v5129_v46 = vmul.f32 %v9390_v24, %v5122_v62  ;;  %v5187_v27 = vld [vmem:[#allocation3 + $0x23] sm:$0x7] }
 0x3dd   : > { %v5135_v54 = vld [vmem:[#allocation3 + $0x21] sm:$0x7]  ;;  %v5116_v5 = vmul.f32 %v9385_v25, %v5109_v60  ;;  %v5174_v21 = vld [vmem:[#allocation3 + $0x52] sm:$0x7]  ;;  %v5155_v58 = vmul.f32 %v9423_v16, %v5148_v52 }
 0x3de   : > { %v4928_v10 = vld [vmem:[#allocation3 + $0x20] sm:$0x7]  ;;  %v4941_v42 = vld [vmem:[#allocation3 + $0x50] sm:$0x7]  ;;  %v5132_v39 = vadd.f32 %v5129_v46, %v5106_v19  ;;  %v5142_v45 = vmul.f32 %v9419_v15, %v5135_v54  ;;  %v5006_v47 = vld [vmem:[#allocation3 + $0x23] sm:$0x7] }
 0x3df   : > { %v5161_v53 = vld [vmem:[#allocation3 + $0x22] sm:$0x7]  ;;  %v4935_v33 = vmul.f32 %v10223_v2, %v4928_v10  ;;  %v4948_v7 = vmul.f32 %v9297_v0, %v4941_v42  ;;  %v4967_v49 = vld [vmem:[#allocation3 + $0x51] sm:$0x7]  ;;  %v5119_v43 = vadd.f32 %v5116_v5, %v5093_v22  ;;  %v5181_v0 = vmul.f32 %v9441_v63, %v5174_v21  ;;  %v5110_v10 = vld [vmem:[#allocation3 + $0x28] sm:$0x7] }
 0x3e0   : > { %v4954_v9 = vld [vmem:[#allocation3 + $0x21] sm:$0x7]  ;;  %v4993_v14 = vld [vmem:[#allocation3 + $0x52] sm:$0x7]  ;;  %v5158_v30 = vadd.f32 %v5155_v58, %v5132_v39  ;;  %v4974_v40 = vmul.f32 %v10225_v17, %v4967_v49  ;;  %v5168_v2 = vmul.f32 %v9432_v1, %v5161_v53  ;;  %v5194_v17 = vmul.f32 %v9459_v57, %v5187_v27  ;;  %v5136_v53 = vld [vmem:[#allocation3 + $0x29] sm:$0x7] }
 0x3e1   : > { %v4961_v28 = vmul.f32 %v10226_v23, %v4954_v9  ;;  %v4980_v41 = vld [vmem:[#allocation3 + $0x22] sm:$0x7]  ;;  %v4938_v32 = vadd.f32 %v4935_v33, %v4912_v61  ;;  %v4951_v59 = vadd.f32 %v4948_v7, %v4925_v4  ;;  %v5145_v35 = vadd.f32 %v5142_v45, %v5119_v43  ;;  %v5058_v22 = vld [vmem:[#allocation3 + $0xb1] sm:$0x7]  ;;  %v5149_v33 = vld [vmem:[#allocation3 + $0x59] sm:$0x7] }
 0x3e2   : > { %v4987_v18 = vmul.f32 %v10230_v11, %v4980_v41  ;;  %v5000_v36 = vmul.f32 %v10229_v20, %v4993_v14  ;;  %v5184_v56 = vadd.f32 %v5181_v0, %v5158_v30  ;;  %v5071_v62 = vld [vmem:[#allocation3 + $0x82] sm:$0x7]  ;;  %v5013_v46 = vmul.f32 %v10233_v44, %v5006_v47  ;;  %v5084_v61 = vld [vmem:[#allocation3 + $0xb2] sm:$0x7]  ;;  %v5162_v43 = vld [vmem:[#allocation3 + $0x2a] sm:$0x7] }
 0x3e3   : > { %v4964_v51 = vadd.f32 %v4961_v28, %v4938_v32  ;;  %v4977_v23 = vadd.f32 %v4974_v40, %v4951_v59  ;;  %v5171_v19 = vadd.f32 %v5168_v2, %v5145_v35  ;;  %v5097_v4 = vld [vmem:[#allocation3 + $0x83] sm:$0x7]  ;;  %v5065_v20 = vmul.f32 %v9355_v29, %v5058_v22  ;;  %v5175_v41 = vld [vmem:[#allocation3 + $0x5a] sm:$0x7]  ;;  %v5188_v14 = vld [vmem:[#allocation3 + $0x2b] sm:$0x7] }
 0x3e4   : > { %v5078_v5 = vmul.f32 %v9363_v34, %v5071_v62  ;;  %v5091_v58 = vmul.f32 %v9367_v48, %v5084_v61  ;;  %v5104_v44 = vmul.f32 %v9381_v37, %v5097_v4  ;;  %v5117_v49 = vmul.f32 %v9385_v25, %v5110_v10  ;;  %v619_v22 = vld [vmem:[%s9658_s11 + $0x8] sm:$0xff]  ;;  %v620_v62 = vld [vmem:[%s9658_s11 + $0x10] sm:$0xff] }
 0x3e5   : > { %v4990_v52 = vadd.f32 %v4987_v18, %v4964_v51  ;;  %v5003_v60 = vadd.f32 %v5000_v36, %v4977_v23  ;;  %v5197_v54 = vadd.f32 %v5194_v17, %v5171_v19  ;;  %v5130_v29 = vmul.f32 %v9390_v24, %v5123_v26 }
 0x3e6   : > { %v5143_v48 = vmul.f32 %v9419_v15, %v5136_v53  ;;  %v5156_v37 = vmul.f32 %v9423_v16, %v5149_v33  ;;  %v5169_v32 = vmul.f32 %v9432_v1, %v5162_v43  ;;  %v5182_v24 = vmul.f32 %v9441_v63, %v5175_v41 }
 0x3e7   : > { %v5016_v11 = vadd.f32 %v5013_v46, %v4990_v52  ;;  %v5029_v50 = vadd.f32 %v5026_v3, %v5003_v60  ;;  %v5200_v21 = vadd.f32 %v5197_v54, %v5184_v56  ;;  %v5195_v40 = vmul.f32 %v9459_v57, %v5188_v14  ;;  %v621_v46 = vld [vmem:[%s9658_s11 + $0x18] sm:$0xff] }
 0x3e8   : > { %v5447_v60 = vand.u32 4294901760, %v619_v22  ;;  %v5453_v54 = vand.u32 4294901760, %v621_v46 }
 0x3e9   : > { %v5042_v42 = vadd.f32 %v5039_v38, %v5016_v11  ;;  %v5055_v39 = vadd.f32 %v5052_v55, %v5029_v50  ;;  %v5210_v8 = vadd.f32 %v9477_v13, %v5200_v21  ;;  %v618_v38 = vld [vmem:[%s9658_s11] sm:$0xff]  ;;  %v5450_v55 = vand.u32 4294901760, %v620_v62 }
 0x3ea   : > { %v5444_v52 = vand.u32 4294901760, %v618_v38  ;;  %v5541_v50 = vsub.f32 %v619_v22, %v5447_v60  ;;  %v5555_v10 = vsub.f32 %v621_v46, %v5453_v54 }
 0x3eb   : > { %v5068_v7 = vadd.f32 %v5065_v20, %v5042_v42  ;;  %v5081_v9 = vadd.f32 %v5078_v5, %v5055_v39  ;;  %v5217_v34 = vsel %vm4533_vm9, %v5210_v8, 0.0  ;;  %v9576_v4 = vpack.c.bf16 %v5453_v54, %v5450_v55 }
 0x3ec   : > { %5218 = vadd.xlane.f32.xlu1 %v5217_v34  ;;  %v9574_v61 = vpack.c.bf16 %v5447_v60, %v5444_v52  ;;  %v5534_v11 = vsub.f32 %v618_v38, %v5444_v52  ;;  %v5542_v5 = vand.u32 4294901760, %v5541_v50  ;;  %v5548_v21 = vsub.f32 %v620_v62, %v5450_v55 }
 0x3ed   : > { %v5094_v45 = vadd.f32 %v5091_v58, %v5068_v7  ;;  %v5107_v28 = vadd.f32 %v5104_v44, %v5081_v9  ;;  %v5556_v58 = vand.u32 4294901760, %v5555_v10 }
 0x3ee   : > { %6735 = vmatprep.subr.bf16.mxu0 %v9574_v61  ;;  %v5535_v20 = vand.u32 4294901760, %v5534_v11  ;;  %v5543_v42 = vsub.f32 %v5541_v50, %v5542_v5  ;;  %v5549_v39 = vand.u32 4294901760, %v5548_v21  ;;  %v9582_v7 = vpack.c.bf16 %v5541_v50, %v5534_v11 }
 0x3ef   : > { %v5120_v30 = vadd.f32 %v5117_v49, %v5094_v45  ;;  %v5133_v27 = vadd.f32 %v5130_v29, %v5107_v28  ;;  %6737 = vmatpush3.bf16.msra.mxu0 %v9574_v61  ;;  %v5557_v33 = vsub.f32 %v5555_v10, %v5556_v58  ;;  %v9589_v45 = vpack.c.bf16 %v5555_v10, %v5548_v21 }
 0x3f0   : > { %6739 = vmatprep.subr.bf16.mxu0 %v9576_v4  ;;  %v5536_v26 = vsub.f32 %v5534_v11, %v5535_v20  ;;  %v5550_v53 = vsub.f32 %v5548_v21, %v5549_v39  ;;  %v9593_v41 = vpack.c.bf16 %v5556_v58, %v5549_v39  ;;  %v7053_v11 = vmov 1966171168  }
 0x3f1   : > { %v5146_v59 = vadd.f32 %v5143_v48, %v5120_v30  ;;  %v5159_v25 = vadd.f32 %v5156_v37, %v5133_v27  ;;  %v5558_v29 = vand.u32 4294901760, %v5557_v33  ;;  %v9591_v37 = vpack.c.bf16 %v5542_v5, %v5535_v20  ;;  %v6107_v27 = vld [vmem:[%s9656_s9] ss:$0 sm:$0xff] }
 0x3f2   : > { %v5537_v44 = vand.u32 4294901760, %v5536_v26  ;;  %v5551_v49 = vand.u32 4294901760, %v5550_v53  ;;  %v5302_v50 = vunpack.c.l.s4 %v7053_v11 }
 0x3f3   : > { %v5172_v6 = vadd.f32 %v5169_v32, %v5146_v59  ;;  %v5185_v35 = vadd.f32 %v5182_v24, %v5159_v25  ;;  %6741 = vmatpush3.bf16.msra.mxu0 %v9576_v4  ;;  %v6108_v24 = vld [vmem:[%s9657_s10] ss:$0 sm:$0xff] }
 0x3f4   : > { %v9587_v43 = vpack.c.bf16 %v5558_v29, %v5551_v49  ;;  %v5303_v26 = vunpack.c.0.s8 %v5302_v50 }
 0x3f5   : > { %v5198_v2 = vadd.f32 %v5195_v40, %v5172_v6 }
 0x3f7   : > { %v5201_v0 = vadd.f32 %v5198_v2, %v5185_v35 }
 0x3f9   : > { %v5211_v15 = vadd.f32 %v9477_v13, %v5201_v0 }
 0x3fb   : > { %v5220_v16 = vsel %vm4533_vm9, %v5211_v15, 0.0 }
 0x3fc   : > { %5221 = vadd.xlane.f32.xlu0 %v5220_v16 }
 0x454   : > { %v5216_v47 = vpop.xlane.xlu0 %5215 }
 0x455   : > { %v5223_v3 = vmul.f32 0.03125, %v5216_v47 }
 0x457   : > { %v5226_v12 = vsub.f32 %v9485_v31, %v5223_v3 }
 0x459   : > { %v5229_v1 = vmul.f32 %v5226_v12, %v5226_v12 }
 0x45b   : > { %v5232_v51 = vsel %vm4533_vm9, %v5229_v1, 0.0 }
 0x45c   : > { %5233 = vadd.xlane.f32.xlu1 %v5232_v51 }
 0x479   : > { %v5219_v63 = vpop.xlane.xlu1 %5218 }
 0x47a   : > { %v5224_v23 = vmul.f32 0.03125, %v5219_v63 }
 0x47c   : > { %v9552_v57 = vsub.f32 %v5210_v8, %v5224_v23  ;;  %v5544_v8 = vand.u32 4294901760, %v5543_v42 }
 0x47e   : > { %v5230_v18 = vmul.f32 %v9552_v57, %v9552_v57  ;;  %v9584_v9 = vpack.c.bf16 %v5544_v8, %v5537_v44 }
 0x480   : > { %v5235_v13 = vsel %vm4533_vm9, %v5230_v18, 0.0  ;;  %6743 = vmatprep.subr.bf16.mxu0 %v9584_v9 }
 0x481   : > { %5236 = vadd.xlane.f32.xlu0 %v5235_v13 }
 0x489   : > { %v5222_v36 = vpop.xlane.xlu0 %5221 }
 0x48a   : > { %v5225_v19 = vmul.f32 0.03125, %v5222_v36 }
 0x48c   : > { %v9557_v56 = vsub.f32 %v5211_v15, %v5225_v19 }
 0x48e   : > { %v5231_v31 = vmul.f32 %v9557_v56, %v9557_v56 }
 0x490   : > { %v5238_v17 = vsel %vm4533_vm9, %v5231_v31, 0.0 }
 0x491   : > { %5239 = vadd.xlane.f32.xlu1 %v5238_v17 }
 0x4e9   : > { %v5234_v34 = vpop.xlane.xlu1 %5233 }
 0x4ea   : > { %v5241_v28 = vmul.f32 0.03125, %v5234_v34 }
 0x4ec   : > { %v5244_v48 = vadd.f32 1e-06, %v5241_v28 }
 0x4ee   : > { %7026 = vrsqrt.f32 %v5244_v48 }
 0x4f8   : > { %v7027_v14 = vpop.eup %7026 }
 0x4f9   : > { %v5250_v30 = vmul.f32 %v7027_v14, %v5226_v12 }
 0x4fb   : > { %v5259_v59 = vmul.f32 %v6107_v27, %v5250_v30 }
 0x4fd   : > { %v5268_v6 = vadd.f32 %v6108_v24, %v5259_v59 }
 0x4ff   : > { %v5271_v35 = vmul.f32 %v5268_v6, %v5268_v6 }
 0x501   : > { %v5274_v2 = vmul.f32 %v5271_v35, %v5268_v6 }
 0x503   : > { %v5277_v3 = vmul.f32 0.044715, %v5274_v2 }
 0x505   : > { %v5280_v63 = vadd.f32 %v5277_v3, %v5268_v6 }
 0x507   : > { %v5283_v13 = vmul.f32 0.7978846, %v5280_v63 }
 0x50e   : > { %v5237_v32 = vpop.xlane.xlu0 %5236 }
 0x50f   : > { %v5242_v25 = vmul.f32 0.03125, %v5237_v32 }
 0x511   : > { %v5245_v40 = vadd.f32 1e-06, %v5242_v25 }
 0x513   : > { %7028 = vrsqrt.f32 %v5245_v40 }
 0x51d   : > { %v7029_v0 = vpop.eup %7028 }
 0x51e   : > { %v5240_v15 = vpop.xlane.xlu1 %5239  ;;  %v5251_v16 = vmul.f32 %v7029_v0, %v9552_v57 }
 0x51f   : > { %v5243_v47 = vmul.f32 0.03125, %v5240_v15 }
 0x520   : > { %v5260_v12 = vmul.f32 %v6107_v27, %v5251_v16 }
 0x521   : > { %v5246_v1 = vadd.f32 1e-06, %v5243_v47 }
 0x522   : > { %v5269_v51 = vadd.f32 %v6108_v24, %v5260_v12 }
 0x523   : > { %7030 = vrsqrt.f32 %v5246_v1 }
 0x524   : > { %v5272_v23 = vmul.f32 %v5269_v51, %v5269_v51  ;;  %7032 = vtanh.f32 %v5283_v13 }
 0x526   : > { %v5275_v18 = vmul.f32 %v5272_v23, %v5269_v51 }
 0x528   : > { %v5278_v36 = vmul.f32 0.044715, %v5275_v18 }
 0x52a   : > { %v5281_v19 = vadd.f32 %v5278_v36, %v5269_v51 }
 0x52c   : > { %v5284_v17 = vmul.f32 0.7978846, %v5281_v19 }
 0x52d   : > { %v7031_v31 = vpop.eup %7030 }
 0x52e   : > { %v5252_v38 = vmul.f32 %v7031_v31, %v9557_v56  ;;  %7034 = vtanh.f32 %v5284_v17  ;;  %v7033_v52 = vpop.eup %7032  ;;  %v10234_v56 = vld [vmem:[#allocation15_spill] sm:$0xff] }
 0x52f   : > { %v5289_v54 = vadd.f32 1.0, %v7033_v52  ;;  %v5306_v58 = vsub.s32 %v5303_v26, %v10234_v56 }
 0x530   : > { %v5261_v22 = vmul.f32 %v6107_v27, %v5252_v38 }
 0x531   : > { %v5292_v10 = vmul.f32 0.5, %v5289_v54 }
 0x532   : > { %v5270_v57 = vadd.f32 %v6108_v24, %v5261_v22 }
 0x533   : > { %v5295_v39 = vmul.f32 %v5292_v10, %v5268_v6 }
 0x534   : > { %v5273_v62 = vmul.f32 %v5270_v57, %v5270_v57 }
 0x535   : > { %v5307_v8 = vrot.slane %v5295_v39, %v5306_v58 }
 0x536   : > { %v5276_v60 = vmul.f32 %v5273_v62, %v5270_v57 }
 0x537   : > { %v5308_v29 = vcombine.high %v5307_v8, %v5307_v8  ;;  %v5315_v34 = vrot.slane %v5307_v8, %v5306_v58 }
 0x538   : > { %v5279_v46 = vmul.f32 0.044715, %v5276_v60  ;;  %v7035_v55 = vpop.eup %7034 }
 0x539   : > { %v5290_v5 = vadd.f32 1.0, %v7035_v55  ;;  %v5322_v27 = vrot.slane %v5308_v29, %v5306_v58  ;;  %v5323_v32 = vcombine.high %v5315_v34, %v5315_v34 }
 0x53a   : > { %v5282_v20 = vadd.f32 %v5279_v46, %v5270_v57 }
 0x53b   : > { %v5293_v42 = vmul.f32 0.5, %v5290_v5  ;;  %v5376_v2 = vcombine.low %v5315_v34, %v5322_v27 }
 0x53c   : > { %v5285_v21 = vmul.f32 0.7978846, %v5282_v20 }
 0x53d   : > { %v5296_v44 = vmul.f32 %v5293_v42, %v5269_v51  ;;  %v5386_v12 = vrot.slane %v5376_v2, %v5306_v58 }
 0x53e   : > { %7036 = vtanh.f32 %v5285_v21 }
 0x53f   : > { %v5330_v53 = vrot.slane %v5296_v44, %v5306_v58 }
 0x541   : > { %v5331_v48 = vcombine.high %v5330_v53, %v5330_v53  ;;  %v5338_v14 = vrot.slane %v5330_v53, %v5306_v58 }
 0x543   : > { %v5345_v59 = vrot.slane %v5331_v48, %v5306_v58  ;;  %v5346_v25 = vcombine.high %v5338_v14, %v5338_v14  ;;  %v5377_v40 = vcombine.low %v5323_v32, %v5338_v14 }
 0x545   : > { %v5378_v15 = vcombine.low %v5345_v59, %v5346_v25  ;;  %v5393_v16 = vrot.slane %v5377_v40, %v5306_v58 }
 0x547   : > { %v5400_v51 = vrot.slane %v5378_v15, %v5306_v58  ;;  %v5408_v23 = vcombine.low %v5386_v12, %v5393_v16 }
 0x548   : > { %v7037_v33 = vpop.eup %7036 }
 0x549   : > { %v5291_v49 = vadd.f32 1.0, %v7037_v33  ;;  %v5416_v31 = vrot.slane %v5408_v23, %v5306_v58 }
 0x54b   : > { %v5294_v28 = vmul.f32 0.5, %v5291_v49 }
 0x54d   : > { %v5297_v30 = vmul.f32 %v5294_v28, %v5270_v57  ;;  %v6110_v28 = vld [vmem:[%s9660_s13] ss:$0 sm:$0xff] }
 0x54f   : > { %v5353_v24 = vrot.slane %v5297_v30, %v5306_v58  ;;  %v6111_v30 = vld [vmem:[%s9661_s14] ss:$0 sm:$0xff] }
 0x551   : > { %v5354_v6 = vcombine.high %v5353_v24, %v5353_v24  ;;  %v5361_v35 = vrot.slane %v5353_v24, %v5306_v58 }
 0x553   : > { %v5368_v0 = vrot.slane %v5354_v6, %v5306_v58  ;;  %v5369_v47 = vcombine.high %v5361_v35, %v5361_v35 }
 0x555   : > { %v5379_v3 = vcombine.low %v5361_v35, %v5368_v0  ;;  %v5431_v1 = vrot.slane %v5369_v47, %v5306_v58 }
 0x557   : > { %v5407_v63 = vrot.slane %v5379_v3, %v5306_v58  ;;  %v5438_v18 = vrot.slane %v5431_v1, %v5306_v58 }
 0x559   : > { %v5409_v13 = vcombine.low %v5400_v51, %v5407_v63  ;;  %v5441_v36 = vsel %vm495_vm2, %v5438_v18, 0 }
 0x55a   : > { %v5522_v19 = vand.u32 4294901760, %v5441_v36 }
 0x55b   : > { %v5423_v17 = vrot.slane %v5409_v13, %v5306_v58 }
 0x55c   : > { %v5523_v22 = vsub.f32 %v5441_v36, %v5522_v19 }
 0x55d   : > { %v5424_v38 = vcombine.low %v5416_v31, %v5423_v17 }
 0x55e   : > { %v5524_v52 = vand.u32 4294901760, %v5523_v22 }
 0x55f   : > { %v5439_v57 = vsel %vm495_vm2, %v5424_v38, 0 }
 0x560   : > { %v5512_v62 = vand.u32 4294901760, %v5439_v57  ;;  %v5525_v55 = vsub.f32 %v5523_v22, %v5524_v52 }
 0x562   : > { %v5513_v60 = vsub.f32 %v5439_v57, %v5512_v62  ;;  %v5526_v50 = vand.u32 4294901760, %v5525_v55 }
 0x564   : > { %v5514_v46 = vand.u32 4294901760, %v5513_v60 }
 0x566   : > { %v5515_v54 = vsub.f32 %v5513_v60, %v5514_v46 }
 0x568   : > { %v5516_v11 = vand.u32 4294901760, %v5515_v54 }
 0x56a   : > { %6676 = vmatprep.mubr.f32.mxu0 %v5516_v11 }
 0x56b   : > { %6677 = vmatmul.mubr.f32.vlgmr.msra.gmra.mrb[16].mxu0 %v5526_v50 }
 0x56c   : > { %6745 = vmatpush3.bf16.msra.mxu0 %v9584_v9  ;;  %6687 = vmatprep.mubr.f32.mxu0 %v5512_v62 }
 0x56d   : > { %6747 = vmatprep.subr.bf16.mxu0 %v9587_v43 }
 0x570   : > { %6749 = vmatpush3.bf16.msra.mxu0 %v9587_v43 }
 0x571   : > { %6751 = vmatprep.subr.bf16.mxu0 %v9582_v7 }
 0x573   : > { %6688 = vmatmul.mubr.f32.vlgmr.msra.gmra.mrb[16].mxu0 %v5522_v19 }
 0x574   : > { %6753 = vmatpush3.bf16.msra.mxu0 %v9582_v7  ;;  %6698 = vmatprep.mubr.f32.mxu0 %v5513_v60  ;;  %v6109_v7 = vld [vmem:[%s9659_s12] ss:$0 sm:$0xff] }
 0x575   : > { %6755 = vmatprep.subr.bf16.mxu0 %v9589_v45 }
 0x578   : > { %6757 = vmatpush3.bf16.msra.mxu0 %v9589_v45 }
 0x579   : > { %6759 = vmatprep.subr.bf16.mxu0 %v9574_v61 }
 0x57b   : > { %6699 = vmatmul.mubr.f32.vlgmr.msra.gmra.mrb[16].mxu0 %v5523_v22 }
 0x57c   : > { %6761 = vmatpush3.bf16.msra.mxu0 %v9574_v61  ;;  %6709 = vmatprep.mubr.f32.mxu0 %v5514_v46 }
 0x57d   : > { %6763 = vmatprep.subr.bf16.mxu0 %v9576_v4 }
 0x580   : > { %6765 = vmatpush3.bf16.msra.mxu0 %v9576_v4 }
 0x581   : > { %6767 = vmatprep.subr.bf16.mxu0 %v9591_v37 }
 0x583   : > { %6710 = vmatmul.mubr.f32.vlgmr.msra.gmra.mrb[16].mxu0 %v5524_v52 }
 0x584   : > { %6769 = vmatpush3.bf16.msra.mxu0 %v9591_v37  ;;  %6720 = vmatprep.mubr.f32.mxu0 %v5512_v62 }
 0x585   : > { %6771 = vmatprep.subr.bf16.mxu0 %v9593_v41 }
 0x588   : > { %6773 = vmatpush3.bf16.msra.mxu0 %v9593_v41 }
 0x589   : > { %6775 = vmatprep.subr.bf16.mxu0 %v9574_v61 }
 0x58b   : > { %6721 = vmatmul.mubr.f32.vlgmr.msra.gmra.mrb[16].mxu0 %v5522_v19 }
 0x58c   : > { %6777 = vmatpush3.bf16.msra.mxu0 %v9574_v61  ;;  %6731 = vmatprep.mubr.f32.mxu0 %v5512_v62 }
 0x58d   : > { %6779 = vmatprep.subr.bf16.mxu0 %v9576_v4 }
 0x590   : > { %6781 = vmatpush3.bf16.msra.mxu0 %v9576_v4 }
 0x593   : > { %6732 = vmatmul.mubr.f32.vlgmr.msra.gmra.mrb[16].mxu0 %v5522_v19 }
 0x666   : > { %v6733_v9 = vpop.f32.mrb[16].mxu0 }
 0x667   : > { %v6826_v43 = vadd.f32 %v6733_v9, %v6109_v7  ;;  %v5961_v45 = vpop.f32.mrb[17].mxu0 }
 0x668   : > { %v6827_v37 = vadd.f32 %v6109_v7, %v5961_v45 }
 0x669   : > { %v5978_v41 = vsel %vm5977_vm11, %v6826_v43, 0.0 }
 0x66a   : > { %5979 = vadd.xlane.f32.xlu1 %v5978_v41  ;;  %v5974_v61 = vsel %vm5973_vm12, %v6827_v37, 0.0 }
 0x66b   : > { %5975 = vadd.xlane.f32.xlu0 %v5974_v61 }
 0x6f7   : > { %v5980_v20 = vpop.xlane.xlu1 %5979 }
 0x6f8   : > { %v5983_v5 = vmul.f32 0.020833334, %v5980_v20  ;;  %v5976_v4 = vpop.xlane.xlu0 %5975 }
 0x6f9   : > { %v5982_v21 = vmul.f32 0.020833334, %v5976_v4 }
 0x6fa   : > { %v5985_v10 = vsub.f32 %v6826_v43, %v5983_v5 }
 0x6fb   : > { %v5984_v26 = vsub.f32 %v6827_v37, %v5982_v21 }
 0x6fc   : > { %v5987_v42 = vmul.f32 %v5985_v10, %v5985_v10 }
 0x6fd   : > { %v5986_v39 = vmul.f32 %v5984_v26, %v5984_v26 }
 0x6fe   : > { %v5991_v56 = vsel %vm5977_vm11, %v5987_v42, 0.0 }
 0x6ff   : > { %5992 = vadd.xlane.f32.xlu1 %v5991_v56  ;;  %v5988_v58 = vsel %vm5973_vm12, %v5986_v39, 0.0 }
 0x700   : > { %5989 = vadd.xlane.f32.xlu0 %v5988_v58 }
 0x78c   : > { %v5993_v44 = vpop.xlane.xlu1 %5992 }
 0x78d   : > { %v5995_v8 = vmul.f32 0.020833334, %v5993_v44  ;;  %v5990_v53 = vpop.xlane.xlu0 %5989 }
 0x78e   : > { %v5994_v33 = vmul.f32 0.020833334, %v5990_v53 }
 0x78f   : > { %v5997_v49 = vadd.f32 1e-06, %v5995_v8 }
 0x790   : > { %v5996_v29 = vadd.f32 1e-06, %v5994_v33 }
 0x791   : > { %7038 = vrsqrt.f32 %v5997_v49 }
 0x792   : > { %7040 = vrsqrt.f32 %v5996_v29 }
 0x79b   : > { %v7039_v34 = vpop.eup %7038 }
 0x79c   : > { %v7041_v48 = vpop.eup %7040  ;;  %v6001_v14 = vmul.f32 %v7039_v34, %v5985_v10 }
 0x79d   : > { %v6000_v27 = vmul.f32 %v7041_v48, %v5984_v26 }
 0x79e   : > { %v6009_v32 = vmul.f32 %v6110_v28, %v6001_v14 }
 0x79f   : > { %v6008_v59 = vmul.f32 %v6110_v28, %v6000_v27 }
 0x7a0   : > { %v6017_v25 = vadd.f32 %v6111_v30, %v6009_v32 }
 0x7a1   : > { %v6016_v24 = vadd.f32 %v6111_v30, %v6008_v59 }
 0x7a2   : > { %6019 = vst.msk [vmem:[%s494_s24 + $0x8] sm:$0x1] %vm5977_vm11, %v6017_v25 }
 0x7a3   : > { %6018 = vst.msk [vmem:[%s494_s24] sm:$0xff] %vm5973_vm12, %v6016_v24 }
 0x7a4 PF: > { %s25_s18 = sadd.s32 1, %s7050_s18  }
 0x7a5   : > { %p22_p4 = scmp.ge.s32.totalorder %s25_s18, 4  }
 0x7a7   :  { %24 = sbr.rel (!%p22_p4) target bundleno = 1 (0x1), region = 163 }

</bundles_post_ra>
